<compile_context>
chip_gen: v5e
topology: v5e:2x2
jax: 0.10.0
libtpu: 0.0.40
codegen_flags: <defaults>
</compile_context>

<pallas_src>
import functools

import jax
import jax.numpy as jnp
from jax.experimental import pallas as pl
from jax.experimental.pallas import tpu as pltpu


_VMEM_LIMIT = 32 * 1024 * 1024  # fits v5e/v6e scoped and v7x (64 MiB physical)


# ----------------------------------------------------------------------------
# Pallas kernels
# ----------------------------------------------------------------------------

def _mm_bias_kernel(a_ref, w_ref, b_ref, o_ref, *, relu):
    """out = [relu](A @ W + shift).  A,W bf16, accumulate f32 on the MXU."""
    y = jnp.dot(a_ref[...], w_ref[...], preferred_element_type=jnp.float32)
    y = y + b_ref[...]
    if relu:
        y = jnp.maximum(y, 0.0)
    o_ref[...] = y.astype(o_ref.dtype)


def _mm_bias_res_kernel(a_ref, w_ref, b_ref, r_ref, o_ref, *, relu):
    """out = [relu](A @ W + shift + residual)  (last conv of a bottleneck)."""
    y = jnp.dot(a_ref[...], w_ref[...], preferred_element_type=jnp.float32)
    y = y + b_ref[...] + r_ref[...].astype(jnp.float32)
    if relu:
        y = jnp.maximum(y, 0.0)
    o_ref[...] = y.astype(o_ref.dtype)


def _maxpool9_kernel(v0, v1, v2, v3, v4, v5, v6, v7, v8, o_ref):
    """Elementwise max over the 9 shifted 3x3-window views (VPU)."""
    m = jnp.maximum(v0[...], v1[...])
    m = jnp.maximum(m, v2[...])
    m = jnp.maximum(m, v3[...])
    m = jnp.maximum(m, v4[...])
    m = jnp.maximum(m, v5[...])
    m = jnp.maximum(m, v6[...])
    m = jnp.maximum(m, v7[...])
    m = jnp.maximum(m, v8[...])
    o_ref[...] = m


# ----------------------------------------------------------------------------
# Pallas wrappers
# ----------------------------------------------------------------------------

def _round_up(v, m):
    return ((v + m - 1) // m) * m


def _pick_tm(M):
    """Bounded row tile: multiple of 8, <=256, >=2 grid steps when possible."""
    Mp = _round_up(M, 8)
    tm = min(256, Mp)
    if Mp // tm == 1 and Mp > 8 and Mp % 16 == 0:
        tm = Mp // 2           # give megacore two parallel steps
    Mp = _round_up(Mp, tm)
    return tm, Mp


def matmul_bias_act(a, w, shift, *, relu, residual=None):
    """Fused (M,K)@(K,N) + shift [+ residual] [relu].  a/w/residual bf16."""
    M, K = a.shape
    K2, N = w.shape
    assert K == K2

    tm, Mp = _pick_tm(M)
    a_p = a if Mp == M else jnp.pad(a, ((0, Mp - M), (0, 0)))

    in_specs = [
        pl.BlockSpec((tm, K), lambda i: (i, 0)),      # A tile (pipelined over M)
        pl.BlockSpec((K, N), lambda i: (0, 0)),       # weight resident in VMEM
        pl.BlockSpec((1, N), lambda i: (0, 0)),       # folded-BN shift (f32)
    ]
    args = [a_p, w, shift.reshape(1, N)]

    bytes_accessed = (Mp * K + K * N) * 2 + N * 4 + Mp * N * 2
    if residual is not None:
        r_p = residual if Mp == M else jnp.pad(residual, ((0, Mp - M), (0, 0)))
        in_specs.append(pl.BlockSpec((tm, N), lambda i: (i, 0)))
        args.append(r_p)
        bytes_accessed += Mp * N * 2
        kernel = functools.partial(_mm_bias_res_kernel, relu=relu)
    else:
        kernel = functools.partial(_mm_bias_kernel, relu=relu)

    out = pl.pallas_call(
        kernel,
        out_shape=jax.ShapeDtypeStruct((Mp, N), jnp.bfloat16),
        grid=(Mp // tm,),
        in_specs=in_specs,
        out_specs=pl.BlockSpec((tm, N), lambda i: (i, 0)),
        compiler_params=pltpu.CompilerParams(
            dimension_semantics=("parallel",),
            vmem_limit_bytes=_VMEM_LIMIT),
        cost_estimate=pl.CostEstimate(
            flops=2 * Mp * K * N,
            transcendentals=0,
            bytes_accessed=int(bytes_accessed)),
    )(*args)
    return out if Mp == M else out[:M]


def _im2col(x, kh, kw, stride, pad):
    """NHWC patch extraction (plain-JAX glue, bf16).  -> (M, kh*kw*C)."""
    N, H, W, C = x.shape
    OH = (H + 2 * pad - kh) // stride + 1
    OW = (W + 2 * pad - kw) // stride + 1
    xp = jnp.pad(x, ((0, 0), (pad, pad), (pad, pad), (0, 0)))
    cols = []
    for di in range(kh):
        for dj in range(kw):
            cols.append(
                xp[:, di:di + stride * (OH - 1) + 1:stride,
                   dj:dj + stride * (OW - 1) + 1:stride, :])
    patches = jnp.concatenate(cols, axis=-1)  # (N, OH, OW, kh*kw*C) in bf16
    return patches.reshape(N * OH * OW, kh * kw * C), (N, OH, OW)


def conv_bn(x, p, *, stride, pad, relu, residual=None):
    """x: NHWC bf16.  p: {'w': (K,N) bf16 scale-folded, 'shift': (N,) f32}."""
    kh, kw = p["khw"]
    cout = p["w"].shape[1]
    if kh == 1 and kw == 1 and pad == 0:
        xs = x if stride == 1 else x[:, ::stride, ::stride, :]
        n, oh, ow, cin = xs.shape
        a = xs.reshape(n * oh * ow, cin)            # no im2col for 1x1 convs
    else:
        a, (n, oh, ow) = _im2col(x, kh, kw, stride, pad)
    res_flat = None
    if residual is not None:
        res_flat = residual.reshape(n * oh * ow, cout)
    y = matmul_bias_act(a, p["w"], p["shift"], relu=relu, residual=res_flat)
    return y.reshape(n, oh, ow, cout)


def maxpool_3x3_s2_p1(x):
    """NHWC max-pool k=3, s=2, p=1 (ResNet stem).  x is bf16, post-ReLU."""
    N, H, W, C = x.shape
    OH = (H + 2 - 3) // 2 + 1
    OW = (W + 2 - 3) // 2 + 1
    NEG = -1e30
    xp = jnp.pad(x, ((0, 0), (1, 1), (1, 1), (0, 0)), constant_values=NEG)
    views = []
    for di in range(3):
        for dj in range(3):
            v = xp[:, di:di + 2 * (OH - 1) + 1:2, dj:dj + 2 * (OW - 1) + 1:2, :]
            views.append(v.reshape(N * OH * OW, C))

    M = N * OH * OW
    tm, Mp = _pick_tm(M)
    if Mp != M:
        views = [jnp.pad(v, ((0, Mp - M), (0, 0)), constant_values=NEG)
                 for v in views]

    out = pl.pallas_call(
        _maxpool9_kernel,
        out_shape=jax.ShapeDtypeStruct((Mp, C), x.dtype),
        grid=(Mp // tm,),
        in_specs=[pl.BlockSpec((tm, C), lambda i: (i, 0)) for _ in range(9)],
        out_specs=pl.BlockSpec((tm, C), lambda i: (i, 0)),
        compiler_params=pltpu.CompilerParams(
            dimension_semantics=("parallel",),
            vmem_limit_bytes=_VMEM_LIMIT),
        cost_estimate=pl.CostEstimate(
            flops=9 * Mp * C,
            transcendentals=0,
            bytes_accessed=int(10 * Mp * C * x.dtype.itemsize)),
    )(*views)
    out = out if Mp == M else out[:M]
    return out.reshape(N, OH, OW, C)


# ----------------------------------------------------------------------------
# Parameter init (deterministic, synthetic; BN folded into weights, eval mode)
# ----------------------------------------------------------------------------

_BN_EPS = 1e-5


def _init_conv_bn(key, kh, kw, cin, cout):
    k1, k2, k3, k4, k5 = jax.random.split(key, 5)
    w = 0.05 * jax.random.normal(k1, (kh, kw, cin, cout), jnp.float32)
    gamma = 1.0 + 0.1 * jax.random.normal(k2, (cout,), jnp.float32)
    beta = 0.1 * jax.random.normal(k3, (cout,), jnp.float32)
    mean = 0.1 * jax.random.normal(k4, (cout,), jnp.float32)
    var = 0.5 + 0.1 * jnp.abs(jax.random.normal(k5, (cout,), jnp.float32))
    scale = gamma * jax.lax.rsqrt(var + _BN_EPS)
    shift = beta - mean * scale
    # Fold BN scale into the conv weight; store weight in bf16, (K, N) layout.
    w_folded = (w * scale).astype(jnp.bfloat16).reshape(kh * kw * cin, cout)
    return {"w": w_folded, "shift": shift, "khw": (kh, kw)}


def _init_bottleneck(key, in_c, planes, stride, expansion=4):
    out_c = planes * expansion
    k1, k2, k3, k4 = jax.random.split(key, 4)
    p = {
        "conv1": _init_conv_bn(k1, 1, 1, in_c, planes),
        "conv2": _init_conv_bn(k2, 3, 3, planes, planes),
        "conv3": _init_conv_bn(k3, 1, 1, planes, out_c),
        "stride": stride,
        "downsample": None,
    }
    if stride != 1 or in_c != out_c:
        p["downsample"] = _init_conv_bn(k4, 1, 1, in_c, out_c)
    return p, out_c


def init_e_resnet_params(key, stem_out=16, planes=(16, 32, 64, 128),
                         blocks=(1, 1, 1, 1)):
    keys = jax.random.split(key, 1 + len(planes))
    params = {"stem": _init_conv_bn(keys[0], 7, 7, 3, stem_out)}
    in_c = stem_out
    for li, (pl_w, nb) in enumerate(zip(planes, blocks)):
        stride = 1 if li == 0 else 2
        bkeys = jax.random.split(keys[1 + li], nb)
        layer = []
        for bi in range(nb):
            bp, in_c = _init_bottleneck(bkeys[bi], in_c, pl_w,
                                        stride if bi == 0 else 1)
            layer.append(bp)
        params[f"layer{li + 1}"] = layer
    return params


# ----------------------------------------------------------------------------
# Forward
# ----------------------------------------------------------------------------

def _bottleneck_fwd(x, p):
    out = conv_bn(x, p["conv1"], stride=1, pad=0, relu=True)
    out = conv_bn(out, p["conv2"], stride=p["stride"], pad=1, relu=True)
    if p["downsample"] is not None:
        identity = conv_bn(x, p["downsample"], stride=p["stride"], pad=0,
                           relu=False)
    else:
        identity = x
    # final 1x1 conv + folded-BN + residual add + ReLU fused in one kernel
    out = conv_bn(out, p["conv3"], stride=1, pad=0, relu=True,
                  residual=identity)
    return out


def e_resnet_forward(x_nchw, params):
    """Mirrors E_resnet.forward: returns (x_block1, ..., x_block4) in NCHW."""
    x = jnp.transpose(x_nchw, (0, 2, 3, 1)).astype(jnp.bfloat16)   # -> NHWC bf16
    x = conv_bn(x, params["stem"], stride=2, pad=3, relu=True)     # conv1+bn1+relu
    x = maxpool_3x3_s2_p1(x)                                       # maxpool
    blocks = []
    for li in range(1, 5):
        for bp in params[f"layer{li}"]:
            x = _bottleneck_fwd(x, bp)
        blocks.append(jnp.transpose(x, (0, 3, 1, 2)).astype(jnp.float32))
    return tuple(blocks)


# ----------------------------------------------------------------------------
# Main
# ----------------------------------------------------------------------------

if __name__ == "__main__":
    key = jax.random.PRNGKey(0)
    k_params, k_x = jax.random.split(key)

    params = init_e_resnet_params(k_params)
    x = jax.random.normal(k_x, (2, 3, 64, 64), jnp.float32)  # NCHW input

    fwd = jax.jit(lambda inp: e_resnet_forward(inp, params))
    b1, b2, b3, b4 = fwd(x)
    jax.block_until_ready((b1, b2, b3, b4))

    # sanity: expected pyramid shapes for this mini config
    assert b1.shape == (2, 64, 16, 16)
    assert b2.shape == (2, 128, 8, 8)
    assert b3.shape == (2, 256, 4, 4)
    assert b4.shape == (2, 512, 2, 2)
    assert all(bool(jnp.all(jnp.isfinite(b))) for b in (b1, b2, b3, b4))

    print("KERNEL_OK")
</pallas_src>

<mosaic_0001>
module attributes {stable_mosaic.version = 11 : i64} {
  func.func @_mm_bias_kernel(%arg0: i32, %arg1: memref<256x147xbf16, #tpu.memory_space<vmem>>, %arg2: memref<147x16xbf16, #tpu.memory_space<vmem>>, %arg3: memref<1x16xf32, #tpu.memory_space<vmem>>, %arg4: memref<256x16xbf16, #tpu.memory_space<vmem>>) attributes {dimension_semantics = [#tpu.dimension_semantics<parallel>], iteration_bounds = array<i64: 8>, scalar_prefetch = 0 : i64, scratch_operands = 0 : i64, tpu.core_type = #tpu.core_type<tc>, window_params = [{transform_indices = @transform_0, window_bounds = array<i64: 256, 147>}, {pipeline_mode = #tpu.pipeline_mode<synchronous>, transform_indices = @transform_1, window_bounds = array<i64: 147, 16>}, {pipeline_mode = #tpu.pipeline_mode<synchronous>, transform_indices = @transform_2, window_bounds = array<i64: 1, 16>}, {transform_indices = @transform_3, window_bounds = array<i64: 256, 16>}]} {
    %c0 = arith.constant 0 : index
    %c0_0 = arith.constant 0 : index
    %0 = vector.load %arg1[%c0, %c0_0] : memref<256x147xbf16, #tpu.memory_space<vmem>>, vector<256x147xbf16>
    %c0_1 = arith.constant 0 : index
    %c0_2 = arith.constant 0 : index
    %1 = vector.load %arg2[%c0_1, %c0_2] : memref<147x16xbf16, #tpu.memory_space<vmem>>, vector<147x16xbf16>
    %cst = arith.constant dense<0.000000e+00> : vector<256x16xf32>
    %2 = tpu.matmul %0, %1, %cst {dimension_numbers = #tpu.dot_dimension_numbers<[1], [0], [0], [1], [0, 0, 1, 1], [], []>} : vector<256x147xbf16>, vector<147x16xbf16>, vector<256x16xf32> -> vector<256x16xf32>
    %c0_3 = arith.constant 0 : index
    %c0_4 = arith.constant 0 : index
    %3 = vector.load %arg3[%c0_3, %c0_4] : memref<1x16xf32, #tpu.memory_space<vmem>>, vector<1x16xf32>
    %4 = vector.broadcast %3 : vector<1x16xf32> to vector<256x16xf32>
    %5 = arith.addf %2, %4 : vector<256x16xf32>
    %cst_5 = arith.constant 0.000000e+00 : f32
    %6 = vector.broadcast %cst_5 : f32 to vector<256x16xf32>
    %7 = arith.maximumf %5, %6 : vector<256x16xf32>
    %8 = arith.truncf %7 : vector<256x16xf32> to vector<256x16xbf16>
    %c0_6 = arith.constant 0 : index
    %c0_7 = arith.constant 0 : index
    %9 = vector.load %arg4[%c0_6, %c0_7] : memref<256x16xbf16, #tpu.memory_space<vmem>>, vector<256x16xbf16>
    tpu.vector_store %arg4[%c0_6, %c0_7], %8 {strides = array<i32>} : memref<256x16xbf16, #tpu.memory_space<vmem>>, vector<256x16xbf16>,
    return
  }
  func.func @transform_0(%arg0: i32) -> (i32, i32) {
    %c0_i32 = arith.constant 0 : i32
    %c0_i32_0 = arith.constant 0 : i32
    return %arg0, %c0_i32 : i32, i32
  }
  func.func @transform_1(%arg0: i32) -> (i32, i32) {
    %c0_i32 = arith.constant 0 : i32
    %c0_i32_0 = arith.constant 0 : i32
    %c0_i32_1 = arith.constant 0 : i32
    return %c0_i32, %c0_i32_0 : i32, i32
  }
  func.func @transform_2(%arg0: i32) -> (i32, i32) {
    %c0_i32 = arith.constant 0 : i32
    %c0_i32_0 = arith.constant 0 : i32
    %c0_i32_1 = arith.constant 0 : i32
    return %c0_i32, %c0_i32_0 : i32, i32
  }
  func.func @transform_3(%arg0: i32) -> (i32, i32) {
    %c0_i32 = arith.constant 0 : i32
    %c0_i32_0 = arith.constant 0 : i32
    return %arg0, %c0_i32 : i32, i32
  }
}

module attributes {stable_mosaic.version = 11 : i64} {
  func.func @_maxpool9_kernel(%arg0: i32, %arg1: memref<256x16xbf16, #tpu.memory_space<vmem>>, %arg2: memref<256x16xbf16, #tpu.memory_space<vmem>>, %arg3: memref<256x16xbf16, #tpu.memory_space<vmem>>, %arg4: memref<256x16xbf16, #tpu.memory_space<vmem>>, %arg5: memref<256x16xbf16, #tpu.memory_space<vmem>>, %arg6: memref<256x16xbf16, #tpu.memory_space<vmem>>, %arg7: memref<256x16xbf16, #tpu.memory_space<vmem>>, %arg8: memref<256x16xbf16, #tpu.memory_space<vmem>>, %arg9: memref<256x16xbf16, #tpu.memory_space<vmem>>, %arg10: memref<256x16xbf16, #tpu.memory_space<vmem>>) attributes {dimension_semantics = [#tpu.dimension_semantics<parallel>], iteration_bounds = array<i64: 2>, scalar_prefetch = 0 : i64, scratch_operands = 0 : i64, tpu.core_type = #tpu.core_type<tc>, window_params = [{transform_indices = @transform_0, window_bounds = array<i64: 256, 16>}, {transform_indices = @transform_1, window_bounds = array<i64: 256, 16>}, {transform_indices = @transform_2, window_bounds = array<i64: 256, 16>}, {transform_indices = @transform_3, window_bounds = array<i64: 256, 16>}, {transform_indices = @transform_4, window_bounds = array<i64: 256, 16>}, {transform_indices = @transform_5, window_bounds = array<i64: 256, 16>}, {transform_indices = @transform_6, window_bounds = array<i64: 256, 16>}, {transform_indices = @transform_7, window_bounds = array<i64: 256, 16>}, {transform_indices = @transform_8, window_bounds = array<i64: 256, 16>}, {transform_indices = @transform_9, window_bounds = array<i64: 256, 16>}]} {
    %c0 = arith.constant 0 : index
    %c0_0 = arith.constant 0 : index
    %0 = vector.load %arg1[%c0, %c0_0] : memref<256x16xbf16, #tpu.memory_space<vmem>>, vector<256x16xbf16>
    %c0_1 = arith.constant 0 : index
    %c0_2 = arith.constant 0 : index
    %1 = vector.load %arg2[%c0_1, %c0_2] : memref<256x16xbf16, #tpu.memory_space<vmem>>, vector<256x16xbf16>
    %2 = arith.maximumf %0, %1 : vector<256x16xbf16>
    %c0_3 = arith.constant 0 : index
    %c0_4 = arith.constant 0 : index
    %3 = vector.load %arg3[%c0_3, %c0_4] : memref<256x16xbf16, #tpu.memory_space<vmem>>, vector<256x16xbf16>
    %4 = arith.maximumf %2, %3 : vector<256x16xbf16>
    %c0_5 = arith.constant 0 : index
    %c0_6 = arith.constant 0 : index
    %5 = vector.load %arg4[%c0_5, %c0_6] : memref<256x16xbf16, #tpu.memory_space<vmem>>, vector<256x16xbf16>
    %6 = arith.maximumf %4, %5 : vector<256x16xbf16>
    %c0_7 = arith.constant 0 : index
    %c0_8 = arith.constant 0 : index
    %7 = vector.load %arg5[%c0_7, %c0_8] : memref<256x16xbf16, #tpu.memory_space<vmem>>, vector<256x16xbf16>
    %8 = arith.maximumf %6, %7 : vector<256x16xbf16>
    %c0_9 = arith.constant 0 : index
    %c0_10 = arith.constant 0 : index
    %9 = vector.load %arg6[%c0_9, %c0_10] : memref<256x16xbf16, #tpu.memory_space<vmem>>, vector<256x16xbf16>
    %10 = arith.maximumf %8, %9 : vector<256x16xbf16>
    %c0_11 = arith.constant 0 : index
    %c0_12 = arith.constant 0 : index
    %11 = vector.load %arg7[%c0_11, %c0_12] : memref<256x16xbf16, #tpu.memory_space<vmem>>, vector<256x16xbf16>
    %12 = arith.maximumf %10, %11 : vector<256x16xbf16>
    %c0_13 = arith.constant 0 : index
    %c0_14 = arith.constant 0 : index
    %13 = vector.load %arg8[%c0_13, %c0_14] : memref<256x16xbf16, #tpu.memory_space<vmem>>, vector<256x16xbf16>
    %14 = arith.maximumf %12, %13 : vector<256x16xbf16>
    %c0_15 = arith.constant 0 : index
    %c0_16 = arith.constant 0 : index
    %15 = vector.load %arg9[%c0_15, %c0_16] : memref<256x16xbf16, #tpu.memory_space<vmem>>, vector<256x16xbf16>
    %16 = arith.maximumf %14, %15 : vector<256x16xbf16>
    %c0_17 = arith.constant 0 : index
    %c0_18 = arith.constant 0 : index
    %17 = vector.load %arg10[%c0_17, %c0_18] : memref<256x16xbf16, #tpu.memory_space<vmem>>, vector<256x16xbf16>
    tpu.vector_store %arg10[%c0_17, %c0_18], %16 {strides = array<i32>} : memref<256x16xbf16, #tpu.memory_space<vmem>>, vector<256x16xbf16>,
    return
  }
  func.func @transform_0(%arg0: i32) -> (i32, i32) {
    %c0_i32 = arith.constant 0 : i32
    %c0_i32_0 = arith.constant 0 : i32
    return %arg0, %c0_i32 : i32, i32
  }
  func.func @transform_1(%arg0: i32) -> (i32, i32) {
    %c0_i32 = arith.constant 0 : i32
    %c0_i32_0 = arith.constant 0 : i32
    return %arg0, %c0_i32 : i32, i32
  }
  func.func @transform_2(%arg0: i32) -> (i32, i32) {
    %c0_i32 = arith.constant 0 : i32
    %c0_i32_0 = arith.constant 0 : i32
    return %arg0, %c0_i32 : i32, i32
  }
  func.func @transform_3(%arg0: i32) -> (i32, i32) {
    %c0_i32 = arith.constant 0 : i32
    %c0_i32_0 = arith.constant 0 : i32
    return %arg0, %c0_i32 : i32, i32
  }
  func.func @transform_4(%arg0: i32) -> (i32, i32) {
    %c0_i32 = arith.constant 0 : i32
    %c0_i32_0 = arith.constant 0 : i32
    return %arg0, %c0_i32 : i32, i32
  }
  func.func @transform_5(%arg0: i32) -> (i32, i32) {
    %c0_i32 = arith.constant 0 : i32
    %c0_i32_0 = arith.constant 0 : i32
    return %arg0, %c0_i32 : i32, i32
  }
  func.func @transform_6(%arg0: i32) -> (i32, i32) {
    %c0_i32 = arith.constant 0 : i32
    %c0_i32_0 = arith.constant 0 : i32
    return %arg0, %c0_i32 : i32, i32
  }
  func.func @transform_7(%arg0: i32) -> (i32, i32) {
    %c0_i32 = arith.constant 0 : i32
    %c0_i32_0 = arith.constant 0 : i32
    return %arg0, %c0_i32 : i32, i32
  }
  func.func @transform_8(%arg0: i32) -> (i32, i32) {
    %c0_i32 = arith.constant 0 : i32
    %c0_i32_0 = arith.constant 0 : i32
    return %arg0, %c0_i32 : i32, i32
  }
  func.func @transform_9(%arg0: i32) -> (i32, i32) {
    %c0_i32 = arith.constant 0 : i32
    %c0_i32_0 = arith.constant 0 : i32
    return %arg0, %c0_i32 : i32, i32
  }
}

module attributes {stable_mosaic.version = 11 : i64} {
  func.func @_mm_bias_kernel(%arg0: i32, %arg1: memref<256x16xbf16, #tpu.memory_space<vmem>>, %arg2: memref<16x16xbf16, #tpu.memory_space<vmem>>, %arg3: memref<1x16xf32, #tpu.memory_space<vmem>>, %arg4: memref<256x16xbf16, #tpu.memory_space<vmem>>) attributes {dimension_semantics = [#tpu.dimension_semantics<parallel>], iteration_bounds = array<i64: 2>, scalar_prefetch = 0 : i64, scratch_operands = 0 : i64, tpu.core_type = #tpu.core_type<tc>, window_params = [{transform_indices = @transform_0, window_bounds = array<i64: 256, 16>}, {pipeline_mode = #tpu.pipeline_mode<synchronous>, transform_indices = @transform_1, window_bounds = array<i64: 16, 16>}, {pipeline_mode = #tpu.pipeline_mode<synchronous>, transform_indices = @transform_2, window_bounds = array<i64: 1, 16>}, {transform_indices = @transform_3, window_bounds = array<i64: 256, 16>}]} {
    %c0 = arith.constant 0 : index
    %c0_0 = arith.constant 0 : index
    %0 = vector.load %arg1[%c0, %c0_0] : memref<256x16xbf16, #tpu.memory_space<vmem>>, vector<256x16xbf16>
    %c0_1 = arith.constant 0 : index
    %c0_2 = arith.constant 0 : index
    %1 = vector.load %arg2[%c0_1, %c0_2] : memref<16x16xbf16, #tpu.memory_space<vmem>>, vector<16x16xbf16>
    %cst = arith.constant dense<0.000000e+00> : vector<256x16xf32>
    %2 = tpu.matmul %0, %1, %cst {dimension_numbers = #tpu.dot_dimension_numbers<[1], [0], [0], [1], [0, 0, 1, 1], [], []>} : vector<256x16xbf16>, vector<16x16xbf16>, vector<256x16xf32> -> vector<256x16xf32>
    %c0_3 = arith.constant 0 : index
    %c0_4 = arith.constant 0 : index
    %3 = vector.load %arg3[%c0_3, %c0_4] : memref<1x16xf32, #tpu.memory_space<vmem>>, vector<1x16xf32>
    %4 = vector.broadcast %3 : vector<1x16xf32> to vector<256x16xf32>
    %5 = arith.addf %2, %4 : vector<256x16xf32>
    %cst_5 = arith.constant 0.000000e+00 : f32
    %6 = vector.broadcast %cst_5 : f32 to vector<256x16xf32>
    %7 = arith.maximumf %5, %6 : vector<256x16xf32>
    %8 = arith.truncf %7 : vector<256x16xf32> to vector<256x16xbf16>
    %c0_6 = arith.constant 0 : index
    %c0_7 = arith.constant 0 : index
    %9 = vector.load %arg4[%c0_6, %c0_7] : memref<256x16xbf16, #tpu.memory_space<vmem>>, vector<256x16xbf16>
    tpu.vector_store %arg4[%c0_6, %c0_7], %8 {strides = array<i32>} : memref<256x16xbf16, #tpu.memory_space<vmem>>, vector<256x16xbf16>,
    return
  }
  func.func @transform_0(%arg0: i32) -> (i32, i32) {
    %c0_i32 = arith.constant 0 : i32
    %c0_i32_0 = arith.constant 0 : i32
    return %arg0, %c0_i32 : i32, i32
  }
  func.func @transform_1(%arg0: i32) -> (i32, i32) {
    %c0_i32 = arith.constant 0 : i32
    %c0_i32_0 = arith.constant 0 : i32
    %c0_i32_1 = arith.constant 0 : i32
    return %c0_i32, %c0_i32_0 : i32, i32
  }
  func.func @transform_2(%arg0: i32) -> (i32, i32) {
    %c0_i32 = arith.constant 0 : i32
    %c0_i32_0 = arith.constant 0 : i32
    %c0_i32_1 = arith.constant 0 : i32
    return %c0_i32, %c0_i32_0 : i32, i32
  }
  func.func @transform_3(%arg0: i32) -> (i32, i32) {
    %c0_i32 = arith.constant 0 : i32
    %c0_i32_0 = arith.constant 0 : i32
    return %arg0, %c0_i32 : i32, i32
  }
}

module attributes {stable_mosaic.version = 11 : i64} {
  func.func @_mm_bias_kernel(%arg0: i32, %arg1: memref<256x16xbf16, #tpu.memory_space<vmem>>, %arg2: memref<16x64xbf16, #tpu.memory_space<vmem>>, %arg3: memref<1x64xf32, #tpu.memory_space<vmem>>, %arg4: memref<256x64xbf16, #tpu.memory_space<vmem>>) attributes {dimension_semantics = [#tpu.dimension_semantics<parallel>], iteration_bounds = array<i64: 2>, scalar_prefetch = 0 : i64, scratch_operands = 0 : i64, tpu.core_type = #tpu.core_type<tc>, window_params = [{transform_indices = @transform_0, window_bounds = array<i64: 256, 16>}, {pipeline_mode = #tpu.pipeline_mode<synchronous>, transform_indices = @transform_1, window_bounds = array<i64: 16, 64>}, {pipeline_mode = #tpu.pipeline_mode<synchronous>, transform_indices = @transform_2, window_bounds = array<i64: 1, 64>}, {transform_indices = @transform_3, window_bounds = array<i64: 256, 64>}]} {
    %c0 = arith.constant 0 : index
    %c0_0 = arith.constant 0 : index
    %0 = vector.load %arg1[%c0, %c0_0] : memref<256x16xbf16, #tpu.memory_space<vmem>>, vector<256x16xbf16>
    %c0_1 = arith.constant 0 : index
    %c0_2 = arith.constant 0 : index
    %1 = vector.load %arg2[%c0_1, %c0_2] : memref<16x64xbf16, #tpu.memory_space<vmem>>, vector<16x64xbf16>
    %cst = arith.constant dense<0.000000e+00> : vector<256x64xf32>
    %2 = tpu.matmul %0, %1, %cst {dimension_numbers = #tpu.dot_dimension_numbers<[1], [0], [0], [1], [0, 0, 1, 1], [], []>} : vector<256x16xbf16>, vector<16x64xbf16>, vector<256x64xf32> -> vector<256x64xf32>
    %c0_3 = arith.constant 0 : index
    %c0_4 = arith.constant 0 : index
    %3 = vector.load %arg3[%c0_3, %c0_4] : memref<1x64xf32, #tpu.memory_space<vmem>>, vector<1x64xf32>
    %4 = vector.broadcast %3 : vector<1x64xf32> to vector<256x64xf32>
    %5 = arith.addf %2, %4 : vector<256x64xf32>
    %6 = arith.truncf %5 : vector<256x64xf32> to vector<256x64xbf16>
    %c0_5 = arith.constant 0 : index
    %c0_6 = arith.constant 0 : index
    %7 = vector.load %arg4[%c0_5, %c0_6] : memref<256x64xbf16, #tpu.memory_space<vmem>>, vector<256x64xbf16>
    tpu.vector_store %arg4[%c0_5, %c0_6], %6 {strides = array<i32>} : memref<256x64xbf16, #tpu.memory_space<vmem>>, vector<256x64xbf16>,
    return
  }
  func.func @transform_0(%arg0: i32) -> (i32, i32) {
    %c0_i32 = arith.constant 0 : i32
    %c0_i32_0 = arith.constant 0 : i32
    return %arg0, %c0_i32 : i32, i32
  }
  func.func @transform_1(%arg0: i32) -> (i32, i32) {
    %c0_i32 = arith.constant 0 : i32
    %c0_i32_0 = arith.constant 0 : i32
    %c0_i32_1 = arith.constant 0 : i32
    return %c0_i32, %c0_i32_0 : i32, i32
  }
  func.func @transform_2(%arg0: i32) -> (i32, i32) {
    %c0_i32 = arith.constant 0 : i32
    %c0_i32_0 = arith.constant 0 : i32
    %c0_i32_1 = arith.constant 0 : i32
    return %c0_i32, %c0_i32_0 : i32, i32
  }
  func.func @transform_3(%arg0: i32) -> (i32, i32) {
    %c0_i32 = arith.constant 0 : i32
    %c0_i32_0 = arith.constant 0 : i32
    return %arg0, %c0_i32 : i32, i32
  }
}

module attributes {stable_mosaic.version = 11 : i64} {
  func.func @_mm_bias_kernel(%arg0: i32, %arg1: memref<256x144xbf16, #tpu.memory_space<vmem>>, %arg2: memref<144x16xbf16, #tpu.memory_space<vmem>>, %arg3: memref<1x16xf32, #tpu.memory_space<vmem>>, %arg4: memref<256x16xbf16, #tpu.memory_space<vmem>>) attributes {dimension_semantics = [#tpu.dimension_semantics<parallel>], iteration_bounds = array<i64: 2>, scalar_prefetch = 0 : i64, scratch_operands = 0 : i64, tpu.core_type = #tpu.core_type<tc>, window_params = [{transform_indices = @transform_0, window_bounds = array<i64: 256, 144>}, {pipeline_mode = #tpu.pipeline_mode<synchronous>, transform_indices = @transform_1, window_bounds = array<i64: 144, 16>}, {pipeline_mode = #tpu.pipeline_mode<synchronous>, transform_indices = @transform_2, window_bounds = array<i64: 1, 16>}, {transform_indices = @transform_3, window_bounds = array<i64: 256, 16>}]} {
    %c0 = arith.constant 0 : index
    %c0_0 = arith.constant 0 : index
    %0 = vector.load %arg1[%c0, %c0_0] : memref<256x144xbf16, #tpu.memory_space<vmem>>, vector<256x144xbf16>
    %c0_1 = arith.constant 0 : index
    %c0_2 = arith.constant 0 : index
    %1 = vector.load %arg2[%c0_1, %c0_2] : memref<144x16xbf16, #tpu.memory_space<vmem>>, vector<144x16xbf16>
    %cst = arith.constant dense<0.000000e+00> : vector<256x16xf32>
    %2 = tpu.matmul %0, %1, %cst {dimension_numbers = #tpu.dot_dimension_numbers<[1], [0], [0], [1], [0, 0, 1, 1], [], []>} : vector<256x144xbf16>, vector<144x16xbf16>, vector<256x16xf32> -> vector<256x16xf32>
    %c0_3 = arith.constant 0 : index
    %c0_4 = arith.constant 0 : index
    %3 = vector.load %arg3[%c0_3, %c0_4] : memref<1x16xf32, #tpu.memory_space<vmem>>, vector<1x16xf32>
    %4 = vector.broadcast %3 : vector<1x16xf32> to vector<256x16xf32>
    %5 = arith.addf %2, %4 : vector<256x16xf32>
    %cst_5 = arith.constant 0.000000e+00 : f32
    %6 = vector.broadcast %cst_5 : f32 to vector<256x16xf32>
    %7 = arith.maximumf %5, %6 : vector<256x16xf32>
    %8 = arith.truncf %7 : vector<256x16xf32> to vector<256x16xbf16>
    %c0_6 = arith.constant 0 : index
    %c0_7 = arith.constant 0 : index
    %9 = vector.load %arg4[%c0_6, %c0_7] : memref<256x16xbf16, #tpu.memory_space<vmem>>, vector<256x16xbf16>
    tpu.vector_store %arg4[%c0_6, %c0_7], %8 {strides = array<i32>} : memref<256x16xbf16, #tpu.memory_space<vmem>>, vector<256x16xbf16>,
    return
  }
  func.func @transform_0(%arg0: i32) -> (i32, i32) {
    %c0_i32 = arith.constant 0 : i32
    %c0_i32_0 = arith.constant 0 : i32
    return %arg0, %c0_i32 : i32, i32
  }
  func.func @transform_1(%arg0: i32) -> (i32, i32) {
    %c0_i32 = arith.constant 0 : i32
    %c0_i32_0 = arith.constant 0 : i32
    %c0_i32_1 = arith.constant 0 : i32
    return %c0_i32, %c0_i32_0 : i32, i32
  }
  func.func @transform_2(%arg0: i32) -> (i32, i32) {
    %c0_i32 = arith.constant 0 : i32
    %c0_i32_0 = arith.constant 0 : i32
    %c0_i32_1 = arith.constant 0 : i32
    return %c0_i32, %c0_i32_0 : i32, i32
  }
  func.func @transform_3(%arg0: i32) -> (i32, i32) {
    %c0_i32 = arith.constant 0 : i32
    %c0_i32_0 = arith.constant 0 : i32
    return %arg0, %c0_i32 : i32, i32
  }
}

module attributes {stable_mosaic.version = 11 : i64} {
  func.func @_mm_bias_res_kernel(%arg0: i32, %arg1: memref<256x16xbf16, #tpu.memory_space<vmem>>, %arg2: memref<16x64xbf16, #tpu.memory_space<vmem>>, %arg3: memref<1x64xf32, #tpu.memory_space<vmem>>, %arg4: memref<256x64xbf16, #tpu.memory_space<vmem>>, %arg5: memref<256x64xbf16, #tpu.memory_space<vmem>>) attributes {dimension_semantics = [#tpu.dimension_semantics<parallel>], iteration_bounds = array<i64: 2>, scalar_prefetch = 0 : i64, scratch_operands = 0 : i64, tpu.core_type = #tpu.core_type<tc>, window_params = [{transform_indices = @transform_0, window_bounds = array<i64: 256, 16>}, {pipeline_mode = #tpu.pipeline_mode<synchronous>, transform_indices = @transform_1, window_bounds = array<i64: 16, 64>}, {pipeline_mode = #tpu.pipeline_mode<synchronous>, transform_indices = @transform_2, window_bounds = array<i64: 1, 64>}, {transform_indices = @transform_3, window_bounds = array<i64: 256, 64>}, {transform_indices = @transform_4, window_bounds = array<i64: 256, 64>}]} {
    %c0 = arith.constant 0 : index
    %c0_0 = arith.constant 0 : index
    %0 = vector.load %arg1[%c0, %c0_0] : memref<256x16xbf16, #tpu.memory_space<vmem>>, vector<256x16xbf16>
    %c0_1 = arith.constant 0 : index
    %c0_2 = arith.constant 0 : index
    %1 = vector.load %arg2[%c0_1, %c0_2] : memref<16x64xbf16, #tpu.memory_space<vmem>>, vector<16x64xbf16>
    %cst = arith.constant dense<0.000000e+00> : vector<256x64xf32>
    %2 = tpu.matmul %0, %1, %cst {dimension_numbers = #tpu.dot_dimension_numbers<[1], [0], [0], [1], [0, 0, 1, 1], [], []>} : vector<256x16xbf16>, vector<16x64xbf16>, vector<256x64xf32> -> vector<256x64xf32>
    %c0_3 = arith.constant 0 : index
    %c0_4 = arith.constant 0 : index
    %3 = vector.load %arg3[%c0_3, %c0_4] : memref<1x64xf32, #tpu.memory_space<vmem>>, vector<1x64xf32>
    %4 = vector.broadcast %3 : vector<1x64xf32> to vector<256x64xf32>
    %5 = arith.addf %2, %4 : vector<256x64xf32>
    %c0_5 = arith.constant 0 : index
    %c0_6 = arith.constant 0 : index
    %6 = vector.load %arg4[%c0_5, %c0_6] : memref<256x64xbf16, #tpu.memory_space<vmem>>, vector<256x64xbf16>
    %7 = arith.extf %6 : vector<256x64xbf16> to vector<256x64xf32>
    %8 = arith.addf %5, %7 : vector<256x64xf32>
    %cst_7 = arith.constant 0.000000e+00 : f32
    %9 = vector.broadcast %cst_7 : f32 to vector<256x64xf32>
    %10 = arith.maximumf %8, %9 : vector<256x64xf32>
    %11 = arith.truncf %10 : vector<256x64xf32> to vector<256x64xbf16>
    %c0_8 = arith.constant 0 : index
    %c0_9 = arith.constant 0 : index
    %12 = vector.load %arg5[%c0_8, %c0_9] : memref<256x64xbf16, #tpu.memory_space<vmem>>, vector<256x64xbf16>
    tpu.vector_store %arg5[%c0_8, %c0_9], %11 {strides = array<i32>} : memref<256x64xbf16, #tpu.memory_space<vmem>>, vector<256x64xbf16>,
    return
  }
  func.func @transform_0(%arg0: i32) -> (i32, i32) {
    %c0_i32 = arith.constant 0 : i32
    %c0_i32_0 = arith.constant 0 : i32
    return %arg0, %c0_i32 : i32, i32
  }
  func.func @transform_1(%arg0: i32) -> (i32, i32) {
    %c0_i32 = arith.constant 0 : i32
    %c0_i32_0 = arith.constant 0 : i32
    %c0_i32_1 = arith.constant 0 : i32
    return %c0_i32, %c0_i32_0 : i32, i32
  }
  func.func @transform_2(%arg0: i32) -> (i32, i32) {
    %c0_i32 = arith.constant 0 : i32
    %c0_i32_0 = arith.constant 0 : i32
    %c0_i32_1 = arith.constant 0 : i32
    return %c0_i32, %c0_i32_0 : i32, i32
  }
  func.func @transform_3(%arg0: i32) -> (i32, i32) {
    %c0_i32 = arith.constant 0 : i32
    %c0_i32_0 = arith.constant 0 : i32
    return %arg0, %c0_i32 : i32, i32
  }
  func.func @transform_4(%arg0: i32) -> (i32, i32) {
    %c0_i32 = arith.constant 0 : i32
    %c0_i32_0 = arith.constant 0 : i32
    return %arg0, %c0_i32 : i32, i32
  }
}

module attributes {stable_mosaic.version = 11 : i64} {
  func.func @_mm_bias_kernel(%arg0: i32, %arg1: memref<64x64xbf16, #tpu.memory_space<vmem>>, %arg2: memref<64x128xbf16, #tpu.memory_space<vmem>>, %arg3: memref<1x128xf32, #tpu.memory_space<vmem>>, %arg4: memref<64x128xbf16, #tpu.memory_space<vmem>>) attributes {dimension_semantics = [#tpu.dimension_semantics<parallel>], iteration_bounds = array<i64: 2>, scalar_prefetch = 0 : i64, scratch_operands = 0 : i64, tpu.core_type = #tpu.core_type<tc>, window_params = [{transform_indices = @transform_0, window_bounds = array<i64: 64, 64>}, {pipeline_mode = #tpu.pipeline_mode<synchronous>, transform_indices = @transform_1, window_bounds = array<i64: 64, 128>}, {pipeline_mode = #tpu.pipeline_mode<synchronous>, transform_indices = @transform_2, window_bounds = array<i64: 1, 128>}, {transform_indices = @transform_3, window_bounds = array<i64: 64, 128>}]} {
    %c0 = arith.constant 0 : index
    %c0_0 = arith.constant 0 : index
    %0 = vector.load %arg1[%c0, %c0_0] : memref<64x64xbf16, #tpu.memory_space<vmem>>, vector<64x64xbf16>
    %c0_1 = arith.constant 0 : index
    %c0_2 = arith.constant 0 : index
    %1 = vector.load %arg2[%c0_1, %c0_2] : memref<64x128xbf16, #tpu.memory_space<vmem>>, vector<64x128xbf16>
    %cst = arith.constant dense<0.000000e+00> : vector<64x128xf32>
    %2 = tpu.matmul %0, %1, %cst {dimension_numbers = #tpu.dot_dimension_numbers<[1], [0], [0], [1], [0, 0, 1, 1], [], []>} : vector<64x64xbf16>, vector<64x128xbf16>, vector<64x128xf32> -> vector<64x128xf32>
    %c0_3 = arith.constant 0 : index
    %c0_4 = arith.constant 0 : index
    %3 = vector.load %arg3[%c0_3, %c0_4] : memref<1x128xf32, #tpu.memory_space<vmem>>, vector<1x128xf32>
    %4 = vector.broadcast %3 : vector<1x128xf32> to vector<64x128xf32>
    %5 = arith.addf %2, %4 : vector<64x128xf32>
    %6 = arith.truncf %5 : vector<64x128xf32> to vector<64x128xbf16>
    %c0_5 = arith.constant 0 : index
    %c0_6 = arith.constant 0 : index
    %7 = vector.load %arg4[%c0_5, %c0_6] : memref<64x128xbf16, #tpu.memory_space<vmem>>, vector<64x128xbf16>
    tpu.vector_store %arg4[%c0_5, %c0_6], %6 {strides = array<i32>} : memref<64x128xbf16, #tpu.memory_space<vmem>>, vector<64x128xbf16>,
    return
  }
  func.func @transform_0(%arg0: i32) -> (i32, i32) {
    %c0_i32 = arith.constant 0 : i32
    %c0_i32_0 = arith.constant 0 : i32
    return %arg0, %c0_i32 : i32, i32
  }
  func.func @transform_1(%arg0: i32) -> (i32, i32) {
    %c0_i32 = arith.constant 0 : i32
    %c0_i32_0 = arith.constant 0 : i32
    %c0_i32_1 = arith.constant 0 : i32
    return %c0_i32, %c0_i32_0 : i32, i32
  }
  func.func @transform_2(%arg0: i32) -> (i32, i32) {
    %c0_i32 = arith.constant 0 : i32
    %c0_i32_0 = arith.constant 0 : i32
    %c0_i32_1 = arith.constant 0 : i32
    return %c0_i32, %c0_i32_0 : i32, i32
  }
  func.func @transform_3(%arg0: i32) -> (i32, i32) {
    %c0_i32 = arith.constant 0 : i32
    %c0_i32_0 = arith.constant 0 : i32
    return %arg0, %c0_i32 : i32, i32
  }
}

module attributes {stable_mosaic.version = 11 : i64} {
  func.func @_mm_bias_kernel(%arg0: i32, %arg1: memref<256x64xbf16, #tpu.memory_space<vmem>>, %arg2: memref<64x32xbf16, #tpu.memory_space<vmem>>, %arg3: memref<1x32xf32, #tpu.memory_space<vmem>>, %arg4: memref<256x32xbf16, #tpu.memory_space<vmem>>) attributes {dimension_semantics = [#tpu.dimension_semantics<parallel>], iteration_bounds = array<i64: 2>, scalar_prefetch = 0 : i64, scratch_operands = 0 : i64, tpu.core_type = #tpu.core_type<tc>, window_params = [{transform_indices = @transform_0, window_bounds = array<i64: 256, 64>}, {pipeline_mode = #tpu.pipeline_mode<synchronous>, transform_indices = @transform_1, window_bounds = array<i64: 64, 32>}, {pipeline_mode = #tpu.pipeline_mode<synchronous>, transform_indices = @transform_2, window_bounds = array<i64: 1, 32>}, {transform_indices = @transform_3, window_bounds = array<i64: 256, 32>}]} {
    %c0 = arith.constant 0 : index
    %c0_0 = arith.constant 0 : index
    %0 = vector.load %arg1[%c0, %c0_0] : memref<256x64xbf16, #tpu.memory_space<vmem>>, vector<256x64xbf16>
    %c0_1 = arith.constant 0 : index
    %c0_2 = arith.constant 0 : index
    %1 = vector.load %arg2[%c0_1, %c0_2] : memref<64x32xbf16, #tpu.memory_space<vmem>>, vector<64x32xbf16>
    %cst = arith.constant dense<0.000000e+00> : vector<256x32xf32>
    %2 = tpu.matmul %0, %1, %cst {dimension_numbers = #tpu.dot_dimension_numbers<[1], [0], [0], [1], [0, 0, 1, 1], [], []>} : vector<256x64xbf16>, vector<64x32xbf16>, vector<256x32xf32> -> vector<256x32xf32>
    %c0_3 = arith.constant 0 : index
    %c0_4 = arith.constant 0 : index
    %3 = vector.load %arg3[%c0_3, %c0_4] : memref<1x32xf32, #tpu.memory_space<vmem>>, vector<1x32xf32>
    %4 = vector.broadcast %3 : vector<1x32xf32> to vector<256x32xf32>
    %5 = arith.addf %2, %4 : vector<256x32xf32>
    %cst_5 = arith.constant 0.000000e+00 : f32
    %6 = vector.broadcast %cst_5 : f32 to vector<256x32xf32>
    %7 = arith.maximumf %5, %6 : vector<256x32xf32>
    %8 = arith.truncf %7 : vector<256x32xf32> to vector<256x32xbf16>
    %c0_6 = arith.constant 0 : index
    %c0_7 = arith.constant 0 : index
    %9 = vector.load %arg4[%c0_6, %c0_7] : memref<256x32xbf16, #tpu.memory_space<vmem>>, vector<256x32xbf16>
    tpu.vector_store %arg4[%c0_6, %c0_7], %8 {strides = array<i32>} : memref<256x32xbf16, #tpu.memory_space<vmem>>, vector<256x32xbf16>,
    return
  }
  func.func @transform_0(%arg0: i32) -> (i32, i32) {
    %c0_i32 = arith.constant 0 : i32
    %c0_i32_0 = arith.constant 0 : i32
    return %arg0, %c0_i32 : i32, i32
  }
  func.func @transform_1(%arg0: i32) -> (i32, i32) {
    %c0_i32 = arith.constant 0 : i32
    %c0_i32_0 = arith.constant 0 : i32
    %c0_i32_1 = arith.constant 0 : i32
    return %c0_i32, %c0_i32_0 : i32, i32
  }
  func.func @transform_2(%arg0: i32) -> (i32, i32) {
    %c0_i32 = arith.constant 0 : i32
    %c0_i32_0 = arith.constant 0 : i32
    %c0_i32_1 = arith.constant 0 : i32
    return %c0_i32, %c0_i32_0 : i32, i32
  }
  func.func @transform_3(%arg0: i32) -> (i32, i32) {
    %c0_i32 = arith.constant 0 : i32
    %c0_i32_0 = arith.constant 0 : i32
    return %arg0, %c0_i32 : i32, i32
  }
}

module attributes {stable_mosaic.version = 11 : i64} {
  func.func @_mm_bias_kernel(%arg0: i32, %arg1: memref<64x288xbf16, #tpu.memory_space<vmem>>, %arg2: memref<288x32xbf16, #tpu.memory_space<vmem>>, %arg3: memref<1x32xf32, #tpu.memory_space<vmem>>, %arg4: memref<64x32xbf16, #tpu.memory_space<vmem>>) attributes {dimension_semantics = [#tpu.dimension_semantics<parallel>], iteration_bounds = array<i64: 2>, scalar_prefetch = 0 : i64, scratch_operands = 0 : i64, tpu.core_type = #tpu.core_type<tc>, window_params = [{transform_indices = @transform_0, window_bounds = array<i64: 64, 288>}, {pipeline_mode = #tpu.pipeline_mode<synchronous>, transform_indices = @transform_1, window_bounds = array<i64: 288, 32>}, {pipeline_mode = #tpu.pipeline_mode<synchronous>, transform_indices = @transform_2, window_bounds = array<i64: 1, 32>}, {transform_indices = @transform_3, window_bounds = array<i64: 64, 32>}]} {
    %c0 = arith.constant 0 : index
    %c0_0 = arith.constant 0 : index
    %0 = vector.load %arg1[%c0, %c0_0] : memref<64x288xbf16, #tpu.memory_space<vmem>>, vector<64x288xbf16>
    %c0_1 = arith.constant 0 : index
    %c0_2 = arith.constant 0 : index
    %1 = vector.load %arg2[%c0_1, %c0_2] : memref<288x32xbf16, #tpu.memory_space<vmem>>, vector<288x32xbf16>
    %cst = arith.constant dense<0.000000e+00> : vector<64x32xf32>
    %2 = tpu.matmul %0, %1, %cst {dimension_numbers = #tpu.dot_dimension_numbers<[1], [0], [0], [1], [0, 0, 1, 1], [], []>} : vector<64x288xbf16>, vector<288x32xbf16>, vector<64x32xf32> -> vector<64x32xf32>
    %c0_3 = arith.constant 0 : index
    %c0_4 = arith.constant 0 : index
    %3 = vector.load %arg3[%c0_3, %c0_4] : memref<1x32xf32, #tpu.memory_space<vmem>>, vector<1x32xf32>
    %4 = vector.broadcast %3 : vector<1x32xf32> to vector<64x32xf32>
    %5 = arith.addf %2, %4 : vector<64x32xf32>
    %cst_5 = arith.constant 0.000000e+00 : f32
    %6 = vector.broadcast %cst_5 : f32 to vector<64x32xf32>
    %7 = arith.maximumf %5, %6 : vector<64x32xf32>
    %8 = arith.truncf %7 : vector<64x32xf32> to vector<64x32xbf16>
    %c0_6 = arith.constant 0 : index
    %c0_7 = arith.constant 0 : index
    %9 = vector.load %arg4[%c0_6, %c0_7] : memref<64x32xbf16, #tpu.memory_space<vmem>>, vector<64x32xbf16>
    tpu.vector_store %arg4[%c0_6, %c0_7], %8 {strides = array<i32>} : memref<64x32xbf16, #tpu.memory_space<vmem>>, vector<64x32xbf16>,
    return
  }
  func.func @transform_0(%arg0: i32) -> (i32, i32) {
    %c0_i32 = arith.constant 0 : i32
    %c0_i32_0 = arith.constant 0 : i32
    return %arg0, %c0_i32 : i32, i32
  }
  func.func @transform_1(%arg0: i32) -> (i32, i32) {
    %c0_i32 = arith.constant 0 : i32
    %c0_i32_0 = arith.constant 0 : i32
    %c0_i32_1 = arith.constant 0 : i32
    return %c0_i32, %c0_i32_0 : i32, i32
  }
  func.func @transform_2(%arg0: i32) -> (i32, i32) {
    %c0_i32 = arith.constant 0 : i32
    %c0_i32_0 = arith.constant 0 : i32
    %c0_i32_1 = arith.constant 0 : i32
    return %c0_i32, %c0_i32_0 : i32, i32
  }
  func.func @transform_3(%arg0: i32) -> (i32, i32) {
    %c0_i32 = arith.constant 0 : i32
    %c0_i32_0 = arith.constant 0 : i32
    return %arg0, %c0_i32 : i32, i32
  }
}

module attributes {stable_mosaic.version = 11 : i64} {
  func.func @_mm_bias_res_kernel(%arg0: i32, %arg1: memref<64x32xbf16, #tpu.memory_space<vmem>>, %arg2: memref<32x128xbf16, #tpu.memory_space<vmem>>, %arg3: memref<1x128xf32, #tpu.memory_space<vmem>>, %arg4: memref<64x128xbf16, #tpu.memory_space<vmem>>, %arg5: memref<64x128xbf16, #tpu.memory_space<vmem>>) attributes {dimension_semantics = [#tpu.dimension_semantics<parallel>], iteration_bounds = array<i64: 2>, scalar_prefetch = 0 : i64, scratch_operands = 0 : i64, tpu.core_type = #tpu.core_type<tc>, window_params = [{transform_indices = @transform_0, window_bounds = array<i64: 64, 32>}, {pipeline_mode = #tpu.pipeline_mode<synchronous>, transform_indices = @transform_1, window_bounds = array<i64: 32, 128>}, {pipeline_mode = #tpu.pipeline_mode<synchronous>, transform_indices = @transform_2, window_bounds = array<i64: 1, 128>}, {transform_indices = @transform_3, window_bounds = array<i64: 64, 128>}, {transform_indices = @transform_4, window_bounds = array<i64: 64, 128>}]} {
    %c0 = arith.constant 0 : index
    %c0_0 = arith.constant 0 : index
    %0 = vector.load %arg1[%c0, %c0_0] : memref<64x32xbf16, #tpu.memory_space<vmem>>, vector<64x32xbf16>
    %c0_1 = arith.constant 0 : index
    %c0_2 = arith.constant 0 : index
    %1 = vector.load %arg2[%c0_1, %c0_2] : memref<32x128xbf16, #tpu.memory_space<vmem>>, vector<32x128xbf16>
    %cst = arith.constant dense<0.000000e+00> : vector<64x128xf32>
    %2 = tpu.matmul %0, %1, %cst {dimension_numbers = #tpu.dot_dimension_numbers<[1], [0], [0], [1], [0, 0, 1, 1], [], []>} : vector<64x32xbf16>, vector<32x128xbf16>, vector<64x128xf32> -> vector<64x128xf32>
    %c0_3 = arith.constant 0 : index
    %c0_4 = arith.constant 0 : index
    %3 = vector.load %arg3[%c0_3, %c0_4] : memref<1x128xf32, #tpu.memory_space<vmem>>, vector<1x128xf32>
    %4 = vector.broadcast %3 : vector<1x128xf32> to vector<64x128xf32>
    %5 = arith.addf %2, %4 : vector<64x128xf32>
    %c0_5 = arith.constant 0 : index
    %c0_6 = arith.constant 0 : index
    %6 = vector.load %arg4[%c0_5, %c0_6] : memref<64x128xbf16, #tpu.memory_space<vmem>>, vector<64x128xbf16>
    %7 = arith.extf %6 : vector<64x128xbf16> to vector<64x128xf32>
    %8 = arith.addf %5, %7 : vector<64x128xf32>
    %cst_7 = arith.constant 0.000000e+00 : f32
    %9 = vector.broadcast %cst_7 : f32 to vector<64x128xf32>
    %10 = arith.maximumf %8, %9 : vector<64x128xf32>
    %11 = arith.truncf %10 : vector<64x128xf32> to vector<64x128xbf16>
    %c0_8 = arith.constant 0 : index
    %c0_9 = arith.constant 0 : index
    %12 = vector.load %arg5[%c0_8, %c0_9] : memref<64x128xbf16, #tpu.memory_space<vmem>>, vector<64x128xbf16>
    tpu.vector_store %arg5[%c0_8, %c0_9], %11 {strides = array<i32>} : memref<64x128xbf16, #tpu.memory_space<vmem>>, vector<64x128xbf16>,
    return
  }
  func.func @transform_0(%arg0: i32) -> (i32, i32) {
    %c0_i32 = arith.constant 0 : i32
    %c0_i32_0 = arith.constant 0 : i32
    return %arg0, %c0_i32 : i32, i32
  }
  func.func @transform_1(%arg0: i32) -> (i32, i32) {
    %c0_i32 = arith.constant 0 : i32
    %c0_i32_0 = arith.constant 0 : i32
    %c0_i32_1 = arith.constant 0 : i32
    return %c0_i32, %c0_i32_0 : i32, i32
  }
  func.func @transform_2(%arg0: i32) -> (i32, i32) {
    %c0_i32 = arith.constant 0 : i32
    %c0_i32_0 = arith.constant 0 : i32
    %c0_i32_1 = arith.constant 0 : i32
    return %c0_i32, %c0_i32_0 : i32, i32
  }
  func.func @transform_3(%arg0: i32) -> (i32, i32) {
    %c0_i32 = arith.constant 0 : i32
    %c0_i32_0 = arith.constant 0 : i32
    return %arg0, %c0_i32 : i32, i32
  }
  func.func @transform_4(%arg0: i32) -> (i32, i32) {
    %c0_i32 = arith.constant 0 : i32
    %c0_i32_0 = arith.constant 0 : i32
    return %arg0, %c0_i32 : i32, i32
  }
}

module attributes {stable_mosaic.version = 11 : i64} {
  func.func @_mm_bias_kernel(%arg0: i32, %arg1: memref<16x128xbf16, #tpu.memory_space<vmem>>, %arg2: memref<128x256xbf16, #tpu.memory_space<vmem>>, %arg3: memref<1x256xf32, #tpu.memory_space<vmem>>, %arg4: memref<16x256xbf16, #tpu.memory_space<vmem>>) attributes {dimension_semantics = [#tpu.dimension_semantics<parallel>], iteration_bounds = array<i64: 2>, scalar_prefetch = 0 : i64, scratch_operands = 0 : i64, tpu.core_type = #tpu.core_type<tc>, window_params = [{transform_indices = @transform_0, window_bounds = array<i64: 16, 128>}, {pipeline_mode = #tpu.pipeline_mode<synchronous>, transform_indices = @transform_1, window_bounds = array<i64: 128, 256>}, {pipeline_mode = #tpu.pipeline_mode<synchronous>, transform_indices = @transform_2, window_bounds = array<i64: 1, 256>}, {transform_indices = @transform_3, window_bounds = array<i64: 16, 256>}]} {
    %c0 = arith.constant 0 : index
    %c0_0 = arith.constant 0 : index
    %0 = vector.load %arg1[%c0, %c0_0] : memref<16x128xbf16, #tpu.memory_space<vmem>>, vector<16x128xbf16>
    %c0_1 = arith.constant 0 : index
    %c0_2 = arith.constant 0 : index
    %1 = vector.load %arg2[%c0_1, %c0_2] : memref<128x256xbf16, #tpu.memory_space<vmem>>, vector<128x256xbf16>
    %cst = arith.constant dense<0.000000e+00> : vector<16x256xf32>
    %2 = tpu.matmul %0, %1, %cst {dimension_numbers = #tpu.dot_dimension_numbers<[1], [0], [0], [1], [0, 0, 1, 1], [], []>} : vector<16x128xbf16>, vector<128x256xbf16>, vector<16x256xf32> -> vector<16x256xf32>
    %c0_3 = arith.constant 0 : index
    %c0_4 = arith.constant 0 : index
    %3 = vector.load %arg3[%c0_3, %c0_4] : memref<1x256xf32, #tpu.memory_space<vmem>>, vector<1x256xf32>
    %4 = vector.broadcast %3 : vector<1x256xf32> to vector<16x256xf32>
    %5 = arith.addf %2, %4 : vector<16x256xf32>
    %6 = arith.truncf %5 : vector<16x256xf32> to vector<16x256xbf16>
    %c0_5 = arith.constant 0 : index
    %c0_6 = arith.constant 0 : index
    %7 = vector.load %arg4[%c0_5, %c0_6] : memref<16x256xbf16, #tpu.memory_space<vmem>>, vector<16x256xbf16>
    tpu.vector_store %arg4[%c0_5, %c0_6], %6 {strides = array<i32>} : memref<16x256xbf16, #tpu.memory_space<vmem>>, vector<16x256xbf16>,
    return
  }
  func.func @transform_0(%arg0: i32) -> (i32, i32) {
    %c0_i32 = arith.constant 0 : i32
    %c0_i32_0 = arith.constant 0 : i32
    return %arg0, %c0_i32 : i32, i32
  }
  func.func @transform_1(%arg0: i32) -> (i32, i32) {
    %c0_i32 = arith.constant 0 : i32
    %c0_i32_0 = arith.constant 0 : i32
    %c0_i32_1 = arith.constant 0 : i32
    return %c0_i32, %c0_i32_0 : i32, i32
  }
  func.func @transform_2(%arg0: i32) -> (i32, i32) {
    %c0_i32 = arith.constant 0 : i32
    %c0_i32_0 = arith.constant 0 : i32
    %c0_i32_1 = arith.constant 0 : i32
    return %c0_i32, %c0_i32_0 : i32, i32
  }
  func.func @transform_3(%arg0: i32) -> (i32, i32) {
    %c0_i32 = arith.constant 0 : i32
    %c0_i32_0 = arith.constant 0 : i32
    return %arg0, %c0_i32 : i32, i32
  }
}

module attributes {stable_mosaic.version = 11 : i64} {
  func.func @_mm_bias_kernel(%arg0: i32, %arg1: memref<64x128xbf16, #tpu.memory_space<vmem>>, %arg2: memref<128x64xbf16, #tpu.memory_space<vmem>>, %arg3: memref<1x64xf32, #tpu.memory_space<vmem>>, %arg4: memref<64x64xbf16, #tpu.memory_space<vmem>>) attributes {dimension_semantics = [#tpu.dimension_semantics<parallel>], iteration_bounds = array<i64: 2>, scalar_prefetch = 0 : i64, scratch_operands = 0 : i64, tpu.core_type = #tpu.core_type<tc>, window_params = [{transform_indices = @transform_0, window_bounds = array<i64: 64, 128>}, {pipeline_mode = #tpu.pipeline_mode<synchronous>, transform_indices = @transform_1, window_bounds = array<i64: 128, 64>}, {pipeline_mode = #tpu.pipeline_mode<synchronous>, transform_indices = @transform_2, window_bounds = array<i64: 1, 64>}, {transform_indices = @transform_3, window_bounds = array<i64: 64, 64>}]} {
    %c0 = arith.constant 0 : index
    %c0_0 = arith.constant 0 : index
    %0 = vector.load %arg1[%c0, %c0_0] : memref<64x128xbf16, #tpu.memory_space<vmem>>, vector<64x128xbf16>
    %c0_1 = arith.constant 0 : index
    %c0_2 = arith.constant 0 : index
    %1 = vector.load %arg2[%c0_1, %c0_2] : memref<128x64xbf16, #tpu.memory_space<vmem>>, vector<128x64xbf16>
    %cst = arith.constant dense<0.000000e+00> : vector<64x64xf32>
    %2 = tpu.matmul %0, %1, %cst {dimension_numbers = #tpu.dot_dimension_numbers<[1], [0], [0], [1], [0, 0, 1, 1], [], []>} : vector<64x128xbf16>, vector<128x64xbf16>, vector<64x64xf32> -> vector<64x64xf32>
    %c0_3 = arith.constant 0 : index
    %c0_4 = arith.constant 0 : index
    %3 = vector.load %arg3[%c0_3, %c0_4] : memref<1x64xf32, #tpu.memory_space<vmem>>, vector<1x64xf32>
    %4 = vector.broadcast %3 : vector<1x64xf32> to vector<64x64xf32>
    %5 = arith.addf %2, %4 : vector<64x64xf32>
    %cst_5 = arith.constant 0.000000e+00 : f32
    %6 = vector.broadcast %cst_5 : f32 to vector<64x64xf32>
    %7 = arith.maximumf %5, %6 : vector<64x64xf32>
    %8 = arith.truncf %7 : vector<64x64xf32> to vector<64x64xbf16>
    %c0_6 = arith.constant 0 : index
    %c0_7 = arith.constant 0 : index
    %9 = vector.load %arg4[%c0_6, %c0_7] : memref<64x64xbf16, #tpu.memory_space<vmem>>, vector<64x64xbf16>
    tpu.vector_store %arg4[%c0_6, %c0_7], %8 {strides = array<i32>} : memref<64x64xbf16, #tpu.memory_space<vmem>>, vector<64x64xbf16>,
    return
  }
  func.func @transform_0(%arg0: i32) -> (i32, i32) {
    %c0_i32 = arith.constant 0 : i32
    %c0_i32_0 = arith.constant 0 : i32
    return %arg0, %c0_i32 : i32, i32
  }
  func.func @transform_1(%arg0: i32) -> (i32, i32) {
    %c0_i32 = arith.constant 0 : i32
    %c0_i32_0 = arith.constant 0 : i32
    %c0_i32_1 = arith.constant 0 : i32
    return %c0_i32, %c0_i32_0 : i32, i32
  }
  func.func @transform_2(%arg0: i32) -> (i32, i32) {
    %c0_i32 = arith.constant 0 : i32
    %c0_i32_0 = arith.constant 0 : i32
    %c0_i32_1 = arith.constant 0 : i32
    return %c0_i32, %c0_i32_0 : i32, i32
  }
  func.func @transform_3(%arg0: i32) -> (i32, i32) {
    %c0_i32 = arith.constant 0 : i32
    %c0_i32_0 = arith.constant 0 : i32
    return %arg0, %c0_i32 : i32, i32
  }
}

module attributes {stable_mosaic.version = 11 : i64} {
  func.func @_mm_bias_kernel(%arg0: i32, %arg1: memref<16x576xbf16, #tpu.memory_space<vmem>>, %arg2: memref<576x64xbf16, #tpu.memory_space<vmem>>, %arg3: memref<1x64xf32, #tpu.memory_space<vmem>>, %arg4: memref<16x64xbf16, #tpu.memory_space<vmem>>) attributes {dimension_semantics = [#tpu.dimension_semantics<parallel>], iteration_bounds = array<i64: 2>, scalar_prefetch = 0 : i64, scratch_operands = 0 : i64, tpu.core_type = #tpu.core_type<tc>, window_params = [{transform_indices = @transform_0, window_bounds = array<i64: 16, 576>}, {pipeline_mode = #tpu.pipeline_mode<synchronous>, transform_indices = @transform_1, window_bounds = array<i64: 576, 64>}, {pipeline_mode = #tpu.pipeline_mode<synchronous>, transform_indices = @transform_2, window_bounds = array<i64: 1, 64>}, {transform_indices = @transform_3, window_bounds = array<i64: 16, 64>}]} {
    %c0 = arith.constant 0 : index
    %c0_0 = arith.constant 0 : index
    %0 = vector.load %arg1[%c0, %c0_0] : memref<16x576xbf16, #tpu.memory_space<vmem>>, vector<16x576xbf16>
    %c0_1 = arith.constant 0 : index
    %c0_2 = arith.constant 0 : index
    %1 = vector.load %arg2[%c0_1, %c0_2] : memref<576x64xbf16, #tpu.memory_space<vmem>>, vector<576x64xbf16>
    %cst = arith.constant dense<0.000000e+00> : vector<16x64xf32>
    %2 = tpu.matmul %0, %1, %cst {dimension_numbers = #tpu.dot_dimension_numbers<[1], [0], [0], [1], [0, 0, 1, 1], [], []>} : vector<16x576xbf16>, vector<576x64xbf16>, vector<16x64xf32> -> vector<16x64xf32>
    %c0_3 = arith.constant 0 : index
    %c0_4 = arith.constant 0 : index
    %3 = vector.load %arg3[%c0_3, %c0_4] : memref<1x64xf32, #tpu.memory_space<vmem>>, vector<1x64xf32>
    %4 = vector.broadcast %3 : vector<1x64xf32> to vector<16x64xf32>
    %5 = arith.addf %2, %4 : vector<16x64xf32>
    %cst_5 = arith.constant 0.000000e+00 : f32
    %6 = vector.broadcast %cst_5 : f32 to vector<16x64xf32>
    %7 = arith.maximumf %5, %6 : vector<16x64xf32>
    %8 = arith.truncf %7 : vector<16x64xf32> to vector<16x64xbf16>
    %c0_6 = arith.constant 0 : index
    %c0_7 = arith.constant 0 : index
    %9 = vector.load %arg4[%c0_6, %c0_7] : memref<16x64xbf16, #tpu.memory_space<vmem>>, vector<16x64xbf16>
    tpu.vector_store %arg4[%c0_6, %c0_7], %8 {strides = array<i32>} : memref<16x64xbf16, #tpu.memory_space<vmem>>, vector<16x64xbf16>,
    return
  }
  func.func @transform_0(%arg0: i32) -> (i32, i32) {
    %c0_i32 = arith.constant 0 : i32
    %c0_i32_0 = arith.constant 0 : i32
    return %arg0, %c0_i32 : i32, i32
  }
  func.func @transform_1(%arg0: i32) -> (i32, i32) {
    %c0_i32 = arith.constant 0 : i32
    %c0_i32_0 = arith.constant 0 : i32
    %c0_i32_1 = arith.constant 0 : i32
    return %c0_i32, %c0_i32_0 : i32, i32
  }
  func.func @transform_2(%arg0: i32) -> (i32, i32) {
    %c0_i32 = arith.constant 0 : i32
    %c0_i32_0 = arith.constant 0 : i32
    %c0_i32_1 = arith.constant 0 : i32
    return %c0_i32, %c0_i32_0 : i32, i32
  }
  func.func @transform_3(%arg0: i32) -> (i32, i32) {
    %c0_i32 = arith.constant 0 : i32
    %c0_i32_0 = arith.constant 0 : i32
    return %arg0, %c0_i32 : i32, i32
  }
}

module attributes {stable_mosaic.version = 11 : i64} {
  func.func @_mm_bias_res_kernel(%arg0: i32, %arg1: memref<16x64xbf16, #tpu.memory_space<vmem>>, %arg2: memref<64x256xbf16, #tpu.memory_space<vmem>>, %arg3: memref<1x256xf32, #tpu.memory_space<vmem>>, %arg4: memref<16x256xbf16, #tpu.memory_space<vmem>>, %arg5: memref<16x256xbf16, #tpu.memory_space<vmem>>) attributes {dimension_semantics = [#tpu.dimension_semantics<parallel>], iteration_bounds = array<i64: 2>, scalar_prefetch = 0 : i64, scratch_operands = 0 : i64, tpu.core_type = #tpu.core_type<tc>, window_params = [{transform_indices = @transform_0, window_bounds = array<i64: 16, 64>}, {pipeline_mode = #tpu.pipeline_mode<synchronous>, transform_indices = @transform_1, window_bounds = array<i64: 64, 256>}, {pipeline_mode = #tpu.pipeline_mode<synchronous>, transform_indices = @transform_2, window_bounds = array<i64: 1, 256>}, {transform_indices = @transform_3, window_bounds = array<i64: 16, 256>}, {transform_indices = @transform_4, window_bounds = array<i64: 16, 256>}]} {
    %c0 = arith.constant 0 : index
    %c0_0 = arith.constant 0 : index
    %0 = vector.load %arg1[%c0, %c0_0] : memref<16x64xbf16, #tpu.memory_space<vmem>>, vector<16x64xbf16>
    %c0_1 = arith.constant 0 : index
    %c0_2 = arith.constant 0 : index
    %1 = vector.load %arg2[%c0_1, %c0_2] : memref<64x256xbf16, #tpu.memory_space<vmem>>, vector<64x256xbf16>
    %cst = arith.constant dense<0.000000e+00> : vector<16x256xf32>
    %2 = tpu.matmul %0, %1, %cst {dimension_numbers = #tpu.dot_dimension_numbers<[1], [0], [0], [1], [0, 0, 1, 1], [], []>} : vector<16x64xbf16>, vector<64x256xbf16>, vector<16x256xf32> -> vector<16x256xf32>
    %c0_3 = arith.constant 0 : index
    %c0_4 = arith.constant 0 : index
    %3 = vector.load %arg3[%c0_3, %c0_4] : memref<1x256xf32, #tpu.memory_space<vmem>>, vector<1x256xf32>
    %4 = vector.broadcast %3 : vector<1x256xf32> to vector<16x256xf32>
    %5 = arith.addf %2, %4 : vector<16x256xf32>
    %c0_5 = arith.constant 0 : index
    %c0_6 = arith.constant 0 : index
    %6 = vector.load %arg4[%c0_5, %c0_6] : memref<16x256xbf16, #tpu.memory_space<vmem>>, vector<16x256xbf16>
    %7 = arith.extf %6 : vector<16x256xbf16> to vector<16x256xf32>
    %8 = arith.addf %5, %7 : vector<16x256xf32>
    %cst_7 = arith.constant 0.000000e+00 : f32
    %9 = vector.broadcast %cst_7 : f32 to vector<16x256xf32>
    %10 = arith.maximumf %8, %9 : vector<16x256xf32>
    %11 = arith.truncf %10 : vector<16x256xf32> to vector<16x256xbf16>
    %c0_8 = arith.constant 0 : index
    %c0_9 = arith.constant 0 : index
    %12 = vector.load %arg5[%c0_8, %c0_9] : memref<16x256xbf16, #tpu.memory_space<vmem>>, vector<16x256xbf16>
    tpu.vector_store %arg5[%c0_8, %c0_9], %11 {strides = array<i32>} : memref<16x256xbf16, #tpu.memory_space<vmem>>, vector<16x256xbf16>,
    return
  }
  func.func @transform_0(%arg0: i32) -> (i32, i32) {
    %c0_i32 = arith.constant 0 : i32
    %c0_i32_0 = arith.constant 0 : i32
    return %arg0, %c0_i32 : i32, i32
  }
  func.func @transform_1(%arg0: i32) -> (i32, i32) {
    %c0_i32 = arith.constant 0 : i32
    %c0_i32_0 = arith.constant 0 : i32
    %c0_i32_1 = arith.constant 0 : i32
    return %c0_i32, %c0_i32_0 : i32, i32
  }
  func.func @transform_2(%arg0: i32) -> (i32, i32) {
    %c0_i32 = arith.constant 0 : i32
    %c0_i32_0 = arith.constant 0 : i32
    %c0_i32_1 = arith.constant 0 : i32
    return %c0_i32, %c0_i32_0 : i32, i32
  }
  func.func @transform_3(%arg0: i32) -> (i32, i32) {
    %c0_i32 = arith.constant 0 : i32
    %c0_i32_0 = arith.constant 0 : i32
    return %arg0, %c0_i32 : i32, i32
  }
  func.func @transform_4(%arg0: i32) -> (i32, i32) {
    %c0_i32 = arith.constant 0 : i32
    %c0_i32_0 = arith.constant 0 : i32
    return %arg0, %c0_i32 : i32, i32
  }
}

module attributes {stable_mosaic.version = 11 : i64} {
  func.func @_mm_bias_kernel(%arg0: i32, %arg1: memref<16x256xbf16, #tpu.memory_space<vmem>>, %arg2: memref<256x128xbf16, #tpu.memory_space<vmem>>, %arg3: memref<1x128xf32, #tpu.memory_space<vmem>>, %arg4: memref<16x128xbf16, #tpu.memory_space<vmem>>) attributes {dimension_semantics = [#tpu.dimension_semantics<parallel>], iteration_bounds = array<i64: 2>, scalar_prefetch = 0 : i64, scratch_operands = 0 : i64, tpu.core_type = #tpu.core_type<tc>, window_params = [{transform_indices = @transform_0, window_bounds = array<i64: 16, 256>}, {pipeline_mode = #tpu.pipeline_mode<synchronous>, transform_indices = @transform_1, window_bounds = array<i64: 256, 128>}, {pipeline_mode = #tpu.pipeline_mode<synchronous>, transform_indices = @transform_2, window_bounds = array<i64: 1, 128>}, {transform_indices = @transform_3, window_bounds = array<i64: 16, 128>}]} {
    %c0 = arith.constant 0 : index
    %c0_0 = arith.constant 0 : index
    %0 = vector.load %arg1[%c0, %c0_0] : memref<16x256xbf16, #tpu.memory_space<vmem>>, vector<16x256xbf16>
    %c0_1 = arith.constant 0 : index
    %c0_2 = arith.constant 0 : index
    %1 = vector.load %arg2[%c0_1, %c0_2] : memref<256x128xbf16, #tpu.memory_space<vmem>>, vector<256x128xbf16>
    %cst = arith.constant dense<0.000000e+00> : vector<16x128xf32>
    %2 = tpu.matmul %0, %1, %cst {dimension_numbers = #tpu.dot_dimension_numbers<[1], [0], [0], [1], [0, 0, 1, 1], [], []>} : vector<16x256xbf16>, vector<256x128xbf16>, vector<16x128xf32> -> vector<16x128xf32>
    %c0_3 = arith.constant 0 : index
    %c0_4 = arith.constant 0 : index
    %3 = vector.load %arg3[%c0_3, %c0_4] : memref<1x128xf32, #tpu.memory_space<vmem>>, vector<1x128xf32>
    %4 = vector.broadcast %3 : vector<1x128xf32> to vector<16x128xf32>
    %5 = arith.addf %2, %4 : vector<16x128xf32>
    %cst_5 = arith.constant 0.000000e+00 : f32
    %6 = vector.broadcast %cst_5 : f32 to vector<16x128xf32>
    %7 = arith.maximumf %5, %6 : vector<16x128xf32>
    %8 = arith.truncf %7 : vector<16x128xf32> to vector<16x128xbf16>
    %c0_6 = arith.constant 0 : index
    %c0_7 = arith.constant 0 : index
    %9 = vector.load %arg4[%c0_6, %c0_7] : memref<16x128xbf16, #tpu.memory_space<vmem>>, vector<16x128xbf16>
    tpu.vector_store %arg4[%c0_6, %c0_7], %8 {strides = array<i32>} : memref<16x128xbf16, #tpu.memory_space<vmem>>, vector<16x128xbf16>,
    return
  }
  func.func @transform_0(%arg0: i32) -> (i32, i32) {
    %c0_i32 = arith.constant 0 : i32
    %c0_i32_0 = arith.constant 0 : i32
    return %arg0, %c0_i32 : i32, i32
  }
  func.func @transform_1(%arg0: i32) -> (i32, i32) {
    %c0_i32 = arith.constant 0 : i32
    %c0_i32_0 = arith.constant 0 : i32
    %c0_i32_1 = arith.constant 0 : i32
    return %c0_i32, %c0_i32_0 : i32, i32
  }
  func.func @transform_2(%arg0: i32) -> (i32, i32) {
    %c0_i32 = arith.constant 0 : i32
    %c0_i32_0 = arith.constant 0 : i32
    %c0_i32_1 = arith.constant 0 : i32
    return %c0_i32, %c0_i32_0 : i32, i32
  }
  func.func @transform_3(%arg0: i32) -> (i32, i32) {
    %c0_i32 = arith.constant 0 : i32
    %c0_i32_0 = arith.constant 0 : i32
    return %arg0, %c0_i32 : i32, i32
  }
}

module attributes {stable_mosaic.version = 11 : i64} {
  func.func @_mm_bias_kernel(%arg0: i32, %arg1: memref<8x256xbf16, #tpu.memory_space<vmem>>, %arg2: memref<256x512xbf16, #tpu.memory_space<vmem>>, %arg3: memref<1x512xf32, #tpu.memory_space<vmem>>, %arg4: memref<8x512xbf16, #tpu.memory_space<vmem>>) attributes {dimension_semantics = [#tpu.dimension_semantics<parallel>], iteration_bounds = array<i64: 1>, scalar_prefetch = 0 : i64, scratch_operands = 0 : i64, tpu.core_type = #tpu.core_type<tc>, window_params = [{transform_indices = @transform_0, window_bounds = array<i64: 8, 256>}, {pipeline_mode = #tpu.pipeline_mode<synchronous>, transform_indices = @transform_1, window_bounds = array<i64: 256, 512>}, {pipeline_mode = #tpu.pipeline_mode<synchronous>, transform_indices = @transform_2, window_bounds = array<i64: 1, 512>}, {transform_indices = @transform_3, window_bounds = array<i64: 8, 512>}]} {
    %c0 = arith.constant 0 : index
    %c0_0 = arith.constant 0 : index
    %0 = vector.load %arg1[%c0, %c0_0] : memref<8x256xbf16, #tpu.memory_space<vmem>>, vector<8x256xbf16>
    %c0_1 = arith.constant 0 : index
    %c0_2 = arith.constant 0 : index
    %1 = vector.load %arg2[%c0_1, %c0_2] : memref<256x512xbf16, #tpu.memory_space<vmem>>, vector<256x512xbf16>
    %cst = arith.constant dense<0.000000e+00> : vector<8x512xf32>
    %2 = tpu.matmul %0, %1, %cst {dimension_numbers = #tpu.dot_dimension_numbers<[1], [0], [0], [1], [0, 0, 1, 1], [], []>} : vector<8x256xbf16>, vector<256x512xbf16>, vector<8x512xf32> -> vector<8x512xf32>
    %c0_3 = arith.constant 0 : index
    %c0_4 = arith.constant 0 : index
    %3 = vector.load %arg3[%c0_3, %c0_4] : memref<1x512xf32, #tpu.memory_space<vmem>>, vector<1x512xf32>
    %4 = vector.broadcast %3 : vector<1x512xf32> to vector<8x512xf32>
    %5 = arith.addf %2, %4 : vector<8x512xf32>
    %6 = arith.truncf %5 : vector<8x512xf32> to vector<8x512xbf16>
    %c0_5 = arith.constant 0 : index
    %c0_6 = arith.constant 0 : index
    %7 = vector.load %arg4[%c0_5, %c0_6] : memref<8x512xbf16, #tpu.memory_space<vmem>>, vector<8x512xbf16>
    tpu.vector_store %arg4[%c0_5, %c0_6], %6 {strides = array<i32>} : memref<8x512xbf16, #tpu.memory_space<vmem>>, vector<8x512xbf16>,
    return
  }
  func.func @transform_0(%arg0: i32) -> (i32, i32) {
    %c0_i32 = arith.constant 0 : i32
    %c0_i32_0 = arith.constant 0 : i32
    return %arg0, %c0_i32 : i32, i32
  }
  func.func @transform_1(%arg0: i32) -> (i32, i32) {
    %c0_i32 = arith.constant 0 : i32
    %c0_i32_0 = arith.constant 0 : i32
    %c0_i32_1 = arith.constant 0 : i32
    return %c0_i32, %c0_i32_0 : i32, i32
  }
  func.func @transform_2(%arg0: i32) -> (i32, i32) {
    %c0_i32 = arith.constant 0 : i32
    %c0_i32_0 = arith.constant 0 : i32
    %c0_i32_1 = arith.constant 0 : i32
    return %c0_i32, %c0_i32_0 : i32, i32
  }
  func.func @transform_3(%arg0: i32) -> (i32, i32) {
    %c0_i32 = arith.constant 0 : i32
    %c0_i32_0 = arith.constant 0 : i32
    return %arg0, %c0_i32 : i32, i32
  }
}

module attributes {stable_mosaic.version = 11 : i64} {
  func.func @_mm_bias_kernel(%arg0: i32, %arg1: memref<8x1152xbf16, #tpu.memory_space<vmem>>, %arg2: memref<1152x128xbf16, #tpu.memory_space<vmem>>, %arg3: memref<1x128xf32, #tpu.memory_space<vmem>>, %arg4: memref<8x128xbf16, #tpu.memory_space<vmem>>) attributes {dimension_semantics = [#tpu.dimension_semantics<parallel>], iteration_bounds = array<i64: 1>, scalar_prefetch = 0 : i64, scratch_operands = 0 : i64, tpu.core_type = #tpu.core_type<tc>, window_params = [{transform_indices = @transform_0, window_bounds = array<i64: 8, 1152>}, {pipeline_mode = #tpu.pipeline_mode<synchronous>, transform_indices = @transform_1, window_bounds = array<i64: 1152, 128>}, {pipeline_mode = #tpu.pipeline_mode<synchronous>, transform_indices = @transform_2, window_bounds = array<i64: 1, 128>}, {transform_indices = @transform_3, window_bounds = array<i64: 8, 128>}]} {
    %c0 = arith.constant 0 : index
    %c0_0 = arith.constant 0 : index
    %0 = vector.load %arg1[%c0, %c0_0] : memref<8x1152xbf16, #tpu.memory_space<vmem>>, vector<8x1152xbf16>
    %c0_1 = arith.constant 0 : index
    %c0_2 = arith.constant 0 : index
    %1 = vector.load %arg2[%c0_1, %c0_2] : memref<1152x128xbf16, #tpu.memory_space<vmem>>, vector<1152x128xbf16>
    %cst = arith.constant dense<0.000000e+00> : vector<8x128xf32>
    %2 = tpu.matmul %0, %1, %cst {dimension_numbers = #tpu.dot_dimension_numbers<[1], [0], [0], [1], [0, 0, 1, 1], [], []>} : vector<8x1152xbf16>, vector<1152x128xbf16>, vector<8x128xf32> -> vector<8x128xf32>
    %c0_3 = arith.constant 0 : index
    %c0_4 = arith.constant 0 : index
    %3 = vector.load %arg3[%c0_3, %c0_4] : memref<1x128xf32, #tpu.memory_space<vmem>>, vector<1x128xf32>
    %4 = vector.broadcast %3 : vector<1x128xf32> to vector<8x128xf32>
    %5 = arith.addf %2, %4 : vector<8x128xf32>
    %cst_5 = arith.constant 0.000000e+00 : f32
    %6 = vector.broadcast %cst_5 : f32 to vector<8x128xf32>
    %7 = arith.maximumf %5, %6 : vector<8x128xf32>
    %8 = arith.truncf %7 : vector<8x128xf32> to vector<8x128xbf16>
    %c0_6 = arith.constant 0 : index
    %c0_7 = arith.constant 0 : index
    %9 = vector.load %arg4[%c0_6, %c0_7] : memref<8x128xbf16, #tpu.memory_space<vmem>>, vector<8x128xbf16>
    tpu.vector_store %arg4[%c0_6, %c0_7], %8 {strides = array<i32>} : memref<8x128xbf16, #tpu.memory_space<vmem>>, vector<8x128xbf16>,
    return
  }
  func.func @transform_0(%arg0: i32) -> (i32, i32) {
    %c0_i32 = arith.constant 0 : i32
    %c0_i32_0 = arith.constant 0 : i32
    return %arg0, %c0_i32 : i32, i32
  }
  func.func @transform_1(%arg0: i32) -> (i32, i32) {
    %c0_i32 = arith.constant 0 : i32
    %c0_i32_0 = arith.constant 0 : i32
    %c0_i32_1 = arith.constant 0 : i32
    return %c0_i32, %c0_i32_0 : i32, i32
  }
  func.func @transform_2(%arg0: i32) -> (i32, i32) {
    %c0_i32 = arith.constant 0 : i32
    %c0_i32_0 = arith.constant 0 : i32
    %c0_i32_1 = arith.constant 0 : i32
    return %c0_i32, %c0_i32_0 : i32, i32
  }
  func.func @transform_3(%arg0: i32) -> (i32, i32) {
    %c0_i32 = arith.constant 0 : i32
    %c0_i32_0 = arith.constant 0 : i32
    return %arg0, %c0_i32 : i32, i32
  }
}

module attributes {stable_mosaic.version = 11 : i64} {
  func.func @_mm_bias_res_kernel(%arg0: i32, %arg1: memref<8x128xbf16, #tpu.memory_space<vmem>>, %arg2: memref<128x512xbf16, #tpu.memory_space<vmem>>, %arg3: memref<1x512xf32, #tpu.memory_space<vmem>>, %arg4: memref<8x512xbf16, #tpu.memory_space<vmem>>, %arg5: memref<8x512xbf16, #tpu.memory_space<vmem>>) attributes {dimension_semantics = [#tpu.dimension_semantics<parallel>], iteration_bounds = array<i64: 1>, scalar_prefetch = 0 : i64, scratch_operands = 0 : i64, tpu.core_type = #tpu.core_type<tc>, window_params = [{transform_indices = @transform_0, window_bounds = array<i64: 8, 128>}, {pipeline_mode = #tpu.pipeline_mode<synchronous>, transform_indices = @transform_1, window_bounds = array<i64: 128, 512>}, {pipeline_mode = #tpu.pipeline_mode<synchronous>, transform_indices = @transform_2, window_bounds = array<i64: 1, 512>}, {transform_indices = @transform_3, window_bounds = array<i64: 8, 512>}, {transform_indices = @transform_4, window_bounds = array<i64: 8, 512>}]} {
    %c0 = arith.constant 0 : index
    %c0_0 = arith.constant 0 : index
    %0 = vector.load %arg1[%c0, %c0_0] : memref<8x128xbf16, #tpu.memory_space<vmem>>, vector<8x128xbf16>
    %c0_1 = arith.constant 0 : index
    %c0_2 = arith.constant 0 : index
    %1 = vector.load %arg2[%c0_1, %c0_2] : memref<128x512xbf16, #tpu.memory_space<vmem>>, vector<128x512xbf16>
    %cst = arith.constant dense<0.000000e+00> : vector<8x512xf32>
    %2 = tpu.matmul %0, %1, %cst {dimension_numbers = #tpu.dot_dimension_numbers<[1], [0], [0], [1], [0, 0, 1, 1], [], []>} : vector<8x128xbf16>, vector<128x512xbf16>, vector<8x512xf32> -> vector<8x512xf32>
    %c0_3 = arith.constant 0 : index
    %c0_4 = arith.constant 0 : index
    %3 = vector.load %arg3[%c0_3, %c0_4] : memref<1x512xf32, #tpu.memory_space<vmem>>, vector<1x512xf32>
    %4 = vector.broadcast %3 : vector<1x512xf32> to vector<8x512xf32>
    %5 = arith.addf %2, %4 : vector<8x512xf32>
    %c0_5 = arith.constant 0 : index
    %c0_6 = arith.constant 0 : index
    %6 = vector.load %arg4[%c0_5, %c0_6] : memref<8x512xbf16, #tpu.memory_space<vmem>>, vector<8x512xbf16>
    %7 = arith.extf %6 : vector<8x512xbf16> to vector<8x512xf32>
    %8 = arith.addf %5, %7 : vector<8x512xf32>
    %cst_7 = arith.constant 0.000000e+00 : f32
    %9 = vector.broadcast %cst_7 : f32 to vector<8x512xf32>
    %10 = arith.maximumf %8, %9 : vector<8x512xf32>
    %11 = arith.truncf %10 : vector<8x512xf32> to vector<8x512xbf16>
    %c0_8 = arith.constant 0 : index
    %c0_9 = arith.constant 0 : index
    %12 = vector.load %arg5[%c0_8, %c0_9] : memref<8x512xbf16, #tpu.memory_space<vmem>>, vector<8x512xbf16>
    tpu.vector_store %arg5[%c0_8, %c0_9], %11 {strides = array<i32>} : memref<8x512xbf16, #tpu.memory_space<vmem>>, vector<8x512xbf16>,
    return
  }
  func.func @transform_0(%arg0: i32) -> (i32, i32) {
    %c0_i32 = arith.constant 0 : i32
    %c0_i32_0 = arith.constant 0 : i32
    return %arg0, %c0_i32 : i32, i32
  }
  func.func @transform_1(%arg0: i32) -> (i32, i32) {
    %c0_i32 = arith.constant 0 : i32
    %c0_i32_0 = arith.constant 0 : i32
    %c0_i32_1 = arith.constant 0 : i32
    return %c0_i32, %c0_i32_0 : i32, i32
  }
  func.func @transform_2(%arg0: i32) -> (i32, i32) {
    %c0_i32 = arith.constant 0 : i32
    %c0_i32_0 = arith.constant 0 : i32
    %c0_i32_1 = arith.constant 0 : i32
    return %c0_i32, %c0_i32_0 : i32, i32
  }
  func.func @transform_3(%arg0: i32) -> (i32, i32) {
    %c0_i32 = arith.constant 0 : i32
    %c0_i32_0 = arith.constant 0 : i32
    return %arg0, %c0_i32 : i32, i32
  }
  func.func @transform_4(%arg0: i32) -> (i32, i32) {
    %c0_i32 = arith.constant 0 : i32
    %c0_i32_0 = arith.constant 0 : i32
    return %arg0, %c0_i32 : i32, i32
  }
}

</mosaic_0001>

<bundles_post_ra>
// kernel: _lambda_.18
= control target key start
LH: loop header
LB: loop body
LE: loop exit
PB: predicated region body
PF: predicated region fallthrough
CT: control target
= control target key end

     0   :  { %s1104_s12 = smov 0   ;;  %s1346_s0 = inlined_call_operand.vmem [shape: bf16[2048,147], index: 0, kind: input, shape index: {}]   ;;  %s1347_s1 = inlined_call_operand.vmem [shape: bf16[147,16], index: 1, kind: input, shape index: {}]   ;;  %s1348_s2 = inlined_call_operand.vmem [shape: f32[1,16], index: 2, kind: input, shape index: {}]   ;;  %s1349_s3 = inlined_call_operand.vmem [shape: bf16[2048,16], index: 3, kind: output, shape index: {}]  }
   0x1 LB: > { %s821_s13 = sadd.s32 4294967295, %s1081_s12   ;;  %p825_p0 = scmp.ge.s32.totalorder %s1081_s12, 1  ;;  %s1081_s12 = sphi %s1104_s12, %s13_s12  }
   0x2   : > { %p139_p1 = scmp.lt.s32.totalorder %s1081_s12, 9 }
   0x4   : > { %p140_p2 = pnand %p825_p0, %p139_p1 }
   0x5   : > { %s826_s18 = sshll.u32 (!%p140_p2), %s821_s13, 5 }
   0x6   : > { %143 = sbr.rel (%p140_p2) target bundleno = 304 (0x130), region = 32  ;;  %p165_p3 = scmp.lt.s32.totalorder (!%p140_p2), %s826_s18, 255 }
   0xb   : > { %v1053_v0 = vld [vmem:[%s1347_s1 + $0x38] sm:$0xff]  ;;  %v228_v1 = vld [vmem:[%s1347_s1 + $0x48] sm:$0x3]  ;;  %vm483_vm0 = vcmask 1040384   ;;  %vm484_vm1 = vcmask 1041408   ;;  %v1052_v3 = vld [vmem:[%s1347_s1 + $0x30] sm:$0xff] }
   0xc   : > { %v414_v2 = vunpack.c.l.b16 %v228_v1  ;;  %490 = vmatpush.bf16.msra.mxu0 %v1053_v0  ;;  %1055 = vmatpush.bf16.msra.mxu2 %v1053_v0  ;;  %v1083_v4 = vmov 65535   ;;  %s1351_s18 = smov (!%p165_p3, %s826_s18), 255  ;;  %v1051_v9 = vld [vmem:[%s1347_s1 + $0x28] sm:$0xff]  ;;  %v1054_v10 = vld [vmem:[%s1347_s1 + $0x40] sm:$0xff]  ;;  %vm434_vm2 = vcmask 154624   ;;  %v1049_v18 = vld [vmem:[%s1347_s1 + $0x18] sm:$0xff] }
   0xd   : > { %v485_v5 = vsel %vm483_vm0, 4294967295, %v1083_v4  ;;  %s1013_s23 = sshll.u32 %s1351_s18, 3  ;;  %v1050_v14 = vld [vmem:[%s1347_s1 + $0x20] sm:$0xff]  ;;  %v1048_v19 = vld [vmem:[%s1347_s1 + $0x10] sm:$0xff]  ;;  %v1047_v20 = vld [vmem:[%s1347_s1 + $0x8] sm:$0xff]  ;;  %s830_s15 = sshll.u32 %s1351_s18, 2 }
   0xe   : > { %v424_v6 = vpack.c.b16 %v414_v2, %v414_v2  ;;  %v486_v7 = vsel %vm484_vm1, %v485_v5, 0  ;;  %s1133_s28 = scalar_lea.vmem %s1346_s0, %s1013_s23  ;;  %v1046_v26 = vld [vmem:[%s1347_s1] sm:$0xff]  ;;  %s1240_s19 = scalar_lea.vmem %s1349_s3, %s830_s15  ;;  %vm732_vm3 = vcmask 125952  }
   0xf   : > { %v1014_v11 = vld [vmem:[%s1133_s28 + $0x4] sm:$0xf]  ;;  %v835_v12 = vld [vmem:[%s1133_s28 + $0x8] sm:$0xf0]  ;;  %v1032_v15 = vld [vmem:[%s1133_s28 + $0x94] sm:$0xf] }
  0x10   : > { %v488_v8 = vand.u32 %v486_v7, %v424_v6  ;;  %491 = vmatpush.bf16.msra.mxu0 %v1052_v3  ;;  %1056 = vmatpush.bf16.msra.mxu2 %v1052_v3  ;;  %v838_v13 = vor.u32 %v1014_v11, %v835_v12  ;;  %v907_v16 = vld [vmem:[%s1133_s28 + $0x98] sm:$0xf0]  ;;  %v1016_v21 = vld [vmem:[%s1133_s28 + $0x14] sm:$0xf]  ;;  %v1034_v23 = vld [vmem:[%s1133_s28 + $0xa4] sm:$0xf] }
  0x11   : > { %v910_v17 = vor.u32 %v1032_v15, %v907_v16  ;;  %v843_v22 = vld [vmem:[%s1133_s28 + $0x18] sm:$0xf0]  ;;  %v915_v24 = vld [vmem:[%s1133_s28 + $0xa8] sm:$0xf0]  ;;  %v833_v27 = vld [vmem:[%s1133_s28] sm:$0xf] }
  0x12   : > { %585 = vmatpush.bf16.msra.mxu1 %v488_v8  ;;  %1063 = vmatpush.bf16.msra.mxu3 %v488_v8  ;;  %v846_v25 = vor.u32 %v1016_v21, %v843_v22  ;;  %v1015_v28 = vld [vmem:[%s1133_s28 + $0x4] sm:$0xf0]  ;;  %v897_v29 = vld [vmem:[%s1133_s28 + $0x80] sm:$0xf]  ;;  %v918_v31 = vor.u32 %v1034_v23, %v915_v24  ;;  %v1018_v34 = vld [vmem:[%s1133_s28 + $0x24] sm:$0xf] }
  0x13   : > { %v1031_v30 = vld [vmem:[%s1133_s28 + $0x84] sm:$0xf0]  ;;  %v834_v32 = vor.u32 %v1015_v28, %v833_v27  ;;  %v851_v35 = vld [vmem:[%s1133_s28 + $0x28] sm:$0xf0]  ;;  %v1036_v36 = vld [vmem:[%s1133_s28 + $0xb4] sm:$0xf] }
  0x14   : > { %492 = vmatpush.bf16.msra.mxu0 %v1051_v9  ;;  %1057 = vmatpush.bf16.msra.mxu2 %v1051_v9  ;;  %v898_v33 = vor.u32 %v1031_v30, %v897_v29  ;;  %v923_v37 = vld [vmem:[%s1133_s28 + $0xb8] sm:$0xf0]  ;;  %v854_v38 = vor.u32 %v1018_v34, %v851_v35  ;;  %v841_v39 = vld [vmem:[%s1133_s28 + $0x10] sm:$0xf]  ;;  %v1017_v40 = vld [vmem:[%s1133_s28 + $0x14] sm:$0xf0] }
  0x15   : > { %v905_v41 = vld [vmem:[%s1133_s28 + $0x90] sm:$0xf]  ;;  %v1033_v42 = vld [vmem:[%s1133_s28 + $0x94] sm:$0xf0]  ;;  %v926_v43 = vor.u32 %v1036_v36, %v923_v37  ;;  %v842_v44 = vor.u32 %v1017_v40, %v841_v39  ;;  %v1020_v46 = vld [vmem:[%s1133_s28 + $0x34] sm:$0xf] }
  0x16   : > { %586 = vmatpush.bf16.msra.mxu1 %v1054_v10  ;;  %1064 = vmatpush.bf16.msra.mxu3 %v1054_v10  ;;  %v906_v45 = vor.u32 %v1033_v42, %v905_v41  ;;  %v859_v47 = vld [vmem:[%s1133_s28 + $0x38] sm:$0xf0]  ;;  %v1038_v48 = vld [vmem:[%s1133_s28 + $0xc4] sm:$0xf]  ;;  %v931_v49 = vld [vmem:[%s1133_s28 + $0xc8] sm:$0xf0] }
  0x17   : > { %v862_v50 = vor.u32 %v1020_v46, %v859_v47  ;;  %v849_v51 = vld [vmem:[%s1133_s28 + $0x20] sm:$0xf]  ;;  %v1019_v52 = vld [vmem:[%s1133_s28 + $0x24] sm:$0xf0]  ;;  %v934_v55 = vor.u32 %v1038_v48, %v931_v49  ;;  %v1022_v58 = vld [vmem:[%s1133_s28 + $0x44] sm:$0xf] }
  0x18   : > { %493 = vmatpush.bf16.msra.mxu0 %v1050_v14  ;;  %1058 = vmatpush.bf16.msra.mxu2 %v1050_v14  ;;  %v913_v53 = vld [vmem:[%s1133_s28 + $0xa0] sm:$0xf]  ;;  %v1035_v54 = vld [vmem:[%s1133_s28 + $0xa4] sm:$0xf0]  ;;  %v850_v56 = vor.u32 %v1019_v52, %v849_v51  ;;  %v867_v59 = vld [vmem:[%s1133_s28 + $0x48] sm:$0xf0] }
  0x19   : > { %995 = vmatmul.msk.bf16.vlgmr.msra.gmra.mxu1 %vm434_vm2, %v838_v13  ;;  %1004 = vmatmul.msk.bf16.vlgmr.msra.gmra.mxu3 %vm434_vm2, %v910_v17  ;;  %v914_v57 = vor.u32 %v1035_v54, %v913_v53  ;;  %v1040_v60 = vld [vmem:[%s1133_s28 + $0xd4] sm:$0xf]  ;;  %v939_v61 = vld [vmem:[%s1133_s28 + $0xd8] sm:$0xf0]  ;;  %v870_v62 = vor.u32 %v1022_v58, %v867_v59  ;;  %v857_v63 = vld [vmem:[%s1133_s28 + $0x30] sm:$0xf] }
  0x1a   : > { %v1021_v0 = vld [vmem:[%s1133_s28 + $0x34] sm:$0xf0]  ;;  %v921_v1 = vld [vmem:[%s1133_s28 + $0xb0] sm:$0xf]  ;;  %v942_v3 = vor.u32 %v1040_v60, %v939_v61  ;;  %v1024_v6 = vld [vmem:[%s1133_s28 + $0x54] sm:$0xf] }
  0x1b   : > { %v1037_v2 = vld [vmem:[%s1133_s28 + $0xb4] sm:$0xf0]  ;;  %v858_v4 = vor.u32 %v1021_v0, %v857_v63  ;;  %v875_v7 = vld [vmem:[%s1133_s28 + $0x58] sm:$0xf0]  ;;  %v1042_v8 = vld [vmem:[%s1133_s28 + $0xe4] sm:$0xf] }
  0x1c   : > { %494 = vmatpush.bf16.msra.mxu0 %v1049_v18  ;;  %1059 = vmatpush.bf16.msra.mxu2 %v1049_v18  ;;  %v922_v5 = vor.u32 %v1037_v2, %v921_v1  ;;  %v947_v9 = vld [vmem:[%s1133_s28 + $0xe8] sm:$0xf0]  ;;  %v878_v10 = vor.u32 %v1024_v6, %v875_v7  ;;  %v865_v11 = vld [vmem:[%s1133_s28 + $0x40] sm:$0xf]  ;;  %v1023_v12 = vld [vmem:[%s1133_s28 + $0x44] sm:$0xf0] }
  0x1d   : > { %v929_v13 = vld [vmem:[%s1133_s28 + $0xc0] sm:$0xf]  ;;  %v1039_v14 = vld [vmem:[%s1133_s28 + $0xc4] sm:$0xf0]  ;;  %v950_v15 = vor.u32 %v1042_v8, %v947_v9  ;;  %v866_v16 = vor.u32 %v1023_v12, %v865_v11  ;;  %v1026_v18 = vld [vmem:[%s1133_s28 + $0x64] sm:$0xf] }
  0x1e   : > { %v930_v17 = vor.u32 %v1039_v14, %v929_v13  ;;  %v955_v21 = vld [vmem:[%s1133_s28 + $0xf8] sm:$0xf0]  ;;  %v873_v23 = vld [vmem:[%s1133_s28 + $0x50] sm:$0xf]  ;;  %v1025_v24 = vld [vmem:[%s1133_s28 + $0x54] sm:$0xf0] }
  0x1f   : > { %v874_v28 = vor.u32 %v1025_v24, %v873_v23  ;;  %v1028_v30 = vld [vmem:[%s1133_s28 + $0x74] sm:$0xf]  ;;  %v1027_v34 = vld [vmem:[%s1133_s28 + $0x64] sm:$0xf0]  ;;  %v945_v35 = vld [vmem:[%s1133_s28 + $0xe0] sm:$0xf] }
  0x20   : > { %495 = vmatpush.bf16.msra.mxu0 %v1048_v19  ;;  %1060 = vmatpush.bf16.msra.mxu2 %v1048_v19  ;;  %v883_v19 = vld [vmem:[%s1133_s28 + $0x68] sm:$0xf0]  ;;  %v1043_v36 = vld [vmem:[%s1133_s28 + $0xe4] sm:$0xf0]  ;;  %v1030_v39 = vld [vmem:[%s1133_s28 + $0x84] sm:$0xf] }
  0x21   : > { %v886_v22 = vor.u32 %v1026_v18, %v883_v19  ;;  %v899_v40 = vld [vmem:[%s1133_s28 + $0x88] sm:$0xf0]  ;;  %v889_v42 = vld [vmem:[%s1133_s28 + $0x70] sm:$0xf]  ;;  %v1045_v46 = vld [vmem:[%s1133_s28 + $0xf4] sm:$0xf0] }
  0x22   : > { %v902_v41 = vor.u32 %v1030_v39, %v899_v40  ;;  %v1233_v51 = vld [vmem:[%s1348_s2] ss:$0 sm:$0xff] }
  0x24   : > { %496 = vmatpush.bf16.msra.mxu0 %v1047_v20  ;;  %1061 = vmatpush.bf16.msra.mxu2 %v1047_v20  ;;  %v1044_v20 = vld [vmem:[%s1133_s28 + $0xf4] sm:$0xf] }
  0x25   : > { %v958_v27 = vor.u32 %v1044_v20, %v955_v21 }
  0x28   : > { %497 = vmatpush.bf16.msra.mxu0 %v1046_v26  ;;  %1062 = vmatpush.bf16.msra.mxu2 %v1046_v26  ;;  %v1041_v26 = vld [vmem:[%s1133_s28 + $0xd4] sm:$0xf0] }
  0x29   : > { %996 = vmatmul.msk.bf16.gmra.mxu1 %vm434_vm2, %v846_v25  ;;  %1005 = vmatmul.msk.bf16.gmra.mxu3 %vm434_vm2, %v918_v31  ;;  %v937_v25 = vld [vmem:[%s1133_s28 + $0xd0] sm:$0xf]  ;;  %v891_v31 = vld [vmem:[%s1133_s28 + $0x78] sm:$0xf0] }
  0x2a   : > { %v938_v29 = vor.u32 %v1041_v26, %v937_v25 }
  0x2b   : > { %498 = vmatmul.bf16.vlgmr.msra.gmra.mxu0 %v834_v32  ;;  %538 = vmatmul.bf16.vlgmr.msra.gmra.mxu2 %v898_v33  ;;  %v894_v32 = vor.u32 %v1028_v30, %v891_v31  ;;  %v881_v33 = vld [vmem:[%s1133_s28 + $0x60] sm:$0xf] }
  0x2c   : > { %v882_v37 = vor.u32 %v1027_v34, %v881_v33 }
  0x39   : > { %997 = vmatmul.msk.bf16.gmra.mxu1 %vm434_vm2, %v854_v38  ;;  %1006 = vmatmul.msk.bf16.gmra.mxu3 %vm434_vm2, %v926_v43  ;;  %v946_v38 = vor.u32 %v1043_v36, %v945_v35  ;;  %v1029_v43 = vld [vmem:[%s1133_s28 + $0x74] sm:$0xf0] }
  0x3a   : > { %v890_v47 = vor.u32 %v1029_v43, %v889_v42 }
  0x3b   : > { %503 = vmatmul.bf16.gmra.mxu0 %v842_v44  ;;  %543 = vmatmul.bf16.gmra.mxu2 %v906_v45  ;;  %v953_v45 = vld [vmem:[%s1133_s28 + $0xf0] sm:$0xf] }
  0x3c   : > { %v954_v48 = vor.u32 %v1045_v46, %v953_v45 }
  0x49   : > { %998 = vmatmul.msk.bf16.gmra.mxu1 %vm434_vm2, %v862_v50  ;;  %1007 = vmatmul.msk.bf16.gmra.mxu3 %vm434_vm2, %v934_v55 }
  0x4b   : > { %508 = vmatmul.bf16.gmra.mxu0 %v850_v56  ;;  %548 = vmatmul.bf16.gmra.mxu2 %v914_v57 }
  0x59   : > { %999 = vmatmul.msk.bf16.gmra.mxu1 %vm434_vm2, %v870_v62  ;;  %1008 = vmatmul.msk.bf16.gmra.mxu3 %vm434_vm2, %v942_v3 }
  0x5b   : > { %513 = vmatmul.bf16.gmra.mxu0 %v858_v4  ;;  %553 = vmatmul.bf16.gmra.mxu2 %v922_v5 }
  0x69   : > { %1000 = vmatmul.msk.bf16.gmra.mxu1 %vm434_vm2, %v878_v10  ;;  %1009 = vmatmul.msk.bf16.gmra.mxu3 %vm434_vm2, %v950_v15 }
  0x6b   : > { %518 = vmatmul.bf16.gmra.mxu0 %v866_v16  ;;  %558 = vmatmul.bf16.gmra.mxu2 %v930_v17 }
  0x79   : > { %1001 = vmatmul.msk.bf16.gmra.mxu1 %vm434_vm2, %v886_v22  ;;  %1010 = vmatmul.msk.bf16.gmra.mxu3 %vm434_vm2, %v958_v27 }
  0x7b   : > { %523 = vmatmul.bf16.gmra.mxu0 %v874_v28  ;;  %563 = vmatmul.bf16.gmra.mxu2 %v938_v29 }
  0x89   : > { %1002 = vmatmul.msk.bf16.gmra.mxu1 %vm434_vm2, %v894_v32 }
  0x8b   : > { %528 = vmatmul.bf16.gmra.mxu0 %v882_v37  ;;  %568 = vmatmul.bf16.gmra.mxu2 %v946_v38 }
  0x96   : > { %v588_v44 = vpop.f32.mrf.mxu1 }
  0x99   : > { %1003 = vmatmul.msk.bf16.gmra.mxu1 %vm434_vm2, %v902_v41 }
  0x9b   : > { %533 = vmatmul.bf16.gmra.mxu0 %v890_v47  ;;  %573 = vmatmul.bf16.gmra.mxu2 %v954_v48 }
  0x9c   : > { %v633_v52 = vpop.f32.mrf.mxu3 }
  0x9e   : > { %v590_v49 = vpop.f32.mrf.mxu1 }
  0xa4   : > { %v635_v62 = vpop.f32.mrf.mxu3 }
  0xa6   : > { %v593_v50 = vpop.f32.mrf.mxu1 }
  0xa8   : > { %v499_v53 = vpop.f32.mrf.mxu0 }
  0xa9   : > { %v500_v54 = vadd.f32 %v1233_v51, %v499_v53 }
  0xab   : > { %v589_v55 = vadd.f32 %v588_v44, %v500_v54 }
  0xac   : > { %v638_v7 = vpop.f32.mrf.mxu3 }
  0xad   : > { %v668_v56 = vmax.f32 %v589_v55, 0.0 }
  0xae   : > { %v595_v57 = vpop.f32.mrf.mxu1  ;;  %v1242_v59 = vpop.f32.mrf.mxu2 }
  0xaf   : > { %v700_v58 = vpack.c.bf16 %v668_v56, %v668_v56 }
  0xb0   : > { %v501_v60 = vpop.f32.mrf.mxu0 }
  0xb1   : > { %733 = vst.msk [vmem:[%s1240_s19] sm:$0xf] %vm732_vm3, %v700_v58  ;;  %v502_v61 = vadd.f32 %v1233_v51, %v501_v60 }
  0xb3   : > { %v591_v63 = vadd.f32 %v590_v49, %v502_v61 }
  0xb4   : > { %v640_v20 = vpop.f32.mrf.mxu3 }
  0xb5   : > { %v669_v0 = vmax.f32 %v591_v63, 0.0 }
  0xb6   : > { %v598_v1 = vpop.f32.mrf.mxu1  ;;  %v1247_v3 = vpop.f32.mrf.mxu2 }
  0xb7   : > { %v701_v2 = vpack.c.bf16 %v669_v0, %v669_v0 }
  0xb8   : > { %v504_v4 = vpop.f32.mrf.mxu0 }
  0xb9   : > { %734 = vst.msk [vmem:[%s1240_s19 + $0x4] sm:$0xf] %vm732_vm3, %v701_v2  ;;  %v505_v5 = vadd.f32 %v1233_v51, %v504_v4 }
  0xbb   : > { %v594_v6 = vadd.f32 %v593_v50, %v505_v5 }
  0xbc   : > { %v643_v35 = vpop.f32.mrf.mxu3 }
  0xbd   : > { %v670_v8 = vmax.f32 %v594_v6, 0.0 }
  0xbe   : > { %v600_v9 = vpop.f32.mrf.mxu1  ;;  %v544_v11 = vpop.f32.mrf.mxu2 }
  0xbf   : > { %v702_v10 = vpack.c.bf16 %v670_v8, %v670_v8  ;;  %v545_v12 = vadd.f32 %v1233_v51, %v544_v11 }
  0xc0   : > { %v506_v13 = vpop.f32.mrf.mxu0 }
  0xc1   : > { %735 = vst.msk [vmem:[%s1240_s19 + $0x8] sm:$0xf] %vm732_vm3, %v702_v10  ;;  %v507_v14 = vadd.f32 %v1233_v51, %v506_v13  ;;  %v634_v15 = vadd.f32 %v633_v52, %v545_v12 }
  0xc3   : > { %v596_v16 = vadd.f32 %v595_v57, %v507_v14  ;;  %v686_v17 = vmax.f32 %v634_v15, 0.0 }
  0xc4   : > { %v645_v50 = vpop.f32.mrf.mxu3 }
  0xc5   : > { %v671_v18 = vmax.f32 %v596_v16, 0.0  ;;  %v718_v21 = vpack.c.bf16 %v686_v17, %v686_v17 }
  0xc6   : > { %v603_v19 = vpop.f32.mrf.mxu1  ;;  %v546_v23 = vpop.f32.mrf.mxu2 }
  0xc7   : > { %v703_v22 = vpack.c.bf16 %v671_v18, %v671_v18  ;;  %751 = vst.msk [vmem:[%s1240_s19 + $0x48] sm:$0xf] %vm732_vm3, %v718_v21  ;;  %v547_v24 = vadd.f32 %v1233_v51, %v546_v23 }
  0xc8   : > { %v509_v25 = vpop.f32.mrf.mxu0 }
  0xc9   : > { %736 = vst.msk [vmem:[%s1240_s19 + $0xc] sm:$0xf] %vm732_vm3, %v703_v22  ;;  %v510_v26 = vadd.f32 %v1233_v51, %v509_v25  ;;  %v636_v27 = vadd.f32 %v635_v62, %v547_v24 }
  0xcb   : > { %v599_v28 = vadd.f32 %v598_v1, %v510_v26  ;;  %v687_v29 = vmax.f32 %v636_v27, 0.0 }
  0xcc   : > { %v648_v2 = vpop.f32.mrf.mxu3 }
  0xcd   : > { %v672_v30 = vmax.f32 %v599_v28, 0.0  ;;  %v719_v32 = vpack.c.bf16 %v687_v29, %v687_v29 }
  0xce   : > { %v605_v31 = vpop.f32.mrf.mxu1  ;;  %v549_v34 = vpop.f32.mrf.mxu2 }
  0xcf   : > { %v704_v33 = vpack.c.bf16 %v672_v30, %v672_v30  ;;  %752 = vst.msk [vmem:[%s1240_s19 + $0x4c] sm:$0xf] %vm732_vm3, %v719_v32  ;;  %v550_v36 = vadd.f32 %v1233_v51, %v549_v34 }
  0xd0   : > { %v511_v37 = vpop.f32.mrf.mxu0 }
  0xd1   : > { %737 = vst.msk [vmem:[%s1240_s19 + $0x10] sm:$0xf] %vm732_vm3, %v704_v33  ;;  %v512_v38 = vadd.f32 %v1233_v51, %v511_v37  ;;  %v639_v39 = vadd.f32 %v638_v7, %v550_v36 }
  0xd3   : > { %v601_v40 = vadd.f32 %v600_v9, %v512_v38  ;;  %v688_v41 = vmax.f32 %v639_v39, 0.0 }
  0xd4   : > { %v650_v18 = vpop.f32.mrf.mxu3 }
  0xd5   : > { %v673_v42 = vmax.f32 %v601_v40, 0.0  ;;  %v720_v44 = vpack.c.bf16 %v688_v41, %v688_v41 }
  0xd6   : > { %v608_v43 = vpop.f32.mrf.mxu1  ;;  %v551_v46 = vpop.f32.mrf.mxu2 }
  0xd7   : > { %v705_v45 = vpack.c.bf16 %v673_v42, %v673_v42  ;;  %753 = vst.msk [vmem:[%s1240_s19 + $0x50] sm:$0xf] %vm732_vm3, %v720_v44  ;;  %v552_v47 = vadd.f32 %v1233_v51, %v551_v46 }
  0xd8   : > { %v514_v48 = vpop.f32.mrf.mxu0 }
  0xd9   : > { %738 = vst.msk [vmem:[%s1240_s19 + $0x14] sm:$0xf] %vm732_vm3, %v705_v45  ;;  %v515_v49 = vadd.f32 %v1233_v51, %v514_v48  ;;  %v641_v52 = vadd.f32 %v640_v20, %v552_v47 }
  0xdb   : > { %v604_v53 = vadd.f32 %v603_v19, %v515_v49  ;;  %v689_v54 = vmax.f32 %v641_v52, 0.0 }
  0xdc   : > { %v653_v33 = vpop.f32.mrf.mxu3 }
  0xdd   : > { %v674_v55 = vmax.f32 %v604_v53, 0.0  ;;  %v721_v57 = vpack.c.bf16 %v689_v54, %v689_v54 }
  0xde   : > { %v610_v56 = vpop.f32.mrf.mxu1  ;;  %v554_v60 = vpop.f32.mrf.mxu2 }
  0xdf   : > { %v706_v58 = vpack.c.bf16 %v674_v55, %v674_v55  ;;  %754 = vst.msk [vmem:[%s1240_s19 + $0x54] sm:$0xf] %vm732_vm3, %v721_v57  ;;  %v555_v61 = vadd.f32 %v1233_v51, %v554_v60 }
  0xe0   : > { %v516_v62 = vpop.f32.mrf.mxu0 }
  0xe1   : > { %739 = vst.msk [vmem:[%s1240_s19 + $0x18] sm:$0xf] %vm732_vm3, %v706_v58  ;;  %v517_v63 = vadd.f32 %v1233_v51, %v516_v62  ;;  %v644_v0 = vadd.f32 %v643_v35, %v555_v61 }
  0xe3   : > { %v606_v1 = vadd.f32 %v605_v31, %v517_v63  ;;  %v690_v4 = vmax.f32 %v644_v0, 0.0 }
  0xe4   : > { %v655_v48 = vpop.f32.mrf.mxu3 }
  0xe5   : > { %v675_v5 = vmax.f32 %v606_v1, 0.0  ;;  %v722_v7 = vpack.c.bf16 %v690_v4, %v690_v4 }
  0xe6   : > { %v613_v6 = vpop.f32.mrf.mxu1  ;;  %v556_v9 = vpop.f32.mrf.mxu2 }
  0xe7   : > { %v707_v8 = vpack.c.bf16 %v675_v5, %v675_v5  ;;  %755 = vst.msk [vmem:[%s1240_s19 + $0x58] sm:$0xf] %vm732_vm3, %v722_v7  ;;  %v557_v10 = vadd.f32 %v1233_v51, %v556_v9 }
  0xe8   : > { %v519_v11 = vpop.f32.mrf.mxu0 }
  0xe9   : > { %740 = vst.msk [vmem:[%s1240_s19 + $0x1c] sm:$0xf] %vm732_vm3, %v707_v8  ;;  %v520_v12 = vadd.f32 %v1233_v51, %v519_v11  ;;  %v646_v13 = vadd.f32 %v645_v50, %v557_v10 }
  0xeb   : > { %v609_v14 = vadd.f32 %v608_v43, %v520_v12  ;;  %v691_v15 = vmax.f32 %v646_v13, 0.0  ;;  %v540_v13 = vadd.f32 %v1233_v51, %v1242_v59 }
  0xec   : > { %v658_v0 = vpop.f32.mrf.mxu3 }
  0xed   : > { %v676_v16 = vmax.f32 %v609_v14, 0.0  ;;  %v723_v19 = vpack.c.bf16 %v691_v15, %v691_v15 }
  0xee   : > { %v615_v17 = vpop.f32.mrf.mxu1  ;;  %v559_v21 = vpop.f32.mrf.mxu2 }
  0xef   : > { %v708_v20 = vpack.c.bf16 %v676_v16, %v676_v16  ;;  %756 = vst.msk [vmem:[%s1240_s19 + $0x5c] sm:$0xf] %vm732_vm3, %v723_v19  ;;  %v560_v22 = vadd.f32 %v1233_v51, %v559_v21 }
  0xf0   : > { %v521_v23 = vpop.f32.mrf.mxu0 }
  0xf1   : > { %741 = vst.msk [vmem:[%s1240_s19 + $0x20] sm:$0xf] %vm732_vm3, %v708_v20  ;;  %v522_v24 = vadd.f32 %v1233_v51, %v521_v23  ;;  %v649_v25 = vadd.f32 %v648_v2, %v560_v22 }
  0xf3   : > { %v611_v26 = vadd.f32 %v610_v56, %v522_v24  ;;  %v692_v27 = vmax.f32 %v649_v25, 0.0 }
  0xf4   : > { %v660_v16 = vpop.f32.mrf.mxu3 }
  0xf5   : > { %v677_v28 = vmax.f32 %v611_v26, 0.0  ;;  %v724_v30 = vpack.c.bf16 %v692_v27, %v692_v27 }
  0xf6   : > { %v618_v29 = vpop.f32.mrf.mxu1  ;;  %v561_v32 = vpop.f32.mrf.mxu2 }
  0xf7   : > { %v709_v31 = vpack.c.bf16 %v677_v28, %v677_v28  ;;  %757 = vst.msk [vmem:[%s1240_s19 + $0x60] sm:$0xf] %vm732_vm3, %v724_v30  ;;  %v562_v34 = vadd.f32 %v1233_v51, %v561_v32  ;;  %v542_v28 = vadd.f32 %v1233_v51, %v1247_v3 }
  0xf8   : > { %v524_v35 = vpop.f32.mrf.mxu0 }
  0xf9   : > { %742 = vst.msk [vmem:[%s1240_s19 + $0x24] sm:$0xf] %vm732_vm3, %v709_v31  ;;  %v525_v36 = vadd.f32 %v1233_v51, %v524_v35  ;;  %v651_v37 = vadd.f32 %v650_v18, %v562_v34 }
  0xfb   : > { %v614_v38 = vadd.f32 %v613_v6, %v525_v36  ;;  %v693_v39 = vmax.f32 %v651_v37, 0.0 }
  0xfc   : > { %v663_v35 = vpop.f32.mrf.mxu3 }
  0xfd   : > { %v678_v40 = vmax.f32 %v614_v38, 0.0  ;;  %v725_v42 = vpack.c.bf16 %v693_v39, %v693_v39 }
  0xfe   : > { %v620_v41 = vpop.f32.mrf.mxu1  ;;  %v564_v44 = vpop.f32.mrf.mxu2 }
  0xff   : > { %v710_v43 = vpack.c.bf16 %v678_v40, %v678_v40  ;;  %758 = vst.msk [vmem:[%s1240_s19 + $0x64] sm:$0xf] %vm732_vm3, %v725_v42  ;;  %v565_v45 = vadd.f32 %v1233_v51, %v564_v44 }
 0x100   : > { %v526_v46 = vpop.f32.mrf.mxu0 }
 0x101   : > { %743 = vst.msk [vmem:[%s1240_s19 + $0x28] sm:$0xf] %vm732_vm3, %v710_v43  ;;  %v527_v47 = vadd.f32 %v1233_v51, %v526_v46  ;;  %v654_v49 = vadd.f32 %v653_v33, %v565_v45 }
 0x103   : > { %v616_v50 = vadd.f32 %v615_v17, %v527_v47  ;;  %v694_v52 = vmax.f32 %v654_v49, 0.0 }
 0x104   : > { %v665_v49 = vpop.f32.mrf.mxu3 }
 0x105   : > { %v679_v53 = vmax.f32 %v616_v50, 0.0  ;;  %v726_v55 = vpack.c.bf16 %v694_v52, %v694_v52 }
 0x106   : > { %v623_v54 = vpop.f32.mrf.mxu1  ;;  %v566_v57 = vpop.f32.mrf.mxu2 }
 0x107   : > { %v711_v56 = vpack.c.bf16 %v679_v53, %v679_v53  ;;  %759 = vst.msk [vmem:[%s1240_s19 + $0x68] sm:$0xf] %vm732_vm3, %v726_v55  ;;  %v567_v58 = vadd.f32 %v1233_v51, %v566_v57 }
 0x108   : > { %v529_v60 = vpop.f32.mrf.mxu0 }
 0x109   : > { %744 = vst.msk [vmem:[%s1240_s19 + $0x2c] sm:$0xf] %vm732_vm3, %v711_v56  ;;  %v530_v61 = vadd.f32 %v1233_v51, %v529_v60  ;;  %v656_v62 = vadd.f32 %v655_v48, %v567_v58 }
 0x10b   : > { %v619_v63 = vadd.f32 %v618_v29, %v530_v61  ;;  %v695_v1 = vmax.f32 %v656_v62, 0.0 }
 0x10d   : > { %v680_v2 = vmax.f32 %v619_v63, 0.0  ;;  %v727_v5 = vpack.c.bf16 %v695_v1, %v695_v1 }
 0x10e   : > { %v625_v4 = vpop.f32.mrf.mxu1  ;;  %v569_v7 = vpop.f32.mrf.mxu2 }
 0x10f   : > { %v712_v6 = vpack.c.bf16 %v680_v2, %v680_v2  ;;  %760 = vst.msk [vmem:[%s1240_s19 + $0x6c] sm:$0xf] %vm732_vm3, %v727_v5  ;;  %v570_v8 = vadd.f32 %v1233_v51, %v569_v7 }
 0x110   : > { %v531_v9 = vpop.f32.mrf.mxu0 }
 0x111   : > { %745 = vst.msk [vmem:[%s1240_s19 + $0x30] sm:$0xf] %vm732_vm3, %v712_v6  ;;  %v532_v10 = vadd.f32 %v1233_v51, %v531_v9  ;;  %v659_v11 = vadd.f32 %v658_v0, %v570_v8 }
 0x113   : > { %v621_v12 = vadd.f32 %v620_v41, %v532_v10  ;;  %v696_v14 = vmax.f32 %v659_v11, 0.0 }
 0x115   : > { %v681_v15 = vmax.f32 %v621_v12, 0.0  ;;  %v728_v18 = vpack.c.bf16 %v696_v14, %v696_v14 }
 0x116   : > { %v628_v17 = vpop.f32.mrf.mxu1  ;;  %v571_v21 = vpop.f32.mrf.mxu2 }
 0x117   : > { %v629_v19 = vadd.f32 %v628_v17, %v540_v13  ;;  %v713_v20 = vpack.c.bf16 %v681_v15, %v681_v15  ;;  %761 = vst.msk [vmem:[%s1240_s19 + $0x70] sm:$0xf] %vm732_vm3, %v728_v18  ;;  %v572_v23 = vadd.f32 %v1233_v51, %v571_v21 }
 0x118   : > { %v534_v24 = vpop.f32.mrf.mxu0 }
 0x119   : > { %v684_v22 = vmax.f32 %v629_v19, 0.0  ;;  %746 = vst.msk [vmem:[%s1240_s19 + $0x34] sm:$0xf] %vm732_vm3, %v713_v20  ;;  %v535_v59 = vadd.f32 %v1233_v51, %v534_v24  ;;  %v661_v26 = vadd.f32 %v660_v16, %v572_v23 }
 0x11b   : > { %v716_v25 = vpack.c.bf16 %v684_v22, %v684_v22  ;;  %v624_v27 = vadd.f32 %v623_v54, %v535_v59  ;;  %v697_v29 = vmax.f32 %v661_v26, 0.0 }
 0x11d   : > { %749 = vst.msk [vmem:[%s1240_s19 + $0x40] sm:$0xf] %vm732_vm3, %v716_v25  ;;  %v682_v30 = vmax.f32 %v624_v27, 0.0  ;;  %v729_v32 = vpack.c.bf16 %v697_v29, %v697_v29 }
 0x11e   : > { %v630_v31 = vpop.f32.mrf.mxu1  ;;  %v574_v36 = vpop.f32.mrf.mxu2 }
 0x11f   : > { %v631_v33 = vadd.f32 %v630_v31, %v542_v28  ;;  %v714_v34 = vpack.c.bf16 %v682_v30, %v682_v30  ;;  %762 = vst.msk [vmem:[%s1240_s19 + $0x74] sm:$0xf] %vm732_vm3, %v729_v32  ;;  %v575_v38 = vadd.f32 %v1233_v51, %v574_v36 }
 0x120   : > { %v536_v39 = vpop.f32.mrf.mxu0 }
 0x121   : > { %v685_v37 = vmax.f32 %v631_v33, 0.0  ;;  %747 = vst.msk [vmem:[%s1240_s19 + $0x38] sm:$0xf] %vm732_vm3, %v714_v34  ;;  %v537_v3 = vadd.f32 %v1233_v51, %v536_v39  ;;  %v664_v41 = vadd.f32 %v663_v35, %v575_v38 }
 0x123   : > { %v717_v40 = vpack.c.bf16 %v685_v37, %v685_v37  ;;  %v626_v42 = vadd.f32 %v625_v4, %v537_v3  ;;  %v698_v43 = vmax.f32 %v664_v41, 0.0 }
 0x125   : > { %750 = vst.msk [vmem:[%s1240_s19 + $0x44] sm:$0xf] %vm732_vm3, %v717_v40  ;;  %v683_v44 = vmax.f32 %v626_v42, 0.0  ;;  %v730_v45 = vpack.c.bf16 %v698_v43, %v698_v43 }
 0x126   : > { %v576_v47 = vpop.f32.mrf.mxu2 }
 0x127   : > { %v715_v46 = vpack.c.bf16 %v683_v44, %v683_v44  ;;  %763 = vst.msk [vmem:[%s1240_s19 + $0x78] sm:$0xf] %vm732_vm3, %v730_v45  ;;  %v577_v48 = vadd.f32 %v1233_v51, %v576_v47 }
 0x129   : > { %748 = vst.msk [vmem:[%s1240_s19 + $0x3c] sm:$0xf] %vm732_vm3, %v715_v46  ;;  %v666_v50 = vadd.f32 %v665_v49, %v577_v48 }
 0x12b   : > { %v699_v52 = vmax.f32 %v666_v50, 0.0 }
 0x12d   : > { %v731_v53 = vpack.c.bf16 %v699_v52, %v699_v52 }
 0x12f   : > { %764 = vst.msk [vmem:[%s1240_s19 + $0x7c] sm:$0xf] %vm732_vm3, %v731_v53 }
 0x130 PF: > { %s13_s12 = sadd.s32 1, %s1081_s12  }
 0x131   : > { %p10_p4 = scmp.ge.s32.totalorder %s13_s12, 10  }
 0x133   :  { %12 = sbr.rel (!%p10_p4) target bundleno = 1 (0x1), region = 62 }

// kernel: _lambda_.20
= control target key start
LH: loop header
LB: loop body
LE: loop exit
PB: predicated region body
PF: predicated region fallthrough
CT: control target
= control target key end

     0   :  { %s742_s12 = smov 0   ;;  %s888_s0 = inlined_call_operand.vmem [shape: bf16[512,16], index: 0, kind: input, shape index: {}]   ;;  %s889_s1 = inlined_call_operand.vmem [shape: bf16[16,16], index: 1, kind: input, shape index: {}]   ;;  %s890_s2 = inlined_call_operand.vmem [shape: f32[1,16], index: 2, kind: input, shape index: {}]   ;;  %s891_s3 = inlined_call_operand.vmem [shape: bf16[512,16], index: 3, kind: output, shape index: {}]  }
   0x1 LB: > { %s590_s13 = sadd.s32 4294967295, %s720_s12   ;;  %p594_p0 = scmp.ge.s32.totalorder %s720_s12, 1  ;;  %s720_s12 = sphi %s742_s12, %s13_s12  }
   0x2   : > { %p138_p1 = scmp.lt.s32.totalorder %s720_s12, 3 }
   0x4   : > { %p139_p2 = pnand %p594_p0, %p138_p1 }
   0x5   : > { %s595_s16 = sshll.u32 (!%p139_p2), %s590_s13, 5 }
   0x6   : > { %142 = sbr.rel (%p139_p2) target bundleno = 213 (0xd5), region = 32  ;;  %p163_p3 = scmp.lt.s32.totalorder (!%p139_p2), %s595_s16, 63 }
   0xb   : > { %v701_v0 = vld [vmem:[%s889_s1] sm:$0xff]  ;;  %s893_s16 = smov (!%p163_p3, %s595_s16), 63  ;;  %vm299_vm0 = vcmask 130048   ;;  %vm501_vm1 = vcmask 125952  }
   0xc   : > { %355 = vmatpush.bf16.msra.mxu0 %v701_v0  ;;  %702 = vmatpush.bf16.msra.mxu1 %v701_v0  ;;  %s596_s17 = sshll.u32 %s893_s16, 2  ;;  %v780_v17 = vld [vmem:[%s890_s2] ss:$0 sm:$0xff] }
   0xd   : > { %703 = vmatpush.bf16.msra.mxu2 %v701_v0  ;;  %704 = vmatpush.bf16.msra.mxu3 %v701_v0  ;;  %s166_s20 = scalar_lea.vmem %s888_s0, %s596_s17  ;;  %s789_s25 = scalar_lea.vmem %s891_s3, %s596_s17 }
   0xe   : > { %v685_v1 = vld [vmem:[%s166_s20] sm:$0xff]  ;;  %v686_v5 = vld [vmem:[%s166_s20 + $0x8] sm:$0xff]  ;;  %v687_v9 = vld [vmem:[%s166_s20 + $0x10] sm:$0xff] }
   0xf   : > { %v689_v2 = vld [vmem:[%s166_s20 + $0x20] sm:$0xff]  ;;  %667 = vmatmul.msk.bf16.vlgmr.msra.gmra.mxu0 %vm299_vm0, %v685_v1  ;;  %v690_v6 = vld [vmem:[%s166_s20 + $0x28] sm:$0xff]  ;;  %v691_v10 = vld [vmem:[%s166_s20 + $0x30] sm:$0xff] }
  0x10   : > { %v693_v3 = vld [vmem:[%s166_s20 + $0x40] sm:$0xff]  ;;  %671 = vmatmul.msk.bf16.vlgmr.msra.gmra.mxu1 %vm299_vm0, %v689_v2  ;;  %v694_v7 = vld [vmem:[%s166_s20 + $0x48] sm:$0xff]  ;;  %v695_v11 = vld [vmem:[%s166_s20 + $0x50] sm:$0xff] }
  0x11   : > { %v697_v4 = vld [vmem:[%s166_s20 + $0x60] sm:$0xff]  ;;  %675 = vmatmul.msk.bf16.vlgmr.msra.gmra.mxu2 %vm299_vm0, %v693_v3  ;;  %v698_v8 = vld [vmem:[%s166_s20 + $0x68] sm:$0xff]  ;;  %v699_v12 = vld [vmem:[%s166_s20 + $0x70] sm:$0xff] }
  0x12   : > { %679 = vmatmul.msk.bf16.vlgmr.msra.gmra.mxu3 %vm299_vm0, %v697_v4  ;;  %v688_v13 = vld [vmem:[%s166_s20 + $0x18] sm:$0xff] }
  0x13   : > { %v692_v14 = vld [vmem:[%s166_s20 + $0x38] sm:$0xff] }
  0x14   : > { %v696_v15 = vld [vmem:[%s166_s20 + $0x58] sm:$0xff] }
  0x15   : > { %v700_v16 = vld [vmem:[%s166_s20 + $0x78] sm:$0xff] }
  0x1f   : > { %668 = vmatmul.msk.bf16.gmra.mxu0 %vm299_vm0, %v686_v5 }
  0x20   : > { %672 = vmatmul.msk.bf16.gmra.mxu1 %vm299_vm0, %v690_v6 }
  0x21   : > { %676 = vmatmul.msk.bf16.gmra.mxu2 %vm299_vm0, %v694_v7 }
  0x22   : > { %680 = vmatmul.msk.bf16.gmra.mxu3 %vm299_vm0, %v698_v8 }
  0x2f   : > { %669 = vmatmul.msk.bf16.gmra.mxu0 %vm299_vm0, %v687_v9 }
  0x30   : > { %673 = vmatmul.msk.bf16.gmra.mxu1 %vm299_vm0, %v691_v10 }
  0x31   : > { %677 = vmatmul.msk.bf16.gmra.mxu2 %vm299_vm0, %v695_v11 }
  0x32   : > { %681 = vmatmul.msk.bf16.gmra.mxu3 %vm299_vm0, %v699_v12 }
  0x3f   : > { %670 = vmatmul.msk.bf16.gmra.mxu0 %vm299_vm0, %v688_v13 }
  0x40   : > { %674 = vmatmul.msk.bf16.gmra.mxu1 %vm299_vm0, %v692_v14 }
  0x41   : > { %678 = vmatmul.msk.bf16.gmra.mxu2 %vm299_vm0, %v696_v15 }
  0x42   : > { %682 = vmatmul.msk.bf16.gmra.mxu3 %vm299_vm0, %v700_v16 }
  0x8c   : > { %v357_v18 = vpop.f32.mrf.mxu0 }
  0x8d   : > { %v377_v19 = vpop.f32.mrf.mxu1  ;;  %v358_v20 = vadd.f32 %v780_v17, %v357_v18 }
  0x8e   : > { %v378_v21 = vadd.f32 %v780_v17, %v377_v19 }
  0x8f   : > { %v437_v22 = vmax.f32 %v358_v20, 0.0 }
  0x90   : > { %v445_v23 = vmax.f32 %v378_v21, 0.0 }
  0x91   : > { %v469_v24 = vpack.c.bf16 %v437_v22, %v437_v22 }
  0x92   : > { %v477_v25 = vpack.c.bf16 %v445_v23, %v445_v23 }
  0x93   : > { %502 = vst.msk [vmem:[%s789_s25] sm:$0xf] %vm501_vm1, %v469_v24 }
  0x94   : > { %v397_v26 = vpop.f32.mrf.mxu2  ;;  %510 = vst.msk [vmem:[%s789_s25 + $0x20] sm:$0xf] %vm501_vm1, %v477_v25  ;;  %v359_v30 = vpop.f32.mrf.mxu0 }
  0x95   : > { %v417_v27 = vpop.f32.mrf.mxu3  ;;  %v398_v28 = vadd.f32 %v780_v17, %v397_v26  ;;  %v379_v31 = vpop.f32.mrf.mxu1  ;;  %v360_v32 = vadd.f32 %v780_v17, %v359_v30 }
  0x96   : > { %v418_v29 = vadd.f32 %v780_v17, %v417_v27  ;;  %v380_v33 = vadd.f32 %v780_v17, %v379_v31 }
  0x97   : > { %v453_v34 = vmax.f32 %v398_v28, 0.0  ;;  %v438_v36 = vmax.f32 %v360_v32, 0.0 }
  0x98   : > { %v461_v35 = vmax.f32 %v418_v29, 0.0  ;;  %v446_v37 = vmax.f32 %v380_v33, 0.0 }
  0x99   : > { %v485_v38 = vpack.c.bf16 %v453_v34, %v453_v34  ;;  %v470_v40 = vpack.c.bf16 %v438_v36, %v438_v36 }
  0x9a   : > { %v493_v39 = vpack.c.bf16 %v461_v35, %v461_v35  ;;  %v478_v41 = vpack.c.bf16 %v446_v37, %v446_v37 }
  0x9b   : > { %518 = vst.msk [vmem:[%s789_s25 + $0x40] sm:$0xf] %vm501_vm1, %v485_v38 }
  0x9c   : > { %526 = vst.msk [vmem:[%s789_s25 + $0x60] sm:$0xf] %vm501_vm1, %v493_v39  ;;  %v399_v42 = vpop.f32.mrf.mxu2  ;;  %v362_v46 = vpop.f32.mrf.mxu0 }
  0x9d   : > { %v419_v43 = vpop.f32.mrf.mxu3  ;;  %503 = vst.msk [vmem:[%s789_s25 + $0x4] sm:$0xf] %vm501_vm1, %v470_v40  ;;  %v400_v44 = vadd.f32 %v780_v17, %v399_v42  ;;  %v382_v47 = vpop.f32.mrf.mxu1  ;;  %v363_v48 = vadd.f32 %v780_v17, %v362_v46 }
  0x9e   : > { %v420_v45 = vadd.f32 %v780_v17, %v419_v43  ;;  %511 = vst.msk [vmem:[%s789_s25 + $0x24] sm:$0xf] %vm501_vm1, %v478_v41  ;;  %v383_v49 = vadd.f32 %v780_v17, %v382_v47 }
  0x9f   : > { %v454_v50 = vmax.f32 %v400_v44, 0.0  ;;  %v439_v52 = vmax.f32 %v363_v48, 0.0 }
  0xa0   : > { %v462_v51 = vmax.f32 %v420_v45, 0.0  ;;  %v447_v53 = vmax.f32 %v383_v49, 0.0 }
  0xa1   : > { %v486_v54 = vpack.c.bf16 %v454_v50, %v454_v50  ;;  %v471_v56 = vpack.c.bf16 %v439_v52, %v439_v52 }
  0xa2   : > { %v494_v55 = vpack.c.bf16 %v462_v51, %v462_v51  ;;  %v479_v57 = vpack.c.bf16 %v447_v53, %v447_v53 }
  0xa3   : > { %519 = vst.msk [vmem:[%s789_s25 + $0x44] sm:$0xf] %vm501_vm1, %v486_v54 }
  0xa4   : > { %527 = vst.msk [vmem:[%s789_s25 + $0x64] sm:$0xf] %vm501_vm1, %v494_v55  ;;  %v402_v58 = vpop.f32.mrf.mxu2  ;;  %v364_v62 = vpop.f32.mrf.mxu0 }
  0xa5   : > { %v422_v59 = vpop.f32.mrf.mxu3  ;;  %504 = vst.msk [vmem:[%s789_s25 + $0x8] sm:$0xf] %vm501_vm1, %v471_v56  ;;  %v403_v60 = vadd.f32 %v780_v17, %v402_v58  ;;  %v384_v63 = vpop.f32.mrf.mxu1  ;;  %v365_v0 = vadd.f32 %v780_v17, %v364_v62 }
  0xa6   : > { %v423_v61 = vadd.f32 %v780_v17, %v422_v59  ;;  %512 = vst.msk [vmem:[%s789_s25 + $0x28] sm:$0xf] %vm501_vm1, %v479_v57  ;;  %v385_v1 = vadd.f32 %v780_v17, %v384_v63 }
  0xa7   : > { %v455_v2 = vmax.f32 %v403_v60, 0.0  ;;  %v440_v4 = vmax.f32 %v365_v0, 0.0 }
  0xa8   : > { %v463_v3 = vmax.f32 %v423_v61, 0.0  ;;  %v448_v5 = vmax.f32 %v385_v1, 0.0 }
  0xa9   : > { %v487_v6 = vpack.c.bf16 %v455_v2, %v455_v2  ;;  %v472_v8 = vpack.c.bf16 %v440_v4, %v440_v4 }
  0xaa   : > { %v495_v7 = vpack.c.bf16 %v463_v3, %v463_v3  ;;  %v480_v9 = vpack.c.bf16 %v448_v5, %v448_v5 }
  0xab   : > { %520 = vst.msk [vmem:[%s789_s25 + $0x48] sm:$0xf] %vm501_vm1, %v487_v6 }
  0xac   : > { %528 = vst.msk [vmem:[%s789_s25 + $0x68] sm:$0xf] %vm501_vm1, %v495_v7  ;;  %v404_v10 = vpop.f32.mrf.mxu2  ;;  %v367_v14 = vpop.f32.mrf.mxu0 }
  0xad   : > { %v424_v11 = vpop.f32.mrf.mxu3  ;;  %505 = vst.msk [vmem:[%s789_s25 + $0xc] sm:$0xf] %vm501_vm1, %v472_v8  ;;  %v405_v12 = vadd.f32 %v780_v17, %v404_v10  ;;  %v387_v15 = vpop.f32.mrf.mxu1  ;;  %v368_v16 = vadd.f32 %v780_v17, %v367_v14 }
  0xae   : > { %v425_v13 = vadd.f32 %v780_v17, %v424_v11  ;;  %513 = vst.msk [vmem:[%s789_s25 + $0x2c] sm:$0xf] %vm501_vm1, %v480_v9  ;;  %v388_v18 = vadd.f32 %v780_v17, %v387_v15 }
  0xaf   : > { %v456_v19 = vmax.f32 %v405_v12, 0.0  ;;  %v441_v21 = vmax.f32 %v368_v16, 0.0 }
  0xb0   : > { %v464_v20 = vmax.f32 %v425_v13, 0.0  ;;  %v449_v22 = vmax.f32 %v388_v18, 0.0 }
  0xb1   : > { %v488_v23 = vpack.c.bf16 %v456_v19, %v456_v19  ;;  %v473_v25 = vpack.c.bf16 %v441_v21, %v441_v21 }
  0xb2   : > { %v496_v24 = vpack.c.bf16 %v464_v20, %v464_v20  ;;  %v481_v26 = vpack.c.bf16 %v449_v22, %v449_v22 }
  0xb3   : > { %521 = vst.msk [vmem:[%s789_s25 + $0x4c] sm:$0xf] %vm501_vm1, %v488_v23 }
  0xb4   : > { %529 = vst.msk [vmem:[%s789_s25 + $0x6c] sm:$0xf] %vm501_vm1, %v496_v24  ;;  %v407_v27 = vpop.f32.mrf.mxu2  ;;  %v369_v31 = vpop.f32.mrf.mxu0 }
  0xb5   : > { %v427_v28 = vpop.f32.mrf.mxu3  ;;  %506 = vst.msk [vmem:[%s789_s25 + $0x10] sm:$0xf] %vm501_vm1, %v473_v25  ;;  %v408_v29 = vadd.f32 %v780_v17, %v407_v27  ;;  %v389_v32 = vpop.f32.mrf.mxu1  ;;  %v370_v33 = vadd.f32 %v780_v17, %v369_v31 }
  0xb6   : > { %v428_v30 = vadd.f32 %v780_v17, %v427_v28  ;;  %514 = vst.msk [vmem:[%s789_s25 + $0x30] sm:$0xf] %vm501_vm1, %v481_v26  ;;  %v390_v34 = vadd.f32 %v780_v17, %v389_v32 }
  0xb7   : > { %v457_v35 = vmax.f32 %v408_v29, 0.0  ;;  %v442_v37 = vmax.f32 %v370_v33, 0.0 }
  0xb8   : > { %v465_v36 = vmax.f32 %v428_v30, 0.0  ;;  %v450_v38 = vmax.f32 %v390_v34, 0.0 }
  0xb9   : > { %v489_v39 = vpack.c.bf16 %v457_v35, %v457_v35  ;;  %v474_v41 = vpack.c.bf16 %v442_v37, %v442_v37 }
  0xba   : > { %v497_v40 = vpack.c.bf16 %v465_v36, %v465_v36  ;;  %v482_v42 = vpack.c.bf16 %v450_v38, %v450_v38 }
  0xbb   : > { %522 = vst.msk [vmem:[%s789_s25 + $0x50] sm:$0xf] %vm501_vm1, %v489_v39 }
  0xbc   : > { %530 = vst.msk [vmem:[%s789_s25 + $0x70] sm:$0xf] %vm501_vm1, %v497_v40  ;;  %v409_v43 = vpop.f32.mrf.mxu2  ;;  %v372_v47 = vpop.f32.mrf.mxu0 }
  0xbd   : > { %v429_v44 = vpop.f32.mrf.mxu3  ;;  %507 = vst.msk [vmem:[%s789_s25 + $0x14] sm:$0xf] %vm501_vm1, %v474_v41  ;;  %v410_v45 = vadd.f32 %v780_v17, %v409_v43  ;;  %v392_v48 = vpop.f32.mrf.mxu1  ;;  %v373_v49 = vadd.f32 %v780_v17, %v372_v47 }
  0xbe   : > { %v430_v46 = vadd.f32 %v780_v17, %v429_v44  ;;  %515 = vst.msk [vmem:[%s789_s25 + $0x34] sm:$0xf] %vm501_vm1, %v482_v42  ;;  %v393_v50 = vadd.f32 %v780_v17, %v392_v48 }
  0xbf   : > { %v458_v51 = vmax.f32 %v410_v45, 0.0  ;;  %v443_v53 = vmax.f32 %v373_v49, 0.0 }
  0xc0   : > { %v466_v52 = vmax.f32 %v430_v46, 0.0  ;;  %v451_v54 = vmax.f32 %v393_v50, 0.0 }
  0xc1   : > { %v490_v55 = vpack.c.bf16 %v458_v51, %v458_v51  ;;  %v475_v57 = vpack.c.bf16 %v443_v53, %v443_v53 }
  0xc2   : > { %v498_v56 = vpack.c.bf16 %v466_v52, %v466_v52  ;;  %v483_v58 = vpack.c.bf16 %v451_v54, %v451_v54 }
  0xc3   : > { %523 = vst.msk [vmem:[%s789_s25 + $0x54] sm:$0xf] %vm501_vm1, %v490_v55 }
  0xc4   : > { %531 = vst.msk [vmem:[%s789_s25 + $0x74] sm:$0xf] %vm501_vm1, %v498_v56  ;;  %v412_v59 = vpop.f32.mrf.mxu2  ;;  %v374_v63 = vpop.f32.mrf.mxu0 }
  0xc5   : > { %v432_v60 = vpop.f32.mrf.mxu3  ;;  %508 = vst.msk [vmem:[%s789_s25 + $0x18] sm:$0xf] %vm501_vm1, %v475_v57  ;;  %v413_v61 = vadd.f32 %v780_v17, %v412_v59  ;;  %v394_v0 = vpop.f32.mrf.mxu1  ;;  %v375_v1 = vadd.f32 %v780_v17, %v374_v63 }
  0xc6   : > { %v433_v62 = vadd.f32 %v780_v17, %v432_v60  ;;  %516 = vst.msk [vmem:[%s789_s25 + $0x38] sm:$0xf] %vm501_vm1, %v483_v58  ;;  %v395_v2 = vadd.f32 %v780_v17, %v394_v0 }
  0xc7   : > { %v459_v3 = vmax.f32 %v413_v61, 0.0  ;;  %v444_v5 = vmax.f32 %v375_v1, 0.0 }
  0xc8   : > { %v467_v4 = vmax.f32 %v433_v62, 0.0  ;;  %v452_v6 = vmax.f32 %v395_v2, 0.0 }
  0xc9   : > { %v491_v7 = vpack.c.bf16 %v459_v3, %v459_v3  ;;  %v476_v9 = vpack.c.bf16 %v444_v5, %v444_v5 }
  0xca   : > { %v499_v8 = vpack.c.bf16 %v467_v4, %v467_v4  ;;  %v484_v10 = vpack.c.bf16 %v452_v6, %v452_v6 }
  0xcb   : > { %524 = vst.msk [vmem:[%s789_s25 + $0x58] sm:$0xf] %vm501_vm1, %v491_v7 }
  0xcc   : > { %532 = vst.msk [vmem:[%s789_s25 + $0x78] sm:$0xf] %vm501_vm1, %v499_v8  ;;  %v414_v11 = vpop.f32.mrf.mxu2 }
  0xcd   : > { %v434_v12 = vpop.f32.mrf.mxu3  ;;  %509 = vst.msk [vmem:[%s789_s25 + $0x1c] sm:$0xf] %vm501_vm1, %v476_v9  ;;  %v415_v13 = vadd.f32 %v780_v17, %v414_v11 }
  0xce   : > { %v435_v14 = vadd.f32 %v780_v17, %v434_v12  ;;  %517 = vst.msk [vmem:[%s789_s25 + $0x3c] sm:$0xf] %vm501_vm1, %v484_v10 }
  0xcf   : > { %v460_v15 = vmax.f32 %v415_v13, 0.0 }
  0xd0   : > { %v468_v16 = vmax.f32 %v435_v14, 0.0 }
  0xd1   : > { %v492_v18 = vpack.c.bf16 %v460_v15, %v460_v15 }
  0xd2   : > { %v500_v19 = vpack.c.bf16 %v468_v16, %v468_v16 }
  0xd3   : > { %525 = vst.msk [vmem:[%s789_s25 + $0x5c] sm:$0xf] %vm501_vm1, %v492_v18 }
  0xd4   : > { %533 = vst.msk [vmem:[%s789_s25 + $0x7c] sm:$0xf] %vm501_vm1, %v500_v19 }
  0xd5 PF: > { %s13_s12 = sadd.s32 1, %s720_s12  }
  0xd6   : > { %p10_p4 = scmp.ge.s32.totalorder %s13_s12, 4  }
  0xd8   :  { %12 = sbr.rel (!%p10_p4) target bundleno = 1 (0x1), region = 62 }

// kernel: _lambda_.22
= control target key start
LH: loop header
LB: loop body
LE: loop exit
PB: predicated region body
PF: predicated region fallthrough
CT: control target
= control target key end

     0   :  { %s710_s12 = smov 0   ;;  %s856_s0 = inlined_call_operand.vmem [shape: bf16[512,16], index: 0, kind: input, shape index: {}]   ;;  %s857_s1 = inlined_call_operand.vmem [shape: bf16[16,64], index: 1, kind: input, shape index: {}]   ;;  %s858_s2 = inlined_call_operand.vmem [shape: f32[1,64], index: 2, kind: input, shape index: {}]   ;;  %s859_s3 = inlined_call_operand.vmem [shape: bf16[512,64], index: 3, kind: output, shape index: {}]  }
   0x1 LB: > { %s558_s13 = sadd.s32 4294967295, %s688_s12   ;;  %p562_p0 = scmp.ge.s32.totalorder %s688_s12, 1  ;;  %s688_s12 = sphi %s710_s12, %s13_s12  }
   0x2   : > { %p138_p1 = scmp.lt.s32.totalorder %s688_s12, 3 }
   0x4   : > { %p139_p2 = pnand %p562_p0, %p138_p1 }
   0x5   : > { %s563_s16 = sshll.u32 (!%p139_p2), %s558_s13, 5 }
   0x6   : > { %142 = sbr.rel (%p139_p2) target bundleno = 211 (0xd3), region = 32  ;;  %p163_p3 = scmp.lt.s32.totalorder (!%p139_p2), %s563_s16, 63 }
   0xb   : > { %v669_v0 = vld [vmem:[%s857_s1] sm:$0xff]  ;;  %s861_s16 = smov (!%p163_p3, %s563_s16), 63  ;;  %vm299_vm0 = vcmask 130048   ;;  %vm469_vm1 = vcmask 519168  }
   0xc   : > { %355 = vmatpush.bf16.msra.mxu0 %v669_v0  ;;  %670 = vmatpush.bf16.msra.mxu1 %v669_v0  ;;  %s564_s17 = sshll.u32 %s861_s16, 2  ;;  %v748_v17 = vld [vmem:[%s858_s2] ss:$0 sm:$0xff] }
   0xd   : > { %671 = vmatpush.bf16.msra.mxu2 %v669_v0  ;;  %672 = vmatpush.bf16.msra.mxu3 %v669_v0  ;;  %s166_s20 = scalar_lea.vmem %s856_s0, %s564_s17  ;;  %s757_s25 = scalar_lea.vmem %s859_s3, %s564_s17 }
   0xe   : > { %v653_v1 = vld [vmem:[%s166_s20] sm:$0xff]  ;;  %v654_v5 = vld [vmem:[%s166_s20 + $0x8] sm:$0xff]  ;;  %v655_v9 = vld [vmem:[%s166_s20 + $0x10] sm:$0xff] }
   0xf   : > { %v657_v2 = vld [vmem:[%s166_s20 + $0x20] sm:$0xff]  ;;  %635 = vmatmul.msk.bf16.vlgmr.msra.gmra.mxu0 %vm299_vm0, %v653_v1  ;;  %v658_v6 = vld [vmem:[%s166_s20 + $0x28] sm:$0xff]  ;;  %v659_v10 = vld [vmem:[%s166_s20 + $0x30] sm:$0xff] }
  0x10   : > { %v661_v3 = vld [vmem:[%s166_s20 + $0x40] sm:$0xff]  ;;  %639 = vmatmul.msk.bf16.vlgmr.msra.gmra.mxu1 %vm299_vm0, %v657_v2  ;;  %v662_v7 = vld [vmem:[%s166_s20 + $0x48] sm:$0xff]  ;;  %v663_v11 = vld [vmem:[%s166_s20 + $0x50] sm:$0xff] }
  0x11   : > { %v665_v4 = vld [vmem:[%s166_s20 + $0x60] sm:$0xff]  ;;  %643 = vmatmul.msk.bf16.vlgmr.msra.gmra.mxu2 %vm299_vm0, %v661_v3  ;;  %v666_v8 = vld [vmem:[%s166_s20 + $0x68] sm:$0xff]  ;;  %v667_v12 = vld [vmem:[%s166_s20 + $0x70] sm:$0xff] }
  0x12   : > { %647 = vmatmul.msk.bf16.vlgmr.msra.gmra.mxu3 %vm299_vm0, %v665_v4  ;;  %v656_v13 = vld [vmem:[%s166_s20 + $0x18] sm:$0xff] }
  0x13   : > { %v660_v14 = vld [vmem:[%s166_s20 + $0x38] sm:$0xff] }
  0x14   : > { %v664_v15 = vld [vmem:[%s166_s20 + $0x58] sm:$0xff] }
  0x15   : > { %v668_v16 = vld [vmem:[%s166_s20 + $0x78] sm:$0xff] }
  0x1f   : > { %636 = vmatmul.msk.bf16.gmra.mxu0 %vm299_vm0, %v654_v5 }
  0x20   : > { %640 = vmatmul.msk.bf16.gmra.mxu1 %vm299_vm0, %v658_v6 }
  0x21   : > { %644 = vmatmul.msk.bf16.gmra.mxu2 %vm299_vm0, %v662_v7 }
  0x22   : > { %648 = vmatmul.msk.bf16.gmra.mxu3 %vm299_vm0, %v666_v8 }
  0x2f   : > { %637 = vmatmul.msk.bf16.gmra.mxu0 %vm299_vm0, %v655_v9 }
  0x30   : > { %641 = vmatmul.msk.bf16.gmra.mxu1 %vm299_vm0, %v659_v10 }
  0x31   : > { %645 = vmatmul.msk.bf16.gmra.mxu2 %vm299_vm0, %v663_v11 }
  0x32   : > { %649 = vmatmul.msk.bf16.gmra.mxu3 %vm299_vm0, %v667_v12 }
  0x3f   : > { %638 = vmatmul.msk.bf16.gmra.mxu0 %vm299_vm0, %v656_v13 }
  0x40   : > { %642 = vmatmul.msk.bf16.gmra.mxu1 %vm299_vm0, %v660_v14 }
  0x41   : > { %646 = vmatmul.msk.bf16.gmra.mxu2 %vm299_vm0, %v664_v15 }
  0x42   : > { %650 = vmatmul.msk.bf16.gmra.mxu3 %vm299_vm0, %v668_v16 }
  0x8c   : > { %v357_v18 = vpop.f32.mrf.mxu0 }
  0x8d   : > { %v377_v19 = vpop.f32.mrf.mxu1  ;;  %v358_v20 = vadd.f32 %v748_v17, %v357_v18 }
  0x8e   : > { %v378_v21 = vadd.f32 %v748_v17, %v377_v19 }
  0x8f   : > { %v437_v22 = vpack.c.bf16 %v358_v20, %v358_v20 }
  0x90   : > { %v445_v23 = vpack.c.bf16 %v378_v21, %v378_v21 }
  0x91   : > { %470 = vst.msk [vmem:[%s757_s25] sm:$0xf] %vm469_vm1, %v437_v22 }
  0x92   : > { %478 = vst.msk [vmem:[%s757_s25 + $0x20] sm:$0xf] %vm469_vm1, %v445_v23 }
  0x94   : > { %v397_v24 = vpop.f32.mrf.mxu2  ;;  %v359_v28 = vpop.f32.mrf.mxu0 }
  0x95   : > { %v417_v25 = vpop.f32.mrf.mxu3  ;;  %v398_v26 = vadd.f32 %v748_v17, %v397_v24  ;;  %v379_v29 = vpop.f32.mrf.mxu1  ;;  %v360_v30 = vadd.f32 %v748_v17, %v359_v28 }
  0x96   : > { %v418_v27 = vadd.f32 %v748_v17, %v417_v25  ;;  %v380_v31 = vadd.f32 %v748_v17, %v379_v29 }
  0x97   : > { %v453_v32 = vpack.c.bf16 %v398_v26, %v398_v26  ;;  %v438_v34 = vpack.c.bf16 %v360_v30, %v360_v30 }
  0x98   : > { %v461_v33 = vpack.c.bf16 %v418_v27, %v418_v27  ;;  %v446_v35 = vpack.c.bf16 %v380_v31, %v380_v31 }
  0x99   : > { %486 = vst.msk [vmem:[%s757_s25 + $0x40] sm:$0xf] %vm469_vm1, %v453_v32 }
  0x9a   : > { %494 = vst.msk [vmem:[%s757_s25 + $0x60] sm:$0xf] %vm469_vm1, %v461_v33 }
  0x9b   : > { %471 = vst.msk [vmem:[%s757_s25 + $0x4] sm:$0xf] %vm469_vm1, %v438_v34 }
  0x9c   : > { %479 = vst.msk [vmem:[%s757_s25 + $0x24] sm:$0xf] %vm469_vm1, %v446_v35  ;;  %v399_v36 = vpop.f32.mrf.mxu2  ;;  %v362_v40 = vpop.f32.mrf.mxu0 }
  0x9d   : > { %v419_v37 = vpop.f32.mrf.mxu3  ;;  %v400_v38 = vadd.f32 %v748_v17, %v399_v36  ;;  %v382_v41 = vpop.f32.mrf.mxu1  ;;  %v363_v42 = vadd.f32 %v748_v17, %v362_v40 }
  0x9e   : > { %v420_v39 = vadd.f32 %v748_v17, %v419_v37  ;;  %v383_v43 = vadd.f32 %v748_v17, %v382_v41 }
  0x9f   : > { %v454_v44 = vpack.c.bf16 %v400_v38, %v400_v38  ;;  %v439_v46 = vpack.c.bf16 %v363_v42, %v363_v42 }
  0xa0   : > { %v462_v45 = vpack.c.bf16 %v420_v39, %v420_v39  ;;  %v447_v47 = vpack.c.bf16 %v383_v43, %v383_v43 }
  0xa1   : > { %487 = vst.msk [vmem:[%s757_s25 + $0x44] sm:$0xf] %vm469_vm1, %v454_v44 }
  0xa2   : > { %495 = vst.msk [vmem:[%s757_s25 + $0x64] sm:$0xf] %vm469_vm1, %v462_v45 }
  0xa3   : > { %472 = vst.msk [vmem:[%s757_s25 + $0x8] sm:$0xf] %vm469_vm1, %v439_v46 }
  0xa4   : > { %480 = vst.msk [vmem:[%s757_s25 + $0x28] sm:$0xf] %vm469_vm1, %v447_v47  ;;  %v402_v48 = vpop.f32.mrf.mxu2  ;;  %v364_v52 = vpop.f32.mrf.mxu0 }
  0xa5   : > { %v422_v49 = vpop.f32.mrf.mxu3  ;;  %v403_v50 = vadd.f32 %v748_v17, %v402_v48  ;;  %v384_v53 = vpop.f32.mrf.mxu1  ;;  %v365_v54 = vadd.f32 %v748_v17, %v364_v52 }
  0xa6   : > { %v423_v51 = vadd.f32 %v748_v17, %v422_v49  ;;  %v385_v55 = vadd.f32 %v748_v17, %v384_v53 }
  0xa7   : > { %v455_v56 = vpack.c.bf16 %v403_v50, %v403_v50  ;;  %v440_v58 = vpack.c.bf16 %v365_v54, %v365_v54 }
  0xa8   : > { %v463_v57 = vpack.c.bf16 %v423_v51, %v423_v51  ;;  %v448_v59 = vpack.c.bf16 %v385_v55, %v385_v55 }
  0xa9   : > { %488 = vst.msk [vmem:[%s757_s25 + $0x48] sm:$0xf] %vm469_vm1, %v455_v56 }
  0xaa   : > { %496 = vst.msk [vmem:[%s757_s25 + $0x68] sm:$0xf] %vm469_vm1, %v463_v57 }
  0xab   : > { %473 = vst.msk [vmem:[%s757_s25 + $0xc] sm:$0xf] %vm469_vm1, %v440_v58 }
  0xac   : > { %481 = vst.msk [vmem:[%s757_s25 + $0x2c] sm:$0xf] %vm469_vm1, %v448_v59  ;;  %v404_v60 = vpop.f32.mrf.mxu2  ;;  %v367_v0 = vpop.f32.mrf.mxu0 }
  0xad   : > { %v424_v61 = vpop.f32.mrf.mxu3  ;;  %v405_v62 = vadd.f32 %v748_v17, %v404_v60  ;;  %v387_v1 = vpop.f32.mrf.mxu1  ;;  %v368_v2 = vadd.f32 %v748_v17, %v367_v0 }
  0xae   : > { %v425_v63 = vadd.f32 %v748_v17, %v424_v61  ;;  %v388_v3 = vadd.f32 %v748_v17, %v387_v1 }
  0xaf   : > { %v456_v4 = vpack.c.bf16 %v405_v62, %v405_v62  ;;  %v441_v6 = vpack.c.bf16 %v368_v2, %v368_v2 }
  0xb0   : > { %v464_v5 = vpack.c.bf16 %v425_v63, %v425_v63  ;;  %v449_v7 = vpack.c.bf16 %v388_v3, %v388_v3 }
  0xb1   : > { %489 = vst.msk [vmem:[%s757_s25 + $0x4c] sm:$0xf] %vm469_vm1, %v456_v4 }
  0xb2   : > { %497 = vst.msk [vmem:[%s757_s25 + $0x6c] sm:$0xf] %vm469_vm1, %v464_v5 }
  0xb3   : > { %474 = vst.msk [vmem:[%s757_s25 + $0x10] sm:$0xf] %vm469_vm1, %v441_v6 }
  0xb4   : > { %482 = vst.msk [vmem:[%s757_s25 + $0x30] sm:$0xf] %vm469_vm1, %v449_v7  ;;  %v407_v8 = vpop.f32.mrf.mxu2  ;;  %v369_v12 = vpop.f32.mrf.mxu0 }
  0xb5   : > { %v427_v9 = vpop.f32.mrf.mxu3  ;;  %v408_v10 = vadd.f32 %v748_v17, %v407_v8  ;;  %v389_v13 = vpop.f32.mrf.mxu1  ;;  %v370_v14 = vadd.f32 %v748_v17, %v369_v12 }
  0xb6   : > { %v428_v11 = vadd.f32 %v748_v17, %v427_v9  ;;  %v390_v15 = vadd.f32 %v748_v17, %v389_v13 }
  0xb7   : > { %v457_v16 = vpack.c.bf16 %v408_v10, %v408_v10  ;;  %v442_v19 = vpack.c.bf16 %v370_v14, %v370_v14 }
  0xb8   : > { %v465_v18 = vpack.c.bf16 %v428_v11, %v428_v11  ;;  %v450_v20 = vpack.c.bf16 %v390_v15, %v390_v15 }
  0xb9   : > { %490 = vst.msk [vmem:[%s757_s25 + $0x50] sm:$0xf] %vm469_vm1, %v457_v16 }
  0xba   : > { %498 = vst.msk [vmem:[%s757_s25 + $0x70] sm:$0xf] %vm469_vm1, %v465_v18 }
  0xbb   : > { %475 = vst.msk [vmem:[%s757_s25 + $0x14] sm:$0xf] %vm469_vm1, %v442_v19 }
  0xbc   : > { %483 = vst.msk [vmem:[%s757_s25 + $0x34] sm:$0xf] %vm469_vm1, %v450_v20  ;;  %v409_v21 = vpop.f32.mrf.mxu2  ;;  %v372_v25 = vpop.f32.mrf.mxu0 }
  0xbd   : > { %v429_v22 = vpop.f32.mrf.mxu3  ;;  %v410_v23 = vadd.f32 %v748_v17, %v409_v21  ;;  %v392_v26 = vpop.f32.mrf.mxu1  ;;  %v373_v27 = vadd.f32 %v748_v17, %v372_v25 }
  0xbe   : > { %v430_v24 = vadd.f32 %v748_v17, %v429_v22  ;;  %v393_v28 = vadd.f32 %v748_v17, %v392_v26 }
  0xbf   : > { %v458_v29 = vpack.c.bf16 %v410_v23, %v410_v23  ;;  %v443_v31 = vpack.c.bf16 %v373_v27, %v373_v27 }
  0xc0   : > { %v466_v30 = vpack.c.bf16 %v430_v24, %v430_v24  ;;  %v451_v32 = vpack.c.bf16 %v393_v28, %v393_v28 }
  0xc1   : > { %491 = vst.msk [vmem:[%s757_s25 + $0x54] sm:$0xf] %vm469_vm1, %v458_v29 }
  0xc2   : > { %499 = vst.msk [vmem:[%s757_s25 + $0x74] sm:$0xf] %vm469_vm1, %v466_v30 }
  0xc3   : > { %476 = vst.msk [vmem:[%s757_s25 + $0x18] sm:$0xf] %vm469_vm1, %v443_v31 }
  0xc4   : > { %484 = vst.msk [vmem:[%s757_s25 + $0x38] sm:$0xf] %vm469_vm1, %v451_v32  ;;  %v412_v33 = vpop.f32.mrf.mxu2  ;;  %v374_v37 = vpop.f32.mrf.mxu0 }
  0xc5   : > { %v432_v34 = vpop.f32.mrf.mxu3  ;;  %v413_v35 = vadd.f32 %v748_v17, %v412_v33  ;;  %v394_v38 = vpop.f32.mrf.mxu1  ;;  %v375_v39 = vadd.f32 %v748_v17, %v374_v37 }
  0xc6   : > { %v433_v36 = vadd.f32 %v748_v17, %v432_v34  ;;  %v395_v40 = vadd.f32 %v748_v17, %v394_v38 }
  0xc7   : > { %v459_v41 = vpack.c.bf16 %v413_v35, %v413_v35  ;;  %v444_v43 = vpack.c.bf16 %v375_v39, %v375_v39 }
  0xc8   : > { %v467_v42 = vpack.c.bf16 %v433_v36, %v433_v36  ;;  %v452_v44 = vpack.c.bf16 %v395_v40, %v395_v40 }
  0xc9   : > { %492 = vst.msk [vmem:[%s757_s25 + $0x58] sm:$0xf] %vm469_vm1, %v459_v41 }
  0xca   : > { %500 = vst.msk [vmem:[%s757_s25 + $0x78] sm:$0xf] %vm469_vm1, %v467_v42 }
  0xcb   : > { %477 = vst.msk [vmem:[%s757_s25 + $0x1c] sm:$0xf] %vm469_vm1, %v444_v43 }
  0xcc   : > { %485 = vst.msk [vmem:[%s757_s25 + $0x3c] sm:$0xf] %vm469_vm1, %v452_v44  ;;  %v414_v45 = vpop.f32.mrf.mxu2 }
  0xcd   : > { %v434_v46 = vpop.f32.mrf.mxu3  ;;  %v415_v47 = vadd.f32 %v748_v17, %v414_v45 }
  0xce   : > { %v435_v48 = vadd.f32 %v748_v17, %v434_v46 }
  0xcf   : > { %v460_v49 = vpack.c.bf16 %v415_v47, %v415_v47 }
  0xd0   : > { %v468_v50 = vpack.c.bf16 %v435_v48, %v435_v48 }
  0xd1   : > { %493 = vst.msk [vmem:[%s757_s25 + $0x5c] sm:$0xf] %vm469_vm1, %v460_v49 }
  0xd2   : > { %501 = vst.msk [vmem:[%s757_s25 + $0x7c] sm:$0xf] %vm469_vm1, %v468_v50 }
  0xd3 PF: > { %s13_s12 = sadd.s32 1, %s688_s12  }
  0xd4   : > { %p10_p4 = scmp.ge.s32.totalorder %s13_s12, 4  }
  0xd6   :  { %12 = sbr.rel (!%p10_p4) target bundleno = 1 (0x1), region = 62 }

// kernel: _lambda_.19
= control target key start
LH: loop header
LB: loop body
LE: loop exit
PB: predicated region body
PF: predicated region fallthrough
CT: control target
= control target key end

     0   :  { %s2813_s30 = smov 0   ;;  %s3246_s0 = inlined_call_operand.vmem [shape: bf16[512,16], index: 0, kind: input, shape index: {}]   ;;  %s3247_s1 = inlined_call_operand.vmem [shape: bf16[512,16], index: 1, kind: input, shape index: {}]   ;;  %s3248_s2 = inlined_call_operand.vmem [shape: bf16[512,16], index: 2, kind: input, shape index: {}]   ;;  %s3249_s3 = inlined_call_operand.vmem [shape: bf16[512,16], index: 3, kind: input, shape index: {}]   ;;  %s3250_s4 = inlined_call_operand.vmem [shape: bf16[512,16], index: 4, kind: input, shape index: {}]   ;;  %s3251_s5 = inlined_call_operand.vmem [shape: bf16[512,16], index: 5, kind: input, shape index: {}]   ;;  %s3252_s6 = inlined_call_operand.vmem [shape: bf16[512,16], index: 6, kind: input, shape index: {}]   ;;  %s3253_s7 = inlined_call_operand.vmem [shape: bf16[512,16], index: 7, kind: input, shape index: {}]   ;;  %s3254_s8 = inlined_call_operand.vmem [shape: bf16[512,16], index: 8, kind: input, shape index: {}]   ;;  %s3255_s9 = inlined_call_operand.vmem [shape: bf16[512,16], index: 9, kind: output, shape index: {}]  }
   0x1 LB: > { %s2009_s10 = sadd.s32 4294967295, %s2761_s30   ;;  %p2013_p0 = scmp.ge.s32.totalorder %s2761_s30, 1  ;;  %s2761_s30 = sphi %s2813_s30, %s19_s30  }
   0x2   : > { %p376_p1 = scmp.lt.s32.totalorder %s2761_s30, 3 }
   0x4   : > { %p377_p2 = pnand %p2013_p0, %p376_p1 }
   0x5   : > { %s2014_s11 = sshll.u32 (!%p377_p2), %s2009_s10, 5 }
   0x6   : > { %380 = sbr.rel (%p377_p2) target bundleno = 170 (0xaa), region = 56  ;;  %p453_p3 = scmp.lt.s32.totalorder (!%p377_p2), %s2014_s11, 63 }
   0xb   : > { %s3257_s11 = smov (!%p453_p3, %s2014_s11), 63  ;;  %vm1824_vm0 = vcmask 125952  }
   0xc   : > { %s2821_s12 = sshll.u32 %s3257_s11, 2 }
   0xd   : > { %s2827_s15 = scalar_lea.vmem %s3246_s0, %s2821_s12  ;;  %s2833_s18 = scalar_lea.vmem %s3247_s1, %s2821_s12 }
   0xe   : > { %s2839_s21 = scalar_lea.vmem %s3248_s2, %s2821_s12  ;;  %s2845_s24 = scalar_lea.vmem %s3249_s3, %s2821_s12  ;;  %v2037_v0 = vld [vmem:[%s2827_s15] sm:$0xff]   ;;  %v2612_v12 = vld [vmem:[%s2827_s15 + $0x8] sm:$0xff]   ;;  %v2613_v58 = vld [vmem:[%s2827_s15 + $0x10] sm:$0xff]  }
   0xf   : > { %v2101_v1 = vld [vmem:[%s2833_s18] sm:$0xff]   ;;  %s2853_s27 = scalar_lea.vmem %s3250_s4, %s2821_s12  ;;  %s2859_s10 = scalar_lea.vmem %s3251_s5, %s2821_s12  ;;  %v2038_v2 = vunpack.c.l.bf16 %v2037_v0  ;;  %v2039_v6 = vunpack.c.h.bf16 %v2037_v0  ;;  %v2627_v19 = vld [vmem:[%s2833_s18 + $0x8] sm:$0xff]   ;;  %v2042_v31 = vunpack.c.l.bf16 %v2612_v12  ;;  %v2043_v51 = vunpack.c.h.bf16 %v2612_v12  ;;  %v2628_v59 = vld [vmem:[%s2833_s18 + $0x10] sm:$0xff]  }
  0x10   : > { %v2102_v3 = vunpack.c.l.bf16 %v2101_v1  ;;  %v2165_v4 = vld [vmem:[%s2839_s21] sm:$0xff]   ;;  %v2103_v7 = vunpack.c.h.bf16 %v2101_v1  ;;  %s2867_s14 = scalar_lea.vmem %s3252_s6, %s2821_s12  ;;  %s2873_s19 = scalar_lea.vmem %s3253_s7, %s2821_s12  ;;  %v2642_v23 = vld [vmem:[%s2839_s21 + $0x8] sm:$0xff]   ;;  %v2106_v32 = vunpack.c.l.bf16 %v2627_v19  ;;  %v2107_v52 = vunpack.c.h.bf16 %v2627_v19  ;;  %v2643_v0 = vld [vmem:[%s2839_s21 + $0x10] sm:$0xff]  }
  0x11   : > { %v2229_v5 = vld [vmem:[%s2845_s24] sm:$0xff]   ;;  %v2166_v8 = vunpack.c.l.bf16 %v2165_v4  ;;  %v2167_v11 = vunpack.c.h.bf16 %v2165_v4  ;;  %s2882_s23 = scalar_lea.vmem %s3254_s8, %s2821_s12  ;;  %v2657_v28 = vld [vmem:[%s2845_s24 + $0x8] sm:$0xff]   ;;  %v2170_v37 = vunpack.c.l.bf16 %v2642_v23  ;;  %v2171_v53 = vunpack.c.h.bf16 %v2642_v23  ;;  %v2919_v19 = vld [vmem:[%s2859_s10 + $0x10] sm:$0xff]   ;;  %s2927_s28 = scalar_lea.vmem %s3255_s9, %s2821_s12 }
  0x12   : > { %v2293_v9 = vld [vmem:[%s2853_s27] sm:$0xff]   ;;  %v640_v13 = vmax.f32 %v2038_v2, %v2102_v3  ;;  %v2230_v14 = vunpack.c.l.bf16 %v2229_v5  ;;  %v641_v17 = vmax.f32 %v2039_v6, %v2103_v7  ;;  %v2231_v18 = vunpack.c.h.bf16 %v2229_v5  ;;  %v2672_v33 = vld [vmem:[%s2853_s27 + $0x8] sm:$0xff]   ;;  %v2912_v5 = vld [vmem:[%s2845_s24 + $0x10] sm:$0xff]  }
  0x13   : > { %v2357_v10 = vld [vmem:[%s2859_s10] sm:$0xff]   ;;  %v2294_v20 = vunpack.c.l.bf16 %v2293_v9  ;;  %v2295_v27 = vunpack.c.h.bf16 %v2293_v9  ;;  %v642_v40 = vmax.f32 %v2042_v31, %v2106_v32  ;;  %v2234_v41 = vunpack.c.l.bf16 %v2657_v28  ;;  %v2687_v42 = vld [vmem:[%s2859_s10 + $0x8] sm:$0xff]  }
  0x14   : > { %v2421_v15 = vld [vmem:[%s2867_s14] sm:$0xff]   ;;  %v2358_v21 = vunpack.c.l.bf16 %v2357_v10  ;;  %v800_v24 = vmax.f32 %v640_v13, %v2166_v8  ;;  %v801_v26 = vmax.f32 %v641_v17, %v2167_v11  ;;  %v2359_v30 = vunpack.c.h.bf16 %v2357_v10  ;;  %v2896_v43 = vld [vmem:[%s2867_s14 + $0x8] sm:$0xff]  }
  0x15   : > { %v2485_v16 = vld [vmem:[%s2873_s19] sm:$0xff]   ;;  %v2422_v25 = vunpack.c.l.bf16 %v2421_v15  ;;  %v2423_v38 = vunpack.c.h.bf16 %v2421_v15  ;;  %v2298_v47 = vunpack.c.l.bf16 %v2672_v33  ;;  %v2900_v48 = vld [vmem:[%s2873_s19 + $0x8] sm:$0xff]   ;;  %v802_v49 = vmax.f32 %v642_v40, %v2170_v37 }
  0x16   : > { %v2888_v22 = vld [vmem:[%s2882_s23] sm:$0xff]   ;;  %v2486_v29 = vunpack.c.l.bf16 %v2485_v16  ;;  %v960_v34 = vmax.f32 %v800_v24, %v2230_v14  ;;  %v961_v36 = vmax.f32 %v801_v26, %v2231_v18  ;;  %v2487_v39 = vunpack.c.h.bf16 %v2485_v16  ;;  %v2903_v50 = vld [vmem:[%s2882_s23 + $0x8] sm:$0xff]   ;;  %v2915_v14 = vld [vmem:[%s2853_s27 + $0x10] sm:$0xff]  }
  0x17   : > { %v2550_v35 = vunpack.c.l.bf16 %v2888_v22  ;;  %v2551_v46 = vunpack.c.h.bf16 %v2888_v22  ;;  %v2362_v56 = vunpack.c.l.bf16 %v2687_v42  ;;  %v2426_v57 = vunpack.c.l.bf16 %v2896_v43 }
  0x18   : > { %v1120_v44 = vmax.f32 %v960_v34, %v2294_v20  ;;  %v1121_v45 = vmax.f32 %v961_v36, %v2295_v27  ;;  %v962_v60 = vmax.f32 %v802_v49, %v2234_v41  ;;  %v2490_v61 = vunpack.c.l.bf16 %v2900_v48  ;;  %v2935_v36 = vld [vmem:[%s2873_s19 + $0x10] sm:$0xff]   ;;  %v2644_v49 = vld [vmem:[%s2839_s21 + $0x18] sm:$0xff]  }
  0x19   : > { %v643_v62 = vmax.f32 %v2043_v51, %v2107_v52  ;;  %v2235_v63 = vunpack.c.h.bf16 %v2657_v28  ;;  %v2554_v3 = vunpack.c.l.bf16 %v2903_v50  ;;  %v2299_v4 = vunpack.c.h.bf16 %v2672_v33  ;;  %v2931_v28 = vld [vmem:[%s2867_s14 + $0x10] sm:$0xff]  }
  0x1a   : > { %v1280_v54 = vmax.f32 %v1120_v44, %v2358_v21  ;;  %v1281_v55 = vmax.f32 %v1121_v45, %v2359_v30  ;;  %v1122_v6 = vmax.f32 %v962_v60, %v2298_v47  ;;  %v2046_v8 = vunpack.c.l.bf16 %v2613_v58 }
  0x1b   : > { %v803_v7 = vmax.f32 %v643_v62, %v2171_v53  ;;  %v2110_v9 = vunpack.c.l.bf16 %v2628_v59  ;;  %v2363_v12 = vunpack.c.h.bf16 %v2687_v42  ;;  %v2174_v13 = vunpack.c.l.bf16 %v2643_v0 }
  0x1c   : > { %v1440_v1 = vmax.f32 %v1280_v54, %v2422_v25  ;;  %v1441_v2 = vmax.f32 %v1281_v55, %v2423_v38  ;;  %v1282_v15 = vmax.f32 %v1122_v6, %v2362_v56  ;;  %v2238_v18 = vunpack.c.l.bf16 %v2912_v5  ;;  %v2614_v38 = vld [vmem:[%s2827_s15 + $0x18] sm:$0xff]  }
  0x1d   : > { %v963_v16 = vmax.f32 %v803_v7, %v2235_v63  ;;  %v644_v17 = vmax.f32 %v2046_v8, %v2110_v9  ;;  %v2427_v22 = vunpack.c.h.bf16 %v2896_v43  ;;  %v2491_v23 = vunpack.c.h.bf16 %v2900_v48  ;;  %v2629_v48 = vld [vmem:[%s2833_s18 + $0x18] sm:$0xff]  }
  0x1e   : > { %v1600_v10 = vmax.f32 %v1440_v1, %v2486_v29  ;;  %v1601_v11 = vmax.f32 %v1441_v2, %v2487_v39  ;;  %v1442_v24 = vmax.f32 %v1282_v15, %v2426_v57  ;;  %v2302_v27 = vunpack.c.l.bf16 %v2915_v14  ;;  %v2659_v57 = vld [vmem:[%s2845_s24 + $0x18] sm:$0xff]  }
  0x1f   : > { %v1123_v25 = vmax.f32 %v963_v16, %v2299_v4  ;;  %v804_v26 = vmax.f32 %v644_v17, %v2174_v13  ;;  %v2366_v31 = vunpack.c.l.bf16 %v2919_v19  ;;  %v2047_v32 = vunpack.c.h.bf16 %v2613_v58  ;;  %v2674_v2 = vld [vmem:[%s2853_s27 + $0x18] sm:$0xff]  }
  0x20   : > { %v1760_v20 = vmax.f32 %v1600_v10, %v2550_v35  ;;  %v1761_v21 = vmax.f32 %v1601_v11, %v2551_v46  ;;  %v1602_v33 = vmax.f32 %v1442_v24, %v2490_v61  ;;  %v2111_v37 = vunpack.c.h.bf16 %v2628_v59  ;;  %v2946_v46 = vld [vmem:[%s2882_s23 + $0x10] sm:$0xff]   ;;  %v2689_v7 = vld [vmem:[%s2859_s10 + $0x18] sm:$0xff]   ;;  %v2645_v24 = vld [vmem:[%s2839_s21 + $0x20] sm:$0xff]  }
  0x21   : > { %v1283_v34 = vmax.f32 %v1123_v25, %v2363_v12  ;;  %v964_v35 = vmax.f32 %v804_v26, %v2238_v18  ;;  %v2555_v39 = vunpack.c.h.bf16 %v2903_v50  ;;  %v2430_v40 = vunpack.c.l.bf16 %v2931_v28  ;;  %v2963_v8 = vld [vmem:[%s2867_s14 + $0x18] sm:$0xff]   ;;  %v2615_v18 = vld [vmem:[%s2827_s15 + $0x20] sm:$0xff]  }
  0x22   : > { %v1792_v29 = vpack.c.bf16 %v1760_v20, %v1760_v20  ;;  %v1793_v30 = vpack.c.bf16 %v1761_v21, %v1761_v21  ;;  %v2175_v41 = vunpack.c.h.bf16 %v2643_v0  ;;  %v2239_v42 = vunpack.c.h.bf16 %v2912_v5  ;;  %v2966_v12 = vld [vmem:[%s2873_s19 + $0x18] sm:$0xff]  }
  0x23   : > { %v1762_v43 = vmax.f32 %v1602_v33, %v2554_v3  ;;  %v1443_v44 = vmax.f32 %v1283_v34, %v2427_v22  ;;  %v1124_v45 = vmax.f32 %v964_v35, %v2302_v27  ;;  %v645_v47 = vmax.f32 %v2047_v32, %v2111_v37  ;;  %v2976_v27 = vld [vmem:[%s2882_s23 + $0x18] sm:$0xff]   ;;  %v2660_v34 = vld [vmem:[%s2845_s24 + $0x20] sm:$0xff]  }
  0x24   : > { %1825 = vst.msk [vmem:[%s2927_s28] sm:$0xf] %vm1824_vm0, %v1792_v29  ;;  %v2494_v51 = vunpack.c.l.bf16 %v2935_v36  ;;  %v2303_v50 = vunpack.c.h.bf16 %v2915_v14  ;;  %v2050_v52 = vunpack.c.l.bf16 %v2614_v38  ;;  %v2558_v58 = vunpack.c.l.bf16 %v2946_v46 }
  0x25   : > { %1826 = vst.msk [vmem:[%s2927_s28 + $0x4] sm:$0xf] %vm1824_vm0, %v1793_v30  ;;  %v1794_v53 = vpack.c.bf16 %v1762_v43, %v1762_v43  ;;  %v1603_v54 = vmax.f32 %v1443_v44, %v2491_v23  ;;  %v1284_v55 = vmax.f32 %v1124_v45, %v2366_v31  ;;  %v805_v56 = vmax.f32 %v645_v47, %v2175_v41  ;;  %v2630_v23 = vld [vmem:[%s2833_s18 + $0x20] sm:$0xff]  }
  0x26   : > { %v2367_v59 = vunpack.c.h.bf16 %v2919_v19  ;;  %v2114_v60 = vunpack.c.l.bf16 %v2629_v48  ;;  %v2178_v61 = vunpack.c.l.bf16 %v2644_v49  ;;  %v2431_v1 = vunpack.c.h.bf16 %v2931_v28 }
  0x27   : > { %1827 = vst.msk [vmem:[%s2927_s28 + $0x8] sm:$0xf] %vm1824_vm0, %v1794_v53  ;;  %v1763_v62 = vmax.f32 %v1603_v54, %v2555_v39  ;;  %v1444_v63 = vmax.f32 %v1284_v55, %v2430_v40  ;;  %v965_v0 = vmax.f32 %v805_v56, %v2239_v42  ;;  %v2495_v3 = vunpack.c.h.bf16 %v2935_v36  ;;  %v2675_v39 = vld [vmem:[%s2853_s27 + $0x20] sm:$0xff]  }
  0x28   : > { %v2559_v4 = vunpack.c.h.bf16 %v2946_v46  ;;  %v646_v5 = vmax.f32 %v2050_v52, %v2114_v60  ;;  %v2242_v6 = vunpack.c.l.bf16 %v2659_v57  ;;  %v2051_v13 = vunpack.c.h.bf16 %v2614_v38  ;;  %v2987_v56 = vld [vmem:[%s2867_s14 + $0x20] sm:$0xff]  }
  0x29   : > { %v1795_v9 = vpack.c.bf16 %v1763_v62, %v1763_v62  ;;  %v1604_v10 = vmax.f32 %v1444_v63, %v2494_v51  ;;  %v1125_v11 = vmax.f32 %v965_v0, %v2303_v50  ;;  %v2306_v15 = vunpack.c.l.bf16 %v2674_v2 }
  0x2a   : > { %v806_v14 = vmax.f32 %v646_v5, %v2178_v61  ;;  %v2115_v16 = vunpack.c.h.bf16 %v2629_v48  ;;  %v2179_v17 = vunpack.c.h.bf16 %v2644_v49  ;;  %v2370_v21 = vunpack.c.l.bf16 %v2689_v7  ;;  %v2690_v48 = vld [vmem:[%s2859_s10 + $0x20] sm:$0xff]   ;;  %v2646_v5 = vld [vmem:[%s2839_s21 + $0x28] sm:$0xff]  }
  0x2b   : > { %1828 = vst.msk [vmem:[%s2927_s28 + $0xc] sm:$0xf] %vm1824_vm0, %v1795_v9  ;;  %v1764_v19 = vmax.f32 %v1604_v10, %v2558_v58  ;;  %v1285_v20 = vmax.f32 %v1125_v11, %v2367_v59  ;;  %v2434_v22 = vunpack.c.l.bf16 %v2963_v8  ;;  %v2498_v26 = vunpack.c.l.bf16 %v2966_v12 }
  0x2c   : > { %v966_v25 = vmax.f32 %v806_v14, %v2242_v6  ;;  %v647_v28 = vmax.f32 %v2051_v13, %v2115_v16  ;;  %v2243_v29 = vunpack.c.h.bf16 %v2659_v57  ;;  %v2307_v32 = vunpack.c.h.bf16 %v2674_v2  ;;  %v2990_v57 = vld [vmem:[%s2873_s19 + $0x20] sm:$0xff]  }
  0x2d   : > { %v1796_v30 = vpack.c.bf16 %v1764_v19, %v1764_v19  ;;  %v1445_v31 = vmax.f32 %v1285_v20, %v2431_v1  ;;  %v2054_v33 = vunpack.c.l.bf16 %v2615_v18  ;;  %v2118_v37 = vunpack.c.l.bf16 %v2630_v23  ;;  %v2735_v13 = vld [vmem:[%s2882_s23 + $0x20] sm:$0xff]  }
  0x2e   : > { %v1126_v35 = vmax.f32 %v966_v25, %v2306_v15  ;;  %v807_v36 = vmax.f32 %v647_v28, %v2179_v17  ;;  %v2182_v38 = vunpack.c.l.bf16 %v2645_v24  ;;  %v2562_v41 = vunpack.c.l.bf16 %v2976_v27  ;;  %v2661_v15 = vld [vmem:[%s2845_s24 + $0x28] sm:$0xff]  }
  0x2f   : > { %1829 = vst.msk [vmem:[%s2927_s28 + $0x10] sm:$0xf] %vm1824_vm0, %v1796_v30  ;;  %v1605_v40 = vmax.f32 %v1445_v31, %v2495_v3  ;;  %v2371_v42 = vunpack.c.h.bf16 %v2689_v7  ;;  %v2435_v43 = vunpack.c.h.bf16 %v2963_v8  ;;  %v648_v46 = vmax.f32 %v2054_v33, %v2118_v37  ;;  %v2616_v3 = vld [vmem:[%s2827_s15 + $0x28] sm:$0xff]  }
  0x30   : > { %v1286_v44 = vmax.f32 %v1126_v35, %v2370_v21  ;;  %v967_v45 = vmax.f32 %v807_v36, %v2243_v29  ;;  %v2246_v47 = vunpack.c.l.bf16 %v2660_v34  ;;  %v2499_v51 = vunpack.c.h.bf16 %v2966_v12  ;;  %v2691_v33 = vld [vmem:[%s2859_s10 + $0x28] sm:$0xff]  }
  0x31   : > { %v1765_v49 = vmax.f32 %v1605_v40, %v2559_v4  ;;  %v2310_v50 = vunpack.c.l.bf16 %v2675_v39  ;;  %v2055_v52 = vunpack.c.h.bf16 %v2615_v18  ;;  %v808_v55 = vmax.f32 %v648_v46, %v2182_v38  ;;  %v2631_v4 = vld [vmem:[%s2833_s18 + $0x28] sm:$0xff]  }
  0x32   : > { %v1446_v53 = vmax.f32 %v1286_v44, %v2434_v22  ;;  %v1127_v54 = vmax.f32 %v967_v45, %v2307_v32  ;;  %v2119_v58 = vunpack.c.h.bf16 %v2630_v23  ;;  %v2374_v60 = vunpack.c.l.bf16 %v2690_v48  ;;  %v3009_v36 = vld [vmem:[%s2867_s14 + $0x28] sm:$0xff]  }
  0x33   : > { %v1797_v59 = vpack.c.bf16 %v1765_v49, %v1765_v49  ;;  %v2183_v61 = vunpack.c.h.bf16 %v2645_v24  ;;  %v2247_v62 = vunpack.c.h.bf16 %v2660_v34  ;;  %v968_v1 = vmax.f32 %v808_v55, %v2246_v47  ;;  %v2676_v24 = vld [vmem:[%s2853_s27 + $0x28] sm:$0xff]   ;;  %v2632_v49 = vld [vmem:[%s2833_s18 + $0x30] sm:$0xff]  }
  0x34   : > { %v1606_v63 = vmax.f32 %v1446_v53, %v2498_v26  ;;  %v1287_v0 = vmax.f32 %v1127_v54, %v2371_v42  ;;  %v649_v2 = vmax.f32 %v2055_v52, %v2119_v58  ;;  %v2563_v6 = vunpack.c.h.bf16 %v2976_v27  ;;  %v3012_v42 = vld [vmem:[%s2873_s19 + $0x28] sm:$0xff]   ;;  %v2647_v54 = vld [vmem:[%s2839_s21 + $0x30] sm:$0xff]  }
  0x35   : > { %1830 = vst.msk [vmem:[%s2927_s28 + $0x14] sm:$0xf] %vm1824_vm0, %v1797_v59  ;;  %v2438_v7 = vunpack.c.l.bf16 %v2987_v56  ;;  %v2502_v8 = vunpack.c.l.bf16 %v2990_v57  ;;  %v2311_v9 = vunpack.c.h.bf16 %v2675_v39  ;;  %v1128_v12 = vmax.f32 %v968_v1, %v2310_v50 }
  0x36   : > { %v1766_v10 = vmax.f32 %v1606_v63, %v2562_v41  ;;  %v1447_v11 = vmax.f32 %v1287_v0, %v2435_v43  ;;  %v809_v14 = vmax.f32 %v649_v2, %v2183_v61  ;;  %v2375_v16 = vunpack.c.h.bf16 %v2690_v48  ;;  %v2617_v48 = vld [vmem:[%s2827_s15 + $0x30] sm:$0xff]  }
  0x37   : > { %v2058_v17 = vunpack.c.l.bf16 %v2616_v3  ;;  %v2122_v18 = vunpack.c.l.bf16 %v2631_v4  ;;  %v2186_v19 = vunpack.c.l.bf16 %v2646_v5  ;;  %v1288_v22 = vmax.f32 %v1128_v12, %v2374_v60  ;;  %v2662_v60 = vld [vmem:[%s2845_s24 + $0x30] sm:$0xff]  }
  0x38   : > { %v1798_v20 = vpack.c.bf16 %v1766_v10, %v1766_v10  ;;  %v1607_v21 = vmax.f32 %v1447_v11, %v2499_v51  ;;  %v969_v23 = vmax.f32 %v809_v14, %v2247_v62  ;;  %v2566_v25 = vunpack.c.l.bf16 %v2735_v13  ;;  %v2692_v14 = vld [vmem:[%s2859_s10 + $0x30] sm:$0xff]  }
  0x39   : > { %v2439_v26 = vunpack.c.h.bf16 %v2987_v56  ;;  %v650_v27 = vmax.f32 %v2058_v17, %v2122_v18  ;;  %v2250_v28 = vunpack.c.l.bf16 %v2661_v15  ;;  %v1448_v30 = vmax.f32 %v1288_v22, %v2438_v7  ;;  %v3033_v22 = vld [vmem:[%s2873_s19 + $0x30] sm:$0xff]  }
  0x3a   : > { %1831 = vst.msk [vmem:[%s2927_s28 + $0x18] sm:$0xf] %vm1824_vm0, %v1798_v20  ;;  %v1767_v29 = vmax.f32 %v1607_v21, %v2563_v6  ;;  %v1129_v31 = vmax.f32 %v969_v23, %v2311_v9  ;;  %v2503_v32 = vunpack.c.h.bf16 %v2990_v57  ;;  %v2314_v35 = vunpack.c.l.bf16 %v2676_v24  ;;  %v2736_v57 = vld [vmem:[%s2882_s23 + $0x28] sm:$0xff]  }
  0x3b   : > { %v810_v34 = vmax.f32 %v650_v27, %v2186_v19  ;;  %v2059_v37 = vunpack.c.h.bf16 %v2616_v3  ;;  %v2123_v38 = vunpack.c.h.bf16 %v2631_v4  ;;  %v1608_v40 = vmax.f32 %v1448_v30, %v2502_v8  ;;  %v2633_v30 = vld [vmem:[%s2833_s18 + $0x38] sm:$0xff]  }
  0x3c   : > { %v1799_v39 = vpack.c.bf16 %v1767_v29, %v1767_v29  ;;  %v1289_v41 = vmax.f32 %v1129_v31, %v2375_v16  ;;  %v2187_v43 = vunpack.c.h.bf16 %v2646_v5  ;;  %v2378_v45 = vunpack.c.l.bf16 %v2691_v33  ;;  %v2677_v5 = vld [vmem:[%s2853_s27 + $0x30] sm:$0xff]  }
  0x3d   : > { %v970_v44 = vmax.f32 %v810_v34, %v2250_v28  ;;  %v651_v46 = vmax.f32 %v2059_v37, %v2123_v38  ;;  %v2251_v47 = vunpack.c.h.bf16 %v2661_v15  ;;  %v1768_v51 = vmax.f32 %v1608_v40, %v2566_v25  ;;  %v3030_v15 = vld [vmem:[%s2867_s14 + $0x30] sm:$0xff]   ;;  %v2618_v25 = vld [vmem:[%s2827_s15 + $0x38] sm:$0xff]  }
  0x3e   : > { %1832 = vst.msk [vmem:[%s2927_s28 + $0x1c] sm:$0xf] %vm1824_vm0, %v1799_v39  ;;  %v1449_v50 = vmax.f32 %v1289_v41, %v2439_v26  ;;  %v2567_v52 = vunpack.c.h.bf16 %v2735_v13  ;;  %v2442_v53 = vunpack.c.l.bf16 %v3009_v36  ;;  %v2506_v56 = vunpack.c.l.bf16 %v3012_v42  ;;  %v2663_v41 = vld [vmem:[%s2845_s24 + $0x38] sm:$0xff]  }
  0x3f   : > { %v1130_v55 = vmax.f32 %v970_v44, %v2314_v35  ;;  %v811_v58 = vmax.f32 %v651_v46, %v2187_v43  ;;  %v2315_v59 = vunpack.c.h.bf16 %v2676_v24  ;;  %v1800_v61 = vpack.c.bf16 %v1768_v51, %v1768_v51  ;;  %v3047_v46 = vld [vmem:[%s2853_s27 + $0x38] sm:$0xff]  }
  0x40   : > { %v1609_v62 = vmax.f32 %v1449_v50, %v2503_v32  ;;  %v2062_v63 = vunpack.c.l.bf16 %v2617_v48  ;;  %v2126_v0 = vunpack.c.l.bf16 %v2632_v49  ;;  %v2379_v3 = vunpack.c.h.bf16 %v2691_v33  ;;  %v3041_v33 = vld [vmem:[%s2882_s23 + $0x30] sm:$0xff]  }
  0x41   : > { %v1290_v1 = vmax.f32 %v1130_v55, %v2378_v45  ;;  %v971_v2 = vmax.f32 %v811_v58, %v2251_v47  ;;  %v2190_v4 = vunpack.c.l.bf16 %v2647_v54  ;;  %1833 = vst.msk [vmem:[%s2927_s28 + $0x20] sm:$0xf] %vm1824_vm0, %v1800_v61  ;;  %v2570_v7 = vunpack.c.l.bf16 %v2736_v57 }
  0x42   : > { %v1769_v6 = vmax.f32 %v1609_v62, %v2567_v52  ;;  %v652_v8 = vmax.f32 %v2062_v63, %v2126_v0  ;;  %v2254_v9 = vunpack.c.l.bf16 %v2662_v60  ;;  %v2443_v12 = vunpack.c.h.bf16 %v3009_v36  ;;  %v2648_v36 = vld [vmem:[%s2839_s21 + $0x38] sm:$0xff]  }
  0x43   : > { %v1450_v10 = vmax.f32 %v1290_v1, %v2442_v53  ;;  %v1131_v11 = vmax.f32 %v971_v2, %v2315_v59  ;;  %v2507_v13 = vunpack.c.h.bf16 %v3012_v42  ;;  %v2318_v18 = vunpack.c.l.bf16 %v2677_v5  ;;  %v2693_v59 = vld [vmem:[%s2859_s10 + $0x38] sm:$0xff]  }
  0x44   : > { %v1801_v16 = vpack.c.bf16 %v1769_v6, %v1769_v6  ;;  %v812_v17 = vmax.f32 %v652_v8, %v2190_v4  ;;  %v2063_v19 = vunpack.c.h.bf16 %v2617_v48  ;;  %v2127_v23 = vunpack.c.h.bf16 %v2632_v49  ;;  %v3060_v0 = vld [vmem:[%s2873_s19 + $0x38] sm:$0xff]   ;;  %v2619_v6 = vld [vmem:[%s2827_s15 + $0x40] sm:$0xff]  }
  0x45   : > { %v1610_v20 = vmax.f32 %v1450_v10, %v2506_v56  ;;  %v1291_v21 = vmax.f32 %v1131_v11, %v2379_v3  ;;  %v2191_v24 = vunpack.c.h.bf16 %v2647_v54  ;;  %v2571_v26 = vunpack.c.h.bf16 %v2736_v57  ;;  %v2634_v11 = vld [vmem:[%s2833_s18 + $0x40] sm:$0xff]  }
  0x46   : > { %1834 = vst.msk [vmem:[%s2927_s28 + $0x24] sm:$0xf] %vm1824_vm0, %v1801_v16  ;;  %v972_v27 = vmax.f32 %v812_v17, %v2254_v9  ;;  %v2382_v28 = vunpack.c.l.bf16 %v2692_v14  ;;  %v2446_v29 = vunpack.c.l.bf16 %v3030_v15  ;;  %v653_v34 = vmax.f32 %v2063_v19, %v2127_v23 }
  0x47   : > { %v1770_v31 = vmax.f32 %v1610_v20, %v2570_v7  ;;  %v1451_v32 = vmax.f32 %v1291_v21, %v2443_v12  ;;  %v2255_v35 = vunpack.c.h.bf16 %v2662_v60  ;;  %v2510_v38 = vunpack.c.l.bf16 %v3033_v22  ;;  %v3057_v60 = vld [vmem:[%s2867_s14 + $0x38] sm:$0xff]   ;;  %v2649_v12 = vld [vmem:[%s2839_s21 + $0x40] sm:$0xff]  }
  0x48   : > { %v1132_v37 = vmax.f32 %v972_v27, %v2318_v18  ;;  %v2319_v39 = vunpack.c.h.bf16 %v2677_v5  ;;  %v2066_v40 = vunpack.c.l.bf16 %v2618_v25  ;;  %v813_v44 = vmax.f32 %v653_v34, %v2191_v24  ;;  %v2679_v27 = vld [vmem:[%s2853_s27 + $0x40] sm:$0xff]  }
  0x49   : > { %v1802_v42 = vpack.c.bf16 %v1770_v31, %v1770_v31  ;;  %v1611_v43 = vmax.f32 %v1451_v32, %v2507_v13  ;;  %v2130_v45 = vunpack.c.l.bf16 %v2633_v30  ;;  %v2574_v48 = vunpack.c.l.bf16 %v3041_v33 }
  0x4a   : > { %v1292_v47 = vmax.f32 %v1132_v37, %v2382_v28  ;;  %v2383_v49 = vunpack.c.h.bf16 %v2692_v14  ;;  %v2194_v51 = vunpack.c.l.bf16 %v2648_v36  ;;  %v973_v52 = vmax.f32 %v813_v44, %v2255_v35  ;;  %v3086_v44 = vld [vmem:[%s2873_s19 + $0x40] sm:$0xff]  }
  0x4b   : > { %1835 = vst.msk [vmem:[%s2927_s28 + $0x28] sm:$0xf] %vm1824_vm0, %v1802_v42  ;;  %v1771_v50 = vmax.f32 %v1611_v43, %v2571_v26  ;;  %v654_v53 = vmax.f32 %v2066_v40, %v2130_v45  ;;  %v2258_v54 = vunpack.c.l.bf16 %v2663_v41  ;;  %v2447_v56 = vunpack.c.h.bf16 %v3030_v15  ;;  %v3071_v15 = vld [vmem:[%s2882_s23 + $0x38] sm:$0xff]   ;;  %v3083_v43 = vld [vmem:[%s2867_s14 + $0x40] sm:$0xff]  }
  0x4c   : > { %v1452_v55 = vmax.f32 %v1292_v47, %v2446_v29  ;;  %v2511_v57 = vunpack.c.h.bf16 %v3033_v22  ;;  %v2322_v58 = vunpack.c.l.bf16 %v3047_v46  ;;  %v1133_v62 = vmax.f32 %v973_v52, %v2319_v39  ;;  %v2664_v22 = vld [vmem:[%s2845_s24 + $0x40] sm:$0xff]  }
  0x4d   : > { %v1803_v61 = vpack.c.bf16 %v1771_v50, %v1771_v50  ;;  %v814_v63 = vmax.f32 %v654_v53, %v2194_v51  ;;  %v2067_v1 = vunpack.c.h.bf16 %v2618_v25  ;;  %v2575_v3 = vunpack.c.h.bf16 %v3041_v33 }
  0x4e   : > { %v1612_v2 = vmax.f32 %v1452_v55, %v2510_v38  ;;  %v2131_v4 = vunpack.c.h.bf16 %v2633_v30  ;;  %v2195_v5 = vunpack.c.h.bf16 %v2648_v36  ;;  %v1293_v7 = vmax.f32 %v1133_v62, %v2383_v49  ;;  %v2694_v36 = vld [vmem:[%s2859_s10 + $0x40] sm:$0xff]   ;;  %v2620_v55 = vld [vmem:[%s2827_s15 + $0x48] sm:$0xff]  }
  0x4f   : > { %1836 = vst.msk [vmem:[%s2927_s28 + $0x2c] sm:$0xf] %vm1824_vm0, %v1803_v61  ;;  %v974_v8 = vmax.f32 %v814_v63, %v2258_v54  ;;  %v2386_v9 = vunpack.c.l.bf16 %v2693_v59  ;;  %v2450_v10 = vunpack.c.l.bf16 %v3057_v60  ;;  %v2514_v14 = vunpack.c.l.bf16 %v3060_v0 }
  0x50   : > { %v1772_v13 = vmax.f32 %v1612_v2, %v2574_v48  ;;  %v655_v16 = vmax.f32 %v2067_v1, %v2131_v4  ;;  %v2259_v17 = vunpack.c.h.bf16 %v2663_v41  ;;  %v1453_v18 = vmax.f32 %v1293_v7, %v2447_v56  ;;  %v2635_v56 = vld [vmem:[%s2833_s18 + $0x48] sm:$0xff]  }
  0x51   : > { %v1134_v19 = vmax.f32 %v974_v8, %v2322_v58  ;;  %v2323_v20 = vunpack.c.h.bf16 %v3047_v46  ;;  %v2070_v21 = vunpack.c.l.bf16 %v2619_v6  ;;  %v2134_v25 = vunpack.c.l.bf16 %v2634_v11 }
  0x52   : > { %v1804_v23 = vpack.c.bf16 %v1772_v13, %v1772_v13  ;;  %v815_v24 = vmax.f32 %v655_v16, %v2195_v5  ;;  %v2198_v26 = vunpack.c.l.bf16 %v2649_v12  ;;  %v1613_v28 = vmax.f32 %v1453_v18, %v2511_v57  ;;  %v2650_v57 = vld [vmem:[%s2839_s21 + $0x48] sm:$0xff]  }
  0x53   : > { %v1294_v29 = vmax.f32 %v1134_v19, %v2386_v9  ;;  %v2578_v30 = vunpack.c.l.bf16 %v3071_v15  ;;  %v2387_v31 = vunpack.c.h.bf16 %v2693_v59  ;;  %v2451_v33 = vunpack.c.h.bf16 %v3057_v60 }
  0x54   : > { %1837 = vst.msk [vmem:[%s2927_s28 + $0x30] sm:$0xf] %vm1824_vm0, %v1804_v23  ;;  %v975_v32 = vmax.f32 %v815_v24, %v2259_v17  ;;  %v656_v34 = vmax.f32 %v2070_v21, %v2134_v25  ;;  %v2262_v35 = vunpack.c.l.bf16 %v2664_v22  ;;  %v1773_v37 = vmax.f32 %v1613_v28, %v2575_v3  ;;  %v2665_v3 = vld [vmem:[%s2845_s24 + $0x48] sm:$0xff]  }
  0x55   : > { %v1454_v38 = vmax.f32 %v1294_v29, %v2450_v10  ;;  %v2515_v39 = vunpack.c.h.bf16 %v3060_v0  ;;  %v2326_v40 = vunpack.c.l.bf16 %v2679_v27  ;;  %v2071_v45 = vunpack.c.h.bf16 %v2619_v6  ;;  %v2739_v0 = vld [vmem:[%s2882_s23 + $0x40] sm:$0xff]   ;;  %v2695_v21 = vld [vmem:[%s2859_s10 + $0x48] sm:$0xff]  }
  0x56   : > { %v1135_v41 = vmax.f32 %v975_v32, %v2323_v20  ;;  %v816_v42 = vmax.f32 %v656_v34, %v2198_v26  ;;  %v2135_v46 = vunpack.c.h.bf16 %v2634_v11  ;;  %v1805_v47 = vpack.c.bf16 %v1773_v37, %v1773_v37  ;;  %v3105_v24 = vld [vmem:[%s2867_s14 + $0x48] sm:$0xff]   ;;  %v2636_v37 = vld [vmem:[%s2833_s18 + $0x50] sm:$0xff]  }
  0x57   : > { %v1614_v48 = vmax.f32 %v1454_v38, %v2514_v14  ;;  %v2390_v49 = vunpack.c.l.bf16 %v2694_v36  ;;  %v2199_v51 = vunpack.c.h.bf16 %v2649_v12  ;;  %v2263_v54 = vunpack.c.h.bf16 %v2664_v22  ;;  %v2680_v12 = vld [vmem:[%s2853_s27 + $0x48] sm:$0xff]  }
  0x58   : > { %v1295_v50 = vmax.f32 %v1135_v41, %v2387_v31  ;;  %v976_v52 = vmax.f32 %v816_v42, %v2262_v35  ;;  %v657_v53 = vmax.f32 %v2071_v45, %v2135_v46  ;;  %1838 = vst.msk [vmem:[%s2927_s28 + $0x34] sm:$0xf] %vm1824_vm0, %v1805_v47  ;;  %v2579_v59 = vunpack.c.h.bf16 %v3071_v15  ;;  %v2651_v42 = vld [vmem:[%s2839_s21 + $0x50] sm:$0xff]   ;;  %v2740_v45 = vld [vmem:[%s2882_s23 + $0x48] sm:$0xff]  }
  0x59   : > { %v1774_v58 = vmax.f32 %v1614_v48, %v2578_v30  ;;  %v2454_v60 = vunpack.c.l.bf16 %v3083_v43  ;;  %v2518_v61 = vunpack.c.l.bf16 %v3086_v44  ;;  %v2327_v2 = vunpack.c.h.bf16 %v2679_v27  ;;  %v3108_v30 = vld [vmem:[%s2873_s19 + $0x48] sm:$0xff]   ;;  %v2666_v48 = vld [vmem:[%s2845_s24 + $0x50] sm:$0xff]  }
  0x5a   : > { %v1455_v62 = vmax.f32 %v1295_v50, %v2451_v33  ;;  %v1136_v63 = vmax.f32 %v976_v52, %v2326_v40  ;;  %v817_v1 = vmax.f32 %v657_v53, %v2199_v51  ;;  %v2074_v5 = vunpack.c.l.bf16 %v2620_v55 }
  0x5b   : > { %v1806_v4 = vpack.c.bf16 %v1774_v58, %v1774_v58  ;;  %v2138_v6 = vunpack.c.l.bf16 %v2635_v56  ;;  %v2202_v7 = vunpack.c.l.bf16 %v2650_v57  ;;  %v2391_v11 = vunpack.c.h.bf16 %v2694_v36  ;;  %v2621_v36 = vld [vmem:[%s2827_s15 + $0x50] sm:$0xff]  }
  0x5c   : > { %v1615_v8 = vmax.f32 %v1455_v62, %v2515_v39  ;;  %v1296_v9 = vmax.f32 %v1136_v63, %v2390_v49  ;;  %v977_v10 = vmax.f32 %v817_v1, %v2263_v54  ;;  %v2582_v13 = vunpack.c.l.bf16 %v2739_v0 }
  0x5d   : > { %1839 = vst.msk [vmem:[%s2927_s28 + $0x38] sm:$0xf] %vm1824_vm0, %v1806_v4  ;;  %v2455_v14 = vunpack.c.h.bf16 %v3083_v43  ;;  %v658_v15 = vmax.f32 %v2074_v5, %v2138_v6  ;;  %v2266_v16 = vunpack.c.l.bf16 %v2665_v3  ;;  %v2519_v20 = vunpack.c.h.bf16 %v3086_v44 }
  0x5e   : > { %v1775_v17 = vmax.f32 %v1615_v8, %v2579_v59  ;;  %v1456_v18 = vmax.f32 %v1296_v9, %v2454_v60  ;;  %v1137_v19 = vmax.f32 %v977_v10, %v2327_v2  ;;  %v2330_v23 = vunpack.c.l.bf16 %v2680_v12  ;;  %v2696_v2 = vld [vmem:[%s2859_s10 + $0x50] sm:$0xff]  }
  0x5f   : > { %v818_v22 = vmax.f32 %v658_v15, %v2202_v7  ;;  %v2075_v25 = vunpack.c.h.bf16 %v2620_v55  ;;  %v2139_v26 = vunpack.c.h.bf16 %v2635_v56  ;;  %v2203_v31 = vunpack.c.h.bf16 %v2650_v57  ;;  %v2681_v57 = vld [vmem:[%s2853_s27 + $0x50] sm:$0xff]  }
  0x60   : > { %v1807_v27 = vpack.c.bf16 %v1775_v17, %v1775_v17  ;;  %v1616_v28 = vmax.f32 %v1456_v18, %v2518_v61  ;;  %v1297_v29 = vmax.f32 %v1137_v19, %v2391_v11  ;;  %v2394_v33 = vunpack.c.l.bf16 %v2695_v21  ;;  %v3129_v10 = vld [vmem:[%s2873_s19 + $0x50] sm:$0xff]   ;;  %v2637_v18 = vld [vmem:[%s2833_s18 + $0x58] sm:$0xff]  }
  0x61   : > { %v978_v32 = vmax.f32 %v818_v22, %v2266_v16  ;;  %v659_v34 = vmax.f32 %v2075_v25, %v2139_v26  ;;  %v2267_v35 = vunpack.c.h.bf16 %v2665_v3  ;;  %v2583_v40 = vunpack.c.h.bf16 %v2739_v0  ;;  %v3126_v3 = vld [vmem:[%s2867_s14 + $0x50] sm:$0xff]  }
  0x62   : > { %1840 = vst.msk [vmem:[%s2927_s28 + $0x3c] sm:$0xf] %vm1824_vm0, %v1807_v27  ;;  %v1776_v38 = vmax.f32 %v1616_v28, %v2582_v13  ;;  %v1457_v39 = vmax.f32 %v1297_v29, %v2455_v14  ;;  %v2458_v41 = vunpack.c.l.bf16 %v3105_v24  ;;  %v2522_v44 = vunpack.c.l.bf16 %v3108_v30  ;;  %v2622_v13 = vld [vmem:[%s2827_s15 + $0x58] sm:$0xff]  }
  0x63   : > { %v1138_v43 = vmax.f32 %v978_v32, %v2330_v23  ;;  %v819_v46 = vmax.f32 %v659_v34, %v2203_v31  ;;  %v2331_v47 = vunpack.c.h.bf16 %v2680_v12  ;;  %v2078_v50 = vunpack.c.l.bf16 %v2621_v36  ;;  %v2667_v29 = vld [vmem:[%s2845_s24 + $0x58] sm:$0xff]  }
  0x64   : > { %v1808_v49 = vpack.c.bf16 %v1776_v38, %v1776_v38  ;;  %v1617_v51 = vmax.f32 %v1457_v39, %v2519_v20  ;;  %v2142_v52 = vunpack.c.l.bf16 %v2636_v37  ;;  %v2395_v55 = vunpack.c.h.bf16 %v2695_v21  ;;  %v3137_v21 = vld [vmem:[%s2882_s23 + $0x50] sm:$0xff]   ;;  %v3143_v34 = vld [vmem:[%s2853_s27 + $0x58] sm:$0xff]  }
  0x65   : > { %v1298_v53 = vmax.f32 %v1138_v43, %v2394_v33  ;;  %v979_v54 = vmax.f32 %v819_v46, %v2267_v35  ;;  %v2206_v56 = vunpack.c.l.bf16 %v2651_v42  ;;  %v2586_v59 = vunpack.c.l.bf16 %v2740_v45 }
  0x66   : > { %1841 = vst.msk [vmem:[%s2927_s28 + $0x40] sm:$0xf] %vm1824_vm0, %v1808_v49  ;;  %v1777_v58 = vmax.f32 %v1617_v51, %v2583_v40  ;;  %v660_v60 = vmax.f32 %v2078_v50, %v2142_v52  ;;  %v2270_v61 = vunpack.c.l.bf16 %v2666_v48  ;;  %v2459_v0 = vunpack.c.h.bf16 %v3105_v24  ;;  %v2652_v24 = vld [vmem:[%s2839_s21 + $0x58] sm:$0xff]  }
  0x67   : > { %v1458_v62 = vmax.f32 %v1298_v53, %v2458_v41  ;;  %v1139_v63 = vmax.f32 %v979_v54, %v2331_v47  ;;  %v2523_v1 = vunpack.c.h.bf16 %v3108_v30  ;;  %v2334_v6 = vunpack.c.l.bf16 %v2681_v57  ;;  %v2697_v47 = vld [vmem:[%s2859_s10 + $0x58] sm:$0xff]  }
  0x68   : > { %v1809_v4 = vpack.c.bf16 %v1777_v58, %v1777_v58  ;;  %v820_v5 = vmax.f32 %v660_v60, %v2206_v56  ;;  %v2079_v7 = vunpack.c.h.bf16 %v2621_v36  ;;  %v2143_v11 = vunpack.c.h.bf16 %v2636_v37  ;;  %v3156_v52 = vld [vmem:[%s2873_s19 + $0x58] sm:$0xff]   ;;  %v2623_v58 = vld [vmem:[%s2827_s15 + $0x60] sm:$0xff]  }
  0x69   : > { %v1618_v8 = vmax.f32 %v1458_v62, %v2522_v44  ;;  %v1299_v9 = vmax.f32 %v1139_v63, %v2395_v55  ;;  %v2207_v12 = vunpack.c.h.bf16 %v2651_v42  ;;  %v2587_v14 = vunpack.c.h.bf16 %v2740_v45  ;;  %v2638_v63 = vld [vmem:[%s2833_s18 + $0x60] sm:$0xff]  }
  0x6a   : > { %1842 = vst.msk [vmem:[%s2927_s28 + $0x44] sm:$0xf] %vm1824_vm0, %v1809_v4  ;;  %v980_v15 = vmax.f32 %v820_v5, %v2270_v61  ;;  %v2398_v16 = vunpack.c.l.bf16 %v2696_v2  ;;  %v2462_v17 = vunpack.c.l.bf16 %v3126_v3  ;;  %v661_v22 = vmax.f32 %v2079_v7, %v2143_v11 }
  0x6b   : > { %v1778_v19 = vmax.f32 %v1618_v8, %v2586_v59  ;;  %v1459_v20 = vmax.f32 %v1299_v9, %v2459_v0  ;;  %v2271_v23 = vunpack.c.h.bf16 %v2666_v48  ;;  %v2526_v26 = vunpack.c.l.bf16 %v3129_v10  ;;  %v3153_v48 = vld [vmem:[%s2867_s14 + $0x58] sm:$0xff]   ;;  %v2653_v0 = vld [vmem:[%s2839_s21 + $0x60] sm:$0xff]  }
  0x6c   : > { %v1140_v25 = vmax.f32 %v980_v15, %v2334_v6  ;;  %v2335_v27 = vunpack.c.h.bf16 %v2681_v57  ;;  %v2082_v28 = vunpack.c.l.bf16 %v2622_v13  ;;  %v821_v32 = vmax.f32 %v661_v22, %v2207_v12  ;;  %v2683_v15 = vld [vmem:[%s2853_s27 + $0x60] sm:$0xff]  }
  0x6d   : > { %v1810_v30 = vpack.c.bf16 %v1778_v19, %v1778_v19  ;;  %v1619_v31 = vmax.f32 %v1459_v20, %v2523_v1  ;;  %v2146_v33 = vunpack.c.l.bf16 %v2637_v18  ;;  %v2590_v36 = vunpack.c.l.bf16 %v3137_v21 }
  0x6e   : > { %v1300_v35 = vmax.f32 %v1140_v25, %v2398_v16  ;;  %v2399_v37 = vunpack.c.h.bf16 %v2696_v2  ;;  %v2210_v38 = vunpack.c.l.bf16 %v2652_v24  ;;  %v981_v40 = vmax.f32 %v821_v32, %v2271_v23  ;;  %v3182_v32 = vld [vmem:[%s2873_s19 + $0x60] sm:$0xff]  }
  0x6f   : > { %1843 = vst.msk [vmem:[%s2927_s28 + $0x48] sm:$0xf] %vm1824_vm0, %v1810_v30  ;;  %v1779_v39 = vmax.f32 %v1619_v31, %v2587_v14  ;;  %v662_v41 = vmax.f32 %v2082_v28, %v2146_v33  ;;  %v2274_v42 = vunpack.c.l.bf16 %v2667_v29  ;;  %v2463_v44 = vunpack.c.h.bf16 %v3126_v3  ;;  %v3167_v3 = vld [vmem:[%s2882_s23 + $0x58] sm:$0xff]   ;;  %v3179_v31 = vld [vmem:[%s2867_s14 + $0x60] sm:$0xff]  }
  0x70   : > { %v1460_v43 = vmax.f32 %v1300_v35, %v2462_v17  ;;  %v2527_v45 = vunpack.c.h.bf16 %v3129_v10  ;;  %v2338_v46 = vunpack.c.l.bf16 %v3143_v34  ;;  %v1141_v51 = vmax.f32 %v981_v40, %v2335_v27  ;;  %v2668_v10 = vld [vmem:[%s2845_s24 + $0x60] sm:$0xff]  }
  0x71   : > { %v1811_v49 = vpack.c.bf16 %v1779_v39, %v1779_v39  ;;  %v822_v50 = vmax.f32 %v662_v41, %v2210_v38  ;;  %v2083_v53 = vunpack.c.h.bf16 %v2622_v13  ;;  %v2591_v55 = vunpack.c.h.bf16 %v3137_v21 }
  0x72   : > { %v1620_v54 = vmax.f32 %v1460_v43, %v2526_v26  ;;  %v2147_v56 = vunpack.c.h.bf16 %v2637_v18  ;;  %v2211_v57 = vunpack.c.h.bf16 %v2652_v24  ;;  %v1301_v59 = vmax.f32 %v1141_v51, %v2399_v37  ;;  %v2698_v24 = vld [vmem:[%s2859_s10 + $0x60] sm:$0xff]   ;;  %v2624_v43 = vld [vmem:[%s2827_s15 + $0x68] sm:$0xff]  }
  0x73   : > { %1844 = vst.msk [vmem:[%s2927_s28 + $0x4c] sm:$0xf] %vm1824_vm0, %v1811_v49  ;;  %v982_v60 = vmax.f32 %v822_v50, %v2274_v42  ;;  %v2402_v61 = vunpack.c.l.bf16 %v2697_v47  ;;  %v2466_v62 = vunpack.c.l.bf16 %v3153_v48  ;;  %v2530_v2 = vunpack.c.l.bf16 %v3156_v52 }
  0x74   : > { %v1780_v1 = vmax.f32 %v1620_v54, %v2590_v36  ;;  %v663_v4 = vmax.f32 %v2083_v53, %v2147_v56  ;;  %v2275_v5 = vunpack.c.h.bf16 %v2667_v29  ;;  %v1461_v6 = vmax.f32 %v1301_v59, %v2463_v44  ;;  %v2639_v44 = vld [vmem:[%s2833_s18 + $0x68] sm:$0xff]  }
  0x75   : > { %v1142_v7 = vmax.f32 %v982_v60, %v2338_v46  ;;  %v2339_v8 = vunpack.c.h.bf16 %v3143_v34  ;;  %v2086_v9 = vunpack.c.l.bf16 %v2623_v58  ;;  %v2150_v13 = vunpack.c.l.bf16 %v2638_v63 }
  0x76   : > { %v1812_v11 = vpack.c.bf16 %v1780_v1, %v1780_v1  ;;  %v823_v12 = vmax.f32 %v663_v4, %v2211_v57  ;;  %v2214_v14 = vunpack.c.l.bf16 %v2653_v0  ;;  %v1621_v16 = vmax.f32 %v1461_v6, %v2527_v45  ;;  %v2654_v45 = vld [vmem:[%s2839_s21 + $0x68] sm:$0xff]  }
  0x77   : > { %v1302_v17 = vmax.f32 %v1142_v7, %v2402_v61  ;;  %v2594_v18 = vunpack.c.l.bf16 %v3167_v3  ;;  %v2403_v19 = vunpack.c.h.bf16 %v2697_v47  ;;  %v2467_v21 = vunpack.c.h.bf16 %v3153_v48 }
  0x78   : > { %1845 = vst.msk [vmem:[%s2927_s28 + $0x50] sm:$0xf] %vm1824_vm0, %v1812_v11  ;;  %v983_v20 = vmax.f32 %v823_v12, %v2275_v5  ;;  %v664_v22 = vmax.f32 %v2086_v9, %v2150_v13  ;;  %v2278_v23 = vunpack.c.l.bf16 %v2668_v10  ;;  %v1781_v25 = vmax.f32 %v1621_v16, %v2591_v55  ;;  %v2669_v55 = vld [vmem:[%s2845_s24 + $0x68] sm:$0xff]  }
  0x79   : > { %v1462_v26 = vmax.f32 %v1302_v17, %v2466_v62  ;;  %v2531_v27 = vunpack.c.h.bf16 %v3156_v52  ;;  %v2342_v28 = vunpack.c.l.bf16 %v2683_v15  ;;  %v2087_v33 = vunpack.c.h.bf16 %v2623_v58  ;;  %v2743_v52 = vld [vmem:[%s2882_s23 + $0x60] sm:$0xff]   ;;  %v2699_v9 = vld [vmem:[%s2859_s10 + $0x68] sm:$0xff]  }
  0x7a   : > { %v1143_v29 = vmax.f32 %v983_v20, %v2339_v8  ;;  %v824_v30 = vmax.f32 %v664_v22, %v2214_v14  ;;  %v2151_v34 = vunpack.c.h.bf16 %v2638_v63  ;;  %v1813_v35 = vpack.c.bf16 %v1781_v25, %v1781_v25  ;;  %v2714_v12 = vld [vmem:[%s2867_s14 + $0x68] sm:$0xff]   ;;  %v2640_v25 = vld [vmem:[%s2833_s18 + $0x70] sm:$0xff]  }
  0x7b   : > { %v1622_v36 = vmax.f32 %v1462_v26, %v2530_v2  ;;  %v2406_v37 = vunpack.c.l.bf16 %v2698_v24  ;;  %v2215_v38 = vunpack.c.h.bf16 %v2653_v0  ;;  %v2279_v42 = vunpack.c.h.bf16 %v2668_v10  ;;  %v2684_v0 = vld [vmem:[%s2853_s27 + $0x68] sm:$0xff]  }
  0x7c   : > { %v1303_v39 = vmax.f32 %v1143_v29, %v2403_v19  ;;  %v984_v40 = vmax.f32 %v824_v30, %v2278_v23  ;;  %v665_v41 = vmax.f32 %v2087_v33, %v2151_v34  ;;  %1846 = vst.msk [vmem:[%s2927_s28 + $0x54] sm:$0xf] %vm1824_vm0, %v1813_v35  ;;  %v2595_v47 = vunpack.c.h.bf16 %v3167_v3  ;;  %v2655_v30 = vld [vmem:[%s2839_s21 + $0x70] sm:$0xff]   ;;  %v2744_v33 = vld [vmem:[%s2882_s23 + $0x68] sm:$0xff]  }
  0x7d   : > { %v1782_v46 = vmax.f32 %v1622_v36, %v2594_v18  ;;  %v2470_v48 = vunpack.c.l.bf16 %v3179_v31  ;;  %v2534_v49 = vunpack.c.l.bf16 %v3182_v32  ;;  %v2343_v54 = vunpack.c.h.bf16 %v2683_v15  ;;  %v3202_v18 = vld [vmem:[%s2873_s19 + $0x68] sm:$0xff]   ;;  %v2670_v36 = vld [vmem:[%s2845_s24 + $0x70] sm:$0xff]  }
  0x7e   : > { %v1463_v51 = vmax.f32 %v1303_v39, %v2467_v21  ;;  %v1144_v50 = vmax.f32 %v984_v40, %v2342_v28  ;;  %v825_v53 = vmax.f32 %v665_v41, %v2215_v38  ;;  %v2090_v57 = vunpack.c.l.bf16 %v2624_v43 }
  0x7f   : > { %v1814_v56 = vpack.c.bf16 %v1782_v46, %v1782_v46  ;;  %v2154_v58 = vunpack.c.l.bf16 %v2639_v44  ;;  %v2218_v59 = vunpack.c.l.bf16 %v2654_v45  ;;  %v2407_v63 = vunpack.c.h.bf16 %v2698_v24  ;;  %v2625_v24 = vld [vmem:[%s2827_s15 + $0x70] sm:$0xff]  }
  0x80   : > { %v1623_v60 = vmax.f32 %v1463_v51, %v2531_v27  ;;  %v1304_v61 = vmax.f32 %v1144_v50, %v2406_v37  ;;  %v985_v62 = vmax.f32 %v825_v53, %v2279_v42  ;;  %v2598_v1 = vunpack.c.l.bf16 %v2743_v52 }
  0x81   : > { %1847 = vst.msk [vmem:[%s2927_s28 + $0x58] sm:$0xf] %vm1824_vm0, %v1814_v56  ;;  %v2471_v2 = vunpack.c.h.bf16 %v3179_v31  ;;  %v666_v3 = vmax.f32 %v2090_v57, %v2154_v58  ;;  %v2282_v4 = vunpack.c.l.bf16 %v2669_v55  ;;  %v2535_v8 = vunpack.c.h.bf16 %v3182_v32 }
  0x82   : > { %v1783_v5 = vmax.f32 %v1623_v60, %v2595_v47  ;;  %v1464_v6 = vmax.f32 %v1304_v61, %v2470_v48  ;;  %v1145_v7 = vmax.f32 %v985_v62, %v2343_v54  ;;  %v2346_v11 = vunpack.c.l.bf16 %v2684_v0  ;;  %v2700_v54 = vld [vmem:[%s2859_s10 + $0x70] sm:$0xff]  }
  0x83   : > { %v826_v10 = vmax.f32 %v666_v3, %v2218_v59  ;;  %v2091_v13 = vunpack.c.h.bf16 %v2624_v43  ;;  %v2155_v14 = vunpack.c.h.bf16 %v2639_v44  ;;  %v2219_v19 = vunpack.c.h.bf16 %v2654_v45  ;;  %v2685_v45 = vld [vmem:[%s2853_s27 + $0x70] sm:$0xff]  }
  0x84   : > { %v1815_v15 = vpack.c.bf16 %v1783_v5, %v1783_v5  ;;  %v1624_v16 = vmax.f32 %v1464_v6, %v2534_v49  ;;  %v1305_v17 = vmax.f32 %v1145_v7, %v2407_v63  ;;  %v2410_v21 = vunpack.c.l.bf16 %v2699_v9  ;;  %v2715_v61 = vld [vmem:[%s2867_s14 + $0x70] sm:$0xff]  }
  0x85   : > { %v986_v20 = vmax.f32 %v826_v10, %v2282_v4  ;;  %v667_v22 = vmax.f32 %v2091_v13, %v2155_v14  ;;  %v2283_v23 = vunpack.c.h.bf16 %v2669_v55  ;;  %v2599_v28 = vunpack.c.h.bf16 %v2743_v52  ;;  %v2641_v4 = vld [vmem:[%s2833_s18 + $0x78] sm:$0xff]   ;;  %v2730_v7 = vld [vmem:[%s2873_s19 + $0x70] sm:$0xff]  }
  0x86   : > { %1848 = vst.msk [vmem:[%s2927_s28 + $0x5c] sm:$0xf] %vm1824_vm0, %v1815_v15  ;;  %v1784_v26 = vmax.f32 %v1624_v16, %v2598_v1  ;;  %v1465_v27 = vmax.f32 %v1305_v17, %v2471_v2  ;;  %v2474_v29 = vunpack.c.l.bf16 %v2714_v12  ;;  %v2538_v32 = vunpack.c.l.bf16 %v3202_v18  ;;  %v2656_v10 = vld [vmem:[%s2839_s21 + $0x78] sm:$0xff]  }
  0x87   : > { %v1146_v31 = vmax.f32 %v986_v20, %v2346_v11  ;;  %v827_v34 = vmax.f32 %v667_v22, %v2219_v19  ;;  %v2347_v35 = vunpack.c.h.bf16 %v2684_v0  ;;  %v2094_v39 = vunpack.c.l.bf16 %v2625_v24  ;;  %v2626_v0 = vld [vmem:[%s2827_s15 + $0x78] sm:$0xff]  }
  0x88   : > { %v1816_v37 = vpack.c.bf16 %v1784_v26, %v1784_v26  ;;  %v1625_v38 = vmax.f32 %v1465_v27, %v2535_v8  ;;  %v2158_v40 = vunpack.c.l.bf16 %v2640_v25  ;;  %v2411_v43 = vunpack.c.h.bf16 %v2699_v9  ;;  %v2671_v15 = vld [vmem:[%s2845_s24 + $0x78] sm:$0xff]  }
  0x89   : > { %v1306_v41 = vmax.f32 %v1146_v31, %v2410_v21  ;;  %v987_v42 = vmax.f32 %v827_v34, %v2283_v23  ;;  %v2222_v44 = vunpack.c.l.bf16 %v2655_v30  ;;  %v2602_v47 = vunpack.c.l.bf16 %v2744_v33  ;;  %v2686_v21 = vld [vmem:[%s2853_s27 + $0x78] sm:$0xff]  }
  0x8a   : > { %1849 = vst.msk [vmem:[%s2927_s28 + $0x60] sm:$0xf] %vm1824_vm0, %v1816_v37  ;;  %v1785_v46 = vmax.f32 %v1625_v38, %v2599_v28  ;;  %v668_v48 = vmax.f32 %v2094_v39, %v2158_v40  ;;  %v2286_v49 = vunpack.c.l.bf16 %v2670_v36  ;;  %v2475_v52 = vunpack.c.h.bf16 %v2714_v12  ;;  %v2701_v34 = vld [vmem:[%s2859_s10 + $0x78] sm:$0xff]  }
  0x8b   : > { %v1466_v51 = vmax.f32 %v1306_v41, %v2474_v29  ;;  %v1147_v50 = vmax.f32 %v987_v42, %v2347_v35  ;;  %v2539_v53 = vunpack.c.h.bf16 %v3202_v18  ;;  %v2350_v57 = vunpack.c.l.bf16 %v2685_v45  ;;  %v2745_v18 = vld [vmem:[%s2882_s23 + $0x70] sm:$0xff]   ;;  %v2716_v40 = vld [vmem:[%s2867_s14 + $0x78] sm:$0xff]  }
  0x8c   : > { %v1817_v55 = vpack.c.bf16 %v1785_v46, %v1785_v46  ;;  %v828_v56 = vmax.f32 %v668_v48, %v2222_v44  ;;  %v2095_v58 = vunpack.c.h.bf16 %v2625_v24  ;;  %v2159_v62 = vunpack.c.h.bf16 %v2640_v25  ;;  %v2731_v48 = vld [vmem:[%s2873_s19 + $0x78] sm:$0xff]  }
  0x8d   : > { %v1626_v59 = vmax.f32 %v1466_v51, %v2538_v32  ;;  %v1307_v60 = vmax.f32 %v1147_v50, %v2411_v43  ;;  %v2223_v63 = vunpack.c.h.bf16 %v2655_v30  ;;  %v2603_v1 = vunpack.c.h.bf16 %v2744_v33 }
  0x8e   : > { %1850 = vst.msk [vmem:[%s2927_s28 + $0x64] sm:$0xf] %vm1824_vm0, %v1817_v55  ;;  %v988_v2 = vmax.f32 %v828_v56, %v2286_v49  ;;  %v2414_v3 = vunpack.c.l.bf16 %v2700_v54  ;;  %v669_v8 = vmax.f32 %v2095_v58, %v2159_v62  ;;  %v2287_v9 = vunpack.c.h.bf16 %v2670_v36  ;;  %v2746_v56 = vld [vmem:[%s2882_s23 + $0x78] sm:$0xff]  }
  0x8f   : > { %v1786_v5 = vmax.f32 %v1626_v59, %v2602_v47  ;;  %v1467_v6 = vmax.f32 %v1307_v60, %v2475_v52  ;;  %v2478_v12 = vunpack.c.l.bf16 %v2715_v61  ;;  %v2351_v13 = vunpack.c.h.bf16 %v2685_v45 }
  0x90   : > { %v1148_v11 = vmax.f32 %v988_v2, %v2350_v57  ;;  %v2098_v14 = vunpack.c.l.bf16 %v2626_v0  ;;  %v829_v19 = vmax.f32 %v669_v8, %v2223_v63  ;;  %v2162_v20 = vunpack.c.l.bf16 %v2641_v4 }
  0x91   : > { %v1818_v16 = vpack.c.bf16 %v1786_v5, %v1786_v5  ;;  %v1627_v17 = vmax.f32 %v1467_v6, %v2539_v53  ;;  %v2542_v23 = vunpack.c.l.bf16 %v2730_v7  ;;  %v2415_v24 = vunpack.c.h.bf16 %v2700_v54 }
  0x92   : > { %v1308_v22 = vmax.f32 %v1148_v11, %v2414_v3  ;;  %v2226_v25 = vunpack.c.l.bf16 %v2656_v10  ;;  %v989_v27 = vmax.f32 %v829_v19, %v2287_v9  ;;  %v670_v28 = vmax.f32 %v2098_v14, %v2162_v20 }
  0x93   : > { %1851 = vst.msk [vmem:[%s2927_s28 + $0x68] sm:$0xf] %vm1824_vm0, %v1818_v16  ;;  %v1787_v26 = vmax.f32 %v1627_v17, %v2603_v1  ;;  %v2290_v29 = vunpack.c.l.bf16 %v2671_v15  ;;  %v2606_v31 = vunpack.c.l.bf16 %v2745_v18  ;;  %v2479_v32 = vunpack.c.h.bf16 %v2715_v61 }
  0x94   : > { %v1468_v30 = vmax.f32 %v1308_v22, %v2478_v12  ;;  %v2354_v33 = vunpack.c.l.bf16 %v2686_v21  ;;  %v1149_v36 = vmax.f32 %v989_v27, %v2351_v13  ;;  %v830_v37 = vmax.f32 %v670_v28, %v2226_v25 }
  0x95   : > { %v1819_v35 = vpack.c.bf16 %v1787_v26, %v1787_v26  ;;  %v2099_v38 = vunpack.c.h.bf16 %v2626_v0  ;;  %v2163_v41 = vunpack.c.h.bf16 %v2641_v4  ;;  %v2227_v42 = vunpack.c.h.bf16 %v2656_v10 }
  0x96   : > { %v1628_v39 = vmax.f32 %v1468_v30, %v2542_v23  ;;  %v1309_v43 = vmax.f32 %v1149_v36, %v2415_v24  ;;  %v2543_v44 = vunpack.c.h.bf16 %v2730_v7  ;;  %v990_v45 = vmax.f32 %v830_v37, %v2290_v29 }
  0x97   : > { %1852 = vst.msk [vmem:[%s2927_s28 + $0x6c] sm:$0xf] %vm1824_vm0, %v1819_v35  ;;  %v2418_v46 = vunpack.c.l.bf16 %v2701_v34  ;;  %v671_v49 = vmax.f32 %v2099_v38, %v2163_v41  ;;  %v2291_v51 = vunpack.c.h.bf16 %v2671_v15  ;;  %v2607_v52 = vunpack.c.h.bf16 %v2745_v18 }
  0x98   : > { %v1788_v47 = vmax.f32 %v1628_v39, %v2606_v31  ;;  %v1469_v50 = vmax.f32 %v1309_v43, %v2479_v32  ;;  %v1150_v53 = vmax.f32 %v990_v45, %v2354_v33  ;;  %v2482_v54 = vunpack.c.l.bf16 %v2716_v40 }
  0x99   : > { %v831_v57 = vmax.f32 %v671_v49, %v2227_v42  ;;  %v2355_v58 = vunpack.c.h.bf16 %v2686_v21  ;;  %v2546_v61 = vunpack.c.l.bf16 %v2731_v48  ;;  %v2419_v63 = vunpack.c.h.bf16 %v2701_v34 }
  0x9a   : > { %v1820_v55 = vpack.c.bf16 %v1788_v47, %v1788_v47  ;;  %v1629_v59 = vmax.f32 %v1469_v50, %v2543_v44  ;;  %v1310_v60 = vmax.f32 %v1150_v53, %v2418_v46  ;;  %v2610_v2 = vunpack.c.l.bf16 %v2746_v56 }
  0x9b   : > { %v991_v62 = vmax.f32 %v831_v57, %v2291_v51  ;;  %v2483_v4 = vunpack.c.h.bf16 %v2716_v40  ;;  %v2547_v8 = vunpack.c.h.bf16 %v2731_v48  ;;  %v2611_v11 = vunpack.c.h.bf16 %v2746_v56 }
  0x9c   : > { %1853 = vst.msk [vmem:[%s2927_s28 + $0x70] sm:$0xf] %vm1824_vm0, %v1820_v55  ;;  %v1789_v0 = vmax.f32 %v1629_v59, %v2607_v52  ;;  %v1470_v1 = vmax.f32 %v1310_v60, %v2482_v54 }
  0x9d   : > { %v1151_v3 = vmax.f32 %v991_v62, %v2355_v58 }
  0x9e   : > { %v1821_v5 = vpack.c.bf16 %v1789_v0, %v1789_v0  ;;  %v1630_v6 = vmax.f32 %v1470_v1, %v2546_v61 }
  0x9f   : > { %v1311_v7 = vmax.f32 %v1151_v3, %v2419_v63 }
  0xa0   : > { %1854 = vst.msk [vmem:[%s2927_s28 + $0x74] sm:$0xf] %vm1824_vm0, %v1821_v5  ;;  %v1790_v9 = vmax.f32 %v1630_v6, %v2610_v2 }
  0xa1   : > { %v1471_v10 = vmax.f32 %v1311_v7, %v2483_v4 }
  0xa2   : > { %v1822_v12 = vpack.c.bf16 %v1790_v9, %v1790_v9 }
  0xa3   : > { %v1631_v13 = vmax.f32 %v1471_v10, %v2547_v8 }
  0xa4   : > { %1855 = vst.msk [vmem:[%s2927_s28 + $0x78] sm:$0xf] %vm1824_vm0, %v1822_v12 }
  0xa5   : > { %v1791_v14 = vmax.f32 %v1631_v13, %v2611_v11 }
  0xa7   : > { %v1823_v15 = vpack.c.bf16 %v1791_v14, %v1791_v14 }
  0xa9   : > { %1856 = vst.msk [vmem:[%s2927_s28 + $0x7c] sm:$0xf] %vm1824_vm0, %v1823_v15 }
  0xaa PF: > { %s19_s30 = sadd.s32 1, %s2761_s30  }
  0xab   : > { %p16_p4 = scmp.ge.s32.totalorder %s19_s30, 4  }
  0xad   :  { %18 = sbr.rel (!%p16_p4) target bundleno = 1 (0x1), region = 110 }

// kernel: _lambda_.21
= control target key start
LH: loop header
LB: loop body
LE: loop exit
PB: predicated region body
PF: predicated region fallthrough
CT: control target
= control target key end

     0   :  { %s1090_s12 = smov 0   ;;  %s1329_s0 = inlined_call_operand.vmem [shape: bf16[512,144], index: 0, kind: input, shape index: {}]   ;;  %s1330_s1 = inlined_call_operand.vmem [shape: bf16[144,16], index: 1, kind: input, shape index: {}]   ;;  %s1331_s2 = inlined_call_operand.vmem [shape: f32[1,16], index: 2, kind: input, shape index: {}]   ;;  %s1332_s3 = inlined_call_operand.vmem [shape: bf16[512,16], index: 3, kind: output, shape index: {}]  }
   0x1 LB: > { %s810_s13 = sadd.s32 4294967295, %s1068_s12   ;;  %p814_p0 = scmp.ge.s32.totalorder %s1068_s12, 1  ;;  %s1068_s12 = sphi %s1090_s12, %s13_s12  }
   0x2   : > { %p139_p1 = scmp.lt.s32.totalorder %s1068_s12, 3 }
   0x4   : > { %p140_p2 = pnand %p814_p0, %p139_p1 }
   0x5   : > { %s815_s18 = sshll.u32 (!%p140_p2), %s810_s13, 5 }
   0x6   : > { %143 = sbr.rel (%p140_p2) target bundleno = 304 (0x130), region = 32  ;;  %p165_p3 = scmp.lt.s32.totalorder (!%p140_p2), %s815_s18, 63 }
   0xb   : > { %v1042_v0 = vld [vmem:[%s1330_s1 + $0x38] sm:$0xff]  ;;  %v1043_v1 = vld [vmem:[%s1330_s1 + $0x40] sm:$0xff]  ;;  %v1041_v2 = vld [vmem:[%s1330_s1 + $0x30] sm:$0xff]  ;;  %s1334_s18 = smov (!%p165_p3, %s815_s18), 63  ;;  %vm430_vm0 = vcmask 130048   ;;  %vm721_vm1 = vcmask 125952  }
   0xc   : > { %479 = vmatpush.bf16.msra.mxu0 %v1042_v0  ;;  %1044 = vmatpush.bf16.msra.mxu2 %v1042_v0  ;;  %s1002_s21 = sshll.u32 %s1334_s18, 3  ;;  %v1040_v3 = vld [vmem:[%s1330_s1 + $0x28] sm:$0xff]  ;;  %v1039_v7 = vld [vmem:[%s1330_s1 + $0x20] sm:$0xff]  ;;  %v1038_v11 = vld [vmem:[%s1330_s1 + $0x18] sm:$0xff]  ;;  %s819_s13 = sshll.u32 %s1334_s18, 2 }
   0xd   : > { %575 = vmatpush.bf16.msra.mxu1 %v1043_v1  ;;  %1052 = vmatpush.bf16.msra.mxu3 %v1043_v1  ;;  %s1113_s24 = scalar_lea.vmem %s1329_s0, %s1002_s21  ;;  %v1037_v12 = vld [vmem:[%s1330_s1 + $0x10] sm:$0xff]  ;;  %v1036_v16 = vld [vmem:[%s1330_s1 + $0x8] sm:$0xff]  ;;  %v1035_v19 = vld [vmem:[%s1330_s1] sm:$0xff]  ;;  %s1223_s16 = scalar_lea.vmem %s1332_s3, %s819_s13 }
   0xe   : > { %v1003_v4 = vld [vmem:[%s1113_s24 + $0x4] sm:$0xf]  ;;  %v824_v5 = vld [vmem:[%s1113_s24 + $0x8] sm:$0xf0]  ;;  %v1021_v8 = vld [vmem:[%s1113_s24 + $0x94] sm:$0xf] }
   0xf   : > { %v827_v6 = vor.u32 %v1003_v4, %v824_v5  ;;  %v896_v9 = vld [vmem:[%s1113_s24 + $0x98] sm:$0xf0]  ;;  %v1005_v13 = vld [vmem:[%s1113_s24 + $0x14] sm:$0xf]  ;;  %v1023_v17 = vld [vmem:[%s1113_s24 + $0xa4] sm:$0xf] }
  0x10   : > { %480 = vmatpush.bf16.msra.mxu0 %v1041_v2  ;;  %1045 = vmatpush.bf16.msra.mxu2 %v1041_v2  ;;  %v899_v10 = vor.u32 %v1021_v8, %v896_v9  ;;  %v832_v14 = vld [vmem:[%s1113_s24 + $0x18] sm:$0xf0]  ;;  %v904_v18 = vld [vmem:[%s1113_s24 + $0xa8] sm:$0xf0]  ;;  %v822_v20 = vld [vmem:[%s1113_s24] sm:$0xf] }
  0x11   : > { %984 = vmatmul.msk.bf16.vlgmr.msra.gmra.mxu1 %vm430_vm0, %v827_v6  ;;  %v835_v15 = vor.u32 %v1005_v13, %v832_v14  ;;  %v1004_v21 = vld [vmem:[%s1113_s24 + $0x4] sm:$0xf0]  ;;  %v907_v22 = vor.u32 %v1023_v17, %v904_v18  ;;  %v886_v23 = vld [vmem:[%s1113_s24 + $0x80] sm:$0xf]  ;;  %v1007_v27 = vld [vmem:[%s1113_s24 + $0x24] sm:$0xf] }
  0x12   : > { %993 = vmatmul.msk.bf16.vlgmr.msra.gmra.mxu3 %vm430_vm0, %v899_v10  ;;  %v1020_v24 = vld [vmem:[%s1113_s24 + $0x84] sm:$0xf0]  ;;  %v823_v25 = vor.u32 %v1004_v21, %v822_v20  ;;  %v840_v28 = vld [vmem:[%s1113_s24 + $0x28] sm:$0xf0]  ;;  %v1025_v30 = vld [vmem:[%s1113_s24 + $0xb4] sm:$0xf] }
  0x13   : > { %v887_v26 = vor.u32 %v1020_v24, %v886_v23  ;;  %v843_v29 = vor.u32 %v1007_v27, %v840_v28  ;;  %v912_v31 = vld [vmem:[%s1113_s24 + $0xb8] sm:$0xf0]  ;;  %v830_v32 = vld [vmem:[%s1113_s24 + $0x10] sm:$0xf]  ;;  %v1006_v33 = vld [vmem:[%s1113_s24 + $0x14] sm:$0xf0] }
  0x14   : > { %481 = vmatpush.bf16.msra.mxu0 %v1040_v3  ;;  %1046 = vmatpush.bf16.msra.mxu2 %v1040_v3  ;;  %v915_v34 = vor.u32 %v1025_v30, %v912_v31  ;;  %v894_v35 = vld [vmem:[%s1113_s24 + $0x90] sm:$0xf]  ;;  %v1022_v36 = vld [vmem:[%s1113_s24 + $0x94] sm:$0xf0]  ;;  %v831_v37 = vor.u32 %v1006_v33, %v830_v32  ;;  %v1009_v39 = vld [vmem:[%s1113_s24 + $0x34] sm:$0xf] }
  0x15   : > { %v895_v38 = vor.u32 %v1022_v36, %v894_v35  ;;  %v848_v40 = vld [vmem:[%s1113_s24 + $0x38] sm:$0xf0]  ;;  %v1027_v42 = vld [vmem:[%s1113_s24 + $0xc4] sm:$0xf]  ;;  %v920_v43 = vld [vmem:[%s1113_s24 + $0xc8] sm:$0xf0] }
  0x16   : > { %v851_v41 = vor.u32 %v1009_v39, %v848_v40  ;;  %v838_v44 = vld [vmem:[%s1113_s24 + $0x20] sm:$0xf]  ;;  %v1008_v45 = vld [vmem:[%s1113_s24 + $0x24] sm:$0xf0]  ;;  %v923_v46 = vor.u32 %v1027_v42, %v920_v43  ;;  %v1011_v51 = vld [vmem:[%s1113_s24 + $0x44] sm:$0xf] }
  0x17   : > { %v902_v47 = vld [vmem:[%s1113_s24 + $0xa0] sm:$0xf]  ;;  %v1024_v48 = vld [vmem:[%s1113_s24 + $0xa4] sm:$0xf0]  ;;  %v839_v49 = vor.u32 %v1008_v45, %v838_v44  ;;  %v856_v52 = vld [vmem:[%s1113_s24 + $0x48] sm:$0xf0] }
  0x18   : > { %482 = vmatpush.bf16.msra.mxu0 %v1039_v7  ;;  %1047 = vmatpush.bf16.msra.mxu2 %v1039_v7  ;;  %v903_v50 = vor.u32 %v1024_v48, %v902_v47  ;;  %v859_v53 = vor.u32 %v1011_v51, %v856_v52  ;;  %v1029_v54 = vld [vmem:[%s1113_s24 + $0xd4] sm:$0xf]  ;;  %v928_v55 = vld [vmem:[%s1113_s24 + $0xd8] sm:$0xf0]  ;;  %v846_v56 = vld [vmem:[%s1113_s24 + $0x30] sm:$0xf] }
  0x19   : > { %v1010_v57 = vld [vmem:[%s1113_s24 + $0x34] sm:$0xf0]  ;;  %v931_v58 = vor.u32 %v1029_v54, %v928_v55  ;;  %v910_v59 = vld [vmem:[%s1113_s24 + $0xb0] sm:$0xf]  ;;  %v1013_v63 = vld [vmem:[%s1113_s24 + $0x54] sm:$0xf] }
  0x1a   : > { %v1026_v60 = vld [vmem:[%s1113_s24 + $0xb4] sm:$0xf0]  ;;  %v847_v61 = vor.u32 %v1010_v57, %v846_v56  ;;  %v864_v0 = vld [vmem:[%s1113_s24 + $0x58] sm:$0xf0]  ;;  %v1031_v2 = vld [vmem:[%s1113_s24 + $0xe4] sm:$0xf] }
  0x1b   : > { %v911_v62 = vor.u32 %v1026_v60, %v910_v59  ;;  %v867_v1 = vor.u32 %v1013_v63, %v864_v0  ;;  %v936_v3 = vld [vmem:[%s1113_s24 + $0xe8] sm:$0xf0]  ;;  %v854_v4 = vld [vmem:[%s1113_s24 + $0x40] sm:$0xf]  ;;  %v1012_v5 = vld [vmem:[%s1113_s24 + $0x44] sm:$0xf0] }
  0x1c   : > { %483 = vmatpush.bf16.msra.mxu0 %v1038_v11  ;;  %1048 = vmatpush.bf16.msra.mxu2 %v1038_v11  ;;  %v939_v6 = vor.u32 %v1031_v2, %v936_v3  ;;  %v918_v7 = vld [vmem:[%s1113_s24 + $0xc0] sm:$0xf]  ;;  %v1028_v8 = vld [vmem:[%s1113_s24 + $0xc4] sm:$0xf0]  ;;  %v855_v9 = vor.u32 %v1012_v5, %v854_v4  ;;  %v1015_v11 = vld [vmem:[%s1113_s24 + $0x64] sm:$0xf] }
  0x1d   : > { %v919_v10 = vor.u32 %v1028_v8, %v918_v7  ;;  %v1033_v14 = vld [vmem:[%s1113_s24 + $0xf4] sm:$0xf]  ;;  %v1014_v17 = vld [vmem:[%s1113_s24 + $0x54] sm:$0xf0]  ;;  %v880_v24 = vld [vmem:[%s1113_s24 + $0x78] sm:$0xf0] }
  0x1e   : > { %v1030_v20 = vld [vmem:[%s1113_s24 + $0xd4] sm:$0xf0]  ;;  %v1017_v23 = vld [vmem:[%s1113_s24 + $0x74] sm:$0xf]  ;;  %v1016_v27 = vld [vmem:[%s1113_s24 + $0x64] sm:$0xf0] }
  0x1f   : > { %v934_v28 = vld [vmem:[%s1113_s24 + $0xe0] sm:$0xf]  ;;  %v1019_v32 = vld [vmem:[%s1113_s24 + $0x84] sm:$0xf]  ;;  %v888_v33 = vld [vmem:[%s1113_s24 + $0x88] sm:$0xf0] }
  0x20   : > { %484 = vmatpush.bf16.msra.mxu0 %v1037_v12  ;;  %1049 = vmatpush.bf16.msra.mxu2 %v1037_v12  ;;  %v872_v12 = vld [vmem:[%s1113_s24 + $0x68] sm:$0xf0]  ;;  %v878_v36 = vld [vmem:[%s1113_s24 + $0x70] sm:$0xf]  ;;  %v1034_v39 = vld [vmem:[%s1113_s24 + $0xf4] sm:$0xf0] }
  0x21   : > { %985 = vmatmul.msk.bf16.gmra.mxu1 %vm430_vm0, %v835_v15  ;;  %v875_v13 = vor.u32 %v1015_v11, %v872_v12  ;;  %v944_v15 = vld [vmem:[%s1113_s24 + $0xf8] sm:$0xf0]  ;;  %v1216_v44 = vld [vmem:[%s1331_s2] ss:$0 sm:$0xff] }
  0x22   : > { %994 = vmatmul.msk.bf16.gmra.mxu3 %vm430_vm0, %v907_v22  ;;  %v947_v18 = vor.u32 %v1033_v14, %v944_v15 }
  0x24   : > { %485 = vmatpush.bf16.msra.mxu0 %v1036_v16  ;;  %1050 = vmatpush.bf16.msra.mxu2 %v1036_v16  ;;  %v862_v16 = vld [vmem:[%s1113_s24 + $0x50] sm:$0xf] }
  0x25   : > { %v863_v21 = vor.u32 %v1014_v17, %v862_v16 }
  0x28   : > { %486 = vmatpush.bf16.msra.mxu0 %v1035_v19  ;;  %1051 = vmatpush.bf16.msra.mxu2 %v1035_v19  ;;  %v926_v19 = vld [vmem:[%s1113_s24 + $0xd0] sm:$0xf] }
  0x29   : > { %v927_v22 = vor.u32 %v1030_v20, %v926_v19 }
  0x2b   : > { %487 = vmatmul.bf16.vlgmr.msra.gmra.mxu0 %v823_v25  ;;  %527 = vmatmul.bf16.vlgmr.msra.gmra.mxu2 %v887_v26  ;;  %v883_v25 = vor.u32 %v1017_v23, %v880_v24  ;;  %v870_v26 = vld [vmem:[%s1113_s24 + $0x60] sm:$0xf] }
  0x2c   : > { %v871_v30 = vor.u32 %v1016_v27, %v870_v26 }
  0x31   : > { %986 = vmatmul.msk.bf16.gmra.mxu1 %vm430_vm0, %v843_v29  ;;  %v1032_v29 = vld [vmem:[%s1113_s24 + $0xe4] sm:$0xf0] }
  0x32   : > { %995 = vmatmul.msk.bf16.gmra.mxu3 %vm430_vm0, %v915_v34  ;;  %v935_v31 = vor.u32 %v1032_v29, %v934_v28  ;;  %v891_v34 = vor.u32 %v1019_v32, %v888_v33 }
  0x3b   : > { %492 = vmatmul.bf16.gmra.mxu0 %v831_v37  ;;  %532 = vmatmul.bf16.gmra.mxu2 %v895_v38  ;;  %v1018_v37 = vld [vmem:[%s1113_s24 + $0x74] sm:$0xf0]  ;;  %v942_v38 = vld [vmem:[%s1113_s24 + $0xf0] sm:$0xf] }
  0x3c   : > { %v879_v40 = vor.u32 %v1018_v37, %v878_v36 }
  0x41   : > { %987 = vmatmul.msk.bf16.gmra.mxu1 %vm430_vm0, %v851_v41  ;;  %v943_v41 = vor.u32 %v1034_v39, %v942_v38 }
  0x42   : > { %996 = vmatmul.msk.bf16.gmra.mxu3 %vm430_vm0, %v923_v46 }
  0x4b   : > { %497 = vmatmul.bf16.gmra.mxu0 %v839_v49  ;;  %537 = vmatmul.bf16.gmra.mxu2 %v903_v50 }
  0x51   : > { %988 = vmatmul.msk.bf16.gmra.mxu1 %vm430_vm0, %v859_v53 }
  0x52   : > { %997 = vmatmul.msk.bf16.gmra.mxu3 %vm430_vm0, %v931_v58 }
  0x5b   : > { %502 = vmatmul.bf16.gmra.mxu0 %v847_v61  ;;  %542 = vmatmul.bf16.gmra.mxu2 %v911_v62 }
  0x61   : > { %989 = vmatmul.msk.bf16.gmra.mxu1 %vm430_vm0, %v867_v1 }
  0x62   : > { %998 = vmatmul.msk.bf16.gmra.mxu3 %vm430_vm0, %v939_v6 }
  0x6b   : > { %507 = vmatmul.bf16.gmra.mxu0 %v855_v9  ;;  %547 = vmatmul.bf16.gmra.mxu2 %v919_v10 }
  0x71   : > { %990 = vmatmul.msk.bf16.gmra.mxu1 %vm430_vm0, %v875_v13 }
  0x72   : > { %999 = vmatmul.msk.bf16.gmra.mxu3 %vm430_vm0, %v947_v18 }
  0x7b   : > { %512 = vmatmul.bf16.gmra.mxu0 %v863_v21  ;;  %552 = vmatmul.bf16.gmra.mxu2 %v927_v22 }
  0x81   : > { %991 = vmatmul.msk.bf16.gmra.mxu1 %vm430_vm0, %v883_v25 }
  0x8b   : > { %517 = vmatmul.bf16.gmra.mxu0 %v871_v30  ;;  %557 = vmatmul.bf16.gmra.mxu2 %v935_v31 }
  0x8e   : > { %v577_v35 = vpop.f32.mrf.mxu1 }
  0x91   : > { %992 = vmatmul.msk.bf16.gmra.mxu1 %vm430_vm0, %v891_v34 }
  0x95   : > { %v622_v45 = vpop.f32.mrf.mxu3 }
  0x96   : > { %v579_v42 = vpop.f32.mrf.mxu1 }
  0x9b   : > { %522 = vmatmul.bf16.gmra.mxu0 %v879_v40  ;;  %562 = vmatmul.bf16.gmra.mxu2 %v943_v41 }
  0x9d   : > { %v624_v56 = vpop.f32.mrf.mxu3 }
  0x9e   : > { %v582_v43 = vpop.f32.mrf.mxu1 }
  0xa5   : > { %v627_v1 = vpop.f32.mrf.mxu3 }
  0xa6   : > { %v584_v48 = vpop.f32.mrf.mxu1 }
  0xa8   : > { %v488_v46 = vpop.f32.mrf.mxu0 }
  0xa9   : > { %v489_v47 = vadd.f32 %v1216_v44, %v488_v46 }
  0xab   : > { %v578_v49 = vadd.f32 %v577_v35, %v489_v47 }
  0xad   : > { %v657_v50 = vmax.f32 %v578_v49, 0.0  ;;  %v629_v13 = vpop.f32.mrf.mxu3 }
  0xae   : > { %v1225_v52 = vpop.f32.mrf.mxu2  ;;  %v587_v55 = vpop.f32.mrf.mxu1 }
  0xaf   : > { %v689_v51 = vpack.c.bf16 %v657_v50, %v657_v50 }
  0xb0   : > { %v490_v53 = vpop.f32.mrf.mxu0 }
  0xb1   : > { %722 = vst.msk [vmem:[%s1223_s16] sm:$0xf] %vm721_vm1, %v689_v51  ;;  %v491_v54 = vadd.f32 %v1216_v44, %v490_v53 }
  0xb3   : > { %v580_v57 = vadd.f32 %v579_v42, %v491_v54 }
  0xb5   : > { %v658_v58 = vmax.f32 %v580_v57, 0.0  ;;  %v632_v28 = vpop.f32.mrf.mxu3 }
  0xb6   : > { %v1230_v60 = vpop.f32.mrf.mxu2  ;;  %v589_v63 = vpop.f32.mrf.mxu1 }
  0xb7   : > { %v690_v59 = vpack.c.bf16 %v658_v58, %v658_v58 }
  0xb8   : > { %v493_v61 = vpop.f32.mrf.mxu0 }
  0xb9   : > { %723 = vst.msk [vmem:[%s1223_s16 + $0x4] sm:$0xf] %vm721_vm1, %v690_v59  ;;  %v494_v62 = vadd.f32 %v1216_v44, %v493_v61 }
  0xbb   : > { %v583_v0 = vadd.f32 %v582_v43, %v494_v62 }
  0xbd   : > { %v659_v2 = vmax.f32 %v583_v0, 0.0 }
  0xbe   : > { %v533_v4 = vpop.f32.mrf.mxu2  ;;  %v592_v8 = vpop.f32.mrf.mxu1 }
  0xbf   : > { %v691_v3 = vpack.c.bf16 %v659_v2, %v659_v2  ;;  %v534_v5 = vadd.f32 %v1216_v44, %v533_v4 }
  0xc0   : > { %v495_v6 = vpop.f32.mrf.mxu0 }
  0xc1   : > { %724 = vst.msk [vmem:[%s1223_s16 + $0x8] sm:$0xf] %vm721_vm1, %v691_v3  ;;  %v496_v7 = vadd.f32 %v1216_v44, %v495_v6  ;;  %v623_v9 = vadd.f32 %v622_v45, %v534_v5  ;;  %v634_v45 = vpop.f32.mrf.mxu3 }
  0xc3   : > { %v585_v10 = vadd.f32 %v584_v48, %v496_v7  ;;  %v675_v11 = vmax.f32 %v623_v9, 0.0 }
  0xc5   : > { %v660_v12 = vmax.f32 %v585_v10, 0.0  ;;  %v707_v14 = vpack.c.bf16 %v675_v11, %v675_v11 }
  0xc6   : > { %v535_v16 = vpop.f32.mrf.mxu2  ;;  %v594_v20 = vpop.f32.mrf.mxu1 }
  0xc7   : > { %v692_v15 = vpack.c.bf16 %v660_v12, %v660_v12  ;;  %740 = vst.msk [vmem:[%s1223_s16 + $0x48] sm:$0xf] %vm721_vm1, %v707_v14  ;;  %v536_v17 = vadd.f32 %v1216_v44, %v535_v16 }
  0xc8   : > { %v498_v18 = vpop.f32.mrf.mxu0 }
  0xc9   : > { %725 = vst.msk [vmem:[%s1223_s16 + $0xc] sm:$0xf] %vm721_vm1, %v692_v15  ;;  %v499_v19 = vadd.f32 %v1216_v44, %v498_v18  ;;  %v625_v21 = vadd.f32 %v624_v56, %v536_v17  ;;  %v637_v61 = vpop.f32.mrf.mxu3 }
  0xcb   : > { %v588_v22 = vadd.f32 %v587_v55, %v499_v19  ;;  %v676_v23 = vmax.f32 %v625_v21, 0.0 }
  0xcd   : > { %v661_v24 = vmax.f32 %v588_v22, 0.0  ;;  %v708_v25 = vpack.c.bf16 %v676_v23, %v676_v23 }
  0xce   : > { %v538_v27 = vpop.f32.mrf.mxu2  ;;  %v597_v32 = vpop.f32.mrf.mxu1 }
  0xcf   : > { %v693_v26 = vpack.c.bf16 %v661_v24, %v661_v24  ;;  %741 = vst.msk [vmem:[%s1223_s16 + $0x4c] sm:$0xf] %vm721_vm1, %v708_v25  ;;  %v539_v29 = vadd.f32 %v1216_v44, %v538_v27 }
  0xd0   : > { %v500_v30 = vpop.f32.mrf.mxu0 }
  0xd1   : > { %726 = vst.msk [vmem:[%s1223_s16 + $0x10] sm:$0xf] %vm721_vm1, %v693_v26  ;;  %v501_v31 = vadd.f32 %v1216_v44, %v500_v30  ;;  %v628_v33 = vadd.f32 %v627_v1, %v539_v29  ;;  %v639_v11 = vpop.f32.mrf.mxu3 }
  0xd3   : > { %v590_v34 = vadd.f32 %v589_v63, %v501_v31  ;;  %v677_v35 = vmax.f32 %v628_v33, 0.0 }
  0xd5   : > { %v662_v36 = vmax.f32 %v590_v34, 0.0  ;;  %v709_v37 = vpack.c.bf16 %v677_v35, %v677_v35 }
  0xd6   : > { %v540_v39 = vpop.f32.mrf.mxu2  ;;  %v599_v43 = vpop.f32.mrf.mxu1 }
  0xd7   : > { %v694_v38 = vpack.c.bf16 %v662_v36, %v662_v36  ;;  %742 = vst.msk [vmem:[%s1223_s16 + $0x50] sm:$0xf] %vm721_vm1, %v709_v37  ;;  %v541_v40 = vadd.f32 %v1216_v44, %v540_v39 }
  0xd8   : > { %v503_v41 = vpop.f32.mrf.mxu0 }
  0xd9   : > { %727 = vst.msk [vmem:[%s1223_s16 + $0x14] sm:$0xf] %vm721_vm1, %v694_v38  ;;  %v504_v42 = vadd.f32 %v1216_v44, %v503_v41  ;;  %v630_v46 = vadd.f32 %v629_v13, %v541_v40  ;;  %v642_v26 = vpop.f32.mrf.mxu3 }
  0xdb   : > { %v593_v47 = vadd.f32 %v592_v8, %v504_v42  ;;  %v678_v48 = vmax.f32 %v630_v46, 0.0 }
  0xdd   : > { %v663_v49 = vmax.f32 %v593_v47, 0.0  ;;  %v710_v50 = vpack.c.bf16 %v678_v48, %v678_v48 }
  0xde   : > { %v543_v53 = vpop.f32.mrf.mxu2  ;;  %v602_v57 = vpop.f32.mrf.mxu1 }
  0xdf   : > { %v695_v51 = vpack.c.bf16 %v663_v49, %v663_v49  ;;  %743 = vst.msk [vmem:[%s1223_s16 + $0x54] sm:$0xf] %vm721_vm1, %v710_v50  ;;  %v544_v54 = vadd.f32 %v1216_v44, %v543_v53 }
  0xe0   : > { %v505_v55 = vpop.f32.mrf.mxu0 }
  0xe1   : > { %728 = vst.msk [vmem:[%s1223_s16 + $0x18] sm:$0xf] %vm721_vm1, %v695_v51  ;;  %v506_v56 = vadd.f32 %v1216_v44, %v505_v55  ;;  %v633_v58 = vadd.f32 %v632_v28, %v544_v54  ;;  %v644_v42 = vpop.f32.mrf.mxu3 }
  0xe3   : > { %v595_v59 = vadd.f32 %v594_v20, %v506_v56  ;;  %v679_v62 = vmax.f32 %v633_v58, 0.0 }
  0xe5   : > { %v664_v63 = vmax.f32 %v595_v59, 0.0  ;;  %v711_v0 = vpack.c.bf16 %v679_v62, %v679_v62 }
  0xe6   : > { %v545_v2 = vpop.f32.mrf.mxu2  ;;  %v604_v6 = vpop.f32.mrf.mxu1 }
  0xe7   : > { %v696_v1 = vpack.c.bf16 %v664_v63, %v664_v63  ;;  %744 = vst.msk [vmem:[%s1223_s16 + $0x58] sm:$0xf] %vm721_vm1, %v711_v0  ;;  %v546_v3 = vadd.f32 %v1216_v44, %v545_v2 }
  0xe8   : > { %v508_v4 = vpop.f32.mrf.mxu0 }
  0xe9   : > { %729 = vst.msk [vmem:[%s1223_s16 + $0x1c] sm:$0xf] %vm721_vm1, %v696_v1  ;;  %v509_v5 = vadd.f32 %v1216_v44, %v508_v4  ;;  %v635_v7 = vadd.f32 %v634_v45, %v546_v3  ;;  %v647_v58 = vpop.f32.mrf.mxu3  ;;  %v529_v1 = vadd.f32 %v1216_v44, %v1225_v52 }
  0xeb   : > { %v598_v8 = vadd.f32 %v597_v32, %v509_v5  ;;  %v680_v9 = vmax.f32 %v635_v7, 0.0 }
  0xed   : > { %v665_v10 = vmax.f32 %v598_v8, 0.0  ;;  %v712_v12 = vpack.c.bf16 %v680_v9, %v680_v9 }
  0xee   : > { %v548_v14 = vpop.f32.mrf.mxu2  ;;  %v607_v18 = vpop.f32.mrf.mxu1 }
  0xef   : > { %v697_v13 = vpack.c.bf16 %v665_v10, %v665_v10  ;;  %745 = vst.msk [vmem:[%s1223_s16 + $0x5c] sm:$0xf] %vm721_vm1, %v712_v12  ;;  %v549_v15 = vadd.f32 %v1216_v44, %v548_v14 }
  0xf0   : > { %v510_v16 = vpop.f32.mrf.mxu0 }
  0xf1   : > { %730 = vst.msk [vmem:[%s1223_s16 + $0x20] sm:$0xf] %vm721_vm1, %v697_v13  ;;  %v511_v17 = vadd.f32 %v1216_v44, %v510_v16  ;;  %v638_v19 = vadd.f32 %v637_v61, %v549_v15  ;;  %v649_v52 = vpop.f32.mrf.mxu3  ;;  %v531_v16 = vadd.f32 %v1216_v44, %v1230_v60 }
  0xf3   : > { %v600_v20 = vadd.f32 %v599_v43, %v511_v17  ;;  %v681_v21 = vmax.f32 %v638_v19, 0.0 }
  0xf5   : > { %v666_v22 = vmax.f32 %v600_v20, 0.0  ;;  %v713_v23 = vpack.c.bf16 %v681_v21, %v681_v21 }
  0xf6   : > { %v550_v25 = vpop.f32.mrf.mxu2  ;;  %v609_v30 = vpop.f32.mrf.mxu1 }
  0xf7   : > { %v698_v24 = vpack.c.bf16 %v666_v22, %v666_v22  ;;  %746 = vst.msk [vmem:[%s1223_s16 + $0x60] sm:$0xf] %vm721_vm1, %v713_v23  ;;  %v551_v27 = vadd.f32 %v1216_v44, %v550_v25 }
  0xf8   : > { %v513_v28 = vpop.f32.mrf.mxu0 }
  0xf9   : > { %731 = vst.msk [vmem:[%s1223_s16 + $0x24] sm:$0xf] %vm721_vm1, %v698_v24  ;;  %v514_v29 = vadd.f32 %v1216_v44, %v513_v28  ;;  %v640_v31 = vadd.f32 %v639_v11, %v551_v27 }
  0xfb   : > { %v603_v32 = vadd.f32 %v602_v57, %v514_v29  ;;  %v682_v33 = vmax.f32 %v640_v31, 0.0  ;;  %v652_v29 = vpop.f32.mrf.mxu3 }
  0xfd   : > { %v667_v34 = vmax.f32 %v603_v32, 0.0  ;;  %v714_v35 = vpack.c.bf16 %v682_v33, %v682_v33 }
  0xfe   : > { %v553_v37 = vpop.f32.mrf.mxu2  ;;  %v612_v41 = vpop.f32.mrf.mxu1 }
  0xff   : > { %v699_v36 = vpack.c.bf16 %v667_v34, %v667_v34  ;;  %747 = vst.msk [vmem:[%s1223_s16 + $0x64] sm:$0xf] %vm721_vm1, %v714_v35  ;;  %v554_v38 = vadd.f32 %v1216_v44, %v553_v37 }
 0x100   : > { %v515_v39 = vpop.f32.mrf.mxu0 }
 0x101   : > { %732 = vst.msk [vmem:[%s1223_s16 + $0x28] sm:$0xf] %vm721_vm1, %v699_v36  ;;  %v516_v40 = vadd.f32 %v1216_v44, %v515_v39  ;;  %v643_v43 = vadd.f32 %v642_v26, %v554_v38 }
 0x103   : > { %v605_v45 = vadd.f32 %v604_v6, %v516_v40  ;;  %v683_v46 = vmax.f32 %v643_v43, 0.0 }
 0x105   : > { %v668_v47 = vmax.f32 %v605_v45, 0.0  ;;  %v715_v48 = vpack.c.bf16 %v683_v46, %v683_v46 }
 0x106   : > { %v555_v50 = vpop.f32.mrf.mxu2  ;;  %v614_v55 = vpop.f32.mrf.mxu1 }
 0x107   : > { %v700_v49 = vpack.c.bf16 %v668_v47, %v668_v47  ;;  %748 = vst.msk [vmem:[%s1223_s16 + $0x68] sm:$0xf] %vm721_vm1, %v715_v48  ;;  %v556_v51 = vadd.f32 %v1216_v44, %v555_v50 }
 0x108   : > { %v518_v53 = vpop.f32.mrf.mxu0 }
 0x109   : > { %733 = vst.msk [vmem:[%s1223_s16 + $0x2c] sm:$0xf] %vm721_vm1, %v700_v49  ;;  %v519_v54 = vadd.f32 %v1216_v44, %v518_v53  ;;  %v645_v56 = vadd.f32 %v644_v42, %v556_v51  ;;  %v654_v42 = vpop.f32.mrf.mxu3 }
 0x10b   : > { %v608_v57 = vadd.f32 %v607_v18, %v519_v54  ;;  %v684_v59 = vmax.f32 %v645_v56, 0.0 }
 0x10d   : > { %v669_v61 = vmax.f32 %v608_v57, 0.0  ;;  %v716_v62 = vpack.c.bf16 %v684_v59, %v684_v59 }
 0x10e   : > { %v558_v0 = vpop.f32.mrf.mxu2  ;;  %v617_v5 = vpop.f32.mrf.mxu1 }
 0x10f   : > { %v701_v63 = vpack.c.bf16 %v669_v61, %v669_v61  ;;  %749 = vst.msk [vmem:[%s1223_s16 + $0x6c] sm:$0xf] %vm721_vm1, %v716_v62  ;;  %v559_v2 = vadd.f32 %v1216_v44, %v558_v0  ;;  %v618_v7 = vadd.f32 %v617_v5, %v529_v1 }
 0x110   : > { %v520_v3 = vpop.f32.mrf.mxu0 }
 0x111   : > { %734 = vst.msk [vmem:[%s1223_s16 + $0x30] sm:$0xf] %vm721_vm1, %v701_v63  ;;  %v521_v4 = vadd.f32 %v1216_v44, %v520_v3  ;;  %v648_v6 = vadd.f32 %v647_v58, %v559_v2  ;;  %v673_v10 = vmax.f32 %v618_v7, 0.0 }
 0x113   : > { %v610_v8 = vadd.f32 %v609_v30, %v521_v4  ;;  %v685_v9 = vmax.f32 %v648_v6, 0.0  ;;  %v705_v13 = vpack.c.bf16 %v673_v10, %v673_v10 }
 0x115   : > { %v670_v11 = vmax.f32 %v610_v8, 0.0  ;;  %v717_v12 = vpack.c.bf16 %v685_v9, %v685_v9  ;;  %738 = vst.msk [vmem:[%s1223_s16 + $0x40] sm:$0xf] %vm721_vm1, %v705_v13 }
 0x116   : > { %v560_v15 = vpop.f32.mrf.mxu2  ;;  %v619_v20 = vpop.f32.mrf.mxu1 }
 0x117   : > { %v702_v14 = vpack.c.bf16 %v670_v11, %v670_v11  ;;  %750 = vst.msk [vmem:[%s1223_s16 + $0x70] sm:$0xf] %vm721_vm1, %v717_v12  ;;  %v561_v17 = vadd.f32 %v1216_v44, %v560_v15  ;;  %v620_v22 = vadd.f32 %v619_v20, %v531_v16 }
 0x118   : > { %v523_v18 = vpop.f32.mrf.mxu0 }
 0x119   : > { %735 = vst.msk [vmem:[%s1223_s16 + $0x34] sm:$0xf] %vm721_vm1, %v702_v14  ;;  %v524_v19 = vadd.f32 %v1216_v44, %v523_v18  ;;  %v650_v21 = vadd.f32 %v649_v52, %v561_v17  ;;  %v674_v60 = vmax.f32 %v620_v22, 0.0 }
 0x11b   : > { %v613_v23 = vadd.f32 %v612_v41, %v524_v19  ;;  %v686_v24 = vmax.f32 %v650_v21, 0.0  ;;  %v706_v27 = vpack.c.bf16 %v674_v60, %v674_v60 }
 0x11d   : > { %v671_v25 = vmax.f32 %v613_v23, 0.0  ;;  %v718_v26 = vpack.c.bf16 %v686_v24, %v686_v24  ;;  %739 = vst.msk [vmem:[%s1223_s16 + $0x44] sm:$0xf] %vm721_vm1, %v706_v27 }
 0x11e   : > { %v563_v30 = vpop.f32.mrf.mxu2 }
 0x11f   : > { %v703_v28 = vpack.c.bf16 %v671_v25, %v671_v25  ;;  %751 = vst.msk [vmem:[%s1223_s16 + $0x74] sm:$0xf] %vm721_vm1, %v718_v26  ;;  %v564_v31 = vadd.f32 %v1216_v44, %v563_v30 }
 0x120   : > { %v525_v32 = vpop.f32.mrf.mxu0 }
 0x121   : > { %736 = vst.msk [vmem:[%s1223_s16 + $0x38] sm:$0xf] %vm721_vm1, %v703_v28  ;;  %v526_v33 = vadd.f32 %v1216_v44, %v525_v32  ;;  %v653_v34 = vadd.f32 %v652_v29, %v564_v31 }
 0x123   : > { %v615_v35 = vadd.f32 %v614_v55, %v526_v33  ;;  %v687_v36 = vmax.f32 %v653_v34, 0.0 }
 0x125   : > { %v672_v37 = vmax.f32 %v615_v35, 0.0  ;;  %v719_v38 = vpack.c.bf16 %v687_v36, %v687_v36 }
 0x126   : > { %v565_v40 = vpop.f32.mrf.mxu2 }
 0x127   : > { %v704_v39 = vpack.c.bf16 %v672_v37, %v672_v37  ;;  %752 = vst.msk [vmem:[%s1223_s16 + $0x78] sm:$0xf] %vm721_vm1, %v719_v38  ;;  %v566_v41 = vadd.f32 %v1216_v44, %v565_v40 }
 0x129   : > { %737 = vst.msk [vmem:[%s1223_s16 + $0x3c] sm:$0xf] %vm721_vm1, %v704_v39  ;;  %v655_v43 = vadd.f32 %v654_v42, %v566_v41 }
 0x12b   : > { %v688_v45 = vmax.f32 %v655_v43, 0.0 }
 0x12d   : > { %v720_v46 = vpack.c.bf16 %v688_v45, %v688_v45 }
 0x12f   : > { %753 = vst.msk [vmem:[%s1223_s16 + $0x7c] sm:$0xf] %vm721_vm1, %v720_v46 }
 0x130 PF: > { %s13_s12 = sadd.s32 1, %s1068_s12  }
 0x131   : > { %p10_p4 = scmp.ge.s32.totalorder %s13_s12, 4  }
 0x133   :  { %12 = sbr.rel (!%p10_p4) target bundleno = 1 (0x1), region = 62 }

// kernel: _lambda_.26
= control target key start
LH: loop header
LB: loop body
LE: loop exit
PB: predicated region body
PF: predicated region fallthrough
CT: control target
= control target key end

     0   :  { %s480_s12 = smov 0   ;;  %s519_s0 = inlined_call_operand.vmem [shape: bf16[128,64], index: 0, kind: input, shape index: {}]   ;;  %s520_s1 = inlined_call_operand.vmem [shape: bf16[64,128], index: 1, kind: input, shape index: {}]   ;;  %s521_s2 = inlined_call_operand.vmem [shape: f32[1,128], index: 2, kind: input, shape index: {}]   ;;  %s522_s3 = inlined_call_operand.vmem [shape: bf16[128,128], index: 3, kind: output, shape index: {}]  }
   0x1 LB: > { %s353_s13 = sadd.s32 4294967295, %s458_s12   ;;  %p357_p0 = scmp.ge.s32.totalorder %s458_s12, 1  ;;  %s458_s12 = sphi %s480_s12, %s13_s12  }
   0x2   : > { %p138_p1 = scmp.lt.s32.totalorder %s458_s12, 3 }
   0x4   : > { %p139_p2 = pnand %p357_p0, %p138_p1 }
   0x5   : > { %s358_s16 = sshll.u32 (!%p139_p2), %s353_s13, 3 }
   0x6   : > { %142 = sbr.rel (%p139_p2) target bundleno = 174 (0xae), region = 32  ;;  %p163_p3 = scmp.lt.s32.totalorder (!%p139_p2), %s358_s16, 15 }
   0xb   : > { %v407_v0 = vld [vmem:[%s520_s1 + $0x18] sm:$0xff]  ;;  %v406_v1 = vld [vmem:[%s520_s1 + $0x10] sm:$0xff]  ;;  %s524_s16 = smov (!%p163_p3, %s358_s16), 15  ;;  %v405_v2 = vld [vmem:[%s520_s1 + $0x8] sm:$0xff]  ;;  %vm239_vm0 = vcmask 523264  }
   0xc   : > { %256 = vmatpush.bf16.msra.mxu0 %v407_v0  ;;  %431 = vmatpush.bf16.msra.mxu1 %v407_v0  ;;  %s359_s21 = sshll.u32 %s524_s16, 2  ;;  %v404_v3 = vld [vmem:[%s520_s1] sm:$0xff] }
   0xd   : > { %432 = vmatpush.bf16.msra.mxu2 %v407_v0  ;;  %433 = vmatpush.bf16.msra.mxu3 %v407_v0  ;;  %s166_s26 = scalar_lea.vmem %s519_s0, %s359_s21  ;;  %v451_v10 = vld [vmem:[%s521_s2] ss:$0 sm:$0xff]  ;;  %s172_s4 = scalar_lea.vmem %s522_s3, %s359_s21 }
   0xe   : > { %v400_v4 = vld [vmem:[%s166_s26] sm:$0xff]  ;;  %v401_v5 = vld [vmem:[%s166_s26 + $0x8] sm:$0xff]  ;;  %v402_v6 = vld [vmem:[%s166_s26 + $0x10] sm:$0xff] }
   0xf   : > { %v403_v7 = vld [vmem:[%s166_s26 + $0x18] sm:$0xff] }
  0x10   : > { %257 = vmatpush.bf16.msra.mxu0 %v406_v1  ;;  %434 = vmatpush.bf16.msra.mxu1 %v406_v1 }
  0x11   : > { %435 = vmatpush.bf16.msra.mxu2 %v406_v1  ;;  %436 = vmatpush.bf16.msra.mxu3 %v406_v1 }
  0x14   : > { %258 = vmatpush.bf16.msra.mxu0 %v405_v2  ;;  %437 = vmatpush.bf16.msra.mxu1 %v405_v2 }
  0x15   : > { %438 = vmatpush.bf16.msra.mxu2 %v405_v2  ;;  %439 = vmatpush.bf16.msra.mxu3 %v405_v2 }
  0x18   : > { %259 = vmatpush.bf16.msra.mxu0 %v404_v3  ;;  %440 = vmatpush.bf16.msra.mxu1 %v404_v3 }
  0x19   : > { %441 = vmatpush.bf16.msra.mxu2 %v404_v3  ;;  %442 = vmatpush.bf16.msra.mxu3 %v404_v3 }
  0x1b   : > { %394 = vmatmul.msk.bf16.vlgmr.msra.gmra.mxu0 %vm239_vm0, %v400_v4  ;;  %395 = vmatmul.msk.bf16.vlgmr.msra.gmra.mxu1 %vm239_vm0, %v401_v5 }
  0x1c   : > { %396 = vmatmul.msk.bf16.vlgmr.msra.gmra.mxu2 %vm239_vm0, %v402_v6  ;;  %397 = vmatmul.msk.bf16.vlgmr.msra.gmra.mxu3 %vm239_vm0, %v403_v7 }
  0x98   : > { %v261_v8 = vpop.f32.mrf.mxu0  ;;  %v266_v9 = vpop.f32.mrf.mxu1 }
  0x99   : > { %v262_v15 = vadd.f32 %v451_v10, %v261_v8  ;;  %v267_v16 = vadd.f32 %v451_v10, %v266_v9 }
  0x9f   : > { %v271_v11 = vpop.f32.mrf.mxu2  ;;  %v276_v12 = vpop.f32.mrf.mxu3 }
  0xa0   : > { %v263_v13 = vpop.f32.mrf.mxu0  ;;  %v268_v14 = vpop.f32.mrf.mxu1  ;;  %v272_v23 = vadd.f32 %v451_v10, %v271_v11  ;;  %v277_v24 = vadd.f32 %v451_v10, %v276_v12 }
  0xa1   : > { %v264_v17 = vadd.f32 %v451_v10, %v263_v13  ;;  %v269_v18 = vadd.f32 %v451_v10, %v268_v14 }
  0xa3   : > { %v411_v19 = vpack.c.bf16 %v264_v17, %v262_v15  ;;  %v416_v20 = vpack.c.bf16 %v269_v18, %v267_v16 }
  0xa5   : > { %412 = vst [vmem:[%s172_s4] sm:$0xff] %v411_v19  }
  0xa6   : > { %428 = vst [vmem:[%s172_s4 + $0x8] sm:$0xff] %v416_v20  }
  0xa7   : > { %v273_v21 = vpop.f32.mrf.mxu2  ;;  %v278_v22 = vpop.f32.mrf.mxu3 }
  0xa8   : > { %v274_v25 = vadd.f32 %v451_v10, %v273_v21  ;;  %v279_v26 = vadd.f32 %v451_v10, %v278_v22 }
  0xaa   : > { %v421_v27 = vpack.c.bf16 %v274_v25, %v272_v23  ;;  %v426_v28 = vpack.c.bf16 %v279_v26, %v277_v24 }
  0xac   : > { %429 = vst [vmem:[%s172_s4 + $0x10] sm:$0xff] %v421_v27  }
  0xad   : > { %430 = vst [vmem:[%s172_s4 + $0x18] sm:$0xff] %v426_v28  }
  0xae PF: > { %s13_s12 = sadd.s32 1, %s458_s12  }
  0xaf   : > { %p10_p4 = scmp.ge.s32.totalorder %s13_s12, 4  }
  0xb1   :  { %12 = sbr.rel (!%p10_p4) target bundleno = 1 (0x1), region = 62 }

// kernel: _lambda_.23
= control target key start
LH: loop header
LB: loop body
LE: loop exit
PB: predicated region body
PF: predicated region fallthrough
CT: control target
= control target key end

     0   :  { %s985_s15 = smov 0   ;;  %s1150_s0 = inlined_call_operand.vmem [shape: bf16[512,16], index: 0, kind: input, shape index: {}]   ;;  %s1151_s1 = inlined_call_operand.vmem [shape: bf16[16,64], index: 1, kind: input, shape index: {}]   ;;  %s1152_s2 = inlined_call_operand.vmem [shape: f32[1,64], index: 2, kind: input, shape index: {}]   ;;  %s1153_s3 = inlined_call_operand.vmem [shape: bf16[512,64], index: 3, kind: input, shape index: {}]   ;;  %s1154_s4 = inlined_call_operand.vmem [shape: bf16[512,64], index: 4, kind: output, shape index: {}]  }
   0x1 LB: > { %s747_s16 = sadd.s32 4294967295, %s958_s15   ;;  %p751_p0 = scmp.ge.s32.totalorder %s958_s15, 1  ;;  %s958_s15 = sphi %s985_s15, %s14_s15  }
   0x2   : > { %p174_p1 = scmp.lt.s32.totalorder %s958_s15, 3 }
   0x4   : > { %p175_p2 = pnand %p751_p0, %p174_p1 }
   0x5   : > { %s752_s19 = sshll.u32 (!%p175_p2), %s747_s16, 5 }
   0x6   : > { %178 = sbr.rel (%p175_p2) target bundleno = 215 (0xd7), region = 36  ;;  %p206_p3 = scmp.lt.s32.totalorder (!%p175_p2), %s752_s19, 63 }
   0xb   : > { %v860_v0 = vld [vmem:[%s1151_s1] sm:$0xff]  ;;  %s1156_s19 = smov (!%p206_p3, %s752_s19), 63  ;;  %vm348_vm0 = vcmask 130048   ;;  %vm646_vm1 = vcmask 519168  }
   0xc   : > { %404 = vmatpush.bf16.msra.mxu0 %v860_v0  ;;  %940 = vmatpush.bf16.msra.mxu1 %v860_v0  ;;  %s996_s20 = sshll.u32 %s1156_s19, 2  ;;  %v1029_v19 = vld [vmem:[%s1152_s2] ss:$0 sm:$0xff] }
   0xd   : > { %941 = vmatpush.bf16.msra.mxu2 %v860_v0  ;;  %942 = vmatpush.bf16.msra.mxu3 %v860_v0  ;;  %s209_s23 = scalar_lea.vmem %s1150_s0, %s996_s20  ;;  %s1022_s26 = scalar_lea.vmem %s1153_s3, %s996_s20 }
   0xe   : > { %v844_v1 = vld [vmem:[%s209_s23] sm:$0xff]  ;;  %v845_v5 = vld [vmem:[%s209_s23 + $0x8] sm:$0xff]  ;;  %v846_v9 = vld [vmem:[%s209_s23 + $0x10] sm:$0xff]  ;;  %s1039_s5 = scalar_lea.vmem %s1154_s4, %s996_s20 }
   0xf   : > { %v848_v2 = vld [vmem:[%s209_s23 + $0x20] sm:$0xff]  ;;  %826 = vmatmul.msk.bf16.vlgmr.msra.gmra.mxu0 %vm348_vm0, %v844_v1  ;;  %v849_v6 = vld [vmem:[%s209_s23 + $0x28] sm:$0xff]  ;;  %v850_v10 = vld [vmem:[%s209_s23 + $0x30] sm:$0xff] }
  0x10   : > { %v852_v3 = vld [vmem:[%s209_s23 + $0x40] sm:$0xff]  ;;  %830 = vmatmul.msk.bf16.vlgmr.msra.gmra.mxu1 %vm348_vm0, %v848_v2  ;;  %v853_v7 = vld [vmem:[%s209_s23 + $0x48] sm:$0xff]  ;;  %v854_v11 = vld [vmem:[%s209_s23 + $0x50] sm:$0xff] }
  0x11   : > { %v856_v4 = vld [vmem:[%s209_s23 + $0x60] sm:$0xff]  ;;  %834 = vmatmul.msk.bf16.vlgmr.msra.gmra.mxu2 %vm348_vm0, %v852_v3  ;;  %v857_v8 = vld [vmem:[%s209_s23 + $0x68] sm:$0xff]  ;;  %v858_v12 = vld [vmem:[%s209_s23 + $0x70] sm:$0xff] }
  0x12   : > { %838 = vmatmul.msk.bf16.vlgmr.msra.gmra.mxu3 %vm348_vm0, %v856_v4  ;;  %v847_v13 = vld [vmem:[%s209_s23 + $0x18] sm:$0xff]  ;;  %v862_v17 = vld [vmem:[%s1022_s26] sm:$0xff]   ;;  %v925_v52 = vld [vmem:[%s1022_s26 + $0x8] sm:$0xff]  }
  0x13   : > { %v851_v14 = vld [vmem:[%s209_s23 + $0x38] sm:$0xff]  ;;  %v928_v18 = vld [vmem:[%s1022_s26 + $0x20] sm:$0xff]   ;;  %v863_v20 = vunpack.c.l.bf16 %v862_v17  ;;  %v864_v38 = vunpack.c.h.bf16 %v862_v17  ;;  %v929_v53 = vld [vmem:[%s1022_s26 + $0x28] sm:$0xff]   ;;  %v867_v0 = vunpack.c.l.bf16 %v925_v52 }
  0x14   : > { %v855_v15 = vld [vmem:[%s209_s23 + $0x58] sm:$0xff]  ;;  %v879_v21 = vunpack.c.l.bf16 %v928_v18  ;;  %v932_v28 = vld [vmem:[%s1022_s26 + $0x40] sm:$0xff]   ;;  %v880_v39 = vunpack.c.h.bf16 %v928_v18  ;;  %v883_v1 = vunpack.c.l.bf16 %v929_v53 }
  0x15   : > { %v859_v16 = vld [vmem:[%s209_s23 + $0x78] sm:$0xff]  ;;  %v936_v29 = vld [vmem:[%s1022_s26 + $0x60] sm:$0xff]   ;;  %v895_v32 = vunpack.c.l.bf16 %v932_v28  ;;  %v896_v58 = vunpack.c.h.bf16 %v932_v28  ;;  %v884_v28 = vunpack.c.h.bf16 %v929_v53 }
  0x16   : > { %v911_v33 = vunpack.c.l.bf16 %v936_v29  ;;  %v912_v59 = vunpack.c.h.bf16 %v936_v29 }
  0x1f   : > { %827 = vmatmul.msk.bf16.gmra.mxu0 %vm348_vm0, %v845_v5 }
  0x20   : > { %831 = vmatmul.msk.bf16.gmra.mxu1 %vm348_vm0, %v849_v6 }
  0x21   : > { %835 = vmatmul.msk.bf16.gmra.mxu2 %vm348_vm0, %v853_v7 }
  0x22   : > { %839 = vmatmul.msk.bf16.gmra.mxu3 %vm348_vm0, %v857_v8 }
  0x2f   : > { %828 = vmatmul.msk.bf16.gmra.mxu0 %vm348_vm0, %v846_v9 }
  0x30   : > { %832 = vmatmul.msk.bf16.gmra.mxu1 %vm348_vm0, %v850_v10 }
  0x31   : > { %836 = vmatmul.msk.bf16.gmra.mxu2 %vm348_vm0, %v854_v11 }
  0x32   : > { %840 = vmatmul.msk.bf16.gmra.mxu3 %vm348_vm0, %v858_v12  ;;  %v933_v12 = vld [vmem:[%s1022_s26 + $0x48] sm:$0xff]  }
  0x3f   : > { %829 = vmatmul.msk.bf16.gmra.mxu0 %vm348_vm0, %v847_v13  ;;  %v937_v13 = vld [vmem:[%s1022_s26 + $0x68] sm:$0xff]  }
  0x40   : > { %833 = vmatmul.msk.bf16.gmra.mxu1 %vm348_vm0, %v851_v14 }
  0x41   : > { %837 = vmatmul.msk.bf16.gmra.mxu2 %vm348_vm0, %v855_v15 }
  0x42   : > { %841 = vmatmul.msk.bf16.gmra.mxu3 %vm348_vm0, %v859_v16 }
  0x8c   : > { %v406_v22 = vpop.f32.mrf.mxu0 }
  0x8d   : > { %v426_v23 = vpop.f32.mrf.mxu1  ;;  %v407_v24 = vadd.f32 %v1029_v19, %v406_v22  ;;  %v915_v22 = vunpack.c.l.bf16 %v937_v13 }
  0x8e   : > { %v427_v25 = vadd.f32 %v1029_v19, %v426_v23 }
  0x8f   : > { %v550_v26 = vadd.f32 %v863_v20, %v407_v24 }
  0x90   : > { %v558_v27 = vadd.f32 %v879_v21, %v427_v25  ;;  %v899_v21 = vunpack.c.l.bf16 %v933_v12 }
  0x91   : > { %v582_v30 = vmax.f32 %v550_v26, 0.0 }
  0x92   : > { %v590_v31 = vmax.f32 %v558_v27, 0.0  ;;  %v868_v27 = vunpack.c.h.bf16 %v925_v52 }
  0x93   : > { %v614_v34 = vpack.c.bf16 %v582_v30, %v582_v30 }
  0x94   : > { %v622_v35 = vpack.c.bf16 %v590_v31, %v590_v31  ;;  %v446_v36 = vpop.f32.mrf.mxu2  ;;  %v408_v42 = vpop.f32.mrf.mxu0 }
  0x95   : > { %v466_v37 = vpop.f32.mrf.mxu3  ;;  %v447_v40 = vadd.f32 %v1029_v19, %v446_v36  ;;  %v428_v43 = vpop.f32.mrf.mxu1  ;;  %647 = vst.msk [vmem:[%s1039_s5] sm:$0xf] %vm646_vm1, %v614_v34  ;;  %v409_v44 = vadd.f32 %v1029_v19, %v408_v42  ;;  %v930_v42 = vld [vmem:[%s1022_s26 + $0x30] sm:$0xff]  }
  0x96   : > { %v467_v41 = vadd.f32 %v1029_v19, %v466_v37  ;;  %v429_v45 = vadd.f32 %v1029_v19, %v428_v43  ;;  %655 = vst.msk [vmem:[%s1039_s5 + $0x20] sm:$0xf] %vm646_vm1, %v622_v35 }
  0x97   : > { %v566_v46 = vadd.f32 %v895_v32, %v447_v40  ;;  %v551_v48 = vadd.f32 %v864_v38, %v409_v44 }
  0x98   : > { %v574_v47 = vadd.f32 %v911_v33, %v467_v41  ;;  %v559_v49 = vadd.f32 %v880_v39, %v429_v45  ;;  %v926_v41 = vld [vmem:[%s1022_s26 + $0x10] sm:$0xff]  }
  0x99   : > { %v598_v50 = vmax.f32 %v566_v46, 0.0  ;;  %v583_v54 = vmax.f32 %v551_v48, 0.0  ;;  %v916_v48 = vunpack.c.h.bf16 %v937_v13  ;;  %v871_v53 = vunpack.c.l.bf16 %v926_v41 }
  0x9a   : > { %v606_v51 = vmax.f32 %v574_v47, 0.0  ;;  %v591_v55 = vmax.f32 %v559_v49, 0.0  ;;  %v900_v47 = vunpack.c.h.bf16 %v933_v12 }
  0x9b   : > { %v630_v56 = vpack.c.bf16 %v598_v50, %v598_v50  ;;  %v615_v60 = vpack.c.bf16 %v583_v54, %v583_v54  ;;  %v887_v54 = vunpack.c.l.bf16 %v930_v42 }
  0x9c   : > { %v638_v57 = vpack.c.bf16 %v606_v51, %v606_v51  ;;  %v623_v61 = vpack.c.bf16 %v591_v55, %v591_v55  ;;  %v448_v62 = vpop.f32.mrf.mxu2  ;;  %v411_v4 = vpop.f32.mrf.mxu0 }
  0x9d   : > { %v468_v63 = vpop.f32.mrf.mxu3  ;;  %663 = vst.msk [vmem:[%s1039_s5 + $0x40] sm:$0xf] %vm646_vm1, %v630_v56  ;;  %v449_v2 = vadd.f32 %v1029_v19, %v448_v62  ;;  %v431_v5 = vpop.f32.mrf.mxu1  ;;  %v412_v6 = vadd.f32 %v1029_v19, %v411_v4 }
  0x9e   : > { %v469_v3 = vadd.f32 %v1029_v19, %v468_v63  ;;  %671 = vst.msk [vmem:[%s1039_s5 + $0x60] sm:$0xf] %vm646_vm1, %v638_v57  ;;  %v432_v7 = vadd.f32 %v1029_v19, %v431_v5 }
  0x9f   : > { %648 = vst.msk [vmem:[%s1039_s5 + $0x4] sm:$0xf] %vm646_vm1, %v615_v60  ;;  %v567_v8 = vadd.f32 %v896_v58, %v449_v2  ;;  %v552_v10 = vadd.f32 %v867_v0, %v412_v6  ;;  %v938_v2 = vld [vmem:[%s1022_s26 + $0x70] sm:$0xff]  }
  0xa0   : > { %v575_v9 = vadd.f32 %v912_v59, %v469_v3  ;;  %656 = vst.msk [vmem:[%s1039_s5 + $0x24] sm:$0xf] %vm646_vm1, %v623_v61  ;;  %v560_v11 = vadd.f32 %v883_v1, %v432_v7  ;;  %v934_v1 = vld [vmem:[%s1022_s26 + $0x50] sm:$0xff]  }
  0xa1   : > { %v599_v14 = vmax.f32 %v567_v8, 0.0  ;;  %v584_v16 = vmax.f32 %v552_v10, 0.0  ;;  %v919_v10 = vunpack.c.l.bf16 %v938_v2 }
  0xa2   : > { %v607_v15 = vmax.f32 %v575_v9, 0.0  ;;  %v592_v17 = vmax.f32 %v560_v11, 0.0  ;;  %v903_v9 = vunpack.c.l.bf16 %v934_v1 }
  0xa3   : > { %v631_v18 = vpack.c.bf16 %v599_v14, %v599_v14  ;;  %v616_v23 = vpack.c.bf16 %v584_v16, %v584_v16  ;;  %v888_v16 = vunpack.c.h.bf16 %v930_v42 }
  0xa4   : > { %v639_v20 = vpack.c.bf16 %v607_v15, %v607_v15  ;;  %v624_v24 = vpack.c.bf16 %v592_v17, %v592_v17  ;;  %v451_v25 = vpop.f32.mrf.mxu2  ;;  %v413_v31 = vpop.f32.mrf.mxu0  ;;  %v872_v15 = vunpack.c.h.bf16 %v926_v41 }
  0xa5   : > { %v471_v26 = vpop.f32.mrf.mxu3  ;;  %664 = vst.msk [vmem:[%s1039_s5 + $0x44] sm:$0xf] %vm646_vm1, %v631_v18  ;;  %v452_v29 = vadd.f32 %v1029_v19, %v451_v25  ;;  %v433_v32 = vpop.f32.mrf.mxu1  ;;  %v414_v33 = vadd.f32 %v1029_v19, %v413_v31  ;;  %v931_v31 = vld [vmem:[%s1022_s26 + $0x38] sm:$0xff]  }
  0xa6   : > { %v472_v30 = vadd.f32 %v1029_v19, %v471_v26  ;;  %672 = vst.msk [vmem:[%s1039_s5 + $0x64] sm:$0xf] %vm646_vm1, %v639_v20  ;;  %v434_v34 = vadd.f32 %v1029_v19, %v433_v32 }
  0xa7   : > { %649 = vst.msk [vmem:[%s1039_s5 + $0x8] sm:$0xf] %vm646_vm1, %v616_v23  ;;  %v568_v35 = vadd.f32 %v899_v21, %v452_v29  ;;  %v553_v37 = vadd.f32 %v868_v27, %v414_v33 }
  0xa8   : > { %v576_v36 = vadd.f32 %v915_v22, %v472_v30  ;;  %657 = vst.msk [vmem:[%s1039_s5 + $0x28] sm:$0xf] %vm646_vm1, %v624_v24  ;;  %v561_v38 = vadd.f32 %v884_v28, %v434_v34  ;;  %v927_v30 = vld [vmem:[%s1022_s26 + $0x18] sm:$0xff]  }
  0xa9   : > { %v600_v39 = vmax.f32 %v568_v35, 0.0  ;;  %v585_v43 = vmax.f32 %v553_v37, 0.0  ;;  %v920_v37 = vunpack.c.h.bf16 %v938_v2  ;;  %v875_v42 = vunpack.c.l.bf16 %v927_v30 }
  0xaa   : > { %v608_v40 = vmax.f32 %v576_v36, 0.0  ;;  %v593_v44 = vmax.f32 %v561_v38, 0.0  ;;  %v904_v36 = vunpack.c.h.bf16 %v934_v1 }
  0xab   : > { %v632_v45 = vpack.c.bf16 %v600_v39, %v600_v39  ;;  %v617_v49 = vpack.c.bf16 %v585_v43, %v585_v43  ;;  %v891_v43 = vunpack.c.l.bf16 %v931_v31 }
  0xac   : > { %v640_v46 = vpack.c.bf16 %v608_v40, %v608_v40  ;;  %v625_v50 = vpack.c.bf16 %v593_v44, %v593_v44  ;;  %v453_v51 = vpop.f32.mrf.mxu2  ;;  %v416_v57 = vpop.f32.mrf.mxu0 }
  0xad   : > { %v473_v52 = vpop.f32.mrf.mxu3  ;;  %665 = vst.msk [vmem:[%s1039_s5 + $0x48] sm:$0xf] %vm646_vm1, %v632_v45  ;;  %v454_v55 = vadd.f32 %v1029_v19, %v453_v51  ;;  %v436_v58 = vpop.f32.mrf.mxu1  ;;  %v417_v59 = vadd.f32 %v1029_v19, %v416_v57 }
  0xae   : > { %v474_v56 = vadd.f32 %v1029_v19, %v473_v52  ;;  %673 = vst.msk [vmem:[%s1039_s5 + $0x68] sm:$0xf] %vm646_vm1, %v640_v46  ;;  %v437_v60 = vadd.f32 %v1029_v19, %v436_v58 }
  0xaf   : > { %650 = vst.msk [vmem:[%s1039_s5 + $0xc] sm:$0xf] %vm646_vm1, %v617_v49  ;;  %v569_v61 = vadd.f32 %v900_v47, %v454_v55  ;;  %v554_v63 = vadd.f32 %v871_v53, %v417_v59  ;;  %v939_v55 = vld [vmem:[%s1022_s26 + $0x78] sm:$0xff]  }
  0xb0   : > { %v577_v62 = vadd.f32 %v916_v48, %v474_v56  ;;  %658 = vst.msk [vmem:[%s1039_s5 + $0x2c] sm:$0xf] %vm646_vm1, %v625_v50  ;;  %v562_v0 = vadd.f32 %v887_v54, %v437_v60  ;;  %v935_v54 = vld [vmem:[%s1022_s26 + $0x58] sm:$0xff]  }
  0xb1   : > { %v601_v3 = vmax.f32 %v569_v61, 0.0  ;;  %v586_v5 = vmax.f32 %v554_v63, 0.0  ;;  %v923_v63 = vunpack.c.l.bf16 %v939_v55 }
  0xb2   : > { %v609_v4 = vmax.f32 %v577_v62, 0.0  ;;  %v594_v6 = vmax.f32 %v562_v0, 0.0  ;;  %v907_v62 = vunpack.c.l.bf16 %v935_v54 }
  0xb3   : > { %v633_v7 = vpack.c.bf16 %v601_v3, %v601_v3  ;;  %v618_v11 = vpack.c.bf16 %v586_v5, %v586_v5  ;;  %v892_v5 = vunpack.c.h.bf16 %v931_v31 }
  0xb4   : > { %v641_v8 = vpack.c.bf16 %v609_v4, %v609_v4  ;;  %v626_v12 = vpack.c.bf16 %v594_v6, %v594_v6  ;;  %v456_v13 = vpop.f32.mrf.mxu2  ;;  %v418_v20 = vpop.f32.mrf.mxu0  ;;  %v876_v4 = vunpack.c.h.bf16 %v927_v30 }
  0xb5   : > { %v476_v14 = vpop.f32.mrf.mxu3  ;;  %666 = vst.msk [vmem:[%s1039_s5 + $0x4c] sm:$0xf] %vm646_vm1, %v633_v7  ;;  %v457_v17 = vadd.f32 %v1029_v19, %v456_v13  ;;  %v438_v21 = vpop.f32.mrf.mxu1  ;;  %v419_v22 = vadd.f32 %v1029_v19, %v418_v20 }
  0xb6   : > { %v477_v18 = vadd.f32 %v1029_v19, %v476_v14  ;;  %674 = vst.msk [vmem:[%s1039_s5 + $0x6c] sm:$0xf] %vm646_vm1, %v641_v8  ;;  %v439_v23 = vadd.f32 %v1029_v19, %v438_v21 }
  0xb7   : > { %651 = vst.msk [vmem:[%s1039_s5 + $0x10] sm:$0xf] %vm646_vm1, %v618_v11  ;;  %v570_v24 = vadd.f32 %v903_v9, %v457_v17  ;;  %v555_v26 = vadd.f32 %v872_v15, %v419_v22 }
  0xb8   : > { %v578_v25 = vadd.f32 %v919_v10, %v477_v18  ;;  %659 = vst.msk [vmem:[%s1039_s5 + $0x30] sm:$0xf] %vm646_vm1, %v626_v12  ;;  %v563_v27 = vadd.f32 %v888_v16, %v439_v23  ;;  %v908_v23 = vunpack.c.h.bf16 %v935_v54 }
  0xb9   : > { %v602_v28 = vmax.f32 %v570_v24, 0.0  ;;  %v587_v32 = vmax.f32 %v555_v26, 0.0  ;;  %v924_v24 = vunpack.c.h.bf16 %v939_v55 }
  0xba   : > { %v610_v29 = vmax.f32 %v578_v25, 0.0  ;;  %v595_v33 = vmax.f32 %v563_v27, 0.0 }
  0xbb   : > { %v634_v34 = vpack.c.bf16 %v602_v28, %v602_v28  ;;  %v619_v38 = vpack.c.bf16 %v587_v32, %v587_v32 }
  0xbc   : > { %v642_v35 = vpack.c.bf16 %v610_v29, %v610_v29  ;;  %v627_v39 = vpack.c.bf16 %v595_v33, %v595_v33  ;;  %v458_v40 = vpop.f32.mrf.mxu2  ;;  %v421_v46 = vpop.f32.mrf.mxu0 }
  0xbd   : > { %v478_v41 = vpop.f32.mrf.mxu3  ;;  %667 = vst.msk [vmem:[%s1039_s5 + $0x50] sm:$0xf] %vm646_vm1, %v634_v34  ;;  %v459_v44 = vadd.f32 %v1029_v19, %v458_v40  ;;  %v441_v47 = vpop.f32.mrf.mxu1  ;;  %v422_v48 = vadd.f32 %v1029_v19, %v421_v46 }
  0xbe   : > { %v479_v45 = vadd.f32 %v1029_v19, %v478_v41  ;;  %675 = vst.msk [vmem:[%s1039_s5 + $0x70] sm:$0xf] %vm646_vm1, %v642_v35  ;;  %v442_v49 = vadd.f32 %v1029_v19, %v441_v47 }
  0xbf   : > { %652 = vst.msk [vmem:[%s1039_s5 + $0x14] sm:$0xf] %vm646_vm1, %v619_v38  ;;  %v571_v50 = vadd.f32 %v904_v36, %v459_v44  ;;  %v556_v52 = vadd.f32 %v875_v42, %v422_v48 }
  0xc0   : > { %v579_v51 = vadd.f32 %v920_v37, %v479_v45  ;;  %660 = vst.msk [vmem:[%s1039_s5 + $0x34] sm:$0xf] %vm646_vm1, %v627_v39  ;;  %v564_v53 = vadd.f32 %v891_v43, %v442_v49 }
  0xc1   : > { %v603_v56 = vmax.f32 %v571_v50, 0.0  ;;  %v588_v58 = vmax.f32 %v556_v52, 0.0 }
  0xc2   : > { %v611_v57 = vmax.f32 %v579_v51, 0.0  ;;  %v596_v59 = vmax.f32 %v564_v53, 0.0 }
  0xc3   : > { %v635_v60 = vpack.c.bf16 %v603_v56, %v603_v56  ;;  %v620_v0 = vpack.c.bf16 %v588_v58, %v588_v58 }
  0xc4   : > { %v643_v61 = vpack.c.bf16 %v611_v57, %v611_v57  ;;  %v628_v1 = vpack.c.bf16 %v596_v59, %v596_v59  ;;  %v461_v2 = vpop.f32.mrf.mxu2  ;;  %v423_v8 = vpop.f32.mrf.mxu0 }
  0xc5   : > { %v481_v3 = vpop.f32.mrf.mxu3  ;;  %668 = vst.msk [vmem:[%s1039_s5 + $0x54] sm:$0xf] %vm646_vm1, %v635_v60  ;;  %v462_v6 = vadd.f32 %v1029_v19, %v461_v2  ;;  %v443_v9 = vpop.f32.mrf.mxu1  ;;  %v424_v10 = vadd.f32 %v1029_v19, %v423_v8 }
  0xc6   : > { %v482_v7 = vadd.f32 %v1029_v19, %v481_v3  ;;  %676 = vst.msk [vmem:[%s1039_s5 + $0x74] sm:$0xf] %vm646_vm1, %v643_v61  ;;  %v444_v11 = vadd.f32 %v1029_v19, %v443_v9 }
  0xc7   : > { %653 = vst.msk [vmem:[%s1039_s5 + $0x18] sm:$0xf] %vm646_vm1, %v620_v0  ;;  %v572_v12 = vadd.f32 %v907_v62, %v462_v6  ;;  %v557_v14 = vadd.f32 %v876_v4, %v424_v10 }
  0xc8   : > { %v580_v13 = vadd.f32 %v923_v63, %v482_v7  ;;  %661 = vst.msk [vmem:[%s1039_s5 + $0x38] sm:$0xf] %vm646_vm1, %v628_v1  ;;  %v565_v15 = vadd.f32 %v892_v5, %v444_v11 }
  0xc9   : > { %v604_v16 = vmax.f32 %v572_v12, 0.0  ;;  %v589_v18 = vmax.f32 %v557_v14, 0.0 }
  0xca   : > { %v612_v17 = vmax.f32 %v580_v13, 0.0  ;;  %v597_v20 = vmax.f32 %v565_v15, 0.0 }
  0xcb   : > { %v636_v21 = vpack.c.bf16 %v604_v16, %v604_v16  ;;  %v621_v25 = vpack.c.bf16 %v589_v18, %v589_v18 }
  0xcc   : > { %v644_v22 = vpack.c.bf16 %v612_v17, %v612_v17  ;;  %v629_v26 = vpack.c.bf16 %v597_v20, %v597_v20  ;;  %v463_v27 = vpop.f32.mrf.mxu2 }
  0xcd   : > { %v483_v28 = vpop.f32.mrf.mxu3  ;;  %669 = vst.msk [vmem:[%s1039_s5 + $0x58] sm:$0xf] %vm646_vm1, %v636_v21  ;;  %v464_v29 = vadd.f32 %v1029_v19, %v463_v27 }
  0xce   : > { %v484_v30 = vadd.f32 %v1029_v19, %v483_v28  ;;  %677 = vst.msk [vmem:[%s1039_s5 + $0x78] sm:$0xf] %vm646_vm1, %v644_v22 }
  0xcf   : > { %654 = vst.msk [vmem:[%s1039_s5 + $0x1c] sm:$0xf] %vm646_vm1, %v621_v25  ;;  %v573_v31 = vadd.f32 %v908_v23, %v464_v29 }
  0xd0   : > { %v581_v32 = vadd.f32 %v924_v24, %v484_v30  ;;  %662 = vst.msk [vmem:[%s1039_s5 + $0x3c] sm:$0xf] %vm646_vm1, %v629_v26 }
  0xd1   : > { %v605_v33 = vmax.f32 %v573_v31, 0.0 }
  0xd2   : > { %v613_v34 = vmax.f32 %v581_v32, 0.0 }
  0xd3   : > { %v637_v35 = vpack.c.bf16 %v605_v33, %v605_v33 }
  0xd4   : > { %v645_v36 = vpack.c.bf16 %v613_v34, %v613_v34 }
  0xd5   : > { %670 = vst.msk [vmem:[%s1039_s5 + $0x5c] sm:$0xf] %vm646_vm1, %v637_v35 }
  0xd6   : > { %678 = vst.msk [vmem:[%s1039_s5 + $0x7c] sm:$0xf] %vm646_vm1, %v645_v36 }
  0xd7 PF: > { %s14_s15 = sadd.s32 1, %s958_s15  }
  0xd8   : > { %p11_p4 = scmp.ge.s32.totalorder %s14_s15, 4  }
  0xda   :  { %13 = sbr.rel (!%p11_p4) target bundleno = 1 (0x1), region = 69 }

// kernel: _lambda_.24
= control target key start
LH: loop header
LB: loop body
LE: loop exit
PB: predicated region body
PF: predicated region fallthrough
CT: control target
= control target key end

     0   :  { %s790_s12 = smov 0   ;;  %s963_s0 = inlined_call_operand.vmem [shape: bf16[512,64], index: 0, kind: input, shape index: {}]   ;;  %s964_s1 = inlined_call_operand.vmem [shape: bf16[64,32], index: 1, kind: input, shape index: {}]   ;;  %s965_s2 = inlined_call_operand.vmem [shape: f32[1,32], index: 2, kind: input, shape index: {}]   ;;  %s966_s3 = inlined_call_operand.vmem [shape: bf16[512,32], index: 3, kind: output, shape index: {}]  }
   0x1 LB: > { %s614_s13 = sadd.s32 4294967295, %s768_s12   ;;  %p618_p0 = scmp.ge.s32.totalorder %s768_s12, 1  ;;  %s768_s12 = sphi %s790_s12, %s13_s12  }
   0x2   : > { %p138_p1 = scmp.lt.s32.totalorder %s768_s12, 3 }
   0x4   : > { %p139_p2 = pnand %p618_p0, %p138_p1 }
   0x5   : > { %s619_s16 = sshll.u32 (!%p139_p2), %s614_s13, 5 }
   0x6   : > { %142 = sbr.rel (%p139_p2) target bundleno = 224 (0xe0), region = 32  ;;  %p163_p3 = scmp.lt.s32.totalorder (!%p139_p2), %s619_s16, 63 }
   0xb   : > { %v740_v0 = vld [vmem:[%s964_s1 + $0x18] sm:$0xff]  ;;  %v739_v1 = vld [vmem:[%s964_s1 + $0x10] sm:$0xff]  ;;  %s968_s16 = smov (!%p163_p3, %s619_s16), 63  ;;  %v738_v2 = vld [vmem:[%s964_s1 + $0x8] sm:$0xff]  ;;  %vm323_vm0 = vcmask 523264   ;;  %vm525_vm1 = vcmask 257024  }
   0xc   : > { %376 = vmatpush.bf16.msra.mxu0 %v740_v0  ;;  %741 = vmatpush.bf16.msra.mxu1 %v740_v0  ;;  %s620_s21 = sshll.u32 %s968_s16, 2  ;;  %v737_v3 = vld [vmem:[%s964_s1] sm:$0xff] }
   0xd   : > { %742 = vmatpush.bf16.msra.mxu2 %v740_v0  ;;  %743 = vmatpush.bf16.msra.mxu3 %v740_v0  ;;  %s818_s26 = scalar_lea.vmem %s963_s0, %s620_s21  ;;  %v855_v20 = vld [vmem:[%s965_s2] ss:$0 sm:$0xff]  ;;  %s864_s4 = scalar_lea.vmem %s966_s3, %s620_s21 }
   0xe   : > { %v721_v4 = vld [vmem:[%s818_s26] sm:$0xff]  ;;  %v722_v8 = vld [vmem:[%s818_s26 + $0x8] sm:$0xff]  ;;  %v723_v12 = vld [vmem:[%s818_s26 + $0x10] sm:$0xff] }
   0xf   : > { %v725_v5 = vld [vmem:[%s818_s26 + $0x20] sm:$0xff]  ;;  %v726_v9 = vld [vmem:[%s818_s26 + $0x28] sm:$0xff]  ;;  %v727_v13 = vld [vmem:[%s818_s26 + $0x30] sm:$0xff] }
  0x10   : > { %377 = vmatpush.bf16.msra.mxu0 %v739_v1  ;;  %744 = vmatpush.bf16.msra.mxu1 %v739_v1  ;;  %v729_v6 = vld [vmem:[%s818_s26 + $0x40] sm:$0xff]  ;;  %v730_v10 = vld [vmem:[%s818_s26 + $0x48] sm:$0xff]  ;;  %v731_v14 = vld [vmem:[%s818_s26 + $0x50] sm:$0xff] }
  0x11   : > { %745 = vmatpush.bf16.msra.mxu2 %v739_v1  ;;  %746 = vmatpush.bf16.msra.mxu3 %v739_v1  ;;  %v733_v7 = vld [vmem:[%s818_s26 + $0x60] sm:$0xff]  ;;  %v734_v11 = vld [vmem:[%s818_s26 + $0x68] sm:$0xff]  ;;  %v735_v15 = vld [vmem:[%s818_s26 + $0x70] sm:$0xff] }
  0x12   : > { %v724_v16 = vld [vmem:[%s818_s26 + $0x18] sm:$0xff] }
  0x13   : > { %v728_v17 = vld [vmem:[%s818_s26 + $0x38] sm:$0xff] }
  0x14   : > { %378 = vmatpush.bf16.msra.mxu0 %v738_v2  ;;  %747 = vmatpush.bf16.msra.mxu1 %v738_v2  ;;  %v732_v18 = vld [vmem:[%s818_s26 + $0x58] sm:$0xff] }
  0x15   : > { %748 = vmatpush.bf16.msra.mxu2 %v738_v2  ;;  %749 = vmatpush.bf16.msra.mxu3 %v738_v2  ;;  %v736_v19 = vld [vmem:[%s818_s26 + $0x78] sm:$0xff] }
  0x18   : > { %379 = vmatpush.bf16.msra.mxu0 %v737_v3  ;;  %750 = vmatpush.bf16.msra.mxu1 %v737_v3 }
  0x19   : > { %751 = vmatpush.bf16.msra.mxu2 %v737_v3  ;;  %752 = vmatpush.bf16.msra.mxu3 %v737_v3 }
  0x1b   : > { %703 = vmatmul.msk.bf16.vlgmr.msra.gmra.mxu0 %vm323_vm0, %v721_v4  ;;  %707 = vmatmul.msk.bf16.vlgmr.msra.gmra.mxu1 %vm323_vm0, %v725_v5 }
  0x1c   : > { %711 = vmatmul.msk.bf16.vlgmr.msra.gmra.mxu2 %vm323_vm0, %v729_v6  ;;  %715 = vmatmul.msk.bf16.vlgmr.msra.gmra.mxu3 %vm323_vm0, %v733_v7 }
  0x2b   : > { %704 = vmatmul.msk.bf16.gmra.mxu0 %vm323_vm0, %v722_v8  ;;  %708 = vmatmul.msk.bf16.gmra.mxu1 %vm323_vm0, %v726_v9 }
  0x2c   : > { %712 = vmatmul.msk.bf16.gmra.mxu2 %vm323_vm0, %v730_v10  ;;  %716 = vmatmul.msk.bf16.gmra.mxu3 %vm323_vm0, %v734_v11 }
  0x3b   : > { %705 = vmatmul.msk.bf16.gmra.mxu0 %vm323_vm0, %v723_v12  ;;  %709 = vmatmul.msk.bf16.gmra.mxu1 %vm323_vm0, %v727_v13 }
  0x3c   : > { %713 = vmatmul.msk.bf16.gmra.mxu2 %vm323_vm0, %v731_v14  ;;  %717 = vmatmul.msk.bf16.gmra.mxu3 %vm323_vm0, %v735_v15 }
  0x4b   : > { %706 = vmatmul.msk.bf16.gmra.mxu0 %vm323_vm0, %v724_v16  ;;  %710 = vmatmul.msk.bf16.gmra.mxu1 %vm323_vm0, %v728_v17 }
  0x4c   : > { %714 = vmatmul.msk.bf16.gmra.mxu2 %vm323_vm0, %v732_v18  ;;  %718 = vmatmul.msk.bf16.gmra.mxu3 %vm323_vm0, %v736_v19 }
  0x98   : > { %v381_v21 = vpop.f32.mrf.mxu0  ;;  %v401_v22 = vpop.f32.mrf.mxu1 }
  0x99   : > { %v382_v23 = vadd.f32 %v855_v20, %v381_v21  ;;  %v402_v24 = vadd.f32 %v855_v20, %v401_v22 }
  0x9b   : > { %v461_v25 = vmax.f32 %v382_v23, 0.0  ;;  %v469_v26 = vmax.f32 %v402_v24, 0.0 }
  0x9d   : > { %v493_v27 = vpack.c.bf16 %v461_v25, %v461_v25  ;;  %v501_v28 = vpack.c.bf16 %v469_v26, %v469_v26 }
  0x9f   : > { %526 = vst.msk [vmem:[%s864_s4] sm:$0xf] %vm525_vm1, %v493_v27  ;;  %v421_v29 = vpop.f32.mrf.mxu2  ;;  %v441_v30 = vpop.f32.mrf.mxu3 }
  0xa0   : > { %534 = vst.msk [vmem:[%s864_s4 + $0x20] sm:$0xf] %vm525_vm1, %v501_v28  ;;  %v422_v31 = vadd.f32 %v855_v20, %v421_v29  ;;  %v442_v32 = vadd.f32 %v855_v20, %v441_v30  ;;  %v383_v33 = vpop.f32.mrf.mxu0  ;;  %v403_v34 = vpop.f32.mrf.mxu1 }
  0xa1   : > { %v384_v35 = vadd.f32 %v855_v20, %v383_v33  ;;  %v404_v36 = vadd.f32 %v855_v20, %v403_v34 }
  0xa2   : > { %v477_v37 = vmax.f32 %v422_v31, 0.0  ;;  %v485_v38 = vmax.f32 %v442_v32, 0.0 }
  0xa3   : > { %v462_v39 = vmax.f32 %v384_v35, 0.0  ;;  %v470_v40 = vmax.f32 %v404_v36, 0.0 }
  0xa4   : > { %v509_v41 = vpack.c.bf16 %v477_v37, %v477_v37  ;;  %v517_v42 = vpack.c.bf16 %v485_v38, %v485_v38 }
  0xa5   : > { %v494_v43 = vpack.c.bf16 %v462_v39, %v462_v39  ;;  %v502_v44 = vpack.c.bf16 %v470_v40, %v470_v40 }
  0xa6   : > { %542 = vst.msk [vmem:[%s864_s4 + $0x40] sm:$0xf] %vm525_vm1, %v509_v41 }
  0xa7   : > { %550 = vst.msk [vmem:[%s864_s4 + $0x60] sm:$0xf] %vm525_vm1, %v517_v42  ;;  %v423_v45 = vpop.f32.mrf.mxu2  ;;  %v443_v46 = vpop.f32.mrf.mxu3 }
  0xa8   : > { %527 = vst.msk [vmem:[%s864_s4 + $0x4] sm:$0xf] %vm525_vm1, %v494_v43  ;;  %v424_v47 = vadd.f32 %v855_v20, %v423_v45  ;;  %v444_v48 = vadd.f32 %v855_v20, %v443_v46  ;;  %v386_v49 = vpop.f32.mrf.mxu0  ;;  %v406_v50 = vpop.f32.mrf.mxu1 }
  0xa9   : > { %535 = vst.msk [vmem:[%s864_s4 + $0x24] sm:$0xf] %vm525_vm1, %v502_v44  ;;  %v387_v51 = vadd.f32 %v855_v20, %v386_v49  ;;  %v407_v52 = vadd.f32 %v855_v20, %v406_v50 }
  0xaa   : > { %v478_v53 = vmax.f32 %v424_v47, 0.0  ;;  %v486_v54 = vmax.f32 %v444_v48, 0.0 }
  0xab   : > { %v463_v55 = vmax.f32 %v387_v51, 0.0  ;;  %v471_v56 = vmax.f32 %v407_v52, 0.0 }
  0xac   : > { %v510_v57 = vpack.c.bf16 %v478_v53, %v478_v53  ;;  %v518_v58 = vpack.c.bf16 %v486_v54, %v486_v54 }
  0xad   : > { %v495_v59 = vpack.c.bf16 %v463_v55, %v463_v55  ;;  %v503_v60 = vpack.c.bf16 %v471_v56, %v471_v56 }
  0xae   : > { %543 = vst.msk [vmem:[%s864_s4 + $0x44] sm:$0xf] %vm525_vm1, %v510_v57 }
  0xaf   : > { %551 = vst.msk [vmem:[%s864_s4 + $0x64] sm:$0xf] %vm525_vm1, %v518_v58  ;;  %v426_v61 = vpop.f32.mrf.mxu2  ;;  %v446_v62 = vpop.f32.mrf.mxu3 }
  0xb0   : > { %528 = vst.msk [vmem:[%s864_s4 + $0x8] sm:$0xf] %vm525_vm1, %v495_v59  ;;  %v427_v63 = vadd.f32 %v855_v20, %v426_v61  ;;  %v447_v0 = vadd.f32 %v855_v20, %v446_v62  ;;  %v388_v1 = vpop.f32.mrf.mxu0  ;;  %v408_v2 = vpop.f32.mrf.mxu1 }
  0xb1   : > { %536 = vst.msk [vmem:[%s864_s4 + $0x28] sm:$0xf] %vm525_vm1, %v503_v60  ;;  %v389_v3 = vadd.f32 %v855_v20, %v388_v1  ;;  %v409_v4 = vadd.f32 %v855_v20, %v408_v2 }
  0xb2   : > { %v479_v5 = vmax.f32 %v427_v63, 0.0  ;;  %v487_v6 = vmax.f32 %v447_v0, 0.0 }
  0xb3   : > { %v464_v7 = vmax.f32 %v389_v3, 0.0  ;;  %v472_v8 = vmax.f32 %v409_v4, 0.0 }
  0xb4   : > { %v511_v9 = vpack.c.bf16 %v479_v5, %v479_v5  ;;  %v519_v10 = vpack.c.bf16 %v487_v6, %v487_v6 }
  0xb5   : > { %v496_v11 = vpack.c.bf16 %v464_v7, %v464_v7  ;;  %v504_v12 = vpack.c.bf16 %v472_v8, %v472_v8 }
  0xb6   : > { %544 = vst.msk [vmem:[%s864_s4 + $0x48] sm:$0xf] %vm525_vm1, %v511_v9 }
  0xb7   : > { %552 = vst.msk [vmem:[%s864_s4 + $0x68] sm:$0xf] %vm525_vm1, %v519_v10  ;;  %v428_v13 = vpop.f32.mrf.mxu2  ;;  %v448_v14 = vpop.f32.mrf.mxu3 }
  0xb8   : > { %529 = vst.msk [vmem:[%s864_s4 + $0xc] sm:$0xf] %vm525_vm1, %v496_v11  ;;  %v429_v15 = vadd.f32 %v855_v20, %v428_v13  ;;  %v449_v16 = vadd.f32 %v855_v20, %v448_v14  ;;  %v391_v17 = vpop.f32.mrf.mxu0  ;;  %v411_v18 = vpop.f32.mrf.mxu1 }
  0xb9   : > { %537 = vst.msk [vmem:[%s864_s4 + $0x2c] sm:$0xf] %vm525_vm1, %v504_v12  ;;  %v392_v19 = vadd.f32 %v855_v20, %v391_v17  ;;  %v412_v21 = vadd.f32 %v855_v20, %v411_v18 }
  0xba   : > { %v480_v22 = vmax.f32 %v429_v15, 0.0  ;;  %v488_v23 = vmax.f32 %v449_v16, 0.0 }
  0xbb   : > { %v465_v24 = vmax.f32 %v392_v19, 0.0  ;;  %v473_v25 = vmax.f32 %v412_v21, 0.0 }
  0xbc   : > { %v512_v26 = vpack.c.bf16 %v480_v22, %v480_v22  ;;  %v520_v27 = vpack.c.bf16 %v488_v23, %v488_v23 }
  0xbd   : > { %v497_v28 = vpack.c.bf16 %v465_v24, %v465_v24  ;;  %v505_v29 = vpack.c.bf16 %v473_v25, %v473_v25 }
  0xbe   : > { %545 = vst.msk [vmem:[%s864_s4 + $0x4c] sm:$0xf] %vm525_vm1, %v512_v26 }
  0xbf   : > { %553 = vst.msk [vmem:[%s864_s4 + $0x6c] sm:$0xf] %vm525_vm1, %v520_v27  ;;  %v431_v30 = vpop.f32.mrf.mxu2  ;;  %v451_v31 = vpop.f32.mrf.mxu3 }
  0xc0   : > { %530 = vst.msk [vmem:[%s864_s4 + $0x10] sm:$0xf] %vm525_vm1, %v497_v28  ;;  %v432_v32 = vadd.f32 %v855_v20, %v431_v30  ;;  %v452_v33 = vadd.f32 %v855_v20, %v451_v31  ;;  %v393_v34 = vpop.f32.mrf.mxu0  ;;  %v413_v35 = vpop.f32.mrf.mxu1 }
  0xc1   : > { %538 = vst.msk [vmem:[%s864_s4 + $0x30] sm:$0xf] %vm525_vm1, %v505_v29  ;;  %v394_v36 = vadd.f32 %v855_v20, %v393_v34  ;;  %v414_v37 = vadd.f32 %v855_v20, %v413_v35 }
  0xc2   : > { %v481_v38 = vmax.f32 %v432_v32, 0.0  ;;  %v489_v39 = vmax.f32 %v452_v33, 0.0 }
  0xc3   : > { %v466_v40 = vmax.f32 %v394_v36, 0.0  ;;  %v474_v41 = vmax.f32 %v414_v37, 0.0 }
  0xc4   : > { %v513_v42 = vpack.c.bf16 %v481_v38, %v481_v38  ;;  %v521_v43 = vpack.c.bf16 %v489_v39, %v489_v39 }
  0xc5   : > { %v498_v44 = vpack.c.bf16 %v466_v40, %v466_v40  ;;  %v506_v45 = vpack.c.bf16 %v474_v41, %v474_v41 }
  0xc6   : > { %546 = vst.msk [vmem:[%s864_s4 + $0x50] sm:$0xf] %vm525_vm1, %v513_v42 }
  0xc7   : > { %554 = vst.msk [vmem:[%s864_s4 + $0x70] sm:$0xf] %vm525_vm1, %v521_v43  ;;  %v433_v46 = vpop.f32.mrf.mxu2  ;;  %v453_v47 = vpop.f32.mrf.mxu3 }
  0xc8   : > { %531 = vst.msk [vmem:[%s864_s4 + $0x14] sm:$0xf] %vm525_vm1, %v498_v44  ;;  %v434_v48 = vadd.f32 %v855_v20, %v433_v46  ;;  %v454_v49 = vadd.f32 %v855_v20, %v453_v47  ;;  %v396_v50 = vpop.f32.mrf.mxu0  ;;  %v416_v51 = vpop.f32.mrf.mxu1 }
  0xc9   : > { %539 = vst.msk [vmem:[%s864_s4 + $0x34] sm:$0xf] %vm525_vm1, %v506_v45  ;;  %v397_v52 = vadd.f32 %v855_v20, %v396_v50  ;;  %v417_v53 = vadd.f32 %v855_v20, %v416_v51 }
  0xca   : > { %v482_v54 = vmax.f32 %v434_v48, 0.0  ;;  %v490_v55 = vmax.f32 %v454_v49, 0.0 }
  0xcb   : > { %v467_v56 = vmax.f32 %v397_v52, 0.0  ;;  %v475_v57 = vmax.f32 %v417_v53, 0.0 }
  0xcc   : > { %v514_v58 = vpack.c.bf16 %v482_v54, %v482_v54  ;;  %v522_v59 = vpack.c.bf16 %v490_v55, %v490_v55 }
  0xcd   : > { %v499_v60 = vpack.c.bf16 %v467_v56, %v467_v56  ;;  %v507_v61 = vpack.c.bf16 %v475_v57, %v475_v57 }
  0xce   : > { %547 = vst.msk [vmem:[%s864_s4 + $0x54] sm:$0xf] %vm525_vm1, %v514_v58 }
  0xcf   : > { %555 = vst.msk [vmem:[%s864_s4 + $0x74] sm:$0xf] %vm525_vm1, %v522_v59  ;;  %v436_v62 = vpop.f32.mrf.mxu2  ;;  %v456_v63 = vpop.f32.mrf.mxu3 }
  0xd0   : > { %532 = vst.msk [vmem:[%s864_s4 + $0x18] sm:$0xf] %vm525_vm1, %v499_v60  ;;  %v437_v0 = vadd.f32 %v855_v20, %v436_v62  ;;  %v457_v1 = vadd.f32 %v855_v20, %v456_v63  ;;  %v398_v2 = vpop.f32.mrf.mxu0  ;;  %v418_v3 = vpop.f32.mrf.mxu1 }
  0xd1   : > { %540 = vst.msk [vmem:[%s864_s4 + $0x38] sm:$0xf] %vm525_vm1, %v507_v61  ;;  %v399_v4 = vadd.f32 %v855_v20, %v398_v2  ;;  %v419_v5 = vadd.f32 %v855_v20, %v418_v3 }
  0xd2   : > { %v483_v6 = vmax.f32 %v437_v0, 0.0  ;;  %v491_v7 = vmax.f32 %v457_v1, 0.0 }
  0xd3   : > { %v468_v8 = vmax.f32 %v399_v4, 0.0  ;;  %v476_v9 = vmax.f32 %v419_v5, 0.0 }
  0xd4   : > { %v515_v10 = vpack.c.bf16 %v483_v6, %v483_v6  ;;  %v523_v11 = vpack.c.bf16 %v491_v7, %v491_v7 }
  0xd5   : > { %v500_v12 = vpack.c.bf16 %v468_v8, %v468_v8  ;;  %v508_v13 = vpack.c.bf16 %v476_v9, %v476_v9 }
  0xd6   : > { %548 = vst.msk [vmem:[%s864_s4 + $0x58] sm:$0xf] %vm525_vm1, %v515_v10 }
  0xd7   : > { %556 = vst.msk [vmem:[%s864_s4 + $0x78] sm:$0xf] %vm525_vm1, %v523_v11  ;;  %v438_v14 = vpop.f32.mrf.mxu2  ;;  %v458_v15 = vpop.f32.mrf.mxu3 }
  0xd8   : > { %533 = vst.msk [vmem:[%s864_s4 + $0x1c] sm:$0xf] %vm525_vm1, %v500_v12  ;;  %v439_v16 = vadd.f32 %v855_v20, %v438_v14  ;;  %v459_v17 = vadd.f32 %v855_v20, %v458_v15 }
  0xd9   : > { %541 = vst.msk [vmem:[%s864_s4 + $0x3c] sm:$0xf] %vm525_vm1, %v508_v13 }
  0xda   : > { %v484_v18 = vmax.f32 %v439_v16, 0.0  ;;  %v492_v19 = vmax.f32 %v459_v17, 0.0 }
  0xdc   : > { %v516_v21 = vpack.c.bf16 %v484_v18, %v484_v18  ;;  %v524_v22 = vpack.c.bf16 %v492_v19, %v492_v19 }
  0xde   : > { %549 = vst.msk [vmem:[%s864_s4 + $0x5c] sm:$0xf] %vm525_vm1, %v516_v21 }
  0xdf   : > { %557 = vst.msk [vmem:[%s864_s4 + $0x7c] sm:$0xf] %vm525_vm1, %v524_v22 }
  0xe0 PF: > { %s13_s12 = sadd.s32 1, %s768_s12  }
  0xe1   : > { %p10_p4 = scmp.ge.s32.totalorder %s13_s12, 4  }
  0xe3   :  { %12 = sbr.rel (!%p10_p4) target bundleno = 1 (0x1), region = 62 }

// kernel: _lambda_.27
= control target key start
LH: loop header
LB: loop body
LE: loop exit
PB: predicated region body
PF: predicated region fallthrough
CT: control target
= control target key end

     0   :  { %s567_s15 = smov 0   ;;  %s601_s0 = inlined_call_operand.vmem [shape: bf16[128,32], index: 0, kind: input, shape index: {}]   ;;  %s602_s1 = inlined_call_operand.vmem [shape: bf16[32,128], index: 1, kind: input, shape index: {}]   ;;  %s603_s2 = inlined_call_operand.vmem [shape: f32[1,128], index: 2, kind: input, shape index: {}]   ;;  %s604_s3 = inlined_call_operand.vmem [shape: bf16[128,128], index: 3, kind: input, shape index: {}]   ;;  %s605_s4 = inlined_call_operand.vmem [shape: bf16[128,128], index: 4, kind: output, shape index: {}]  }
   0x1 LB: > { %s430_s16 = sadd.s32 4294967295, %s540_s15   ;;  %p434_p0 = scmp.ge.s32.totalorder %s540_s15, 1  ;;  %s540_s15 = sphi %s567_s15, %s14_s15  }
   0x2   : > { %p174_p1 = scmp.lt.s32.totalorder %s540_s15, 3 }
   0x4   : > { %p175_p2 = pnand %p434_p0, %p174_p1 }
   0x5   : > { %s435_s19 = sshll.u32 (!%p175_p2), %s430_s16, 3 }
   0x6   : > { %178 = sbr.rel (%p175_p2) target bundleno = 170 (0xaa), region = 36  ;;  %p206_p3 = scmp.lt.s32.totalorder (!%p175_p2), %s435_s19, 15 }
   0xb   : > { %v476_v0 = vld [vmem:[%s602_s1 + $0x8] sm:$0xff]  ;;  %v475_v1 = vld [vmem:[%s602_s1] sm:$0xff]  ;;  %s607_s19 = smov (!%p206_p3, %s435_s19), 15  ;;  %vm272_vm0 = vcmask 261120  }
   0xc   : > { %291 = vmatpush.bf16.msra.mxu0 %v476_v0  ;;  %519 = vmatpush.bf16.msra.mxu1 %v476_v0  ;;  %s581_s22 = sshll.u32 %s607_s19, 2  ;;  %v533_v8 = vld [vmem:[%s603_s2] ss:$0 sm:$0xff] }
   0xd   : > { %520 = vmatpush.bf16.msra.mxu2 %v476_v0  ;;  %521 = vmatpush.bf16.msra.mxu3 %v476_v0  ;;  %s209_s25 = scalar_lea.vmem %s601_s0, %s581_s22  ;;  %s215_s28 = scalar_lea.vmem %s604_s3, %s581_s22 }
   0xe   : > { %v471_v2 = vld [vmem:[%s209_s25] sm:$0xff]  ;;  %v472_v3 = vld [vmem:[%s209_s25 + $0x8] sm:$0xff]  ;;  %v473_v4 = vld [vmem:[%s209_s25 + $0x10] sm:$0xff]  ;;  %s221_s7 = scalar_lea.vmem %s605_s4, %s581_s22 }
   0xf   : > { %v474_v5 = vld [vmem:[%s209_s25 + $0x18] sm:$0xff]  ;;  %v478_v9 = vld [vmem:[%s215_s28] sm:$0xff]   ;;  %v513_v10 = vld [vmem:[%s215_s28 + $0x8] sm:$0xff]  }
  0x10   : > { %292 = vmatpush.bf16.msra.mxu0 %v475_v1  ;;  %522 = vmatpush.bf16.msra.mxu1 %v475_v1  ;;  %v479_v12 = vunpack.c.l.bf16 %v478_v9  ;;  %v483_v14 = vunpack.c.l.bf16 %v513_v10  ;;  %v480_v17 = vunpack.c.h.bf16 %v478_v9  ;;  %v484_v18 = vunpack.c.h.bf16 %v513_v10  ;;  %v514_v23 = vld [vmem:[%s215_s28 + $0x10] sm:$0xff]   ;;  %v515_v24 = vld [vmem:[%s215_s28 + $0x18] sm:$0xff]  }
  0x11   : > { %523 = vmatpush.bf16.msra.mxu2 %v475_v1  ;;  %524 = vmatpush.bf16.msra.mxu3 %v475_v1  ;;  %v487_v30 = vunpack.c.l.bf16 %v514_v23  ;;  %v491_v32 = vunpack.c.l.bf16 %v515_v24  ;;  %v488_v37 = vunpack.c.h.bf16 %v514_v23  ;;  %v492_v38 = vunpack.c.h.bf16 %v515_v24 }
  0x13   : > { %465 = vmatmul.msk.bf16.vlgmr.msra.gmra.mxu0 %vm272_vm0, %v471_v2  ;;  %466 = vmatmul.msk.bf16.vlgmr.msra.gmra.mxu1 %vm272_vm0, %v472_v3 }
  0x14   : > { %467 = vmatmul.msk.bf16.vlgmr.msra.gmra.mxu2 %vm272_vm0, %v473_v4  ;;  %468 = vmatmul.msk.bf16.vlgmr.msra.gmra.mxu3 %vm272_vm0, %v474_v5 }
  0x90   : > { %v294_v6 = vpop.f32.mrf.mxu0  ;;  %v299_v7 = vpop.f32.mrf.mxu1 }
  0x91   : > { %v295_v11 = vadd.f32 %v533_v8, %v294_v6  ;;  %v300_v13 = vadd.f32 %v533_v8, %v299_v7 }
  0x93   : > { %v330_v21 = vadd.f32 %v479_v12, %v295_v11  ;;  %v332_v22 = vadd.f32 %v483_v14, %v300_v13 }
  0x95   : > { %v338_v33 = vmax.f32 %v330_v21, 0.0  ;;  %v340_v34 = vmax.f32 %v332_v22, 0.0 }
  0x97   : > { %v304_v15 = vpop.f32.mrf.mxu2  ;;  %v309_v16 = vpop.f32.mrf.mxu3 }
  0x98   : > { %v296_v19 = vpop.f32.mrf.mxu0  ;;  %v301_v20 = vpop.f32.mrf.mxu1  ;;  %v305_v29 = vadd.f32 %v533_v8, %v304_v15  ;;  %v310_v31 = vadd.f32 %v533_v8, %v309_v16 }
  0x99   : > { %v297_v25 = vadd.f32 %v533_v8, %v296_v19  ;;  %v302_v26 = vadd.f32 %v533_v8, %v301_v20 }
  0x9a   : > { %v334_v43 = vadd.f32 %v487_v30, %v305_v29  ;;  %v336_v44 = vadd.f32 %v491_v32, %v310_v31 }
  0x9b   : > { %v331_v27 = vadd.f32 %v480_v17, %v297_v25  ;;  %v333_v28 = vadd.f32 %v484_v18, %v302_v26 }
  0x9c   : > { %v342_v49 = vmax.f32 %v334_v43, 0.0  ;;  %v344_v50 = vmax.f32 %v336_v44, 0.0 }
  0x9d   : > { %v339_v35 = vmax.f32 %v331_v27, 0.0  ;;  %v341_v36 = vmax.f32 %v333_v28, 0.0 }
  0x9f   : > { %v496_v39 = vpack.c.bf16 %v339_v35, %v338_v33  ;;  %v501_v40 = vpack.c.bf16 %v341_v36, %v340_v34  ;;  %v306_v41 = vpop.f32.mrf.mxu2  ;;  %v311_v42 = vpop.f32.mrf.mxu3 }
  0xa0   : > { %v307_v45 = vadd.f32 %v533_v8, %v306_v41  ;;  %v312_v46 = vadd.f32 %v533_v8, %v311_v42 }
  0xa1   : > { %497 = vst [vmem:[%s221_s7] sm:$0xff] %v496_v39  }
  0xa2   : > { %516 = vst [vmem:[%s221_s7 + $0x8] sm:$0xff] %v501_v40   ;;  %v335_v47 = vadd.f32 %v488_v37, %v307_v45  ;;  %v337_v48 = vadd.f32 %v492_v38, %v312_v46 }
  0xa4   : > { %v343_v51 = vmax.f32 %v335_v47, 0.0  ;;  %v345_v52 = vmax.f32 %v337_v48, 0.0 }
  0xa6   : > { %v506_v53 = vpack.c.bf16 %v343_v51, %v342_v49  ;;  %v511_v54 = vpack.c.bf16 %v345_v52, %v344_v50 }
  0xa8   : > { %517 = vst [vmem:[%s221_s7 + $0x10] sm:$0xff] %v506_v53  }
  0xa9   : > { %518 = vst [vmem:[%s221_s7 + $0x18] sm:$0xff] %v511_v54  }
  0xaa PF: > { %s14_s15 = sadd.s32 1, %s540_s15  }
  0xab   : > { %p11_p4 = scmp.ge.s32.totalorder %s14_s15, 4  }
  0xad   :  { %13 = sbr.rel (!%p11_p4) target bundleno = 1 (0x1), region = 69 }

// kernel: _lambda_.25
= control target key start
LH: loop header
LB: loop body
LE: loop exit
PB: predicated region body
PF: predicated region fallthrough
CT: control target
= control target key end

     0   :  { %s802_s12 = smov 0   ;;  %s942_s0 = inlined_call_operand.vmem [shape: bf16[128,288], index: 0, kind: input, shape index: {}]   ;;  %s943_s1 = inlined_call_operand.vmem [shape: bf16[288,32], index: 1, kind: input, shape index: {}]   ;;  %s944_s2 = inlined_call_operand.vmem [shape: f32[1,32], index: 2, kind: input, shape index: {}]   ;;  %s945_s3 = inlined_call_operand.vmem [shape: bf16[128,32], index: 3, kind: output, shape index: {}]  }
   0x1 LB: > { %s583_s13 = sadd.s32 4294967295, %s780_s12   ;;  %p587_p0 = scmp.ge.s32.totalorder %s780_s12, 1  ;;  %s780_s12 = sphi %s802_s12, %s13_s12  }
   0x2   : > { %p139_p1 = scmp.lt.s32.totalorder %s780_s12, 3 }
   0x4   : > { %p140_p2 = pnand %p587_p0, %p139_p1 }
   0x5   : > { %s588_s18 = sshll.u32 (!%p140_p2), %s583_s13, 3 }
   0x6   : > { %143 = sbr.rel (%p140_p2) target bundleno = 226 (0xe2), region = 32  ;;  %p165_p3 = scmp.lt.s32.totalorder (!%p140_p2), %s588_s18, 15 }
   0xb   : > { %v737_v0 = vld [vmem:[%s943_s1 + $0x38] sm:$0xff]  ;;  %v747_v2 = vld [vmem:[%s943_s1 + $0x88] sm:$0xff]  ;;  %v736_v3 = vld [vmem:[%s943_s1 + $0x30] sm:$0xff]  ;;  %s947_s18 = smov (!%p165_p3, %s588_s18), 15  ;;  %vm402_vm0 = vcmask 261120   ;;  %vm518_vm1 = vcmask 257024  }
   0xc   : > { %v816_v1 = vld [vmem:[%s943_s1 + $0x78] sm:$0xff]  ;;  %415 = vmatpush.bf16.msra.mxu0 %v737_v0  ;;  %748 = vmatpush.bf16.msra.mxu3 %v737_v0  ;;  %v744_v4 = vld [vmem:[%s943_s1 + $0x70] sm:$0xff]  ;;  %v746_v5 = vld [vmem:[%s943_s1 + $0x80] sm:$0xff]  ;;  %s764_s27 = smul.u32 12, %s947_s18  ;;  %s591_s5 = sshll.u32 %s947_s18, 2 }
   0xd   : > { %756 = vmatpush.bf16.msra.mxu1 %v816_v1  ;;  %479 = vmatpush.bf16.msra.mxu2 %v747_v2  ;;  %v735_v6 = vld [vmem:[%s943_s1 + $0x28] sm:$0xff]  ;;  %v734_v11 = vld [vmem:[%s943_s1 + $0x20] sm:$0xff]  ;;  %v733_v13 = vld [vmem:[%s943_s1 + $0x18] sm:$0xff]  ;;  %s914_s8 = scalar_lea.vmem %s945_s3, %s591_s5 }
   0xe   : > { %v743_v7 = vld [vmem:[%s943_s1 + $0x68] sm:$0xff]  ;;  %s843_s7 = scalar_lea.vmem %s942_s0, %s764_s27  ;;  %v742_v12 = vld [vmem:[%s943_s1 + $0x60] sm:$0xff]  ;;  %v741_v14 = vld [vmem:[%s943_s1 + $0x58] sm:$0xff] }
   0xf   : > { %v602_v8 = vld [vmem:[%s843_s7 + $0x8] sm:$0xf]  ;;  %v720_v9 = vld [vmem:[%s843_s7 + $0x10] sm:$0xf0]  ;;  %v614_v17 = vld [vmem:[%s843_s7 + $0x20] sm:$0xf] }
  0x10   : > { %416 = vmatpush.bf16.msra.mxu0 %v736_v3  ;;  %749 = vmatpush.bf16.msra.mxu3 %v736_v3  ;;  %v603_v10 = vor.u32 %v720_v9, %v602_v8  ;;  %v732_v15 = vld [vmem:[%s943_s1 + $0x10] sm:$0xff]  ;;  %v723_v18 = vld [vmem:[%s843_s7 + $0x28] sm:$0xf0]  ;;  %v730_v22 = vld [vmem:[%s943_s1] sm:$0xff] }
  0x11   : > { %757 = vmatpush.bf16.msra.mxu1 %v744_v4  ;;  %480 = vmatpush.bf16.msra.mxu2 %v746_v5  ;;  %v740_v16 = vld [vmem:[%s943_s1 + $0x50] sm:$0xff]  ;;  %v731_v19 = vld [vmem:[%s943_s1 + $0x8] sm:$0xff]  ;;  %v615_v21 = vor.u32 %v723_v18, %v614_v17  ;;  %v606_v23 = vld [vmem:[%s843_s7 + $0x18] sm:$0xf] }
  0x12   : > { %v739_v20 = vld [vmem:[%s943_s1 + $0x48] sm:$0xff]  ;;  %v722_v24 = vld [vmem:[%s843_s7 + $0x20] sm:$0xf0]  ;;  %v594_v25 = vld [vmem:[%s843_s7] sm:$0xf] }
  0x13   : > { %v719_v26 = vld [vmem:[%s843_s7 + $0x8] sm:$0xf0]  ;;  %v738_v27 = vld [vmem:[%s943_s1 + $0x40] sm:$0xff]  ;;  %v721_v28 = vld [vmem:[%s843_s7 + $0x1c] sm:$0xf]  ;;  %v607_v30 = vor.u32 %v722_v24, %v606_v23 }
  0x14   : > { %417 = vmatpush.bf16.msra.mxu0 %v735_v6  ;;  %750 = vmatpush.bf16.msra.mxu3 %v735_v6  ;;  %v608_v29 = vld [vmem:[%s843_s7 + $0x24] sm:$0xf0]  ;;  %v595_v31 = vor.u32 %v719_v26, %v594_v25  ;;  %v626_v33 = vld [vmem:[%s843_s7 + $0x38] sm:$0xf]  ;;  %v726_v34 = vld [vmem:[%s843_s7 + $0x40] sm:$0xf0] }
  0x15   : > { %758 = vmatpush.bf16.msra.mxu1 %v743_v7  ;;  %712 = vmatmul.msk.bf16.vlgmr.msra.gmra.mxu2 %vm402_vm0, %v603_v10  ;;  %v611_v32 = vor.u32 %v721_v28, %v608_v29  ;;  %v627_v35 = vor.u32 %v726_v34, %v626_v33  ;;  %v618_v36 = vld [vmem:[%s843_s7 + $0x30] sm:$0xf]  ;;  %v725_v37 = vld [vmem:[%s843_s7 + $0x38] sm:$0xf0]  ;;  %v724_v38 = vld [vmem:[%s843_s7 + $0x34] sm:$0xf] }
  0x16   : > { %v620_v39 = vld [vmem:[%s843_s7 + $0x3c] sm:$0xf0]  ;;  %v619_v40 = vor.u32 %v725_v37, %v618_v36  ;;  %v638_v42 = vld [vmem:[%s843_s7 + $0x50] sm:$0xf]  ;;  %v729_v43 = vld [vmem:[%s843_s7 + $0x58] sm:$0xf0] }
  0x17   : > { %v623_v41 = vor.u32 %v724_v38, %v620_v39  ;;  %v639_v44 = vor.u32 %v729_v43, %v638_v42  ;;  %v718_v45 = vld [vmem:[%s843_s7 + $0x4] sm:$0xf]  ;;  %v596_v46 = vld [vmem:[%s843_s7 + $0xc] sm:$0xf0]  ;;  %v630_v48 = vld [vmem:[%s843_s7 + $0x48] sm:$0xf] }
  0x18   : > { %418 = vmatpush.bf16.msra.mxu0 %v734_v11  ;;  %751 = vmatpush.bf16.msra.mxu3 %v734_v11  ;;  %v599_v47 = vor.u32 %v718_v45, %v596_v46  ;;  %v728_v49 = vld [vmem:[%s843_s7 + $0x50] sm:$0xf0]  ;;  %v727_v50 = vld [vmem:[%s843_s7 + $0x4c] sm:$0xf]  ;;  %v632_v51 = vld [vmem:[%s843_s7 + $0x54] sm:$0xf0] }
  0x19   : > { %759 = vmatpush.bf16.msra.mxu1 %v742_v12  ;;  %v631_v52 = vor.u32 %v728_v49, %v630_v48  ;;  %v635_v53 = vor.u32 %v727_v50, %v632_v51  ;;  %v907_v58 = vld [vmem:[%s944_s2] ss:$0 sm:$0xff] }
  0x1c   : > { %419 = vmatpush.bf16.msra.mxu0 %v733_v13  ;;  %752 = vmatpush.bf16.msra.mxu3 %v733_v13 }
  0x1d   : > { %760 = vmatpush.bf16.msra.mxu1 %v741_v14 }
  0x20   : > { %420 = vmatpush.bf16.msra.mxu0 %v732_v15  ;;  %753 = vmatpush.bf16.msra.mxu3 %v732_v15 }
  0x21   : > { %761 = vmatpush.bf16.msra.mxu1 %v740_v16 }
  0x24   : > { %421 = vmatpush.bf16.msra.mxu0 %v731_v19  ;;  %754 = vmatpush.bf16.msra.mxu3 %v731_v19 }
  0x25   : > { %762 = vmatpush.bf16.msra.mxu1 %v739_v20  ;;  %713 = vmatmul.msk.bf16.gmra.mxu2 %vm402_vm0, %v615_v21 }
  0x28   : > { %422 = vmatpush.bf16.msra.mxu0 %v730_v22  ;;  %755 = vmatpush.bf16.msra.mxu3 %v730_v22 }
  0x29   : > { %763 = vmatpush.bf16.msra.mxu1 %v738_v27 }
  0x2b   : > { %428 = vmatmul.bf16.vlgmr.msra.gmra.mxu3 %v607_v30  ;;  %423 = vmatmul.bf16.vlgmr.msra.gmra.mxu0 %v595_v31 }
  0x2c   : > { %444 = vmatpush.bf16.msrb.mxu0 %v816_v1  ;;  %457 = vmatmul.bf16.vlgmr.msra.gmra.mxu1 %v611_v32 }
  0x30   : > { %445 = vmatpush.bf16.msrb.mxu0 %v744_v4 }
  0x34   : > { %446 = vmatpush.bf16.msrb.mxu0 %v743_v7 }
  0x35   : > { %714 = vmatmul.msk.bf16.gmra.mxu2 %vm402_vm0, %v627_v35 }
  0x38   : > { %447 = vmatpush.bf16.msrb.mxu0 %v742_v12 }
  0x3b   : > { %433 = vmatmul.bf16.gmra.mxu3 %v619_v40 }
  0x3c   : > { %448 = vmatpush.bf16.msrb.mxu0 %v741_v14  ;;  %462 = vmatmul.bf16.gmra.mxu1 %v623_v41 }
  0x40   : > { %449 = vmatpush.bf16.msrb.mxu0 %v740_v16 }
  0x44   : > { %450 = vmatpush.bf16.msrb.mxu0 %v739_v20 }
  0x45   : > { %715 = vmatmul.msk.bf16.gmra.mxu2 %vm402_vm0, %v639_v44 }
  0x48   : > { %451 = vmatpush.bf16.msrb.mxu0 %v738_v27 }
  0x4b   : > { %452 = vmatmul.bf16.vlgmr.msrb.gmra.mxu0 %v599_v47  ;;  %438 = vmatmul.bf16.gmra.mxu3 %v631_v52 }
  0x4c   : > { %467 = vmatmul.bf16.gmra.mxu1 %v635_v53 }
  0x98   : > { %v482_v54 = vpop.f32.mrf.mxu2 }
  0xa0   : > { %v484_v55 = vpop.f32.mrf.mxu2 }
  0xa8   : > { %v487_v56 = vpop.f32.mrf.mxu2  ;;  %v424_v63 = vpop.f32.mrf.mxu0 }
  0xa9   : > { %v458_v57 = vpop.f32.mrf.mxu1  ;;  %v425_v17 = vadd.f32 %v907_v58, %v424_v63 }
  0xae   : > { %v429_v59 = vpop.f32.mrf.mxu3 }
  0xaf   : > { %v430_v60 = vadd.f32 %v907_v58, %v429_v59 }
  0xb0   : > { %v489_v0 = vpop.f32.mrf.mxu2  ;;  %v426_v9 = vpop.f32.mrf.mxu0 }
  0xb1   : > { %v459_v61 = vadd.f32 %v458_v57, %v430_v60  ;;  %v460_v62 = vpop.f32.mrf.mxu1  ;;  %v427_v30 = vadd.f32 %v907_v58, %v426_v9 }
  0xb3   : > { %v488_v1 = vadd.f32 %v487_v56, %v459_v61 }
  0xb5   : > { %v504_v2 = vmax.f32 %v488_v1, 0.0 }
  0xb6   : > { %v431_v3 = vpop.f32.mrf.mxu3 }
  0xb7   : > { %v512_v4 = vpack.c.bf16 %v504_v2, %v504_v2  ;;  %v432_v5 = vadd.f32 %v907_v58, %v431_v3 }
  0xb8   : > { %v492_v10 = vpop.f32.mrf.mxu2 }
  0xb9   : > { %521 = vst.msk [vmem:[%s914_s8 + $0x8] sm:$0xf] %vm518_vm1, %v512_v4  ;;  %v461_v6 = vadd.f32 %v460_v62, %v432_v5  ;;  %v463_v7 = vpop.f32.mrf.mxu1 }
  0xbb   : > { %v490_v8 = vadd.f32 %v489_v0, %v461_v6 }
  0xbd   : > { %v505_v11 = vmax.f32 %v490_v8, 0.0 }
  0xbe   : > { %v434_v12 = vpop.f32.mrf.mxu3 }
  0xbf   : > { %v513_v13 = vpack.c.bf16 %v505_v11, %v505_v11  ;;  %v435_v14 = vadd.f32 %v907_v58, %v434_v12 }
  0xc0   : > { %v494_v21 = vpop.f32.mrf.mxu2 }
  0xc1   : > { %522 = vst.msk [vmem:[%s914_s8 + $0xc] sm:$0xf] %vm518_vm1, %v513_v13  ;;  %v464_v15 = vadd.f32 %v463_v7, %v435_v14  ;;  %v465_v18 = vpop.f32.mrf.mxu1 }
  0xc3   : > { %v493_v16 = vadd.f32 %v492_v10, %v464_v15 }
  0xc5   : > { %v506_v19 = vmax.f32 %v493_v16, 0.0 }
  0xc6   : > { %v436_v23 = vpop.f32.mrf.mxu3 }
  0xc7   : > { %v514_v24 = vpack.c.bf16 %v506_v19, %v506_v19  ;;  %v437_v25 = vadd.f32 %v907_v58, %v436_v23 }
  0xc8   : > { %v453_v20 = vpop.f32.mrf.mxu0  ;;  %v497_v39 = vpop.f32.mrf.mxu2 }
  0xc9   : > { %v454_v22 = vadd.f32 %v453_v20, %v425_v17  ;;  %523 = vst.msk [vmem:[%s914_s8 + $0x10] sm:$0xf] %vm518_vm1, %v514_v24  ;;  %v466_v27 = vadd.f32 %v465_v18, %v437_v25  ;;  %v468_v34 = vpop.f32.mrf.mxu1 }
  0xcb   : > { %v483_v26 = vadd.f32 %v482_v54, %v454_v22  ;;  %v495_v29 = vadd.f32 %v494_v21, %v466_v27 }
  0xcd   : > { %v502_v28 = vmax.f32 %v483_v26, 0.0  ;;  %v507_v32 = vmax.f32 %v495_v29, 0.0 }
  0xce   : > { %v439_v36 = vpop.f32.mrf.mxu3 }
  0xcf   : > { %v510_v31 = vpack.c.bf16 %v502_v28, %v502_v28  ;;  %v515_v37 = vpack.c.bf16 %v507_v32, %v507_v32  ;;  %v440_v38 = vadd.f32 %v907_v58, %v439_v36 }
  0xd0   : > { %v455_v33 = vpop.f32.mrf.mxu0  ;;  %v499_v51 = vpop.f32.mrf.mxu2 }
  0xd1   : > { %519 = vst.msk [vmem:[%s914_s8] sm:$0xf] %vm518_vm1, %v510_v31  ;;  %v456_v35 = vadd.f32 %v455_v33, %v427_v30  ;;  %v469_v41 = vadd.f32 %v468_v34, %v440_v38  ;;  %v470_v49 = vpop.f32.mrf.mxu1 }
  0xd2   : > { %524 = vst.msk [vmem:[%s914_s8 + $0x14] sm:$0xf] %vm518_vm1, %v515_v37 }
  0xd3   : > { %v485_v40 = vadd.f32 %v484_v55, %v456_v35  ;;  %v498_v43 = vadd.f32 %v497_v39, %v469_v41 }
  0xd5   : > { %v503_v42 = vmax.f32 %v485_v40, 0.0  ;;  %v508_v45 = vmax.f32 %v498_v43, 0.0 }
  0xd6   : > { %v441_v46 = vpop.f32.mrf.mxu3 }
  0xd7   : > { %v511_v44 = vpack.c.bf16 %v503_v42, %v503_v42  ;;  %v516_v47 = vpack.c.bf16 %v508_v45, %v508_v45  ;;  %v442_v48 = vadd.f32 %v907_v58, %v441_v46 }
  0xd9   : > { %520 = vst.msk [vmem:[%s914_s8 + $0x4] sm:$0xf] %vm518_vm1, %v511_v44  ;;  %v471_v50 = vadd.f32 %v470_v49, %v442_v48 }
  0xda   : > { %525 = vst.msk [vmem:[%s914_s8 + $0x18] sm:$0xf] %vm518_vm1, %v516_v47 }
  0xdb   : > { %v500_v52 = vadd.f32 %v499_v51, %v471_v50 }
  0xdd   : > { %v509_v53 = vmax.f32 %v500_v52, 0.0 }
  0xdf   : > { %v517_v54 = vpack.c.bf16 %v509_v53, %v509_v53 }
  0xe1   : > { %526 = vst.msk [vmem:[%s914_s8 + $0x1c] sm:$0xf] %vm518_vm1, %v517_v54 }
  0xe2 PF: > { %s13_s12 = sadd.s32 1, %s780_s12  }
  0xe3   : > { %p10_p4 = scmp.ge.s32.totalorder %s13_s12, 4  }
  0xe5   :  { %12 = sbr.rel (!%p10_p4) target bundleno = 1 (0x1), region = 62 }

// kernel: _lambda_.30
= control target key start
LH: loop header
LB: loop body
LE: loop exit
PB: predicated region body
PF: predicated region fallthrough
CT: control target
= control target key end

     0   :  { %s510_s12 = smov 0   ;;  %s632_s0 = inlined_call_operand.vmem [shape: bf16[32,128], index: 0, kind: input, shape index: {}]   ;;  %s633_s1 = inlined_call_operand.vmem [shape: bf16[128,256], index: 1, kind: input, shape index: {}]   ;;  %s634_s2 = inlined_call_operand.vmem [shape: f32[1,256], index: 2, kind: input, shape index: {}]   ;;  %s635_s3 = inlined_call_operand.vmem [shape: bf16[32,256], index: 3, kind: output, shape index: {}]  }
   0x1 LB: > { %s376_s13 = sadd.s32 4294967295, %s488_s12   ;;  %p380_p0 = scmp.ge.s32.totalorder %s488_s12, 1  ;;  %s488_s12 = sphi %s510_s12, %s13_s12  }
   0x2   : > { %p138_p1 = scmp.lt.s32.totalorder %s488_s12, 3 }
   0x4   : > { %p139_p2 = pnand %p380_p0, %p138_p1 }
   0x5   : > { %s381_s29 = sshll.u32 (!%p139_p2), %s376_s13, 1 }
   0x6   : > { %142 = sbr.rel (%p139_p2) target bundleno = 185 (0xb9), region = 32  ;;  %p164_p3 = scmp.lt.s32.totalorder (!%p139_p2), %s381_s29, 3 }
   0xb   : > { %v448_v0 = vld [vmem:[%s633_s1 + $0x70] sm:$0xf]  ;;  %v473_v1 = vld [vmem:[%s633_s1 + $0x74] sm:$0xf0]  ;;  %v472_v2 = vld [vmem:[%s633_s1 + $0x74] sm:$0xf] }
   0xc   : > { %v449_v3 = vor.u32 %v473_v1, %v448_v0  ;;  %v450_v4 = vld [vmem:[%s633_s1 + $0x78] sm:$0xf0]  ;;  %v440_v5 = vld [vmem:[%s633_s1 + $0x60] sm:$0xf]  ;;  %v471_v6 = vld [vmem:[%s633_s1 + $0x64] sm:$0xf0] }
   0xd   : > { %v453_v7 = vor.u32 %v472_v2, %v450_v4  ;;  %v470_v8 = vld [vmem:[%s633_s1 + $0x64] sm:$0xf]  ;;  %v442_v9 = vld [vmem:[%s633_s1 + $0x68] sm:$0xf0]  ;;  %v441_v10 = vor.u32 %v471_v6, %v440_v5  ;;  %v432_v12 = vld [vmem:[%s633_s1 + $0x50] sm:$0xf] }
   0xe   : > { %286 = vmatpush.bf16.msra.mxu0 %v449_v3  ;;  %v445_v11 = vor.u32 %v470_v8, %v442_v9  ;;  %v469_v13 = vld [vmem:[%s633_s1 + $0x54] sm:$0xf0]  ;;  %v468_v14 = vld [vmem:[%s633_s1 + $0x54] sm:$0xf]  ;;  %v434_v15 = vld [vmem:[%s633_s1 + $0x58] sm:$0xf0] }
   0xf   : > { %300 = vmatpush.bf16.msra.mxu1 %v453_v7  ;;  %v433_v16 = vor.u32 %v469_v13, %v432_v12  ;;  %v437_v17 = vor.u32 %v468_v14, %v434_v15  ;;  %v424_v18 = vld [vmem:[%s633_s1 + $0x40] sm:$0xf]  ;;  %v467_v19 = vld [vmem:[%s633_s1 + $0x44] sm:$0xf0]  ;;  %v466_v20 = vld [vmem:[%s633_s1 + $0x44] sm:$0xf] }
  0x10   : > { %v426_v21 = vld [vmem:[%s633_s1 + $0x48] sm:$0xf0]  ;;  %v425_v22 = vor.u32 %v467_v19, %v424_v18  ;;  %v416_v24 = vld [vmem:[%s633_s1 + $0x30] sm:$0xf]  ;;  %v465_v25 = vld [vmem:[%s633_s1 + $0x34] sm:$0xf0] }
  0x11   : > { %v429_v23 = vor.u32 %v466_v20, %v426_v21  ;;  %v464_v26 = vld [vmem:[%s633_s1 + $0x34] sm:$0xf]  ;;  %v418_v27 = vld [vmem:[%s633_s1 + $0x38] sm:$0xf0]  ;;  %v417_v28 = vor.u32 %v465_v25, %v416_v24  ;;  %v408_v30 = vld [vmem:[%s633_s1 + $0x20] sm:$0xf] }
  0x12   : > { %287 = vmatpush.bf16.msra.mxu0 %v441_v10  ;;  %v421_v29 = vor.u32 %v464_v26, %v418_v27  ;;  %v463_v31 = vld [vmem:[%s633_s1 + $0x24] sm:$0xf0]  ;;  %v462_v32 = vld [vmem:[%s633_s1 + $0x24] sm:$0xf]  ;;  %v410_v33 = vld [vmem:[%s633_s1 + $0x28] sm:$0xf0] }
  0x13   : > { %301 = vmatpush.bf16.msra.mxu1 %v445_v11  ;;  %v409_v34 = vor.u32 %v463_v31, %v408_v30  ;;  %v413_v35 = vor.u32 %v462_v32, %v410_v33  ;;  %v400_v36 = vld [vmem:[%s633_s1 + $0x10] sm:$0xf]  ;;  %v461_v37 = vld [vmem:[%s633_s1 + $0x14] sm:$0xf0]  ;;  %s637_s29 = smov (!%p164_p3, %s381_s29), 3 }
  0x14   : > { %v460_v38 = vld [vmem:[%s633_s1 + $0x14] sm:$0xf]  ;;  %v402_v39 = vld [vmem:[%s633_s1 + $0x18] sm:$0xf0]  ;;  %v401_v40 = vor.u32 %v461_v37, %v400_v36  ;;  %v392_v42 = vld [vmem:[%s633_s1] sm:$0xf] }
  0x15   : > { %v405_v41 = vor.u32 %v460_v38, %v402_v39  ;;  %v459_v43 = vld [vmem:[%s633_s1 + $0x4] sm:$0xf0]  ;;  %s382_s24 = sshll.u32 %s637_s29, 2  ;;  %v458_v44 = vld [vmem:[%s633_s1 + $0x4] sm:$0xf]  ;;  %s456_s8 = sshll.u32 %s637_s29, 3 }
  0x16   : > { %288 = vmatpush.bf16.msra.mxu0 %v433_v16  ;;  %v394_v45 = vld [vmem:[%s633_s1 + $0x8] sm:$0xf0]  ;;  %v393_v46 = vor.u32 %v459_v43, %v392_v42  ;;  %s167_s5 = scalar_lea.vmem %s632_s0, %s382_s24  ;;  %v194_v49 = vld [vmem:[%s634_s2] sm:$0x3]  ;;  %s174_s13 = scalar_lea.vmem %s635_s3, %s456_s8 }
  0x17   : > { %302 = vmatpush.bf16.msra.mxu1 %v437_v17  ;;  %v397_v47 = vor.u32 %v458_v44, %v394_v45  ;;  %v457_v48 = vld [vmem:[%s167_s5] sm:$0xff]  ;;  %v196_v50 = vperm.slane %v194_v49, 0  ;;  %v197_v51 = vperm.slane %v194_v49, 1 }
  0x1a   : > { %289 = vmatpush.bf16.msra.mxu0 %v425_v22 }
  0x1b   : > { %303 = vmatpush.bf16.msra.mxu1 %v429_v23 }
  0x1e   : > { %290 = vmatpush.bf16.msra.mxu0 %v417_v28 }
  0x1f   : > { %304 = vmatpush.bf16.msra.mxu1 %v421_v29 }
  0x22   : > { %291 = vmatpush.bf16.msra.mxu0 %v409_v34 }
  0x23   : > { %305 = vmatpush.bf16.msra.mxu1 %v413_v35 }
  0x26   : > { %292 = vmatpush.bf16.msra.mxu0 %v401_v40 }
  0x27   : > { %306 = vmatpush.bf16.msra.mxu1 %v405_v41 }
  0x2a   : > { %293 = vmatpush.bf16.msra.mxu0 %v393_v46 }
  0x2b   : > { %307 = vmatpush.bf16.msra.mxu1 %v397_v47 }
  0x2d   : > { %294 = vmatmul.bf16.vlgmr.msra.gmra.mxu0 %v457_v48 }
  0x2e   : > { %308 = vmatmul.bf16.vlgmr.msra.gmra.mxu1 %v457_v48 }
  0xaa   : > { %v295_v52 = vpop.f32.mrf.mxu0 }
  0xab   : > { %v296_v53 = vadd.f32 %v295_v52, %v196_v50  ;;  %v309_v54 = vpop.f32.mrf.mxu1 }
  0xac   : > { %v310_v55 = vadd.f32 %v309_v54, %v197_v51 }
  0xae   : > { %v314_v56 = vpack.c.bf16 %v310_v55, %v296_v53 }
  0xb0   : > { %316 = vst [vmem:[%s174_s13] sm:$0xff] %v314_v56 }
  0xb2   : > { %v297_v57 = vpop.f32.mrf.mxu0 }
  0xb3   : > { %v298_v58 = vadd.f32 %v297_v57, %v196_v50  ;;  %v311_v59 = vpop.f32.mrf.mxu1 }
  0xb4   : > { %v312_v60 = vadd.f32 %v311_v59, %v197_v51 }
  0xb6   : > { %v315_v61 = vpack.c.bf16 %v312_v60, %v298_v58 }
  0xb8   : > { %317 = vst [vmem:[%s174_s13 + $0x8] sm:$0xff] %v315_v61 }
  0xb9 PF: > { %s13_s12 = sadd.s32 1, %s488_s12  }
  0xba   : > { %p10_p4 = scmp.ge.s32.totalorder %s13_s12, 4  }
  0xbc   :  { %12 = sbr.rel (!%p10_p4) target bundleno = 1 (0x1), region = 62 }

// kernel: _lambda_.28
= control target key start
LH: loop header
LB: loop body
LE: loop exit
PB: predicated region body
PF: predicated region fallthrough
CT: control target
= control target key end

     0   :  { %s516_s12 = smov 0   ;;  %s581_s0 = inlined_call_operand.vmem [shape: bf16[128,128], index: 0, kind: input, shape index: {}]   ;;  %s582_s1 = inlined_call_operand.vmem [shape: bf16[128,64], index: 1, kind: input, shape index: {}]   ;;  %s583_s2 = inlined_call_operand.vmem [shape: f32[1,64], index: 2, kind: input, shape index: {}]   ;;  %s584_s3 = inlined_call_operand.vmem [shape: bf16[128,64], index: 3, kind: output, shape index: {}]  }
   0x1 LB: > { %s384_s13 = sadd.s32 4294967295, %s494_s12   ;;  %p388_p0 = scmp.ge.s32.totalorder %s494_s12, 1  ;;  %s494_s12 = sphi %s516_s12, %s13_s12  }
   0x2   : > { %p138_p1 = scmp.lt.s32.totalorder %s494_s12, 3 }
   0x4   : > { %p139_p2 = pnand %p388_p0, %p138_p1 }
   0x5   : > { %s389_s22 = sshll.u32 (!%p139_p2), %s384_s13, 3 }
   0x6   : > { %142 = sbr.rel (%p139_p2) target bundleno = 192 (0xc0), region = 32  ;;  %p163_p3 = scmp.lt.s32.totalorder (!%p139_p2), %s389_s22, 15 }
   0xb   : > { %v454_v0 = vld [vmem:[%s582_s1 + $0x38] sm:$0xff]  ;;  %v453_v1 = vld [vmem:[%s582_s1 + $0x30] sm:$0xff]  ;;  %v452_v2 = vld [vmem:[%s582_s1 + $0x28] sm:$0xff]  ;;  %s586_s22 = smov (!%p163_p3, %s389_s22), 15  ;;  %vm319_vm0 = vcmask 519168  }
   0xc   : > { %274 = vmatpush.bf16.msra.mxu0 %v454_v0  ;;  %455 = vmatpush.bf16.msra.mxu1 %v454_v0  ;;  %v451_v3 = vld [vmem:[%s582_s1 + $0x20] sm:$0xff]  ;;  %v450_v4 = vld [vmem:[%s582_s1 + $0x18] sm:$0xff]  ;;  %v449_v5 = vld [vmem:[%s582_s1 + $0x10] sm:$0xff]  ;;  %s390_s29 = sshll.u32 %s586_s22, 2 }
   0xd   : > { %456 = vmatpush.bf16.msra.mxu2 %v454_v0  ;;  %457 = vmatpush.bf16.msra.mxu3 %v454_v0  ;;  %v448_v6 = vld [vmem:[%s582_s1 + $0x8] sm:$0xff]  ;;  %v447_v7 = vld [vmem:[%s582_s1] sm:$0xff]  ;;  %s166_s7 = scalar_lea.vmem %s581_s0, %s390_s29  ;;  %s560_s13 = scalar_lea.vmem %s584_s3, %s390_s29 }
   0xe   : > { %v443_v8 = vld [vmem:[%s166_s7] sm:$0xff]  ;;  %v444_v9 = vld [vmem:[%s166_s7 + $0x8] sm:$0xff]  ;;  %v445_v10 = vld [vmem:[%s166_s7 + $0x10] sm:$0xff] }
   0xf   : > { %v446_v11 = vld [vmem:[%s166_s7 + $0x18] sm:$0xff]  ;;  %v487_v12 = vld [vmem:[%s583_s2] ss:$0 sm:$0xff] }
  0x10   : > { %275 = vmatpush.bf16.msra.mxu0 %v453_v1  ;;  %458 = vmatpush.bf16.msra.mxu1 %v453_v1 }
  0x11   : > { %459 = vmatpush.bf16.msra.mxu2 %v453_v1  ;;  %460 = vmatpush.bf16.msra.mxu3 %v453_v1 }
  0x14   : > { %276 = vmatpush.bf16.msra.mxu0 %v452_v2  ;;  %461 = vmatpush.bf16.msra.mxu1 %v452_v2 }
  0x15   : > { %462 = vmatpush.bf16.msra.mxu2 %v452_v2  ;;  %463 = vmatpush.bf16.msra.mxu3 %v452_v2 }
  0x18   : > { %277 = vmatpush.bf16.msra.mxu0 %v451_v3  ;;  %464 = vmatpush.bf16.msra.mxu1 %v451_v3 }
  0x19   : > { %465 = vmatpush.bf16.msra.mxu2 %v451_v3  ;;  %466 = vmatpush.bf16.msra.mxu3 %v451_v3 }
  0x1c   : > { %278 = vmatpush.bf16.msra.mxu0 %v450_v4  ;;  %467 = vmatpush.bf16.msra.mxu1 %v450_v4 }
  0x1d   : > { %468 = vmatpush.bf16.msra.mxu2 %v450_v4  ;;  %469 = vmatpush.bf16.msra.mxu3 %v450_v4 }
  0x20   : > { %279 = vmatpush.bf16.msra.mxu0 %v449_v5  ;;  %470 = vmatpush.bf16.msra.mxu1 %v449_v5 }
  0x21   : > { %471 = vmatpush.bf16.msra.mxu2 %v449_v5  ;;  %472 = vmatpush.bf16.msra.mxu3 %v449_v5 }
  0x24   : > { %280 = vmatpush.bf16.msra.mxu0 %v448_v6  ;;  %473 = vmatpush.bf16.msra.mxu1 %v448_v6 }
  0x25   : > { %474 = vmatpush.bf16.msra.mxu2 %v448_v6  ;;  %475 = vmatpush.bf16.msra.mxu3 %v448_v6 }
  0x28   : > { %281 = vmatpush.bf16.msra.mxu0 %v447_v7  ;;  %476 = vmatpush.bf16.msra.mxu1 %v447_v7 }
  0x29   : > { %477 = vmatpush.bf16.msra.mxu2 %v447_v7  ;;  %478 = vmatpush.bf16.msra.mxu3 %v447_v7 }
  0x2b   : > { %282 = vmatmul.bf16.vlgmr.msra.gmra.mxu0 %v443_v8  ;;  %287 = vmatmul.bf16.vlgmr.msra.gmra.mxu1 %v444_v9 }
  0x2c   : > { %292 = vmatmul.bf16.vlgmr.msra.gmra.mxu2 %v445_v10  ;;  %297 = vmatmul.bf16.vlgmr.msra.gmra.mxu3 %v446_v11 }
  0xa8   : > { %v283_v13 = vpop.f32.mrf.mxu0  ;;  %v288_v14 = vpop.f32.mrf.mxu1 }
  0xa9   : > { %v284_v15 = vadd.f32 %v487_v12, %v283_v13  ;;  %v289_v16 = vadd.f32 %v487_v12, %v288_v14 }
  0xab   : > { %v303_v17 = vmax.f32 %v284_v15, 0.0  ;;  %v305_v18 = vmax.f32 %v289_v16, 0.0 }
  0xad   : > { %v311_v19 = vpack.c.bf16 %v303_v17, %v303_v17  ;;  %v313_v20 = vpack.c.bf16 %v305_v18, %v305_v18 }
  0xaf   : > { %320 = vst.msk [vmem:[%s560_s13] sm:$0xf] %vm319_vm0, %v311_v19  ;;  %v293_v21 = vpop.f32.mrf.mxu2  ;;  %v298_v22 = vpop.f32.mrf.mxu3 }
  0xb0   : > { %322 = vst.msk [vmem:[%s560_s13 + $0x8] sm:$0xf] %vm319_vm0, %v313_v20  ;;  %v294_v23 = vadd.f32 %v487_v12, %v293_v21  ;;  %v299_v24 = vadd.f32 %v487_v12, %v298_v22  ;;  %v285_v25 = vpop.f32.mrf.mxu0  ;;  %v290_v26 = vpop.f32.mrf.mxu1 }
  0xb1   : > { %v286_v27 = vadd.f32 %v487_v12, %v285_v25  ;;  %v291_v28 = vadd.f32 %v487_v12, %v290_v26 }
  0xb2   : > { %v307_v29 = vmax.f32 %v294_v23, 0.0  ;;  %v309_v30 = vmax.f32 %v299_v24, 0.0 }
  0xb3   : > { %v304_v31 = vmax.f32 %v286_v27, 0.0  ;;  %v306_v32 = vmax.f32 %v291_v28, 0.0 }
  0xb4   : > { %v315_v33 = vpack.c.bf16 %v307_v29, %v307_v29  ;;  %v317_v34 = vpack.c.bf16 %v309_v30, %v309_v30 }
  0xb5   : > { %v312_v35 = vpack.c.bf16 %v304_v31, %v304_v31  ;;  %v314_v36 = vpack.c.bf16 %v306_v32, %v306_v32 }
  0xb6   : > { %324 = vst.msk [vmem:[%s560_s13 + $0x10] sm:$0xf] %vm319_vm0, %v315_v33 }
  0xb7   : > { %326 = vst.msk [vmem:[%s560_s13 + $0x18] sm:$0xf] %vm319_vm0, %v317_v34  ;;  %v295_v37 = vpop.f32.mrf.mxu2  ;;  %v300_v38 = vpop.f32.mrf.mxu3 }
  0xb8   : > { %321 = vst.msk [vmem:[%s560_s13 + $0x4] sm:$0xf] %vm319_vm0, %v312_v35  ;;  %v296_v39 = vadd.f32 %v487_v12, %v295_v37  ;;  %v301_v40 = vadd.f32 %v487_v12, %v300_v38 }
  0xb9   : > { %323 = vst.msk [vmem:[%s560_s13 + $0xc] sm:$0xf] %vm319_vm0, %v314_v36 }
  0xba   : > { %v308_v41 = vmax.f32 %v296_v39, 0.0  ;;  %v310_v42 = vmax.f32 %v301_v40, 0.0 }
  0xbc   : > { %v316_v43 = vpack.c.bf16 %v308_v41, %v308_v41  ;;  %v318_v44 = vpack.c.bf16 %v310_v42, %v310_v42 }
  0xbe   : > { %325 = vst.msk [vmem:[%s560_s13 + $0x14] sm:$0xf] %vm319_vm0, %v316_v43 }
  0xbf   : > { %327 = vst.msk [vmem:[%s560_s13 + $0x1c] sm:$0xf] %vm319_vm0, %v318_v44 }
  0xc0 PF: > { %s13_s12 = sadd.s32 1, %s494_s12  }
  0xc1   : > { %p10_p4 = scmp.ge.s32.totalorder %s13_s12, 4  }
  0xc3   :  { %12 = sbr.rel (!%p10_p4) target bundleno = 1 (0x1), region = 62 }

// kernel: _lambda_.31
= control target key start
LH: loop header
LB: loop body
LE: loop exit
PB: predicated region body
PF: predicated region fallthrough
CT: control target
= control target key end

     0   :  { %s515_s15 = smov 0   ;;  %s590_s0 = inlined_call_operand.vmem [shape: bf16[32,64], index: 0, kind: input, shape index: {}]   ;;  %s591_s1 = inlined_call_operand.vmem [shape: bf16[64,256], index: 1, kind: input, shape index: {}]   ;;  %s592_s2 = inlined_call_operand.vmem [shape: f32[1,256], index: 2, kind: input, shape index: {}]   ;;  %s593_s3 = inlined_call_operand.vmem [shape: bf16[32,256], index: 3, kind: input, shape index: {}]   ;;  %s594_s4 = inlined_call_operand.vmem [shape: bf16[32,256], index: 4, kind: output, shape index: {}]  }
   0x1 LB: > { %s410_s16 = sadd.s32 4294967295, %s488_s15   ;;  %p414_p0 = scmp.ge.s32.totalorder %s488_s15, 1  ;;  %s488_s15 = sphi %s515_s15, %s14_s15  }
   0x2   : > { %p175_p1 = scmp.lt.s32.totalorder %s488_s15, 3 }
   0x4   : > { %p176_p2 = pnand %p414_p0, %p175_p1 }
   0x5   : > { %s415_s17 = sshll.u32 (!%p176_p2), %s410_s16, 1 }
   0x6   : > { %179 = sbr.rel (%p176_p2) target bundleno = 173 (0xad), region = 36  ;;  %p209_p3 = scmp.lt.s32.totalorder (!%p176_p2), %s415_s17, 3 }
   0xb   : > { %v453_v0 = vld [vmem:[%s591_s1 + $0x30] sm:$0xf]  ;;  %v473_v1 = vld [vmem:[%s591_s1 + $0x34] sm:$0xf0]  ;;  %v472_v2 = vld [vmem:[%s591_s1 + $0x34] sm:$0xf] }
   0xc   : > { %v454_v3 = vor.u32 %v473_v1, %v453_v0  ;;  %v455_v4 = vld [vmem:[%s591_s1 + $0x38] sm:$0xf0]  ;;  %v445_v5 = vld [vmem:[%s591_s1 + $0x20] sm:$0xf]  ;;  %v471_v6 = vld [vmem:[%s591_s1 + $0x24] sm:$0xf0] }
   0xd   : > { %v458_v7 = vor.u32 %v472_v2, %v455_v4  ;;  %v470_v8 = vld [vmem:[%s591_s1 + $0x24] sm:$0xf]  ;;  %v447_v9 = vld [vmem:[%s591_s1 + $0x28] sm:$0xf0]  ;;  %v446_v10 = vor.u32 %v471_v6, %v445_v5  ;;  %v437_v12 = vld [vmem:[%s591_s1 + $0x10] sm:$0xf] }
   0xe   : > { %298 = vmatpush.bf16.msra.mxu0 %v454_v3  ;;  %v450_v11 = vor.u32 %v470_v8, %v447_v9  ;;  %v469_v13 = vld [vmem:[%s591_s1 + $0x14] sm:$0xf0]  ;;  %v468_v14 = vld [vmem:[%s591_s1 + $0x14] sm:$0xf]  ;;  %v439_v15 = vld [vmem:[%s591_s1 + $0x18] sm:$0xf0] }
   0xf   : > { %312 = vmatpush.bf16.msra.mxu1 %v458_v7  ;;  %v438_v16 = vor.u32 %v469_v13, %v437_v12  ;;  %v442_v17 = vor.u32 %v468_v14, %v439_v15  ;;  %v429_v18 = vld [vmem:[%s591_s1] sm:$0xf]  ;;  %v467_v19 = vld [vmem:[%s591_s1 + $0x4] sm:$0xf0]  ;;  %s596_s17 = smov (!%p209_p3, %s415_s17), 3  ;;  %vm290_vm0 = vcmask 523264  }
  0x10   : > { %v466_v20 = vld [vmem:[%s591_s1 + $0x4] sm:$0xf]  ;;  %v431_v21 = vld [vmem:[%s591_s1 + $0x8] sm:$0xf0]  ;;  %s416_s25 = sshll.u32 %s596_s17, 2  ;;  %v430_v22 = vor.u32 %v467_v19, %v429_v18  ;;  %s463_s29 = sshll.u32 %s596_s17, 3 }
  0x11   : > { %s212_s28 = scalar_lea.vmem %s590_s0, %s416_s25  ;;  %v434_v23 = vor.u32 %v466_v20, %v431_v21  ;;  %s219_s6 = scalar_lea.vmem %s593_s3, %s463_s29  ;;  %v239_v25 = vld [vmem:[%s592_s2] sm:$0x3] }
  0x12   : > { %299 = vmatpush.bf16.msra.mxu0 %v446_v10  ;;  %v465_v24 = vld [vmem:[%s212_s28] sm:$0xff]  ;;  %v241_v27 = vperm.slane %v239_v25, 0  ;;  %v242_v28 = vperm.slane %v239_v25, 1  ;;  %v323_v37 = vld [vmem:[%s219_s6 + $0x8] sm:$0xff]  ;;  %s226_s11 = scalar_lea.vmem %s594_s4, %s463_s29 }
  0x13   : > { %313 = vmatpush.bf16.msra.mxu1 %v450_v11  ;;  %v322_v26 = vld [vmem:[%s219_s6] sm:$0xff]  ;;  %v326_v40 = vunpack.c.l.bf16 %v323_v37  ;;  %v327_v43 = vunpack.c.h.bf16 %v323_v37 }
  0x14   : > { %v324_v29 = vunpack.c.l.bf16 %v322_v26  ;;  %v325_v31 = vunpack.c.h.bf16 %v322_v26 }
  0x16   : > { %300 = vmatpush.bf16.msra.mxu0 %v438_v16 }
  0x17   : > { %314 = vmatpush.bf16.msra.mxu1 %v442_v17 }
  0x1a   : > { %301 = vmatpush.bf16.msra.mxu0 %v430_v22 }
  0x1b   : > { %315 = vmatpush.bf16.msra.mxu1 %v434_v23 }
  0x1d   : > { %459 = vmatmul.msk.bf16.vlgmr.msra.gmra.mxu0 %vm290_vm0, %v465_v24 }
  0x1e   : > { %460 = vmatmul.msk.bf16.vlgmr.msra.gmra.mxu1 %vm290_vm0, %v465_v24 }
  0x9a   : > { %v303_v30 = vpop.f32.mrf.mxu0 }
  0x9b   : > { %v304_v32 = vadd.f32 %v303_v30, %v241_v27  ;;  %v317_v33 = vpop.f32.mrf.mxu1 }
  0x9c   : > { %v318_v34 = vadd.f32 %v317_v33, %v242_v28 }
  0x9d   : > { %v328_v35 = vadd.f32 %v324_v29, %v304_v32 }
  0x9e   : > { %v329_v36 = vadd.f32 %v325_v31, %v318_v34 }
  0x9f   : > { %v332_v38 = vmax.f32 %v328_v35, 0.0 }
  0xa0   : > { %v333_v39 = vmax.f32 %v329_v36, 0.0 }
  0xa2   : > { %v336_v41 = vpack.c.bf16 %v333_v39, %v332_v38  ;;  %v305_v42 = vpop.f32.mrf.mxu0 }
  0xa3   : > { %v306_v44 = vadd.f32 %v305_v42, %v241_v27  ;;  %v319_v45 = vpop.f32.mrf.mxu1 }
  0xa4   : > { %338 = vst [vmem:[%s226_s11] sm:$0xff] %v336_v41  ;;  %v320_v46 = vadd.f32 %v319_v45, %v242_v28 }
  0xa5   : > { %v330_v47 = vadd.f32 %v326_v40, %v306_v44 }
  0xa6   : > { %v331_v48 = vadd.f32 %v327_v43, %v320_v46 }
  0xa7   : > { %v334_v49 = vmax.f32 %v330_v47, 0.0 }
  0xa8   : > { %v335_v50 = vmax.f32 %v331_v48, 0.0 }
  0xaa   : > { %v337_v51 = vpack.c.bf16 %v335_v50, %v334_v49 }
  0xac   : > { %339 = vst [vmem:[%s226_s11 + $0x8] sm:$0xff] %v337_v51 }
  0xad PF: > { %s14_s15 = sadd.s32 1, %s488_s15  }
  0xae   : > { %p11_p4 = scmp.ge.s32.totalorder %s14_s15, 4  }
  0xb0   :  { %13 = sbr.rel (!%p11_p4) target bundleno = 1 (0x1), region = 69 }

// kernel: _lambda_.32
= control target key start
LH: loop header
LB: loop body
LE: loop exit
PB: predicated region body
PF: predicated region fallthrough
CT: control target
= control target key end

     0   :  { %s556_s12 = smov 0   ;;  %s628_s0 = inlined_call_operand.vmem [shape: bf16[32,256], index: 0, kind: input, shape index: {}]   ;;  %s629_s1 = inlined_call_operand.vmem [shape: bf16[256,128], index: 1, kind: input, shape index: {}]   ;;  %s630_s2 = inlined_call_operand.vmem [shape: f32[1,128], index: 2, kind: input, shape index: {}]   ;;  %s631_s3 = inlined_call_operand.vmem [shape: bf16[32,128], index: 3, kind: output, shape index: {}]  }
   0x1 LB: > { %s411_s13 = sadd.s32 4294967295, %s534_s12   ;;  %p415_p0 = scmp.ge.s32.totalorder %s534_s12, 1  ;;  %s534_s12 = sphi %s556_s12, %s13_s12  }
   0x2   : > { %p139_p1 = scmp.lt.s32.totalorder %s534_s12, 3 }
   0x4   : > { %p140_p2 = pnand %p415_p0, %p139_p1 }
   0x5   : > { %s416_s26 = sshll.u32 (!%p140_p2), %s411_s13, 1 }
   0x6   : > { %143 = sbr.rel (%p140_p2) target bundleno = 186 (0xba), region = 32  ;;  %p165_p3 = scmp.lt.s32.totalorder (!%p140_p2), %s416_s26, 3 }
   0xb   : > { %v505_v0 = vld [vmem:[%s629_s1 + $0x38] sm:$0xff]  ;;  %v504_v2 = vld [vmem:[%s629_s1 + $0x30] sm:$0xff]  ;;  %v503_v4 = vld [vmem:[%s629_s1 + $0x28] sm:$0xff]  ;;  %s633_s26 = smov (!%p165_p3, %s416_s26), 3 }
   0xc   : > { %v513_v1 = vld [vmem:[%s629_s1 + $0x78] sm:$0xff]  ;;  %321 = vmatpush.bf16.msra.mxu0 %v505_v0  ;;  %v512_v3 = vld [vmem:[%s629_s1 + $0x70] sm:$0xff]  ;;  %v511_v5 = vld [vmem:[%s629_s1 + $0x68] sm:$0xff]  ;;  %s495_s13 = sshll.u32 %s633_s26, 3  ;;  %s420_s28 = sshll.u32 %s633_s26, 2 }
   0xd   : > { %335 = vmatpush.bf16.msra.mxu1 %v513_v1  ;;  %v502_v6 = vld [vmem:[%s629_s1 + $0x20] sm:$0xff]  ;;  %v501_v8 = vld [vmem:[%s629_s1 + $0x18] sm:$0xff]  ;;  %v500_v10 = vld [vmem:[%s629_s1 + $0x10] sm:$0xff]  ;;  %s169_s20 = scalar_lea.vmem %s628_s0, %s495_s13  ;;  %s175_s4 = scalar_lea.vmem %s631_s3, %s420_s28 }
   0xe   : > { %v510_v7 = vld [vmem:[%s629_s1 + $0x60] sm:$0xff]  ;;  %v509_v9 = vld [vmem:[%s629_s1 + $0x58] sm:$0xff]  ;;  %v508_v11 = vld [vmem:[%s629_s1 + $0x50] sm:$0xff] }
   0xf   : > { %v499_v12 = vld [vmem:[%s629_s1 + $0x8] sm:$0xff]  ;;  %v498_v14 = vld [vmem:[%s629_s1] sm:$0xff] }
  0x10   : > { %322 = vmatpush.bf16.msra.mxu0 %v504_v2  ;;  %v507_v13 = vld [vmem:[%s629_s1 + $0x48] sm:$0xff]  ;;  %v506_v15 = vld [vmem:[%s629_s1 + $0x40] sm:$0xff] }
  0x11   : > { %336 = vmatpush.bf16.msra.mxu1 %v512_v3  ;;  %v423_v16 = vld [vmem:[%s169_s20] sm:$0xf]  ;;  %v497_v17 = vld [vmem:[%s169_s20 + $0x4] sm:$0xf0]  ;;  %v496_v18 = vld [vmem:[%s169_s20 + $0x4] sm:$0xf] }
  0x12   : > { %v425_v19 = vld [vmem:[%s169_s20 + $0x8] sm:$0xf0]  ;;  %v424_v20 = vor.u32 %v497_v17, %v423_v16  ;;  %v527_v24 = vld [vmem:[%s630_s2] ss:$0 sm:$0xff] }
  0x13   : > { %v428_v21 = vor.u32 %v496_v18, %v425_v19 }
  0x14   : > { %323 = vmatpush.bf16.msra.mxu0 %v503_v4 }
  0x15   : > { %337 = vmatpush.bf16.msra.mxu1 %v511_v5 }
  0x18   : > { %324 = vmatpush.bf16.msra.mxu0 %v502_v6 }
  0x19   : > { %338 = vmatpush.bf16.msra.mxu1 %v510_v7 }
  0x1c   : > { %325 = vmatpush.bf16.msra.mxu0 %v501_v8 }
  0x1d   : > { %339 = vmatpush.bf16.msra.mxu1 %v509_v9 }
  0x20   : > { %326 = vmatpush.bf16.msra.mxu0 %v500_v10 }
  0x21   : > { %340 = vmatpush.bf16.msra.mxu1 %v508_v11 }
  0x24   : > { %327 = vmatpush.bf16.msra.mxu0 %v499_v12 }
  0x25   : > { %341 = vmatpush.bf16.msra.mxu1 %v507_v13 }
  0x28   : > { %328 = vmatpush.bf16.msra.mxu0 %v498_v14 }
  0x29   : > { %342 = vmatpush.bf16.msra.mxu1 %v506_v15 }
  0x2b   : > { %329 = vmatmul.bf16.vlgmr.msra.gmra.mxu0 %v424_v20 }
  0x2c   : > { %343 = vmatmul.bf16.vlgmr.msra.gmra.mxu1 %v428_v21 }
  0xa8   : > { %v330_v22 = vpop.f32.mrf.mxu0 }
  0xa9   : > { %v344_v23 = vpop.f32.mrf.mxu1  ;;  %v331_v25 = vadd.f32 %v527_v24, %v330_v22 }
  0xab   : > { %v345_v27 = vadd.f32 %v344_v23, %v331_v25 }
  0xad   : > { %v349_v31 = vmax.f32 %v345_v27, 0.0 }
  0xb0   : > { %v332_v26 = vpop.f32.mrf.mxu0 }
  0xb1   : > { %v333_v28 = vadd.f32 %v527_v24, %v332_v26  ;;  %v346_v29 = vpop.f32.mrf.mxu1 }
  0xb3   : > { %v347_v30 = vadd.f32 %v346_v29, %v333_v28 }
  0xb5   : > { %v350_v32 = vmax.f32 %v347_v30, 0.0 }
  0xb7   : > { %v517_v33 = vpack.c.bf16 %v350_v32, %v349_v31 }
  0xb9   : > { %518 = vst [vmem:[%s175_s4] sm:$0xff] %v517_v33  }
  0xba PF: > { %s13_s12 = sadd.s32 1, %s534_s12  }
  0xbb   : > { %p10_p4 = scmp.ge.s32.totalorder %s13_s12, 4  }
  0xbd   :  { %12 = sbr.rel (!%p10_p4) target bundleno = 1 (0x1), region = 62 }

// kernel: _lambda_.29
= control target key start
LH: loop header
LB: loop body
LE: loop exit
PB: predicated region body
PF: predicated region fallthrough
CT: control target
= control target key end

     0   :  { %s893_s12 = smov 0   ;;  %s1037_s0 = inlined_call_operand.vmem [shape: bf16[32,576], index: 0, kind: input, shape index: {}]   ;;  %s1038_s1 = inlined_call_operand.vmem [shape: bf16[576,64], index: 1, kind: input, shape index: {}]   ;;  %s1039_s2 = inlined_call_operand.vmem [shape: f32[1,64], index: 2, kind: input, shape index: {}]   ;;  %s1040_s3 = inlined_call_operand.vmem [shape: bf16[32,64], index: 3, kind: output, shape index: {}]  }
   0x1 LB: > { %s638_s13 = sadd.s32 4294967295, %s871_s12   ;;  %p642_p0 = scmp.ge.s32.totalorder %s871_s12, 1  ;;  %s871_s12 = sphi %s893_s12, %s13_s12  }
   0x2   : > { %p139_p1 = scmp.lt.s32.totalorder %s871_s12, 3 }
   0x4   : > { %p140_p2 = pnand %p642_p0, %p139_p1 }
   0x5   : > { %s643_s11 = sshll.u32 (!%p140_p2), %s638_s13, 1 }
   0x6   : > { %143 = sbr.rel (%p140_p2) target bundleno = 200 (0xc8), region = 32  ;;  %p165_p3 = scmp.lt.s32.totalorder (!%p140_p2), %s643_s11, 3 }
   0xb   : > { %v826_v0 = vld [vmem:[%s1038_s1 + $0x38] sm:$0xff]  ;;  %v825_v4 = vld [vmem:[%s1038_s1 + $0x30] sm:$0xff]  ;;  %v824_v8 = vld [vmem:[%s1038_s1 + $0x28] sm:$0xff]  ;;  %s1042_s11 = smov (!%p165_p3, %s643_s11), 3  ;;  %vm501_vm0 = vcmask 523264   ;;  %vm579_vm1 = vcmask 519168  }
   0xc   : > { %v842_v1 = vld [vmem:[%s1038_s1 + $0xb8] sm:$0xff]  ;;  %505 = vmatpush.bf16.msra.mxu0 %v826_v0  ;;  %v841_v5 = vld [vmem:[%s1038_s1 + $0xb0] sm:$0xff]  ;;  %v840_v9 = vld [vmem:[%s1038_s1 + $0xa8] sm:$0xff]  ;;  %s855_s6 = smul.u32 20, %s1042_s11  ;;  %s646_s18 = sshll.u32 %s1042_s11, 2 }
   0xd   : > { %v850_v2 = vld [vmem:[%s1038_s1 + $0xf8] sm:$0xff]  ;;  %533 = vmatpush.bf16.msra.mxu2 %v842_v1  ;;  %v849_v6 = vld [vmem:[%s1038_s1 + $0xf0] sm:$0xff]  ;;  %v848_v10 = vld [vmem:[%s1038_s1 + $0xe8] sm:$0xff]  ;;  %s175_s21 = scalar_lea.vmem %s1040_s3, %s646_s18 }
   0xe   : > { %v834_v3 = vld [vmem:[%s1038_s1 + $0x78] sm:$0xff]  ;;  %547 = vmatpush.bf16.msra.mxu3 %v850_v2  ;;  %v833_v7 = vld [vmem:[%s1038_s1 + $0x70] sm:$0xff]  ;;  %v832_v11 = vld [vmem:[%s1038_s1 + $0x68] sm:$0xff]  ;;  %s985_s20 = scalar_lea.vmem %s1037_s0, %s855_s6 }
   0xf   : > { %519 = vmatpush.bf16.msra.mxu1 %v834_v3  ;;  %v823_v12 = vld [vmem:[%s1038_s1 + $0x20] sm:$0xff]  ;;  %v822_v16 = vld [vmem:[%s1038_s1 + $0x18] sm:$0xff]  ;;  %v821_v20 = vld [vmem:[%s1038_s1 + $0x10] sm:$0xff] }
  0x10   : > { %506 = vmatpush.bf16.msra.mxu0 %v825_v4  ;;  %v839_v13 = vld [vmem:[%s1038_s1 + $0xa0] sm:$0xff]  ;;  %v838_v17 = vld [vmem:[%s1038_s1 + $0x98] sm:$0xff]  ;;  %v837_v21 = vld [vmem:[%s1038_s1 + $0x90] sm:$0xff] }
  0x11   : > { %534 = vmatpush.bf16.msra.mxu2 %v841_v5  ;;  %v847_v14 = vld [vmem:[%s1038_s1 + $0xe0] sm:$0xff]  ;;  %v846_v18 = vld [vmem:[%s1038_s1 + $0xd8] sm:$0xff]  ;;  %v845_v22 = vld [vmem:[%s1038_s1 + $0xd0] sm:$0xff] }
  0x12   : > { %548 = vmatpush.bf16.msra.mxu3 %v849_v6  ;;  %v831_v15 = vld [vmem:[%s1038_s1 + $0x60] sm:$0xff]  ;;  %v830_v19 = vld [vmem:[%s1038_s1 + $0x58] sm:$0xff]  ;;  %v829_v23 = vld [vmem:[%s1038_s1 + $0x50] sm:$0xff] }
  0x13   : > { %520 = vmatpush.bf16.msra.mxu1 %v833_v7  ;;  %v820_v24 = vld [vmem:[%s1038_s1 + $0x8] sm:$0xff]  ;;  %v819_v28 = vld [vmem:[%s1038_s1] sm:$0xff]  ;;  %v816_v33 = vld [vmem:[%s985_s20 + $0x10] sm:$0xf0] }
  0x14   : > { %507 = vmatpush.bf16.msra.mxu0 %v824_v8  ;;  %v836_v25 = vld [vmem:[%s1038_s1 + $0x88] sm:$0xff]  ;;  %v835_v29 = vld [vmem:[%s1038_s1 + $0x80] sm:$0xff]  ;;  %v817_v35 = vld [vmem:[%s985_s20 + $0x18] sm:$0xf0] }
  0x15   : > { %535 = vmatpush.bf16.msra.mxu2 %v840_v9  ;;  %v844_v26 = vld [vmem:[%s1038_s1 + $0xc8] sm:$0xff]  ;;  %v843_v30 = vld [vmem:[%s1038_s1 + $0xc0] sm:$0xff]  ;;  %v651_v39 = vld [vmem:[%s985_s20 + $0x14] sm:$0xf0] }
  0x16   : > { %549 = vmatpush.bf16.msra.mxu3 %v848_v10  ;;  %v828_v27 = vld [vmem:[%s1038_s1 + $0x48] sm:$0xff]  ;;  %v827_v31 = vld [vmem:[%s1038_s1 + $0x40] sm:$0xff]  ;;  %v854_v40 = vld [vmem:[%s1038_s1 + $0x118] sm:$0xff] }
  0x17   : > { %521 = vmatpush.bf16.msra.mxu1 %v832_v11  ;;  %v649_v32 = vld [vmem:[%s985_s20] sm:$0xf]  ;;  %v657_v34 = vld [vmem:[%s985_s20 + $0x8] sm:$0xf]  ;;  %v815_v36 = vld [vmem:[%s985_s20 + $0xc] sm:$0xf] }
  0x18   : > { %508 = vmatpush.bf16.msra.mxu0 %v823_v12  ;;  %v659_v37 = vld [vmem:[%s985_s20 + $0x1c] sm:$0xf0]  ;;  %v814_v38 = vld [vmem:[%s985_s20 + $0x4] sm:$0xf]  ;;  %v650_v41 = vor.u32 %v816_v33, %v649_v32  ;;  %v658_v42 = vor.u32 %v817_v35, %v657_v34  ;;  %v853_v45 = vld [vmem:[%s1038_s1 + $0x110] sm:$0xff] }
  0x19   : > { %536 = vmatpush.bf16.msra.mxu2 %v839_v13  ;;  %v662_v43 = vor.u32 %v815_v36, %v659_v37  ;;  %v654_v44 = vor.u32 %v814_v38, %v651_v39  ;;  %v852_v46 = vld [vmem:[%s1038_s1 + $0x108] sm:$0xff]  ;;  %v851_v47 = vld [vmem:[%s1038_s1 + $0x100] sm:$0xff]  ;;  %v665_v48 = vld [vmem:[%s985_s20 + $0x10] sm:$0xf] }
  0x1a   : > { %550 = vmatpush.bf16.msra.mxu3 %v847_v14  ;;  %v818_v49 = vld [vmem:[%s985_s20 + $0x20] sm:$0xf0]  ;;  %v864_v52 = vld [vmem:[%s1039_s2] ss:$0 sm:$0xff] }
  0x1b   : > { %522 = vmatpush.bf16.msra.mxu1 %v831_v15  ;;  %v666_v50 = vor.u32 %v818_v49, %v665_v48 }
  0x1c   : > { %509 = vmatpush.bf16.msra.mxu0 %v822_v16 }
  0x1d   : > { %537 = vmatpush.bf16.msra.mxu2 %v838_v17 }
  0x1e   : > { %551 = vmatpush.bf16.msra.mxu3 %v846_v18 }
  0x1f   : > { %523 = vmatpush.bf16.msra.mxu1 %v830_v19 }
  0x20   : > { %510 = vmatpush.bf16.msra.mxu0 %v821_v20 }
  0x21   : > { %538 = vmatpush.bf16.msra.mxu2 %v837_v21 }
  0x22   : > { %552 = vmatpush.bf16.msra.mxu3 %v845_v22 }
  0x23   : > { %524 = vmatpush.bf16.msra.mxu1 %v829_v23 }
  0x24   : > { %511 = vmatpush.bf16.msra.mxu0 %v820_v24 }
  0x25   : > { %539 = vmatpush.bf16.msra.mxu2 %v836_v25 }
  0x26   : > { %553 = vmatpush.bf16.msra.mxu3 %v844_v26 }
  0x27   : > { %525 = vmatpush.bf16.msra.mxu1 %v828_v27 }
  0x28   : > { %512 = vmatpush.bf16.msra.mxu0 %v819_v28 }
  0x29   : > { %540 = vmatpush.bf16.msra.mxu2 %v835_v29 }
  0x2a   : > { %554 = vmatpush.bf16.msra.mxu3 %v843_v30 }
  0x2b   : > { %526 = vmatpush.bf16.msra.mxu1 %v827_v31  ;;  %513 = vmatmul.bf16.vlgmr.msra.gmra.mxu0 %v650_v41 }
  0x2c   : > { %565 = vmatpush.bf16.msrb.mxu0 %v854_v40  ;;  %541 = vmatmul.bf16.vlgmr.msra.gmra.mxu2 %v658_v42 }
  0x2d   : > { %555 = vmatmul.bf16.vlgmr.msra.gmra.mxu3 %v662_v43 }
  0x2e   : > { %527 = vmatmul.bf16.vlgmr.msra.gmra.mxu1 %v654_v44 }
  0x30   : > { %566 = vmatpush.bf16.msrb.mxu0 %v853_v45 }
  0x34   : > { %567 = vmatpush.bf16.msrb.mxu0 %v852_v46 }
  0x38   : > { %568 = vmatpush.bf16.msrb.mxu0 %v851_v47 }
  0x3b   : > { %811 = vmatmul.msk.bf16.vlgmr.msrb.gmra.mxu0 %vm501_vm0, %v666_v50 }
  0xa8   : > { %v514_v51 = vpop.f32.mrf.mxu0 }
  0xa9   : > { %v515_v54 = vadd.f32 %v864_v52, %v514_v51 }
  0xab   : > { %v528_v53 = vpop.f32.mrf.mxu1 }
  0xac   : > { %v529_v57 = vadd.f32 %v528_v53, %v515_v54 }
  0xaf   : > { %v542_v55 = vpop.f32.mrf.mxu2 }
  0xb0   : > { %v516_v56 = vpop.f32.mrf.mxu0  ;;  %v543_v58 = vadd.f32 %v542_v55, %v529_v57  ;;  %v556_v59 = vpop.f32.mrf.mxu3 }
  0xb1   : > { %v517_v60 = vadd.f32 %v864_v52, %v516_v56 }
  0xb2   : > { %v557_v62 = vadd.f32 %v556_v59, %v543_v58 }
  0xb3   : > { %v530_v61 = vpop.f32.mrf.mxu1 }
  0xb4   : > { %v531_v1 = vadd.f32 %v530_v61, %v517_v60 }
  0xb7   : > { %v544_v63 = vpop.f32.mrf.mxu2 }
  0xb8   : > { %v570_v0 = vpop.f32.mrf.mxu0  ;;  %v545_v3 = vadd.f32 %v544_v63, %v531_v1  ;;  %v558_v6 = vpop.f32.mrf.mxu3 }
  0xb9   : > { %v571_v2 = vadd.f32 %v570_v0, %v557_v62 }
  0xba   : > { %v559_v7 = vadd.f32 %v558_v6, %v545_v3 }
  0xbb   : > { %v575_v4 = vmax.f32 %v571_v2, 0.0 }
  0xbd   : > { %v577_v5 = vpack.c.bf16 %v575_v4, %v575_v4 }
  0xbf   : > { %580 = vst.msk [vmem:[%s175_s21] sm:$0xf] %vm579_vm1, %v577_v5 }
  0xc0   : > { %v572_v8 = vpop.f32.mrf.mxu0 }
  0xc1   : > { %v573_v9 = vadd.f32 %v572_v8, %v559_v7 }
  0xc3   : > { %v576_v10 = vmax.f32 %v573_v9, 0.0 }
  0xc5   : > { %v578_v11 = vpack.c.bf16 %v576_v10, %v576_v10 }
  0xc7   : > { %581 = vst.msk [vmem:[%s175_s21 + $0x4] sm:$0xf] %vm579_vm1, %v578_v11 }
  0xc8 PF: > { %s13_s12 = sadd.s32 1, %s871_s12  }
  0xc9   : > { %p10_p4 = scmp.ge.s32.totalorder %s13_s12, 4  }
  0xcb   :  { %12 = sbr.rel (!%p10_p4) target bundleno = 1 (0x1), region = 62 }

// kernel: _lambda_.34
= control target key start
LH: loop header
LB: loop body
LE: loop exit
PB: predicated region body
PF: predicated region fallthrough
CT: control target
= control target key end

     0   :  { %s1276_s1 = inlined_call_operand.vmem [shape: bf16[256,512], index: 1, kind: input, shape index: {}]   ;;  %s1277_s0 = inlined_call_operand.vmem [shape: bf16[8,256], index: 0, kind: input, shape index: {}]   ;;  %s1278_s2 = inlined_call_operand.vmem [shape: f32[1,512], index: 2, kind: input, shape index: {}]   ;;  %s1279_s3 = inlined_call_operand.vmem [shape: bf16[8,512], index: 3, kind: output, shape index: {}]  }
   0x1   :  { %v642_v0 = vld [vmem:[%s1276_s1 + $0xe0] sm:$0xf]  ;;  %v814_v1 = vld [vmem:[%s1276_s1 + $0xec] sm:$0xf0]  ;;  %v812_v5 = vld [vmem:[%s1276_s1 + $0xe4] sm:$0xf] }
   0x2   :  { %v770_v2 = vld [vmem:[%s1276_s1 + $0x1e0] sm:$0xf]  ;;  %v643_v3 = vor.u32 %v814_v1, %v642_v0  ;;  %v846_v4 = vld [vmem:[%s1276_s1 + $0x1ec] sm:$0xf0]  ;;  %v644_v6 = vld [vmem:[%s1276_s1 + $0xf0] sm:$0xf0] }
   0x3   :  { %v771_v7 = vor.u32 %v846_v4, %v770_v2  ;;  %v647_v8 = vor.u32 %v812_v5, %v644_v6  ;;  %v844_v9 = vld [vmem:[%s1276_s1 + $0x1e4] sm:$0xf]  ;;  %v772_v10 = vld [vmem:[%s1276_s1 + $0x1f0] sm:$0xf0]  ;;  %v626_v11 = vld [vmem:[%s1276_s1 + $0xc0] sm:$0xf] }
   0x4   :  { %416 = vmatpush.bf16.msra.mxu0 %v643_v3  ;;  %v775_v12 = vor.u32 %v844_v9, %v772_v10  ;;  %v810_v13 = vld [vmem:[%s1276_s1 + $0xcc] sm:$0xf0]  ;;  %v754_v14 = vld [vmem:[%s1276_s1 + $0x1c0] sm:$0xf]  ;;  %v808_v18 = vld [vmem:[%s1276_s1 + $0xc4] sm:$0xf] }
   0x5   :  { %v842_v15 = vld [vmem:[%s1276_s1 + $0x1cc] sm:$0xf0]  ;;  %429 = vmatpush.bf16.msra.mxu1 %v771_v7  ;;  %442 = vmatpush.bf16.msra.mxu2 %v647_v8  ;;  %v627_v16 = vor.u32 %v810_v13, %v626_v11  ;;  %v628_v19 = vld [vmem:[%s1276_s1 + $0xd0] sm:$0xf0]  ;;  %v840_v20 = vld [vmem:[%s1276_s1 + $0x1c4] sm:$0xf] }
   0x6   :  { %v755_v17 = vor.u32 %v842_v15, %v754_v14  ;;  %455 = vmatpush.bf16.msra.mxu3 %v775_v12  ;;  %v631_v21 = vor.u32 %v808_v18, %v628_v19  ;;  %v756_v22 = vld [vmem:[%s1276_s1 + $0x1d0] sm:$0xf0]  ;;  %v610_v23 = vld [vmem:[%s1276_s1 + $0xa0] sm:$0xf]  ;;  %v806_v24 = vld [vmem:[%s1276_s1 + $0xac] sm:$0xf0] }
   0x7   :  { %v759_v25 = vor.u32 %v840_v20, %v756_v22  ;;  %v738_v26 = vld [vmem:[%s1276_s1 + $0x1a0] sm:$0xf]  ;;  %v838_v27 = vld [vmem:[%s1276_s1 + $0x1ac] sm:$0xf0]  ;;  %v804_v28 = vld [vmem:[%s1276_s1 + $0xa4] sm:$0xf]  ;;  %v611_v29 = vor.u32 %v806_v24, %v610_v23 }
   0x8   :  { %417 = vmatpush.bf16.msra.mxu0 %v627_v16  ;;  %v612_v30 = vld [vmem:[%s1276_s1 + $0xb0] sm:$0xf0]  ;;  %v836_v31 = vld [vmem:[%s1276_s1 + $0x1a4] sm:$0xf]  ;;  %v739_v33 = vor.u32 %v838_v27, %v738_v26  ;;  %v594_v35 = vld [vmem:[%s1276_s1 + $0x80] sm:$0xf] }
   0x9   :  { %v740_v32 = vld [vmem:[%s1276_s1 + $0x1b0] sm:$0xf0]  ;;  %430 = vmatpush.bf16.msra.mxu1 %v755_v17  ;;  %443 = vmatpush.bf16.msra.mxu2 %v631_v21  ;;  %v615_v34 = vor.u32 %v804_v28, %v612_v30  ;;  %v802_v36 = vld [vmem:[%s1276_s1 + $0x8c] sm:$0xf0]  ;;  %v722_v37 = vld [vmem:[%s1276_s1 + $0x180] sm:$0xf] }
   0xa   :  { %456 = vmatpush.bf16.msra.mxu3 %v759_v25  ;;  %v743_v38 = vor.u32 %v836_v31, %v740_v32  ;;  %v834_v39 = vld [vmem:[%s1276_s1 + $0x18c] sm:$0xf0]  ;;  %v800_v40 = vld [vmem:[%s1276_s1 + $0x84] sm:$0xf]  ;;  %v596_v41 = vld [vmem:[%s1276_s1 + $0x90] sm:$0xf0]  ;;  %v595_v44 = vor.u32 %v802_v36, %v594_v35 }
   0xb   :  { %v832_v42 = vld [vmem:[%s1276_s1 + $0x184] sm:$0xf]  ;;  %v724_v43 = vld [vmem:[%s1276_s1 + $0x190] sm:$0xf0]  ;;  %v723_v45 = vor.u32 %v834_v39, %v722_v37  ;;  %v599_v46 = vor.u32 %v800_v40, %v596_v41  ;;  %v578_v47 = vld [vmem:[%s1276_s1 + $0x60] sm:$0xf] }
   0xc   :  { %418 = vmatpush.bf16.msra.mxu0 %v611_v29  ;;  %v798_v48 = vld [vmem:[%s1276_s1 + $0x6c] sm:$0xf0]  ;;  %v706_v49 = vld [vmem:[%s1276_s1 + $0x160] sm:$0xf]  ;;  %v727_v50 = vor.u32 %v832_v42, %v724_v43  ;;  %v796_v52 = vld [vmem:[%s1276_s1 + $0x64] sm:$0xf] }
   0xd   :  { %431 = vmatpush.bf16.msra.mxu1 %v739_v33  ;;  %444 = vmatpush.bf16.msra.mxu2 %v615_v34  ;;  %v830_v51 = vld [vmem:[%s1276_s1 + $0x16c] sm:$0xf0]  ;;  %v580_v53 = vld [vmem:[%s1276_s1 + $0x70] sm:$0xf0]  ;;  %v828_v54 = vld [vmem:[%s1276_s1 + $0x164] sm:$0xf]  ;;  %v579_v56 = vor.u32 %v798_v48, %v578_v47 }
   0xe   :  { %457 = vmatpush.bf16.msra.mxu3 %v743_v38  ;;  %v708_v55 = vld [vmem:[%s1276_s1 + $0x170] sm:$0xf0]  ;;  %v707_v57 = vor.u32 %v830_v51, %v706_v49  ;;  %v583_v58 = vor.u32 %v796_v52, %v580_v53  ;;  %v562_v59 = vld [vmem:[%s1276_s1 + $0x40] sm:$0xf]  ;;  %v794_v60 = vld [vmem:[%s1276_s1 + $0x4c] sm:$0xf0] }
   0xf   :  { %v690_v61 = vld [vmem:[%s1276_s1 + $0x140] sm:$0xf]  ;;  %v711_v62 = vor.u32 %v828_v54, %v708_v55  ;;  %v826_v63 = vld [vmem:[%s1276_s1 + $0x14c] sm:$0xf0]  ;;  %v792_v0 = vld [vmem:[%s1276_s1 + $0x44] sm:$0xf]  ;;  %v563_v4 = vor.u32 %v794_v60, %v562_v59 }
  0x10   :  { %419 = vmatpush.bf16.msra.mxu0 %v595_v44  ;;  %v564_v1 = vld [vmem:[%s1276_s1 + $0x50] sm:$0xf0]  ;;  %v824_v2 = vld [vmem:[%s1276_s1 + $0x144] sm:$0xf]  ;;  %v691_v5 = vor.u32 %v826_v63, %v690_v61  ;;  %v546_v7 = vld [vmem:[%s1276_s1 + $0x20] sm:$0xf] }
  0x11   :  { %432 = vmatpush.bf16.msra.mxu1 %v723_v45  ;;  %445 = vmatpush.bf16.msra.mxu2 %v599_v46  ;;  %v692_v3 = vld [vmem:[%s1276_s1 + $0x150] sm:$0xf0]  ;;  %v567_v6 = vor.u32 %v792_v0, %v564_v1  ;;  %v790_v8 = vld [vmem:[%s1276_s1 + $0x2c] sm:$0xf0]  ;;  %v674_v9 = vld [vmem:[%s1276_s1 + $0x120] sm:$0xf] }
  0x12   :  { %458 = vmatpush.bf16.msra.mxu3 %v727_v50  ;;  %v695_v10 = vor.u32 %v824_v2, %v692_v3  ;;  %v822_v11 = vld [vmem:[%s1276_s1 + $0x12c] sm:$0xf0]  ;;  %v788_v12 = vld [vmem:[%s1276_s1 + $0x24] sm:$0xf]  ;;  %v548_v13 = vld [vmem:[%s1276_s1 + $0x30] sm:$0xf0]  ;;  %v547_v16 = vor.u32 %v790_v8, %v546_v7 }
  0x13   :  { %v820_v14 = vld [vmem:[%s1276_s1 + $0x124] sm:$0xf]  ;;  %v676_v15 = vld [vmem:[%s1276_s1 + $0x130] sm:$0xf0]  ;;  %v530_v17 = vld [vmem:[%s1276_s1] sm:$0xf]  ;;  %v675_v20 = vor.u32 %v822_v11, %v674_v9  ;;  %v551_v21 = vor.u32 %v788_v12, %v548_v13 }
  0x14   :  { %420 = vmatpush.bf16.msra.mxu0 %v579_v56  ;;  %v786_v18 = vld [vmem:[%s1276_s1 + $0xc] sm:$0xf0]  ;;  %v658_v19 = vld [vmem:[%s1276_s1 + $0x100] sm:$0xf]  ;;  %v784_v23 = vld [vmem:[%s1276_s1 + $0x4] sm:$0xf]  ;;  %v679_v25 = vor.u32 %v820_v14, %v676_v15 }
  0x15   :  { %433 = vmatpush.bf16.msra.mxu1 %v707_v57  ;;  %446 = vmatpush.bf16.msra.mxu2 %v583_v58  ;;  %v818_v22 = vld [vmem:[%s1276_s1 + $0x10c] sm:$0xf0]  ;;  %v532_v24 = vld [vmem:[%s1276_s1 + $0x10] sm:$0xf0]  ;;  %v816_v26 = vld [vmem:[%s1276_s1 + $0x104] sm:$0xf]  ;;  %v531_v32 = vor.u32 %v786_v18, %v530_v17 }
  0x16   :  { %459 = vmatpush.bf16.msra.mxu3 %v711_v62  ;;  %v660_v27 = vld [vmem:[%s1276_s1 + $0x110] sm:$0xf0]  ;;  %v650_v28 = vld [vmem:[%s1276_s1 + $0xe8] sm:$0xf]  ;;  %v815_v29 = vld [vmem:[%s1276_s1 + $0xf4] sm:$0xf0]  ;;  %v659_v37 = vor.u32 %v818_v22, %v658_v19  ;;  %v535_v38 = vor.u32 %v784_v23, %v532_v24 }
  0x17   :  { %v778_v30 = vld [vmem:[%s1276_s1 + $0x1e8] sm:$0xf]  ;;  %v14_v31 = vld [vmem:[%s1277_s0] sm:$0xff]  ;;  %v847_v33 = vld [vmem:[%s1276_s1 + $0x1f4] sm:$0xf0]  ;;  %v663_v42 = vor.u32 %v816_v26, %v660_v27  ;;  %v651_v43 = vor.u32 %v815_v29, %v650_v28 }
  0x18   :  { %421 = vmatpush.bf16.msra.mxu0 %v563_v4  ;;  %v813_v34 = vld [vmem:[%s1276_s1 + $0xec] sm:$0xf]  ;;  %v652_v35 = vld [vmem:[%s1276_s1 + $0xf8] sm:$0xf0]  ;;  %v90_v36 = vunpack.c.l.b16 %v14_v31  ;;  %v91_v41 = vunpack.c.h.b16 %v14_v31  ;;  %v779_v44 = vor.u32 %v847_v33, %v778_v30  ;;  %v634_v46 = vld [vmem:[%s1276_s1 + $0xc8] sm:$0xf] }
  0x19   :  { %434 = vmatpush.bf16.msra.mxu1 %v691_v5  ;;  %447 = vmatpush.bf16.msra.mxu2 %v567_v6  ;;  %v845_v39 = vld [vmem:[%s1276_s1 + $0x1ec] sm:$0xf]  ;;  %v780_v40 = vld [vmem:[%s1276_s1 + $0x1f8] sm:$0xf0]  ;;  %v655_v45 = vor.u32 %v813_v34, %v652_v35  ;;  %v811_v47 = vld [vmem:[%s1276_s1 + $0xd4] sm:$0xf0] }
  0x1a   :  { %460 = vmatpush.bf16.msra.mxu3 %v695_v10  ;;  %v762_v48 = vld [vmem:[%s1276_s1 + $0x1c8] sm:$0xf]  ;;  %v783_v49 = vor.u32 %v845_v39, %v780_v40  ;;  %v843_v50 = vld [vmem:[%s1276_s1 + $0x1d4] sm:$0xf0]  ;;  %v809_v51 = vld [vmem:[%s1276_s1 + $0xcc] sm:$0xf]  ;;  %v1105_v53 = vpack.c.b16 %v90_v36, %v90_v36  ;;  %v1113_v56 = vpack.c.b16 %v91_v41, %v91_v41  ;;  %v635_v57 = vor.u32 %v811_v47, %v634_v46 }
  0x1b   :  { %v636_v52 = vld [vmem:[%s1276_s1 + $0xd8] sm:$0xf0]  ;;  %v841_v54 = vld [vmem:[%s1276_s1 + $0x1cc] sm:$0xf]  ;;  %v763_v58 = vor.u32 %v843_v50, %v762_v48  ;;  %v618_v60 = vld [vmem:[%s1276_s1 + $0xa8] sm:$0xf] }
  0x1c   :  { %422 = vmatpush.bf16.msra.mxu0 %v547_v16  ;;  %v764_v55 = vld [vmem:[%s1276_s1 + $0x1d8] sm:$0xf0]  ;;  %v639_v59 = vor.u32 %v809_v51, %v636_v52  ;;  %v807_v61 = vld [vmem:[%s1276_s1 + $0xb4] sm:$0xf0]  ;;  %v746_v62 = vld [vmem:[%s1276_s1 + $0x1a8] sm:$0xf] }
  0x1d   :  { %435 = vmatpush.bf16.msra.mxu1 %v675_v20  ;;  %448 = vmatpush.bf16.msra.mxu2 %v551_v21  ;;  %v767_v63 = vor.u32 %v841_v54, %v764_v55  ;;  %v839_v0 = vld [vmem:[%s1276_s1 + $0x1b4] sm:$0xf0]  ;;  %v805_v1 = vld [vmem:[%s1276_s1 + $0xac] sm:$0xf]  ;;  %v620_v2 = vld [vmem:[%s1276_s1 + $0xb8] sm:$0xf0]  ;;  %v619_v5 = vor.u32 %v807_v61, %v618_v60 }
  0x1e   :  { %461 = vmatpush.bf16.msra.mxu3 %v679_v25  ;;  %v837_v3 = vld [vmem:[%s1276_s1 + $0x1ac] sm:$0xf]  ;;  %v748_v4 = vld [vmem:[%s1276_s1 + $0x1b8] sm:$0xf0]  ;;  %v747_v6 = vor.u32 %v839_v0, %v746_v62  ;;  %v623_v7 = vor.u32 %v805_v1, %v620_v2  ;;  %v602_v8 = vld [vmem:[%s1276_s1 + $0x88] sm:$0xf] }
  0x1f   :  { %v803_v9 = vld [vmem:[%s1276_s1 + $0x94] sm:$0xf0]  ;;  %v730_v10 = vld [vmem:[%s1276_s1 + $0x188] sm:$0xf]  ;;  %v751_v11 = vor.u32 %v837_v3, %v748_v4  ;;  %v801_v13 = vld [vmem:[%s1276_s1 + $0x8c] sm:$0xf] }
  0x20   :  { %423 = vmatpush.bf16.msra.mxu0 %v531_v32  ;;  %v835_v12 = vld [vmem:[%s1276_s1 + $0x194] sm:$0xf0]  ;;  %v604_v14 = vld [vmem:[%s1276_s1 + $0x98] sm:$0xf0]  ;;  %v833_v15 = vld [vmem:[%s1276_s1 + $0x18c] sm:$0xf]  ;;  %v603_v17 = vor.u32 %v803_v9, %v602_v8 }
  0x21   :  { %436 = vmatpush.bf16.msra.mxu1 %v659_v37  ;;  %449 = vmatpush.bf16.msra.mxu2 %v535_v38  ;;  %v732_v16 = vld [vmem:[%s1276_s1 + $0x198] sm:$0xf0]  ;;  %v731_v18 = vor.u32 %v835_v12, %v730_v10  ;;  %v607_v19 = vor.u32 %v801_v13, %v604_v14  ;;  %v586_v20 = vld [vmem:[%s1276_s1 + $0x68] sm:$0xf]  ;;  %v799_v21 = vld [vmem:[%s1276_s1 + $0x74] sm:$0xf0] }
  0x22   :  { %462 = vmatpush.bf16.msra.mxu3 %v663_v42  ;;  %v714_v22 = vld [vmem:[%s1276_s1 + $0x168] sm:$0xf]  ;;  %v735_v23 = vor.u32 %v833_v15, %v732_v16  ;;  %v831_v24 = vld [vmem:[%s1276_s1 + $0x174] sm:$0xf0]  ;;  %v797_v25 = vld [vmem:[%s1276_s1 + $0x6c] sm:$0xf]  ;;  %v587_v29 = vor.u32 %v799_v21, %v586_v20 }
  0x23   :  { %424 = vmatmul.bf16.vlgmr.msra.gmra.mxu0 %v1105_v53  ;;  %v588_v26 = vld [vmem:[%s1276_s1 + $0x78] sm:$0xf0]  ;;  %v829_v27 = vld [vmem:[%s1276_s1 + $0x16c] sm:$0xf]  ;;  %v715_v30 = vor.u32 %v831_v24, %v714_v22  ;;  %v570_v32 = vld [vmem:[%s1276_s1 + $0x48] sm:$0xf] }
  0x24   :  { %468 = vmatpush.bf16.msrb.mxu0 %v651_v43  ;;  %450 = vmatmul.bf16.vlgmr.msra.gmra.mxu2 %v1105_v53  ;;  %v716_v28 = vld [vmem:[%s1276_s1 + $0x178] sm:$0xf0]  ;;  %v591_v31 = vor.u32 %v797_v25, %v588_v26  ;;  %v795_v33 = vld [vmem:[%s1276_s1 + $0x54] sm:$0xf0]  ;;  %v698_v34 = vld [vmem:[%s1276_s1 + $0x148] sm:$0xf] }
  0x25   :  { %481 = vmatpush.bf16.msrb.mxu1 %v779_v44  ;;  %494 = vmatpush.bf16.msrb.mxu2 %v655_v45  ;;  %v719_v35 = vor.u32 %v829_v27, %v716_v28  ;;  %v827_v36 = vld [vmem:[%s1276_s1 + $0x154] sm:$0xf0]  ;;  %v793_v37 = vld [vmem:[%s1276_s1 + $0x4c] sm:$0xf]  ;;  %v572_v38 = vld [vmem:[%s1276_s1 + $0x58] sm:$0xf0]  ;;  %v571_v41 = vor.u32 %v795_v33, %v570_v32 }
  0x26   :  { %507 = vmatpush.bf16.msrb.mxu3 %v783_v49  ;;  %437 = vmatmul.bf16.vlgmr.msra.gmra.mxu1 %v1113_v56  ;;  %v825_v39 = vld [vmem:[%s1276_s1 + $0x14c] sm:$0xf]  ;;  %v700_v40 = vld [vmem:[%s1276_s1 + $0x158] sm:$0xf0]  ;;  %v699_v42 = vor.u32 %v827_v36, %v698_v34  ;;  %v575_v43 = vor.u32 %v793_v37, %v572_v38  ;;  %v554_v44 = vld [vmem:[%s1276_s1 + $0x28] sm:$0xf] }
  0x27   :  { %463 = vmatmul.bf16.vlgmr.msra.gmra.mxu3 %v1113_v56  ;;  %v791_v45 = vld [vmem:[%s1276_s1 + $0x34] sm:$0xf0]  ;;  %v682_v46 = vld [vmem:[%s1276_s1 + $0x128] sm:$0xf]  ;;  %v703_v47 = vor.u32 %v825_v39, %v700_v40  ;;  %v789_v49 = vld [vmem:[%s1276_s1 + $0x2c] sm:$0xf] }
  0x28   :  { %469 = vmatpush.bf16.msrb.mxu0 %v635_v57  ;;  %v823_v48 = vld [vmem:[%s1276_s1 + $0x134] sm:$0xf0]  ;;  %v556_v50 = vld [vmem:[%s1276_s1 + $0x38] sm:$0xf0]  ;;  %v821_v51 = vld [vmem:[%s1276_s1 + $0x12c] sm:$0xf]  ;;  %v555_v54 = vor.u32 %v791_v45, %v554_v44 }
  0x29   :  { %482 = vmatpush.bf16.msrb.mxu1 %v763_v58  ;;  %495 = vmatpush.bf16.msrb.mxu2 %v639_v59  ;;  %v684_v52 = vld [vmem:[%s1276_s1 + $0x138] sm:$0xf0]  ;;  %v683_v55 = vor.u32 %v823_v48, %v682_v46  ;;  %v559_v57 = vor.u32 %v789_v49, %v556_v50  ;;  %v538_v58 = vld [vmem:[%s1276_s1 + $0x8] sm:$0xf]  ;;  %v787_v59 = vld [vmem:[%s1276_s1 + $0x14] sm:$0xf0] }
  0x2a   :  { %508 = vmatpush.bf16.msrb.mxu3 %v767_v63  ;;  %v666_v60 = vld [vmem:[%s1276_s1 + $0x108] sm:$0xf]  ;;  %v687_v61 = vor.u32 %v821_v51, %v684_v52  ;;  %v819_v62 = vld [vmem:[%s1276_s1 + $0x114] sm:$0xf0]  ;;  %v785_v63 = vld [vmem:[%s1276_s1 + $0xc] sm:$0xf]  ;;  %v539_v3 = vor.u32 %v787_v59, %v538_v58 }
  0x2b   :  { %v540_v0 = vld [vmem:[%s1276_s1 + $0x18] sm:$0xf0]  ;;  %v817_v1 = vld [vmem:[%s1276_s1 + $0x10c] sm:$0xf]  ;;  %v667_v4 = vor.u32 %v819_v62, %v666_v60 }
  0x2c   :  { %470 = vmatpush.bf16.msrb.mxu0 %v619_v5  ;;  %v668_v2 = vld [vmem:[%s1276_s1 + $0x118] sm:$0xf0]  ;;  %v543_v5 = vor.u32 %v785_v63, %v540_v0 }
  0x2d   :  { %483 = vmatpush.bf16.msrb.mxu1 %v747_v6  ;;  %496 = vmatpush.bf16.msrb.mxu2 %v623_v7  ;;  %v671_v6 = vor.u32 %v817_v1, %v668_v2  ;;  %v79_v7 = vld [vmem:[%s1278_s2] sm:$0xf] }
  0x2e   :  { %509 = vmatpush.bf16.msrb.mxu3 %v751_v11  ;;  %v81_v8 = vperm.slane %v79_v7, 0  ;;  %v82_v12 = vperm.slane %v79_v7, 1  ;;  %v84_v24 = vperm.slane %v79_v7, 3 }
  0x30   :  { %471 = vmatpush.bf16.msrb.mxu0 %v603_v17 }
  0x31   :  { %484 = vmatpush.bf16.msrb.mxu1 %v731_v18  ;;  %497 = vmatpush.bf16.msrb.mxu2 %v607_v19 }
  0x32   :  { %510 = vmatpush.bf16.msrb.mxu3 %v735_v23  ;;  %v83_v23 = vperm.slane %v79_v7, 2 }
  0x34   :  { %472 = vmatpush.bf16.msrb.mxu0 %v587_v29 }
  0x35   :  { %485 = vmatpush.bf16.msrb.mxu1 %v715_v30  ;;  %498 = vmatpush.bf16.msrb.mxu2 %v591_v31 }
  0x36   :  { %511 = vmatpush.bf16.msrb.mxu3 %v719_v35 }
  0x38   :  { %473 = vmatpush.bf16.msrb.mxu0 %v571_v41 }
  0x39   :  { %486 = vmatpush.bf16.msrb.mxu1 %v699_v42  ;;  %499 = vmatpush.bf16.msrb.mxu2 %v575_v43 }
  0x3a   :  { %512 = vmatpush.bf16.msrb.mxu3 %v703_v47 }
  0x3c   :  { %474 = vmatpush.bf16.msrb.mxu0 %v555_v54 }
  0x3d   :  { %487 = vmatpush.bf16.msrb.mxu1 %v683_v55  ;;  %500 = vmatpush.bf16.msrb.mxu2 %v559_v57 }
  0x3e   :  { %513 = vmatpush.bf16.msrb.mxu3 %v687_v61 }
  0x40   :  { %475 = vmatpush.bf16.msrb.mxu0 %v539_v3 }
  0x41   :  { %488 = vmatpush.bf16.msrb.mxu1 %v667_v4  ;;  %501 = vmatpush.bf16.msrb.mxu2 %v543_v5 }
  0x42   :  { %514 = vmatpush.bf16.msrb.mxu3 %v671_v6 }
  0x43   :  { %476 = vmatmul.bf16.vlgmr.msrb.gmra.mxu0 %v1105_v53 }
  0x44   :  { %489 = vmatmul.bf16.vlgmr.msrb.gmra.mxu1 %v1113_v56  ;;  %502 = vmatmul.bf16.vlgmr.msrb.gmra.mxu2 %v1105_v53 }
  0x45   :  { %515 = vmatmul.bf16.vlgmr.msrb.gmra.mxu3 %v1113_v56 }
  0xa0   :  { %v425_v9 = vpop.f32.mrf.mxu0 }
  0xa1   :  { %v426_v11 = vadd.f32 %v425_v9, %v81_v8 }
  0xa3   :  { %v438_v10 = vpop.f32.mrf.mxu1 }
  0xa4   :  { %v439_v14 = vadd.f32 %v438_v10, %v426_v11 }
  0xa7   :  { %v451_v13 = vpop.f32.mrf.mxu2 }
  0xa8   :  { %v452_v15 = vadd.f32 %v451_v13, %v82_v12  ;;  %v427_v18 = vpop.f32.mrf.mxu0 }
  0xaa   :  { %v464_v16 = vpop.f32.mrf.mxu3 }
  0xab   :  { %v465_v17 = vadd.f32 %v464_v16, %v452_v15  ;;  %v440_v19 = vpop.f32.mrf.mxu1 }
  0xad   :  { %v520_v20 = vpack.c.bf16 %v465_v17, %v439_v14 }
  0xaf   :  { %522 = vst [vmem:[%s1279_s3] sm:$0xff] %v520_v20  ;;  %v453_v53 = vpop.f32.mrf.mxu2 }
  0xb2   :  { %v466_v56 = vpop.f32.mrf.mxu3 }
  0xc0   :  { %v477_v21 = vpop.f32.mrf.mxu0 }
  0xc1   :  { %v490_v22 = vpop.f32.mrf.mxu1  ;;  %v478_v25 = vadd.f32 %v477_v21, %v83_v23 }
  0xc3   :  { %v491_v31 = vadd.f32 %v490_v22, %v478_v25 }
  0xc7   :  { %v503_v26 = vpop.f32.mrf.mxu2 }
  0xc8   :  { %v504_v27 = vadd.f32 %v503_v26, %v84_v24  ;;  %v516_v28 = vpop.f32.mrf.mxu3  ;;  %v479_v29 = vpop.f32.mrf.mxu0 }
  0xc9   :  { %v492_v30 = vpop.f32.mrf.mxu1 }
  0xca   :  { %v517_v32 = vadd.f32 %v516_v28, %v504_v27 }
  0xcc   :  { %v521_v33 = vpack.c.bf16 %v517_v32, %v491_v31 }
  0xce   :  { %523 = vst [vmem:[%s1279_s3 + $0x8] sm:$0xff] %v521_v33 }
  0xcf   :  { %v505_v34 = vpop.f32.mrf.mxu2 }
  0xd0   :  { %v518_v35 = vpop.f32.mrf.mxu3 }

// kernel: _lambda_.35
= control target key start
LH: loop header
LB: loop body
LE: loop exit
PB: predicated region body
PF: predicated region fallthrough
CT: control target
= control target key end

     0   :  { %s689_s1 = inlined_call_operand.vmem [shape: bf16[128,512], index: 1, kind: input, shape index: {}]   ;;  %s690_s0 = inlined_call_operand.vmem [shape: bf16[8,128], index: 0, kind: input, shape index: {}]   ;;  %s691_s2 = inlined_call_operand.vmem [shape: f32[1,512], index: 2, kind: input, shape index: {}]   ;;  %s692_s3 = inlined_call_operand.vmem [shape: bf16[8,512], index: 3, kind: input, shape index: {}]   ;;  %s693_s4 = inlined_call_operand.vmem [shape: bf16[8,512], index: 4, kind: output, shape index: {}]  }
   0x1   :  { %v408_v0 = vld [vmem:[%s689_s1 + $0xe0] sm:$0xf]  ;;  %v452_v1 = vld [vmem:[%s689_s1 + $0xec] sm:$0xf0]  ;;  %v450_v2 = vld [vmem:[%s689_s1 + $0xe4] sm:$0xf] }
   0x2   :  { %v409_v3 = vor.u32 %v452_v1, %v408_v0  ;;  %v410_v4 = vld [vmem:[%s689_s1 + $0xf0] sm:$0xf0]  ;;  %v416_v5 = vld [vmem:[%s689_s1 + $0xe8] sm:$0xf]  ;;  %v453_v6 = vld [vmem:[%s689_s1 + $0xf4] sm:$0xf0] }
   0x3   :  { %v413_v7 = vor.u32 %v450_v2, %v410_v4  ;;  %v417_v8 = vor.u32 %v453_v6, %v416_v5  ;;  %v451_v9 = vld [vmem:[%s689_s1 + $0xec] sm:$0xf]  ;;  %v418_v10 = vld [vmem:[%s689_s1 + $0xf8] sm:$0xf0]  ;;  %v392_v11 = vld [vmem:[%s689_s1 + $0xc0] sm:$0xf] }
   0x4   :  { %220 = vmatpush.bf16.msra.mxu0 %v409_v3  ;;  %v421_v12 = vor.u32 %v451_v9, %v418_v10  ;;  %v448_v13 = vld [vmem:[%s689_s1 + $0xcc] sm:$0xf0]  ;;  %v446_v14 = vld [vmem:[%s689_s1 + $0xc4] sm:$0xf]  ;;  %v394_v15 = vld [vmem:[%s689_s1 + $0xd0] sm:$0xf0] }
   0x5   :  { %233 = vmatpush.bf16.msra.mxu1 %v413_v7  ;;  %246 = vmatpush.bf16.msra.mxu2 %v417_v8  ;;  %v393_v16 = vor.u32 %v448_v13, %v392_v11  ;;  %v397_v17 = vor.u32 %v446_v14, %v394_v15  ;;  %v400_v18 = vld [vmem:[%s689_s1 + $0xc8] sm:$0xf]  ;;  %v449_v19 = vld [vmem:[%s689_s1 + $0xd4] sm:$0xf0]  ;;  %v447_v20 = vld [vmem:[%s689_s1 + $0xcc] sm:$0xf] }
   0x6   :  { %259 = vmatpush.bf16.msra.mxu3 %v421_v12  ;;  %v401_v21 = vor.u32 %v449_v19, %v400_v18  ;;  %v402_v22 = vld [vmem:[%s689_s1 + $0xd8] sm:$0xf0]  ;;  %v376_v23 = vld [vmem:[%s689_s1 + $0xa0] sm:$0xf]  ;;  %v444_v24 = vld [vmem:[%s689_s1 + $0xac] sm:$0xf0] }
   0x7   :  { %v405_v25 = vor.u32 %v447_v20, %v402_v22  ;;  %v442_v26 = vld [vmem:[%s689_s1 + $0xa4] sm:$0xf]  ;;  %v378_v27 = vld [vmem:[%s689_s1 + $0xb0] sm:$0xf0]  ;;  %v384_v28 = vld [vmem:[%s689_s1 + $0xa8] sm:$0xf]  ;;  %v377_v29 = vor.u32 %v444_v24, %v376_v23 }
   0x8   :  { %221 = vmatpush.bf16.msra.mxu0 %v393_v16  ;;  %v445_v30 = vld [vmem:[%s689_s1 + $0xb4] sm:$0xf0]  ;;  %v443_v31 = vld [vmem:[%s689_s1 + $0xac] sm:$0xf]  ;;  %v386_v32 = vld [vmem:[%s689_s1 + $0xb8] sm:$0xf0]  ;;  %v381_v33 = vor.u32 %v442_v26, %v378_v27 }
   0x9   :  { %234 = vmatpush.bf16.msra.mxu1 %v397_v17  ;;  %247 = vmatpush.bf16.msra.mxu2 %v401_v21  ;;  %v385_v34 = vor.u32 %v445_v30, %v384_v28  ;;  %v360_v35 = vld [vmem:[%s689_s1 + $0x80] sm:$0xf]  ;;  %v440_v36 = vld [vmem:[%s689_s1 + $0x8c] sm:$0xf0]  ;;  %v438_v37 = vld [vmem:[%s689_s1 + $0x84] sm:$0xf]  ;;  %v389_v38 = vor.u32 %v443_v31, %v386_v32 }
   0xa   :  { %260 = vmatpush.bf16.msra.mxu3 %v405_v25  ;;  %v362_v39 = vld [vmem:[%s689_s1 + $0x90] sm:$0xf0]  ;;  %v368_v40 = vld [vmem:[%s689_s1 + $0x88] sm:$0xf]  ;;  %v441_v41 = vld [vmem:[%s689_s1 + $0x94] sm:$0xf0]  ;;  %v361_v44 = vor.u32 %v440_v36, %v360_v35 }
   0xb   :  { %v439_v42 = vld [vmem:[%s689_s1 + $0x8c] sm:$0xf]  ;;  %v370_v43 = vld [vmem:[%s689_s1 + $0x98] sm:$0xf0]  ;;  %v365_v45 = vor.u32 %v438_v37, %v362_v39  ;;  %v369_v46 = vor.u32 %v441_v41, %v368_v40  ;;  %v344_v47 = vld [vmem:[%s689_s1 + $0x60] sm:$0xf] }
   0xc   :  { %222 = vmatpush.bf16.msra.mxu0 %v377_v29  ;;  %v436_v48 = vld [vmem:[%s689_s1 + $0x6c] sm:$0xf0]  ;;  %v434_v49 = vld [vmem:[%s689_s1 + $0x64] sm:$0xf]  ;;  %v373_v50 = vor.u32 %v439_v42, %v370_v43  ;;  %v346_v51 = vld [vmem:[%s689_s1 + $0x70] sm:$0xf0] }
   0xd   :  { %235 = vmatpush.bf16.msra.mxu1 %v381_v33  ;;  %248 = vmatpush.bf16.msra.mxu2 %v385_v34  ;;  %v352_v52 = vld [vmem:[%s689_s1 + $0x68] sm:$0xf]  ;;  %v437_v53 = vld [vmem:[%s689_s1 + $0x74] sm:$0xf0]  ;;  %v435_v54 = vld [vmem:[%s689_s1 + $0x6c] sm:$0xf]  ;;  %v345_v56 = vor.u32 %v436_v48, %v344_v47  ;;  %v349_v57 = vor.u32 %v434_v49, %v346_v51 }
   0xe   :  { %261 = vmatpush.bf16.msra.mxu3 %v389_v38  ;;  %v354_v55 = vld [vmem:[%s689_s1 + $0x78] sm:$0xf0]  ;;  %v353_v58 = vor.u32 %v437_v53, %v352_v52  ;;  %v328_v59 = vld [vmem:[%s689_s1 + $0x40] sm:$0xf]  ;;  %v432_v60 = vld [vmem:[%s689_s1 + $0x4c] sm:$0xf0] }
   0xf   :  { %v430_v61 = vld [vmem:[%s689_s1 + $0x44] sm:$0xf]  ;;  %v357_v62 = vor.u32 %v435_v54, %v354_v55  ;;  %v330_v63 = vld [vmem:[%s689_s1 + $0x50] sm:$0xf0]  ;;  %v336_v0 = vld [vmem:[%s689_s1 + $0x48] sm:$0xf]  ;;  %v329_v4 = vor.u32 %v432_v60, %v328_v59 }
  0x10   :  { %223 = vmatpush.bf16.msra.mxu0 %v361_v44  ;;  %v433_v1 = vld [vmem:[%s689_s1 + $0x54] sm:$0xf0]  ;;  %v431_v2 = vld [vmem:[%s689_s1 + $0x4c] sm:$0xf]  ;;  %v338_v3 = vld [vmem:[%s689_s1 + $0x58] sm:$0xf0]  ;;  %v333_v5 = vor.u32 %v430_v61, %v330_v63 }
  0x11   :  { %236 = vmatpush.bf16.msra.mxu1 %v365_v45  ;;  %249 = vmatpush.bf16.msra.mxu2 %v369_v46  ;;  %v337_v6 = vor.u32 %v433_v1, %v336_v0  ;;  %v312_v7 = vld [vmem:[%s689_s1 + $0x20] sm:$0xf]  ;;  %v428_v8 = vld [vmem:[%s689_s1 + $0x2c] sm:$0xf0]  ;;  %v426_v9 = vld [vmem:[%s689_s1 + $0x24] sm:$0xf]  ;;  %v341_v10 = vor.u32 %v431_v2, %v338_v3 }
  0x12   :  { %262 = vmatpush.bf16.msra.mxu3 %v373_v50  ;;  %v314_v11 = vld [vmem:[%s689_s1 + $0x30] sm:$0xf0]  ;;  %v320_v12 = vld [vmem:[%s689_s1 + $0x28] sm:$0xf]  ;;  %v429_v13 = vld [vmem:[%s689_s1 + $0x34] sm:$0xf0]  ;;  %v313_v16 = vor.u32 %v428_v8, %v312_v7 }
  0x13   :  { %v427_v14 = vld [vmem:[%s689_s1 + $0x2c] sm:$0xf]  ;;  %v322_v15 = vld [vmem:[%s689_s1 + $0x38] sm:$0xf0]  ;;  %v317_v17 = vor.u32 %v426_v9, %v314_v11  ;;  %v321_v18 = vor.u32 %v429_v13, %v320_v12  ;;  %v296_v19 = vld [vmem:[%s689_s1] sm:$0xf] }
  0x14   :  { %224 = vmatpush.bf16.msra.mxu0 %v345_v56  ;;  %v424_v20 = vld [vmem:[%s689_s1 + $0xc] sm:$0xf0]  ;;  %v422_v21 = vld [vmem:[%s689_s1 + $0x4] sm:$0xf]  ;;  %v325_v22 = vor.u32 %v427_v14, %v322_v15  ;;  %v298_v23 = vld [vmem:[%s689_s1 + $0x10] sm:$0xf0] }
  0x15   :  { %237 = vmatpush.bf16.msra.mxu1 %v349_v57  ;;  %250 = vmatpush.bf16.msra.mxu2 %v353_v58  ;;  %v304_v24 = vld [vmem:[%s689_s1 + $0x8] sm:$0xf]  ;;  %v425_v25 = vld [vmem:[%s689_s1 + $0x14] sm:$0xf0]  ;;  %v423_v26 = vld [vmem:[%s689_s1 + $0xc] sm:$0xf]  ;;  %v297_v28 = vor.u32 %v424_v20, %v296_v19  ;;  %v301_v29 = vor.u32 %v422_v21, %v298_v23 }
  0x16   :  { %263 = vmatpush.bf16.msra.mxu3 %v357_v62  ;;  %v306_v27 = vld [vmem:[%s689_s1 + $0x18] sm:$0xf0]  ;;  %v305_v30 = vor.u32 %v425_v25, %v304_v24  ;;  %v17_v32 = vld [vmem:[%s690_s0] sm:$0xf]  ;;  %v273_v44 = vld [vmem:[%s692_s3 + $0x8] sm:$0xff] }
  0x17   :  { %v309_v31 = vor.u32 %v423_v26, %v306_v27  ;;  %v50_v33 = vld [vmem:[%s691_s2] sm:$0xf]  ;;  %v276_v50 = vunpack.c.l.bf16 %v273_v44  ;;  %v277_v52 = vunpack.c.h.bf16 %v273_v44 }
  0x18   :  { %225 = vmatpush.bf16.msra.mxu0 %v329_v4  ;;  %v272_v34 = vld [vmem:[%s692_s3] sm:$0xff]  ;;  %v52_v35 = vperm.slane %v50_v33, 0  ;;  %v53_v36 = vperm.slane %v50_v33, 1  ;;  %v54_v46 = vperm.slane %v50_v33, 2  ;;  %v55_v48 = vperm.slane %v50_v33, 3 }
  0x19   :  { %238 = vmatpush.bf16.msra.mxu1 %v333_v5  ;;  %251 = vmatpush.bf16.msra.mxu2 %v337_v6  ;;  %v274_v37 = vunpack.c.l.bf16 %v272_v34  ;;  %v275_v39 = vunpack.c.h.bf16 %v272_v34 }
  0x1a   :  { %264 = vmatpush.bf16.msra.mxu3 %v341_v10 }
  0x1c   :  { %226 = vmatpush.bf16.msra.mxu0 %v313_v16 }
  0x1d   :  { %239 = vmatpush.bf16.msra.mxu1 %v317_v17  ;;  %252 = vmatpush.bf16.msra.mxu2 %v321_v18 }
  0x1e   :  { %265 = vmatpush.bf16.msra.mxu3 %v325_v22 }
  0x20   :  { %227 = vmatpush.bf16.msra.mxu0 %v297_v28 }
  0x21   :  { %240 = vmatpush.bf16.msra.mxu1 %v301_v29  ;;  %253 = vmatpush.bf16.msra.mxu2 %v305_v30 }
  0x22   :  { %266 = vmatpush.bf16.msra.mxu3 %v309_v31 }
  0x23   :  { %228 = vmatmul.bf16.vlgmr.msra.gmra.mxu0 %v17_v32 }
  0x24   :  { %241 = vmatmul.bf16.vlgmr.msra.gmra.mxu1 %v17_v32  ;;  %254 = vmatmul.bf16.vlgmr.msra.gmra.mxu2 %v17_v32 }
  0x25   :  { %267 = vmatmul.bf16.vlgmr.msra.gmra.mxu3 %v17_v32 }
  0xa0   :  { %v229_v38 = vpop.f32.mrf.mxu0 }
  0xa1   :  { %v230_v40 = vadd.f32 %v229_v38, %v52_v35  ;;  %v242_v41 = vpop.f32.mrf.mxu1 }
  0xa2   :  { %v243_v42 = vadd.f32 %v242_v41, %v53_v36 }
  0xa3   :  { %v278_v43 = vadd.f32 %v274_v37, %v230_v40 }
  0xa4   :  { %v279_v45 = vadd.f32 %v275_v39, %v243_v42 }
  0xa5   :  { %v282_v47 = vmax.f32 %v278_v43, 0.0 }
  0xa6   :  { %v283_v49 = vmax.f32 %v279_v45, 0.0 }
  0xa7   :  { %v255_v51 = vpop.f32.mrf.mxu2 }
  0xa8   :  { %v286_v53 = vpack.c.bf16 %v283_v49, %v282_v47  ;;  %v256_v54 = vadd.f32 %v255_v51, %v54_v46  ;;  %v268_v55 = vpop.f32.mrf.mxu3  ;;  %v231_v56 = vpop.f32.mrf.mxu0 }
  0xa9   :  { %v269_v57 = vadd.f32 %v268_v55, %v55_v48  ;;  %v244_v58 = vpop.f32.mrf.mxu1 }
  0xaa   :  { %288 = vst [vmem:[%s693_s4] sm:$0xff] %v286_v53  ;;  %v280_v59 = vadd.f32 %v276_v50, %v256_v54 }
  0xab   :  { %v281_v60 = vadd.f32 %v277_v52, %v269_v57 }
  0xac   :  { %v284_v61 = vmax.f32 %v280_v59, 0.0 }
  0xad   :  { %v285_v62 = vmax.f32 %v281_v60, 0.0 }
  0xaf   :  { %v287_v63 = vpack.c.bf16 %v285_v62, %v284_v61  ;;  %v257_v0 = vpop.f32.mrf.mxu2 }
  0xb0   :  { %v270_v1 = vpop.f32.mrf.mxu3 }
  0xb1   :  { %289 = vst [vmem:[%s693_s4 + $0x8] sm:$0xff] %v287_v63 }

// kernel: _lambda_.33
= control target key start
LH: loop header
LB: loop body
LE: loop exit
PB: predicated region body
PF: predicated region fallthrough
CT: control target
= control target key end

     0   :  { %s1373_s1 = inlined_call_operand.vmem [shape: bf16[1152,128], index: 1, kind: input, shape index: {}]   ;;  %s1374_s2 = inlined_call_operand.vmem [shape: f32[1,128], index: 2, kind: input, shape index: {}]   ;;  %s1375_s0 = inlined_call_operand.vmem [shape: bf16[8,1152], index: 0, kind: input, shape index: {}]   ;;  %s1376_s3 = inlined_call_operand.vmem [shape: bf16[8,128], index: 3, kind: output, shape index: {}]  }
   0x1   :  { %v1050_v0 = vld [vmem:[%s1373_s1 + $0x38] sm:$0xff]  ;;  %v1049_v4 = vld [vmem:[%s1373_s1 + $0x30] sm:$0xff]  ;;  %v1048_v8 = vld [vmem:[%s1373_s1 + $0x28] sm:$0xff] }
   0x2   :  { %v1066_v1 = vld [vmem:[%s1373_s1 + $0xb8] sm:$0xff]  ;;  %631 = vmatpush.bf16.msra.mxu0 %v1050_v0  ;;  %v1065_v5 = vld [vmem:[%s1373_s1 + $0xb0] sm:$0xff]  ;;  %v1064_v9 = vld [vmem:[%s1373_s1 + $0xa8] sm:$0xff] }
   0x3   :  { %v1074_v2 = vld [vmem:[%s1373_s1 + $0xf8] sm:$0xff]  ;;  %657 = vmatpush.bf16.msra.mxu2 %v1066_v1  ;;  %v1073_v6 = vld [vmem:[%s1373_s1 + $0xf0] sm:$0xff]  ;;  %v1072_v10 = vld [vmem:[%s1373_s1 + $0xe8] sm:$0xff] }
   0x4   :  { %v1058_v3 = vld [vmem:[%s1373_s1 + $0x78] sm:$0xff]  ;;  %670 = vmatpush.bf16.msra.mxu3 %v1074_v2  ;;  %v1057_v7 = vld [vmem:[%s1373_s1 + $0x70] sm:$0xff]  ;;  %v1056_v11 = vld [vmem:[%s1373_s1 + $0x68] sm:$0xff] }
   0x5   :  { %644 = vmatpush.bf16.msra.mxu1 %v1058_v3  ;;  %v1047_v12 = vld [vmem:[%s1373_s1 + $0x20] sm:$0xff]  ;;  %v1046_v16 = vld [vmem:[%s1373_s1 + $0x18] sm:$0xff]  ;;  %v1045_v20 = vld [vmem:[%s1373_s1 + $0x10] sm:$0xff] }
   0x6   :  { %632 = vmatpush.bf16.msra.mxu0 %v1049_v4  ;;  %v1063_v13 = vld [vmem:[%s1373_s1 + $0xa0] sm:$0xff]  ;;  %v1062_v17 = vld [vmem:[%s1373_s1 + $0x98] sm:$0xff]  ;;  %v1061_v21 = vld [vmem:[%s1373_s1 + $0x90] sm:$0xff] }
   0x7   :  { %658 = vmatpush.bf16.msra.mxu2 %v1065_v5  ;;  %v1071_v14 = vld [vmem:[%s1373_s1 + $0xe0] sm:$0xff]  ;;  %v1070_v18 = vld [vmem:[%s1373_s1 + $0xd8] sm:$0xff]  ;;  %v1069_v22 = vld [vmem:[%s1373_s1 + $0xd0] sm:$0xff] }
   0x8   :  { %671 = vmatpush.bf16.msra.mxu3 %v1073_v6  ;;  %v1055_v15 = vld [vmem:[%s1373_s1 + $0x60] sm:$0xff]  ;;  %v1054_v19 = vld [vmem:[%s1373_s1 + $0x58] sm:$0xff]  ;;  %v1053_v23 = vld [vmem:[%s1373_s1 + $0x50] sm:$0xff] }
   0x9   :  { %645 = vmatpush.bf16.msra.mxu1 %v1057_v7  ;;  %v1044_v24 = vld [vmem:[%s1373_s1 + $0x8] sm:$0xff]  ;;  %v14_v29 = vld [vmem:[%s1375_s0] sm:$0xff]  ;;  %v1082_v34 = vld [vmem:[%s1373_s1 + $0x138] sm:$0xff] }
   0xa   :  { %633 = vmatpush.bf16.msra.mxu0 %v1048_v8  ;;  %v1060_v25 = vld [vmem:[%s1373_s1 + $0x88] sm:$0xff]  ;;  %v1043_v30 = vld [vmem:[%s1373_s1] sm:$0xff]  ;;  %v172_v33 = vunpack.c.l.b16 %v14_v29  ;;  %v1098_v35 = vld [vmem:[%s1373_s1 + $0x1b8] sm:$0xff]  ;;  %v173_v39 = vunpack.c.h.b16 %v14_v29 }
   0xb   :  { %659 = vmatpush.bf16.msra.mxu2 %v1064_v9  ;;  %v1068_v26 = vld [vmem:[%s1373_s1 + $0xc8] sm:$0xff]  ;;  %v1059_v31 = vld [vmem:[%s1373_s1 + $0x80] sm:$0xff]  ;;  %v1106_v40 = vld [vmem:[%s1373_s1 + $0x1f8] sm:$0xff] }
   0xc   :  { %672 = vmatpush.bf16.msra.mxu3 %v1072_v10  ;;  %v1052_v27 = vld [vmem:[%s1373_s1 + $0x48] sm:$0xff]  ;;  %v1067_v36 = vld [vmem:[%s1373_s1 + $0xc0] sm:$0xff]  ;;  %v1090_v41 = vld [vmem:[%s1373_s1 + $0x178] sm:$0xff]  ;;  %v181_v43 = vpack.c.b16 %v172_v33, %v172_v33  ;;  %v182_v47 = vpack.c.b16 %v173_v39, %v173_v39 }
   0xd   :  { %646 = vmatpush.bf16.msra.mxu1 %v1056_v11  ;;  %v15_v28 = vld [vmem:[%s1375_s0 + $0x8] sm:$0xff]  ;;  %v1051_v37 = vld [vmem:[%s1373_s1 + $0x40] sm:$0xff]  ;;  %v1081_v44 = vld [vmem:[%s1373_s1 + $0x130] sm:$0xff] }
   0xe   :  { %634 = vmatpush.bf16.msra.mxu0 %v1047_v12  ;;  %v174_v32 = vunpack.c.l.b16 %v15_v28  ;;  %v175_v38 = vunpack.c.h.b16 %v15_v28  ;;  %v1097_v45 = vld [vmem:[%s1373_s1 + $0x1b0] sm:$0xff]  ;;  %v1080_v50 = vld [vmem:[%s1373_s1 + $0x128] sm:$0xff]  ;;  %v1079_v54 = vld [vmem:[%s1373_s1 + $0x120] sm:$0xff] }
   0xf   :  { %660 = vmatpush.bf16.msra.mxu2 %v1063_v13  ;;  %v1105_v48 = vld [vmem:[%s1373_s1 + $0x1f0] sm:$0xff]  ;;  %v1096_v51 = vld [vmem:[%s1373_s1 + $0x1a8] sm:$0xff]  ;;  %v1095_v55 = vld [vmem:[%s1373_s1 + $0x1a0] sm:$0xff] }
  0x10   :  { %673 = vmatpush.bf16.msra.mxu3 %v1071_v14  ;;  %v183_v42 = vpack.c.b16 %v174_v32, %v174_v32  ;;  %v184_v46 = vpack.c.b16 %v175_v38, %v175_v38  ;;  %v1089_v49 = vld [vmem:[%s1373_s1 + $0x170] sm:$0xff]  ;;  %v1104_v52 = vld [vmem:[%s1373_s1 + $0x1e8] sm:$0xff]  ;;  %v1103_v56 = vld [vmem:[%s1373_s1 + $0x1e0] sm:$0xff] }
  0x11   :  { %647 = vmatpush.bf16.msra.mxu1 %v1055_v15  ;;  %v1088_v53 = vld [vmem:[%s1373_s1 + $0x168] sm:$0xff]  ;;  %v1087_v57 = vld [vmem:[%s1373_s1 + $0x160] sm:$0xff]  ;;  %v1078_v58 = vld [vmem:[%s1373_s1 + $0x118] sm:$0xff] }
  0x12   :  { %635 = vmatpush.bf16.msra.mxu0 %v1046_v16  ;;  %v1094_v59 = vld [vmem:[%s1373_s1 + $0x198] sm:$0xff]  ;;  %v1077_v62 = vld [vmem:[%s1373_s1 + $0x110] sm:$0xff]  ;;  %v1076_v2 = vld [vmem:[%s1373_s1 + $0x108] sm:$0xff] }
  0x13   :  { %661 = vmatpush.bf16.msra.mxu2 %v1062_v17  ;;  %v1102_v60 = vld [vmem:[%s1373_s1 + $0x1d8] sm:$0xff]  ;;  %v1093_v63 = vld [vmem:[%s1373_s1 + $0x190] sm:$0xff]  ;;  %v1092_v3 = vld [vmem:[%s1373_s1 + $0x188] sm:$0xff] }
  0x14   :  { %674 = vmatpush.bf16.msra.mxu3 %v1070_v18  ;;  %v1086_v61 = vld [vmem:[%s1373_s1 + $0x158] sm:$0xff]  ;;  %v1101_v0 = vld [vmem:[%s1373_s1 + $0x1d0] sm:$0xff]  ;;  %v1100_v6 = vld [vmem:[%s1373_s1 + $0x1c8] sm:$0xff] }
  0x15   :  { %648 = vmatpush.bf16.msra.mxu1 %v1054_v19  ;;  %v1085_v1 = vld [vmem:[%s1373_s1 + $0x150] sm:$0xff]  ;;  %v17_v4 = vld [vmem:[%s1375_s0 + $0x18] sm:$0xff]  ;;  %v1084_v7 = vld [vmem:[%s1373_s1 + $0x148] sm:$0xff] }
  0x16   :  { %636 = vmatpush.bf16.msra.mxu0 %v1045_v20  ;;  %v16_v5 = vld [vmem:[%s1375_s0 + $0x10] sm:$0xff]  ;;  %v178_v8 = vunpack.c.l.b16 %v17_v4  ;;  %v1075_v10 = vld [vmem:[%s1373_s1 + $0x100] sm:$0xff]  ;;  %v1114_v12 = vld [vmem:[%s1373_s1 + $0x238] sm:$0xff]  ;;  %v179_v13 = vunpack.c.h.b16 %v17_v4 }
  0x17   :  { %662 = vmatpush.bf16.msra.mxu2 %v1061_v21  ;;  %v176_v9 = vunpack.c.l.b16 %v16_v5  ;;  %v1091_v11 = vld [vmem:[%s1373_s1 + $0x180] sm:$0xff]  ;;  %v177_v16 = vunpack.c.h.b16 %v16_v5  ;;  %v1113_v19 = vld [vmem:[%s1373_s1 + $0x230] sm:$0xff] }
  0x18   :  { %675 = vmatpush.bf16.msra.mxu3 %v1069_v22  ;;  %v1099_v14 = vld [vmem:[%s1373_s1 + $0x1c0] sm:$0xff]  ;;  %v187_v17 = vpack.c.b16 %v178_v8, %v178_v8  ;;  %v188_v20 = vpack.c.b16 %v179_v13, %v179_v13  ;;  %v1112_v22 = vld [vmem:[%s1373_s1 + $0x228] sm:$0xff] }
  0x19   :  { %649 = vmatpush.bf16.msra.mxu1 %v1053_v23  ;;  %v1083_v15 = vld [vmem:[%s1373_s1 + $0x140] sm:$0xff]  ;;  %v185_v18 = vpack.c.b16 %v176_v9, %v176_v9  ;;  %v186_v21 = vpack.c.b16 %v177_v16, %v177_v16 }
  0x1a   :  { %637 = vmatpush.bf16.msra.mxu0 %v1044_v24  ;;  %v1111_v23 = vld [vmem:[%s1373_s1 + $0x220] sm:$0xff]  ;;  %v1110_v24 = vld [vmem:[%s1373_s1 + $0x218] sm:$0xff] }
  0x1b   :  { %663 = vmatpush.bf16.msra.mxu2 %v1060_v25  ;;  %v1109_v25 = vld [vmem:[%s1373_s1 + $0x210] sm:$0xff]  ;;  %v1107_v29 = vld [vmem:[%s1373_s1 + $0x200] sm:$0xff] }
  0x1c   :  { %676 = vmatpush.bf16.msra.mxu3 %v1068_v26  ;;  %v1108_v26 = vld [vmem:[%s1373_s1 + $0x208] sm:$0xff]  ;;  %v1115_v39 = vld [vmem:[%s1374_s2] ss:$0 sm:$0xff] }
  0x1d   :  { %650 = vmatpush.bf16.msra.mxu1 %v1052_v27  ;;  %v18_v27 = vld [vmem:[%s1375_s0 + $0x20] sm:$0xf] }
  0x1e   :  { %638 = vmatpush.bf16.msra.mxu0 %v1043_v30  ;;  %v180_v28 = vunpack.c.l.b16 %v18_v27 }
  0x1f   :  { %664 = vmatpush.bf16.msra.mxu2 %v1059_v31 }
  0x20   :  { %677 = vmatpush.bf16.msra.mxu3 %v1067_v36  ;;  %v189_v30 = vpack.c.b16 %v180_v28, %v180_v28 }
  0x21   :  { %651 = vmatpush.bf16.msra.mxu1 %v1051_v37  ;;  %639 = vmatmul.bf16.vlgmr.msra.gmra.mxu0 %v181_v43 }
  0x22   :  { %683 = vmatpush.bf16.msrb.mxu0 %v1082_v34  ;;  %665 = vmatmul.bf16.vlgmr.msra.gmra.mxu2 %v183_v42 }
  0x23   :  { %709 = vmatpush.bf16.msrb.mxu2 %v1098_v35  ;;  %678 = vmatmul.bf16.vlgmr.msra.gmra.mxu3 %v184_v46 }
  0x24   :  { %722 = vmatpush.bf16.msrb.mxu3 %v1106_v40  ;;  %652 = vmatmul.bf16.vlgmr.msra.gmra.mxu1 %v182_v47 }
  0x25   :  { %696 = vmatpush.bf16.msrb.mxu1 %v1090_v41 }
  0x26   :  { %684 = vmatpush.bf16.msrb.mxu0 %v1081_v44 }
  0x27   :  { %710 = vmatpush.bf16.msrb.mxu2 %v1097_v45 }
  0x28   :  { %723 = vmatpush.bf16.msrb.mxu3 %v1105_v48 }
  0x29   :  { %697 = vmatpush.bf16.msrb.mxu1 %v1089_v49 }
  0x2a   :  { %685 = vmatpush.bf16.msrb.mxu0 %v1080_v50 }
  0x2b   :  { %711 = vmatpush.bf16.msrb.mxu2 %v1096_v51 }
  0x2c   :  { %724 = vmatpush.bf16.msrb.mxu3 %v1104_v52 }
  0x2d   :  { %698 = vmatpush.bf16.msrb.mxu1 %v1088_v53 }
  0x2e   :  { %686 = vmatpush.bf16.msrb.mxu0 %v1079_v54 }
  0x2f   :  { %712 = vmatpush.bf16.msrb.mxu2 %v1095_v55 }
  0x30   :  { %725 = vmatpush.bf16.msrb.mxu3 %v1103_v56 }
  0x31   :  { %699 = vmatpush.bf16.msrb.mxu1 %v1087_v57 }
  0x32   :  { %687 = vmatpush.bf16.msrb.mxu0 %v1078_v58 }
  0x33   :  { %713 = vmatpush.bf16.msrb.mxu2 %v1094_v59 }
  0x34   :  { %726 = vmatpush.bf16.msrb.mxu3 %v1102_v60 }
  0x35   :  { %700 = vmatpush.bf16.msrb.mxu1 %v1086_v61 }
  0x36   :  { %688 = vmatpush.bf16.msrb.mxu0 %v1077_v62 }
  0x37   :  { %714 = vmatpush.bf16.msrb.mxu2 %v1093_v63 }
  0x38   :  { %727 = vmatpush.bf16.msrb.mxu3 %v1101_v0 }
  0x39   :  { %701 = vmatpush.bf16.msrb.mxu1 %v1085_v1 }
  0x3a   :  { %689 = vmatpush.bf16.msrb.mxu0 %v1076_v2 }
  0x3b   :  { %715 = vmatpush.bf16.msrb.mxu2 %v1092_v3 }
  0x3c   :  { %728 = vmatpush.bf16.msrb.mxu3 %v1100_v6 }
  0x3d   :  { %702 = vmatpush.bf16.msrb.mxu1 %v1084_v7 }
  0x3e   :  { %690 = vmatpush.bf16.msrb.mxu0 %v1075_v10 }
  0x3f   :  { %716 = vmatpush.bf16.msrb.mxu2 %v1091_v11 }
  0x40   :  { %729 = vmatpush.bf16.msrb.mxu3 %v1099_v14 }
  0x41   :  { %703 = vmatpush.bf16.msrb.mxu1 %v1083_v15  ;;  %691 = vmatmul.bf16.vlgmr.msrb.gmra.mxu0 %v185_v18 }
  0x42   :  { %735 = vmatpush.bf16.msra.mxu0 %v1114_v12  ;;  %717 = vmatmul.bf16.vlgmr.msrb.gmra.mxu2 %v187_v17 }
  0x43   :  { %730 = vmatmul.bf16.vlgmr.msrb.gmra.mxu3 %v188_v20 }
  0x44   :  { %704 = vmatmul.bf16.vlgmr.msrb.gmra.mxu1 %v186_v21 }
  0x46   :  { %736 = vmatpush.bf16.msra.mxu0 %v1113_v19 }
  0x4a   :  { %737 = vmatpush.bf16.msra.mxu0 %v1112_v22 }
  0x4e   :  { %738 = vmatpush.bf16.msra.mxu0 %v1111_v23 }
  0x52   :  { %739 = vmatpush.bf16.msra.mxu0 %v1110_v24 }
  0x56   :  { %740 = vmatpush.bf16.msra.mxu0 %v1109_v25 }
  0x5a   :  { %741 = vmatpush.bf16.msra.mxu0 %v1108_v26 }
  0x5e   :  { %742 = vmatpush.bf16.msra.mxu0 %v1107_v29 }
  0x61   :  { %743 = vmatmul.bf16.vlgmr.msra.gmra.mxu0 %v189_v30 }
  0x9e   :  { %v640_v31 = vpop.f32.mrf.mxu0 }
  0x9f   :  { %v641_v40 = vadd.f32 %v1115_v39, %v640_v31 }
  0xa1   :  { %v653_v32 = vpop.f32.mrf.mxu1 }
  0xa2   :  { %v654_v43 = vadd.f32 %v653_v32, %v641_v40 }
  0xa5   :  { %v666_v33 = vpop.f32.mrf.mxu2 }
  0xa6   :  { %v679_v34 = vpop.f32.mrf.mxu3  ;;  %v642_v35 = vpop.f32.mrf.mxu0  ;;  %v667_v45 = vadd.f32 %v666_v33, %v654_v43 }
  0xa8   :  { %v680_v49 = vadd.f32 %v679_v34, %v667_v45 }
  0xa9   :  { %v655_v36 = vpop.f32.mrf.mxu1 }
  0xad   :  { %v668_v37 = vpop.f32.mrf.mxu2 }
  0xae   :  { %v681_v38 = vpop.f32.mrf.mxu3 }
  0xbe   :  { %v692_v41 = vpop.f32.mrf.mxu0 }
  0xbf   :  { %v693_v51 = vadd.f32 %v692_v41, %v680_v49 }
  0xc1   :  { %v705_v42 = vpop.f32.mrf.mxu1 }
  0xc2   :  { %v706_v53 = vadd.f32 %v705_v42, %v693_v51 }
  0xc5   :  { %v718_v44 = vpop.f32.mrf.mxu2 }
  0xc6   :  { %v731_v46 = vpop.f32.mrf.mxu3  ;;  %v694_v47 = vpop.f32.mrf.mxu0  ;;  %v719_v54 = vadd.f32 %v718_v44, %v706_v53 }
  0xc8   :  { %v732_v55 = vadd.f32 %v731_v46, %v719_v54 }
  0xc9   :  { %v707_v48 = vpop.f32.mrf.mxu1 }
  0xcd   :  { %v720_v50 = vpop.f32.mrf.mxu2 }
  0xce   :  { %v733_v52 = vpop.f32.mrf.mxu3 }
  0xde   :  { %v744_v56 = vpop.f32.mrf.mxu0 }
  0xdf   :  { %v745_v57 = vadd.f32 %v744_v56, %v732_v55 }
  0xe1   :  { %v748_v58 = vmax.f32 %v745_v57, 0.0 }
  0xe3   :  { %v749_v59 = vpack.c.bf16 %v748_v58, %v748_v58 }
  0xe5   :  { %750 = vst [vmem:[%s1376_s3] sm:$0xf] %v749_v59 }
  0xe6   :  { %v746_v60 = vpop.f32.mrf.mxu0 }

</bundles_post_ra>
